<compile_context>
chip_gen: v5e
topology: v5e:2x2
jax: 0.10.0
libtpu: 0.0.40
codegen_flags: <defaults>
</compile_context>

<pallas_src>
import functools

import jax
import jax.numpy as jnp
from jax.experimental import pallas as pl
from jax.experimental.pallas import tpu as pltpu


# ----------------------------------------------------------------------------
# Small helpers
# ----------------------------------------------------------------------------
def _round_up(v, m):
    return (v + m - 1) // m * m


def _row_tiling(M, max_tile):
    """Pick (padded_M, TILE_M): TILE_M multiple of 8, weight stays resident."""
    if M <= max_tile:
        Mp = _round_up(max(M, 8), 8)
        return Mp, Mp
    Mp = _round_up(M, max_tile)
    return Mp, max_tile


# ----------------------------------------------------------------------------
# Pallas kernels
# ----------------------------------------------------------------------------
def _mm_bias_act_kernel(x_ref, w_ref, b_ref, o_ref, *, relu):
    # x_ref: (TM, K) bf16, w_ref: (K, Co) bf16, b_ref: (1, Co) f32, o_ref: (TM, Co)
    acc = jnp.dot(x_ref[...], w_ref[...], preferred_element_type=jnp.float32)
    acc = acc + b_ref[...]
    if relu:
        acc = jnp.maximum(acc, 0.0)
    o_ref[...] = acc.astype(o_ref.dtype)


def _mm_bias_relu_pool_kernel(x_ref, w_ref, b_ref, o_ref):
    # x_ref: (4, TM, K) bf16 -- leading axis is the 2x2 pool-window tap.
    # out = max_p relu(x[p] @ w + b): elementwise max of full tiles (VPU only).
    w = w_ref[...]
    b = b_ref[...]
    out = None
    for p in range(4):
        acc = jnp.dot(x_ref[p], w, preferred_element_type=jnp.float32) + b
        acc = jnp.maximum(acc, 0.0)
        out = acc if out is None else jnp.maximum(out, acc)
    o_ref[...] = out.astype(o_ref.dtype)


# ----------------------------------------------------------------------------
# Pallas wrappers (grid over row tiles; weights/bias resident)
# ----------------------------------------------------------------------------
def matmul_bias_act(x, w, b, *, relu, out_dtype=jnp.bfloat16, tile_m=256):
    """x: (M, K), w: (K, Co), b: (Co,) -> act(x @ w + b) with shape (M, Co)."""
    M, K = x.shape
    Co = w.shape[1]
    Mp, TM = _row_tiling(M, tile_m)
    xp = x if Mp == M else jnp.pad(x, ((0, Mp - M), (0, 0)))
    out = pl.pallas_call(
        functools.partial(_mm_bias_act_kernel, relu=relu),
        out_shape=jax.ShapeDtypeStruct((Mp, Co), out_dtype),
        grid=(Mp // TM,),
        in_specs=[
            pl.BlockSpec((TM, K), lambda i: (i, 0)),
            pl.BlockSpec((K, Co), lambda i: (0, 0)),   # weight resident across tiles
            pl.BlockSpec((1, Co), lambda i: (0, 0)),   # bias resident
        ],
        out_specs=pl.BlockSpec((TM, Co), lambda i: (i, 0)),
        compiler_params=pltpu.CompilerParams(dimension_semantics=("parallel",)),
    )(xp.astype(jnp.bfloat16), w.astype(jnp.bfloat16),
      b.reshape(1, Co).astype(jnp.float32))
    return out if Mp == M else out[:M]


def matmul_bias_relu_pool(x4, w, b, *, out_dtype=jnp.bfloat16, tile_m=256):
    """x4: (4, M, K) pool-window slabs -> (M, Co) = max_p relu(x4[p] @ w + b)."""
    _, M, K = x4.shape
    Co = w.shape[1]
    Mp, TM = _row_tiling(M, tile_m)
    xp = x4 if Mp == M else jnp.pad(x4, ((0, 0), (0, Mp - M), (0, 0)))
    out = pl.pallas_call(
        _mm_bias_relu_pool_kernel,
        out_shape=jax.ShapeDtypeStruct((Mp, Co), out_dtype),
        grid=(Mp // TM,),
        in_specs=[
            pl.BlockSpec((4, TM, K), lambda i: (0, i, 0)),
            pl.BlockSpec((K, Co), lambda i: (0, 0)),
            pl.BlockSpec((1, Co), lambda i: (0, 0)),
        ],
        out_specs=pl.BlockSpec((TM, Co), lambda i: (i, 0)),
        compiler_params=pltpu.CompilerParams(dimension_semantics=("parallel",)),
    )(xp.astype(jnp.bfloat16), w.astype(jnp.bfloat16),
      b.reshape(1, Co).astype(jnp.float32))
    return out if Mp == M else out[:M]


# ----------------------------------------------------------------------------
# im2col glue (bfloat16, built directly in the order the kernels consume)
# ----------------------------------------------------------------------------
def _im2col3x3(x):
    """(N,H,W,C) -> (N*H*W, 9*C) patches; column order (dy, dx, c) matches HWIO reshape."""
    N, H, W, C = x.shape
    xp = jnp.pad(x.astype(jnp.bfloat16), ((0, 0), (1, 1), (1, 1), (0, 0)))
    cols = [xp[:, dy:dy + H, dx:dx + W, :] for dy in range(3) for dx in range(3)]
    return jnp.concatenate(cols, axis=-1).reshape(N * H * W, 9 * C)


def _im2col3x3_pool2(x):
    """(N,H,W,C) -> (4, N*(H//2)*(W//2), 9*C); leading axis = 2x2 pool-window tap (py,px)."""
    N, H, W, C = x.shape
    Ho, Wo = H // 2, W // 2
    xp = jnp.pad(x.astype(jnp.bfloat16), ((0, 0), (1, 1), (1, 1), (0, 0)))
    slabs = []
    for py in range(2):
        for px in range(2):
            cols = [xp[:, py + dy:py + dy + H:2, px + dx:px + dx + W:2, :]
                    for dy in range(3) for dx in range(3)]
            slabs.append(jnp.concatenate(cols, axis=-1).reshape(N * Ho * Wo, 9 * C))
    return jnp.stack(slabs, axis=0)


# ----------------------------------------------------------------------------
# Layers
# ----------------------------------------------------------------------------
def conv3x3_relu(x, w, b):
    """Same-padding 3x3 conv + ReLU. w: (3,3,Cin,Cout) HWIO."""
    N, H, W, Cin = x.shape
    Cout = w.shape[-1]
    pat = _im2col3x3(x)
    y = matmul_bias_act(pat, w.reshape(9 * Cin, Cout), b, relu=True)
    return y.reshape(N, H, W, Cout)


def conv3x3_relu_maxpool2(x, w, b):
    """3x3 conv + ReLU with the 2x2/stride-2 max pool fused into the epilogue."""
    N, H, W, Cin = x.shape
    Cout = w.shape[-1]
    pat4 = _im2col3x3_pool2(x)
    y = matmul_bias_relu_pool(pat4, w.reshape(9 * Cin, Cout), b)
    return y.reshape(N, H // 2, W // 2, Cout)


# ----------------------------------------------------------------------------
# Full forward pass
# ----------------------------------------------------------------------------
def fully_cnet_forward(x_nchw, params):
    num_classes = params["wf"].shape[1]
    x = jnp.transpose(x_nchw, (0, 2, 3, 1)).astype(jnp.bfloat16)     # NCHW -> NHWC bf16
    N, H, W, _ = x.shape

    # ---- encoder ----
    h = conv3x3_relu(x, params["w1"], params["b1"])                  # (N, H,   W,   64)
    h = conv3x3_relu_maxpool2(h, params["w2"], params["b2"])         # (N, H/2, W/2, 128)
    h = conv3x3_relu_maxpool2(h, params["w3"], params["b3"])         # (N, H/4, W/4, 256)

    # ---- decoder: all per-pixel matmuls, spatial interleave deferred to the end ----
    H4, W4 = H // 4, W // 4
    y = h.reshape(N * H4 * W4, 256)                                  # rows: (n, ii, jj)

    dw1, db1 = params["dw1"], params["db1"]
    c1 = dw1.shape[-1]
    y = matmul_bias_act(y, dw1.reshape(dw1.shape[0], 4 * c1),
                        jnp.tile(db1, 4), relu=True)                 # (M, 4*128)
    y = y.reshape(-1, c1)                                            # rows: (n,ii,jj,dy,dx)

    dw2, db2 = params["dw2"], params["db2"]
    c2 = dw2.shape[-1]
    y = matmul_bias_act(y, dw2.reshape(dw2.shape[0], 4 * c2),
                        jnp.tile(db2, 4), relu=True)                 # (4M, 4*64)
    y = y.reshape(-1, c2)                                            # rows: (n,ii,jj,dy,dx,dy2,dx2)

    # final 1x1 conv, output padded to a lane-dense 128 columns (f32 network output)
    nc_pad = _round_up(num_classes, 128)
    wf = jnp.pad(params["wf"], ((0, 0), (0, nc_pad - num_classes)))
    bf = jnp.pad(params["bf"], ((0, nc_pad - num_classes),))
    o = matmul_bias_act(y, wf, bf, relu=False, out_dtype=jnp.float32)  # (16M, nc_pad)

    # single tiny spatial untangle: (n,ii,jj,dy,dx,dy2,dx2,c) -> (n, 4ii+2dy+dy2, 4jj+2dx+dx2, c)
    o = o.reshape(N, H4, W4, 2, 2, 2, 2, nc_pad)[..., :num_classes]
    o = o.transpose(0, 1, 3, 5, 2, 4, 6, 7).reshape(N, H, W, num_classes)
    return jnp.transpose(o, (0, 3, 1, 2))                            # NHWC -> NCHW


# ----------------------------------------------------------------------------
# Pure-JAX f32 reference (independent of the Pallas path)
# ----------------------------------------------------------------------------
def _ref_conv3x3_relu(x, w, b):
    N, H, W, C = x.shape
    xp = jnp.pad(x, ((0, 0), (1, 1), (1, 1), (0, 0)))
    acc = jnp.zeros((N, H, W, w.shape[-1]), jnp.float32)
    for dy in range(3):
        for dx in range(3):
            acc = acc + jnp.einsum("nhwc,co->nhwo", xp[:, dy:dy + H, dx:dx + W, :],
                                   w[dy, dx], precision=jax.lax.Precision.HIGHEST)
    return jnp.maximum(acc + b, 0.0)


def _ref_maxpool(x):
    N, H, W, C = x.shape
    return jnp.max(x.reshape(N, H // 2, 2, W // 2, 2, C), axis=(2, 4))


def _ref_deconv_relu(x, w, b):
    N, H, W, Cin = x.shape
    Cout = w.shape[-1]
    out = jnp.zeros((N, 2 * H, 2 * W, Cout), jnp.float32)
    for dy in range(2):
        for dx in range(2):
            val = jnp.einsum("nhwc,co->nhwo", x, w[:, dy, dx, :],
                             precision=jax.lax.Precision.HIGHEST) + b
            out = out.at[:, dy::2, dx::2, :].set(val)
    return jnp.maximum(out, 0.0)


def _ref_forward(x_nchw, p):
    x = jnp.transpose(x_nchw, (0, 2, 3, 1))
    h = _ref_conv3x3_relu(x, p["w1"], p["b1"])
    h = _ref_conv3x3_relu(h, p["w2"], p["b2"])
    h = _ref_maxpool(h)
    h = _ref_conv3x3_relu(h, p["w3"], p["b3"])
    h = _ref_maxpool(h)
    h = _ref_deconv_relu(h, p["dw1"], p["db1"])
    h = _ref_deconv_relu(h, p["dw2"], p["db2"])
    h = jnp.einsum("nhwc,co->nhwo", h, p["wf"],
                   precision=jax.lax.Precision.HIGHEST) + p["bf"]
    return jnp.transpose(h, (0, 3, 1, 2))


# ----------------------------------------------------------------------------
# Deterministic parameter init + run
# ----------------------------------------------------------------------------
def init_params(key, num_classes):
    ks = jax.random.split(key, 12)

    def nrm(k, shape, fan_in):
        return (jax.random.normal(k, shape, jnp.float32) / jnp.sqrt(fan_in)).astype(jnp.float32)

    return {
        # Conv2d weights stored HWIO: (3, 3, Cin, Cout)
        "w1": nrm(ks[0], (3, 3, 3, 64), 3 * 9),
        "b1": 0.01 * jax.random.normal(ks[1], (64,), jnp.float32),
        "w2": nrm(ks[2], (3, 3, 64, 128), 64 * 9),
        "b2": 0.01 * jax.random.normal(ks[3], (128,), jnp.float32),
        "w3": nrm(ks[4], (3, 3, 128, 256), 128 * 9),
        "b3": 0.01 * jax.random.normal(ks[5], (256,), jnp.float32),
        # ConvTranspose2d weights stored (Cin, kH, kW, Cout)
        "dw1": nrm(ks[6], (256, 2, 2, 128), 256),
        "db1": 0.01 * jax.random.normal(ks[7], (128,), jnp.float32),
        "dw2": nrm(ks[8], (128, 2, 2, 64), 128),
        "db2": 0.01 * jax.random.normal(ks[9], (64,), jnp.float32),
        # 1x1 Conv2d weights stored (Cin, Cout)
        "wf": nrm(ks[10], (64, num_classes), 64),
        "bf": 0.01 * jax.random.normal(ks[11], (num_classes,), jnp.float32),
    }


if __name__ == "__main__":
    num_classes = 4
    key = jax.random.PRNGKey(0)
    kx, kp = jax.random.split(key)

    x = jax.random.normal(kx, (2, 3, 16, 16), jnp.float32)   # NCHW, like PyTorch
    params = init_params(kp, num_classes)

    out = jax.jit(fully_cnet_forward)(x, params)
    out = jax.block_until_ready(out)
    assert out.shape == (2, num_classes, 16, 16), out.shape

    ref = jax.block_until_ready(_ref_forward(x, params))
    max_err = float(jnp.max(jnp.abs(out - ref)))
    # bf16 activations / MXU inputs with f32 accumulation vs a pure-f32 reference.
    assert jnp.allclose(out, ref, atol=3e-2, rtol=3e-2), max_err

    print("KERNEL_OK")
</pallas_src>

<mosaic_0001>
module attributes {stable_mosaic.version = 11 : i64} {
  func.func @_mm_bias_act_kernel(%arg0: i32, %arg1: memref<256x27xbf16, #tpu.memory_space<vmem>>, %arg2: memref<27x64xbf16, #tpu.memory_space<vmem>>, %arg3: memref<1x64xf32, #tpu.memory_space<vmem>>, %arg4: memref<256x64xbf16, #tpu.memory_space<vmem>>) attributes {dimension_semantics = [#tpu.dimension_semantics<parallel>], iteration_bounds = array<i64: 2>, scalar_prefetch = 0 : i64, scratch_operands = 0 : i64, tpu.core_type = #tpu.core_type<tc>, window_params = [{transform_indices = @transform_0, window_bounds = array<i64: 256, 27>}, {pipeline_mode = #tpu.pipeline_mode<synchronous>, transform_indices = @transform_1, window_bounds = array<i64: 27, 64>}, {pipeline_mode = #tpu.pipeline_mode<synchronous>, transform_indices = @transform_2, window_bounds = array<i64: 1, 64>}, {transform_indices = @transform_3, window_bounds = array<i64: 256, 64>}]} {
    %c0 = arith.constant 0 : index
    %c0_0 = arith.constant 0 : index
    %0 = vector.load %arg1[%c0, %c0_0] : memref<256x27xbf16, #tpu.memory_space<vmem>>, vector<256x27xbf16>
    %c0_1 = arith.constant 0 : index
    %c0_2 = arith.constant 0 : index
    %1 = vector.load %arg2[%c0_1, %c0_2] : memref<27x64xbf16, #tpu.memory_space<vmem>>, vector<27x64xbf16>
    %cst = arith.constant dense<0.000000e+00> : vector<256x64xf32>
    %2 = tpu.matmul %0, %1, %cst {dimension_numbers = #tpu.dot_dimension_numbers<[1], [0], [0], [1], [0, 0, 1, 1], [], []>} : vector<256x27xbf16>, vector<27x64xbf16>, vector<256x64xf32> -> vector<256x64xf32>
    %c0_3 = arith.constant 0 : index
    %c0_4 = arith.constant 0 : index
    %3 = vector.load %arg3[%c0_3, %c0_4] : memref<1x64xf32, #tpu.memory_space<vmem>>, vector<1x64xf32>
    %4 = vector.broadcast %3 : vector<1x64xf32> to vector<256x64xf32>
    %5 = arith.addf %2, %4 : vector<256x64xf32>
    %cst_5 = arith.constant 0.000000e+00 : f32
    %6 = vector.broadcast %cst_5 : f32 to vector<256x64xf32>
    %7 = arith.maximumf %5, %6 : vector<256x64xf32>
    %8 = arith.truncf %7 : vector<256x64xf32> to vector<256x64xbf16>
    %c0_6 = arith.constant 0 : index
    %c0_7 = arith.constant 0 : index
    %9 = vector.load %arg4[%c0_6, %c0_7] : memref<256x64xbf16, #tpu.memory_space<vmem>>, vector<256x64xbf16>
    tpu.vector_store %arg4[%c0_6, %c0_7], %8 {strides = array<i32>} : memref<256x64xbf16, #tpu.memory_space<vmem>>, vector<256x64xbf16>,
    return
  }
  func.func @transform_0(%arg0: i32) -> (i32, i32) {
    %c0_i32 = arith.constant 0 : i32
    %c0_i32_0 = arith.constant 0 : i32
    return %arg0, %c0_i32 : i32, i32
  }
  func.func @transform_1(%arg0: i32) -> (i32, i32) {
    %c0_i32 = arith.constant 0 : i32
    %c0_i32_0 = arith.constant 0 : i32
    %c0_i32_1 = arith.constant 0 : i32
    return %c0_i32, %c0_i32_0 : i32, i32
  }
  func.func @transform_2(%arg0: i32) -> (i32, i32) {
    %c0_i32 = arith.constant 0 : i32
    %c0_i32_0 = arith.constant 0 : i32
    %c0_i32_1 = arith.constant 0 : i32
    return %c0_i32, %c0_i32_0 : i32, i32
  }
  func.func @transform_3(%arg0: i32) -> (i32, i32) {
    %c0_i32 = arith.constant 0 : i32
    %c0_i32_0 = arith.constant 0 : i32
    return %arg0, %c0_i32 : i32, i32
  }
}

module attributes {stable_mosaic.version = 11 : i64} {
  func.func @_mm_bias_relu_pool_kernel(%arg0: i32, %arg1: memref<4x128x576xbf16, #tpu.memory_space<vmem>>, %arg2: memref<576x128xbf16, #tpu.memory_space<vmem>>, %arg3: memref<1x128xf32, #tpu.memory_space<vmem>>, %arg4: memref<128x128xbf16, #tpu.memory_space<vmem>>) attributes {dimension_semantics = [#tpu.dimension_semantics<parallel>], iteration_bounds = array<i64: 1>, scalar_prefetch = 0 : i64, scratch_operands = 0 : i64, tpu.core_type = #tpu.core_type<tc>, window_params = [{transform_indices = @transform_0, window_bounds = array<i64: 4, 128, 576>}, {pipeline_mode = #tpu.pipeline_mode<synchronous>, transform_indices = @transform_1, window_bounds = array<i64: 576, 128>}, {pipeline_mode = #tpu.pipeline_mode<synchronous>, transform_indices = @transform_2, window_bounds = array<i64: 1, 128>}, {transform_indices = @transform_3, window_bounds = array<i64: 128, 128>}]} {
    %c0 = arith.constant 0 : index
    %c0_0 = arith.constant 0 : index
    %0 = vector.load %arg2[%c0, %c0_0] : memref<576x128xbf16, #tpu.memory_space<vmem>>, vector<576x128xbf16>
    %c0_1 = arith.constant 0 : index
    %c0_2 = arith.constant 0 : index
    %1 = vector.load %arg3[%c0_1, %c0_2] : memref<1x128xf32, #tpu.memory_space<vmem>>, vector<1x128xf32>
    %c0_3 = arith.constant 0 : index
    %c0_4 = arith.constant 0 : index
    %c0_5 = arith.constant 0 : index
    %2 = vector.load %arg1[%c0_3, %c0_4, %c0_5] : memref<4x128x576xbf16, #tpu.memory_space<vmem>>, vector<1x128x576xbf16>
    %3 = vector.shape_cast %2 : vector<1x128x576xbf16> to vector<128x576xbf16>
    %cst = arith.constant dense<0.000000e+00> : vector<128x128xf32>
    %4 = tpu.matmul %3, %0, %cst {dimension_numbers = #tpu.dot_dimension_numbers<[1], [0], [0], [1], [0, 0, 1, 1], [], []>} : vector<128x576xbf16>, vector<576x128xbf16>, vector<128x128xf32> -> vector<128x128xf32>
    %5 = vector.broadcast %1 : vector<1x128xf32> to vector<128x128xf32>
    %6 = arith.addf %4, %5 : vector<128x128xf32>
    %cst_6 = arith.constant 0.000000e+00 : f32
    %7 = vector.broadcast %cst_6 : f32 to vector<128x128xf32>
    %8 = arith.maximumf %6, %7 : vector<128x128xf32>
    %c1 = arith.constant 1 : index
    %c0_7 = arith.constant 0 : index
    %c0_8 = arith.constant 0 : index
    %9 = vector.load %arg1[%c1, %c0_7, %c0_8] : memref<4x128x576xbf16, #tpu.memory_space<vmem>>, vector<1x128x576xbf16>
    %10 = vector.shape_cast %9 : vector<1x128x576xbf16> to vector<128x576xbf16>
    %cst_9 = arith.constant dense<0.000000e+00> : vector<128x128xf32>
    %11 = tpu.matmul %10, %0, %cst_9 {dimension_numbers = #tpu.dot_dimension_numbers<[1], [0], [0], [1], [0, 0, 1, 1], [], []>} : vector<128x576xbf16>, vector<576x128xbf16>, vector<128x128xf32> -> vector<128x128xf32>
    %12 = vector.broadcast %1 : vector<1x128xf32> to vector<128x128xf32>
    %13 = arith.addf %11, %12 : vector<128x128xf32>
    %cst_10 = arith.constant 0.000000e+00 : f32
    %14 = vector.broadcast %cst_10 : f32 to vector<128x128xf32>
    %15 = arith.maximumf %13, %14 : vector<128x128xf32>
    %16 = arith.maximumf %8, %15 : vector<128x128xf32>
    %c2 = arith.constant 2 : index
    %c0_11 = arith.constant 0 : index
    %c0_12 = arith.constant 0 : index
    %17 = vector.load %arg1[%c2, %c0_11, %c0_12] : memref<4x128x576xbf16, #tpu.memory_space<vmem>>, vector<1x128x576xbf16>
    %18 = vector.shape_cast %17 : vector<1x128x576xbf16> to vector<128x576xbf16>
    %cst_13 = arith.constant dense<0.000000e+00> : vector<128x128xf32>
    %19 = tpu.matmul %18, %0, %cst_13 {dimension_numbers = #tpu.dot_dimension_numbers<[1], [0], [0], [1], [0, 0, 1, 1], [], []>} : vector<128x576xbf16>, vector<576x128xbf16>, vector<128x128xf32> -> vector<128x128xf32>
    %20 = vector.broadcast %1 : vector<1x128xf32> to vector<128x128xf32>
    %21 = arith.addf %19, %20 : vector<128x128xf32>
    %cst_14 = arith.constant 0.000000e+00 : f32
    %22 = vector.broadcast %cst_14 : f32 to vector<128x128xf32>
    %23 = arith.maximumf %21, %22 : vector<128x128xf32>
    %24 = arith.maximumf %16, %23 : vector<128x128xf32>
    %c3 = arith.constant 3 : index
    %c0_15 = arith.constant 0 : index
    %c0_16 = arith.constant 0 : index
    %25 = vector.load %arg1[%c3, %c0_15, %c0_16] : memref<4x128x576xbf16, #tpu.memory_space<vmem>>, vector<1x128x576xbf16>
    %26 = vector.shape_cast %25 : vector<1x128x576xbf16> to vector<128x576xbf16>
    %cst_17 = arith.constant dense<0.000000e+00> : vector<128x128xf32>
    %27 = tpu.matmul %26, %0, %cst_17 {dimension_numbers = #tpu.dot_dimension_numbers<[1], [0], [0], [1], [0, 0, 1, 1], [], []>} : vector<128x576xbf16>, vector<576x128xbf16>, vector<128x128xf32> -> vector<128x128xf32>
    %28 = vector.broadcast %1 : vector<1x128xf32> to vector<128x128xf32>
    %29 = arith.addf %27, %28 : vector<128x128xf32>
    %cst_18 = arith.constant 0.000000e+00 : f32
    %30 = vector.broadcast %cst_18 : f32 to vector<128x128xf32>
    %31 = arith.maximumf %29, %30 : vector<128x128xf32>
    %32 = arith.maximumf %24, %31 : vector<128x128xf32>
    %33 = arith.truncf %32 : vector<128x128xf32> to vector<128x128xbf16>
    %c0_19 = arith.constant 0 : index
    %c0_20 = arith.constant 0 : index
    %34 = vector.load %arg4[%c0_19, %c0_20] : memref<128x128xbf16, #tpu.memory_space<vmem>>, vector<128x128xbf16>
    tpu.vector_store %arg4[%c0_19, %c0_20], %33 {strides = array<i32>} : memref<128x128xbf16, #tpu.memory_space<vmem>>, vector<128x128xbf16>,
    return
  }
  func.func @transform_0(%arg0: i32) -> (i32, i32, i32) {
    %c0_i32 = arith.constant 0 : i32
    %c0_i32_0 = arith.constant 0 : i32
    %c0_i32_1 = arith.constant 0 : i32
    return %c0_i32, %arg0, %c0_i32_0 : i32, i32, i32
  }
  func.func @transform_1(%arg0: i32) -> (i32, i32) {
    %c0_i32 = arith.constant 0 : i32
    %c0_i32_0 = arith.constant 0 : i32
    %c0_i32_1 = arith.constant 0 : i32
    return %c0_i32, %c0_i32_0 : i32, i32
  }
  func.func @transform_2(%arg0: i32) -> (i32, i32) {
    %c0_i32 = arith.constant 0 : i32
    %c0_i32_0 = arith.constant 0 : i32
    %c0_i32_1 = arith.constant 0 : i32
    return %c0_i32, %c0_i32_0 : i32, i32
  }
  func.func @transform_3(%arg0: i32) -> (i32, i32) {
    %c0_i32 = arith.constant 0 : i32
    %c0_i32_0 = arith.constant 0 : i32
    return %arg0, %c0_i32 : i32, i32
  }
}

module attributes {stable_mosaic.version = 11 : i64} {
  func.func @_mm_bias_relu_pool_kernel(%arg0: i32, %arg1: memref<4x32x1152xbf16, #tpu.memory_space<vmem>>, %arg2: memref<1152x256xbf16, #tpu.memory_space<vmem>>, %arg3: memref<1x256xf32, #tpu.memory_space<vmem>>, %arg4: memref<32x256xbf16, #tpu.memory_space<vmem>>) attributes {dimension_semantics = [#tpu.dimension_semantics<parallel>], iteration_bounds = array<i64: 1>, scalar_prefetch = 0 : i64, scratch_operands = 0 : i64, tpu.core_type = #tpu.core_type<tc>, window_params = [{transform_indices = @transform_0, window_bounds = array<i64: 4, 32, 1152>}, {pipeline_mode = #tpu.pipeline_mode<synchronous>, transform_indices = @transform_1, window_bounds = array<i64: 1152, 256>}, {pipeline_mode = #tpu.pipeline_mode<synchronous>, transform_indices = @transform_2, window_bounds = array<i64: 1, 256>}, {transform_indices = @transform_3, window_bounds = array<i64: 32, 256>}]} {
    %c0 = arith.constant 0 : index
    %c0_0 = arith.constant 0 : index
    %0 = vector.load %arg2[%c0, %c0_0] : memref<1152x256xbf16, #tpu.memory_space<vmem>>, vector<1152x256xbf16>
    %c0_1 = arith.constant 0 : index
    %c0_2 = arith.constant 0 : index
    %1 = vector.load %arg3[%c0_1, %c0_2] : memref<1x256xf32, #tpu.memory_space<vmem>>, vector<1x256xf32>
    %c0_3 = arith.constant 0 : index
    %c0_4 = arith.constant 0 : index
    %c0_5 = arith.constant 0 : index
    %2 = vector.load %arg1[%c0_3, %c0_4, %c0_5] : memref<4x32x1152xbf16, #tpu.memory_space<vmem>>, vector<1x32x1152xbf16>
    %3 = vector.shape_cast %2 : vector<1x32x1152xbf16> to vector<32x1152xbf16>
    %cst = arith.constant dense<0.000000e+00> : vector<32x256xf32>
    %4 = tpu.matmul %3, %0, %cst {dimension_numbers = #tpu.dot_dimension_numbers<[1], [0], [0], [1], [0, 0, 1, 1], [], []>} : vector<32x1152xbf16>, vector<1152x256xbf16>, vector<32x256xf32> -> vector<32x256xf32>
    %5 = vector.broadcast %1 : vector<1x256xf32> to vector<32x256xf32>
    %6 = arith.addf %4, %5 : vector<32x256xf32>
    %cst_6 = arith.constant 0.000000e+00 : f32
    %7 = vector.broadcast %cst_6 : f32 to vector<32x256xf32>
    %8 = arith.maximumf %6, %7 : vector<32x256xf32>
    %c1 = arith.constant 1 : index
    %c0_7 = arith.constant 0 : index
    %c0_8 = arith.constant 0 : index
    %9 = vector.load %arg1[%c1, %c0_7, %c0_8] : memref<4x32x1152xbf16, #tpu.memory_space<vmem>>, vector<1x32x1152xbf16>
    %10 = vector.shape_cast %9 : vector<1x32x1152xbf16> to vector<32x1152xbf16>
    %cst_9 = arith.constant dense<0.000000e+00> : vector<32x256xf32>
    %11 = tpu.matmul %10, %0, %cst_9 {dimension_numbers = #tpu.dot_dimension_numbers<[1], [0], [0], [1], [0, 0, 1, 1], [], []>} : vector<32x1152xbf16>, vector<1152x256xbf16>, vector<32x256xf32> -> vector<32x256xf32>
    %12 = vector.broadcast %1 : vector<1x256xf32> to vector<32x256xf32>
    %13 = arith.addf %11, %12 : vector<32x256xf32>
    %cst_10 = arith.constant 0.000000e+00 : f32
    %14 = vector.broadcast %cst_10 : f32 to vector<32x256xf32>
    %15 = arith.maximumf %13, %14 : vector<32x256xf32>
    %16 = arith.maximumf %8, %15 : vector<32x256xf32>
    %c2 = arith.constant 2 : index
    %c0_11 = arith.constant 0 : index
    %c0_12 = arith.constant 0 : index
    %17 = vector.load %arg1[%c2, %c0_11, %c0_12] : memref<4x32x1152xbf16, #tpu.memory_space<vmem>>, vector<1x32x1152xbf16>
    %18 = vector.shape_cast %17 : vector<1x32x1152xbf16> to vector<32x1152xbf16>
    %cst_13 = arith.constant dense<0.000000e+00> : vector<32x256xf32>
    %19 = tpu.matmul %18, %0, %cst_13 {dimension_numbers = #tpu.dot_dimension_numbers<[1], [0], [0], [1], [0, 0, 1, 1], [], []>} : vector<32x1152xbf16>, vector<1152x256xbf16>, vector<32x256xf32> -> vector<32x256xf32>
    %20 = vector.broadcast %1 : vector<1x256xf32> to vector<32x256xf32>
    %21 = arith.addf %19, %20 : vector<32x256xf32>
    %cst_14 = arith.constant 0.000000e+00 : f32
    %22 = vector.broadcast %cst_14 : f32 to vector<32x256xf32>
    %23 = arith.maximumf %21, %22 : vector<32x256xf32>
    %24 = arith.maximumf %16, %23 : vector<32x256xf32>
    %c3 = arith.constant 3 : index
    %c0_15 = arith.constant 0 : index
    %c0_16 = arith.constant 0 : index
    %25 = vector.load %arg1[%c3, %c0_15, %c0_16] : memref<4x32x1152xbf16, #tpu.memory_space<vmem>>, vector<1x32x1152xbf16>
    %26 = vector.shape_cast %25 : vector<1x32x1152xbf16> to vector<32x1152xbf16>
    %cst_17 = arith.constant dense<0.000000e+00> : vector<32x256xf32>
    %27 = tpu.matmul %26, %0, %cst_17 {dimension_numbers = #tpu.dot_dimension_numbers<[1], [0], [0], [1], [0, 0, 1, 1], [], []>} : vector<32x1152xbf16>, vector<1152x256xbf16>, vector<32x256xf32> -> vector<32x256xf32>
    %28 = vector.broadcast %1 : vector<1x256xf32> to vector<32x256xf32>
    %29 = arith.addf %27, %28 : vector<32x256xf32>
    %cst_18 = arith.constant 0.000000e+00 : f32
    %30 = vector.broadcast %cst_18 : f32 to vector<32x256xf32>
    %31 = arith.maximumf %29, %30 : vector<32x256xf32>
    %32 = arith.maximumf %24, %31 : vector<32x256xf32>
    %33 = arith.truncf %32 : vector<32x256xf32> to vector<32x256xbf16>
    %c0_19 = arith.constant 0 : index
    %c0_20 = arith.constant 0 : index
    %34 = vector.load %arg4[%c0_19, %c0_20] : memref<32x256xbf16, #tpu.memory_space<vmem>>, vector<32x256xbf16>
    tpu.vector_store %arg4[%c0_19, %c0_20], %33 {strides = array<i32>} : memref<32x256xbf16, #tpu.memory_space<vmem>>, vector<32x256xbf16>,
    return
  }
  func.func @transform_0(%arg0: i32) -> (i32, i32, i32) {
    %c0_i32 = arith.constant 0 : i32
    %c0_i32_0 = arith.constant 0 : i32
    %c0_i32_1 = arith.constant 0 : i32
    return %c0_i32, %arg0, %c0_i32_0 : i32, i32, i32
  }
  func.func @transform_1(%arg0: i32) -> (i32, i32) {
    %c0_i32 = arith.constant 0 : i32
    %c0_i32_0 = arith.constant 0 : i32
    %c0_i32_1 = arith.constant 0 : i32
    return %c0_i32, %c0_i32_0 : i32, i32
  }
  func.func @transform_2(%arg0: i32) -> (i32, i32) {
    %c0_i32 = arith.constant 0 : i32
    %c0_i32_0 = arith.constant 0 : i32
    %c0_i32_1 = arith.constant 0 : i32
    return %c0_i32, %c0_i32_0 : i32, i32
  }
  func.func @transform_3(%arg0: i32) -> (i32, i32) {
    %c0_i32 = arith.constant 0 : i32
    %c0_i32_0 = arith.constant 0 : i32
    return %arg0, %c0_i32 : i32, i32
  }
}

module attributes {stable_mosaic.version = 11 : i64} {
  func.func @_mm_bias_act_kernel(%arg0: i32, %arg1: memref<32x256xbf16, #tpu.memory_space<vmem>>, %arg2: memref<256x512xbf16, #tpu.memory_space<vmem>>, %arg3: memref<1x512xf32, #tpu.memory_space<vmem>>, %arg4: memref<32x512xbf16, #tpu.memory_space<vmem>>) attributes {dimension_semantics = [#tpu.dimension_semantics<parallel>], iteration_bounds = array<i64: 1>, scalar_prefetch = 0 : i64, scratch_operands = 0 : i64, tpu.core_type = #tpu.core_type<tc>, window_params = [{transform_indices = @transform_0, window_bounds = array<i64: 32, 256>}, {pipeline_mode = #tpu.pipeline_mode<synchronous>, transform_indices = @transform_1, window_bounds = array<i64: 256, 512>}, {pipeline_mode = #tpu.pipeline_mode<synchronous>, transform_indices = @transform_2, window_bounds = array<i64: 1, 512>}, {transform_indices = @transform_3, window_bounds = array<i64: 32, 512>}]} {
    %c0 = arith.constant 0 : index
    %c0_0 = arith.constant 0 : index
    %0 = vector.load %arg1[%c0, %c0_0] : memref<32x256xbf16, #tpu.memory_space<vmem>>, vector<32x256xbf16>
    %c0_1 = arith.constant 0 : index
    %c0_2 = arith.constant 0 : index
    %1 = vector.load %arg2[%c0_1, %c0_2] : memref<256x512xbf16, #tpu.memory_space<vmem>>, vector<256x512xbf16>
    %cst = arith.constant dense<0.000000e+00> : vector<32x512xf32>
    %2 = tpu.matmul %0, %1, %cst {dimension_numbers = #tpu.dot_dimension_numbers<[1], [0], [0], [1], [0, 0, 1, 1], [], []>} : vector<32x256xbf16>, vector<256x512xbf16>, vector<32x512xf32> -> vector<32x512xf32>
    %c0_3 = arith.constant 0 : index
    %c0_4 = arith.constant 0 : index
    %3 = vector.load %arg3[%c0_3, %c0_4] : memref<1x512xf32, #tpu.memory_space<vmem>>, vector<1x512xf32>
    %4 = vector.broadcast %3 : vector<1x512xf32> to vector<32x512xf32>
    %5 = arith.addf %2, %4 : vector<32x512xf32>
    %cst_5 = arith.constant 0.000000e+00 : f32
    %6 = vector.broadcast %cst_5 : f32 to vector<32x512xf32>
    %7 = arith.maximumf %5, %6 : vector<32x512xf32>
    %8 = arith.truncf %7 : vector<32x512xf32> to vector<32x512xbf16>
    %c0_6 = arith.constant 0 : index
    %c0_7 = arith.constant 0 : index
    %9 = vector.load %arg4[%c0_6, %c0_7] : memref<32x512xbf16, #tpu.memory_space<vmem>>, vector<32x512xbf16>
    tpu.vector_store %arg4[%c0_6, %c0_7], %8 {strides = array<i32>} : memref<32x512xbf16, #tpu.memory_space<vmem>>, vector<32x512xbf16>,
    return
  }
  func.func @transform_0(%arg0: i32) -> (i32, i32) {
    %c0_i32 = arith.constant 0 : i32
    %c0_i32_0 = arith.constant 0 : i32
    return %arg0, %c0_i32 : i32, i32
  }
  func.func @transform_1(%arg0: i32) -> (i32, i32) {
    %c0_i32 = arith.constant 0 : i32
    %c0_i32_0 = arith.constant 0 : i32
    %c0_i32_1 = arith.constant 0 : i32
    return %c0_i32, %c0_i32_0 : i32, i32
  }
  func.func @transform_2(%arg0: i32) -> (i32, i32) {
    %c0_i32 = arith.constant 0 : i32
    %c0_i32_0 = arith.constant 0 : i32
    %c0_i32_1 = arith.constant 0 : i32
    return %c0_i32, %c0_i32_0 : i32, i32
  }
  func.func @transform_3(%arg0: i32) -> (i32, i32) {
    %c0_i32 = arith.constant 0 : i32
    %c0_i32_0 = arith.constant 0 : i32
    return %arg0, %c0_i32 : i32, i32
  }
}

module attributes {stable_mosaic.version = 11 : i64} {
  func.func @_mm_bias_act_kernel(%arg0: i32, %arg1: memref<128x128xbf16, #tpu.memory_space<vmem>>, %arg2: memref<128x256xbf16, #tpu.memory_space<vmem>>, %arg3: memref<1x256xf32, #tpu.memory_space<vmem>>, %arg4: memref<128x256xbf16, #tpu.memory_space<vmem>>) attributes {dimension_semantics = [#tpu.dimension_semantics<parallel>], iteration_bounds = array<i64: 1>, scalar_prefetch = 0 : i64, scratch_operands = 0 : i64, tpu.core_type = #tpu.core_type<tc>, window_params = [{transform_indices = @transform_0, window_bounds = array<i64: 128, 128>}, {pipeline_mode = #tpu.pipeline_mode<synchronous>, transform_indices = @transform_1, window_bounds = array<i64: 128, 256>}, {pipeline_mode = #tpu.pipeline_mode<synchronous>, transform_indices = @transform_2, window_bounds = array<i64: 1, 256>}, {transform_indices = @transform_3, window_bounds = array<i64: 128, 256>}]} {
    %c0 = arith.constant 0 : index
    %c0_0 = arith.constant 0 : index
    %0 = vector.load %arg1[%c0, %c0_0] : memref<128x128xbf16, #tpu.memory_space<vmem>>, vector<128x128xbf16>
    %c0_1 = arith.constant 0 : index
    %c0_2 = arith.constant 0 : index
    %1 = vector.load %arg2[%c0_1, %c0_2] : memref<128x256xbf16, #tpu.memory_space<vmem>>, vector<128x256xbf16>
    %cst = arith.constant dense<0.000000e+00> : vector<128x256xf32>
    %2 = tpu.matmul %0, %1, %cst {dimension_numbers = #tpu.dot_dimension_numbers<[1], [0], [0], [1], [0, 0, 1, 1], [], []>} : vector<128x128xbf16>, vector<128x256xbf16>, vector<128x256xf32> -> vector<128x256xf32>
    %c0_3 = arith.constant 0 : index
    %c0_4 = arith.constant 0 : index
    %3 = vector.load %arg3[%c0_3, %c0_4] : memref<1x256xf32, #tpu.memory_space<vmem>>, vector<1x256xf32>
    %4 = vector.broadcast %3 : vector<1x256xf32> to vector<128x256xf32>
    %5 = arith.addf %2, %4 : vector<128x256xf32>
    %cst_5 = arith.constant 0.000000e+00 : f32
    %6 = vector.broadcast %cst_5 : f32 to vector<128x256xf32>
    %7 = arith.maximumf %5, %6 : vector<128x256xf32>
    %8 = arith.truncf %7 : vector<128x256xf32> to vector<128x256xbf16>
    %c0_6 = arith.constant 0 : index
    %c0_7 = arith.constant 0 : index
    %9 = vector.load %arg4[%c0_6, %c0_7] : memref<128x256xbf16, #tpu.memory_space<vmem>>, vector<128x256xbf16>
    tpu.vector_store %arg4[%c0_6, %c0_7], %8 {strides = array<i32>} : memref<128x256xbf16, #tpu.memory_space<vmem>>, vector<128x256xbf16>,
    return
  }
  func.func @transform_0(%arg0: i32) -> (i32, i32) {
    %c0_i32 = arith.constant 0 : i32
    %c0_i32_0 = arith.constant 0 : i32
    return %arg0, %c0_i32 : i32, i32
  }
  func.func @transform_1(%arg0: i32) -> (i32, i32) {
    %c0_i32 = arith.constant 0 : i32
    %c0_i32_0 = arith.constant 0 : i32
    %c0_i32_1 = arith.constant 0 : i32
    return %c0_i32, %c0_i32_0 : i32, i32
  }
  func.func @transform_2(%arg0: i32) -> (i32, i32) {
    %c0_i32 = arith.constant 0 : i32
    %c0_i32_0 = arith.constant 0 : i32
    %c0_i32_1 = arith.constant 0 : i32
    return %c0_i32, %c0_i32_0 : i32, i32
  }
  func.func @transform_3(%arg0: i32) -> (i32, i32) {
    %c0_i32 = arith.constant 0 : i32
    %c0_i32_0 = arith.constant 0 : i32
    return %arg0, %c0_i32 : i32, i32
  }
}

module attributes {stable_mosaic.version = 11 : i64} {
  func.func @_mm_bias_act_kernel(%arg0: i32, %arg1: memref<256x64xbf16, #tpu.memory_space<vmem>>, %arg2: memref<64x128xbf16, #tpu.memory_space<vmem>>, %arg3: memref<1x128xf32, #tpu.memory_space<vmem>>, %arg4: memref<256x128xf32, #tpu.memory_space<vmem>>) attributes {dimension_semantics = [#tpu.dimension_semantics<parallel>], iteration_bounds = array<i64: 2>, scalar_prefetch = 0 : i64, scratch_operands = 0 : i64, tpu.core_type = #tpu.core_type<tc>, window_params = [{transform_indices = @transform_0, window_bounds = array<i64: 256, 64>}, {pipeline_mode = #tpu.pipeline_mode<synchronous>, transform_indices = @transform_1, window_bounds = array<i64: 64, 128>}, {pipeline_mode = #tpu.pipeline_mode<synchronous>, transform_indices = @transform_2, window_bounds = array<i64: 1, 128>}, {transform_indices = @transform_3, window_bounds = array<i64: 256, 128>}]} {
    %c0 = arith.constant 0 : index
    %c0_0 = arith.constant 0 : index
    %0 = vector.load %arg1[%c0, %c0_0] : memref<256x64xbf16, #tpu.memory_space<vmem>>, vector<256x64xbf16>
    %c0_1 = arith.constant 0 : index
    %c0_2 = arith.constant 0 : index
    %1 = vector.load %arg2[%c0_1, %c0_2] : memref<64x128xbf16, #tpu.memory_space<vmem>>, vector<64x128xbf16>
    %cst = arith.constant dense<0.000000e+00> : vector<256x128xf32>
    %2 = tpu.matmul %0, %1, %cst {dimension_numbers = #tpu.dot_dimension_numbers<[1], [0], [0], [1], [0, 0, 1, 1], [], []>} : vector<256x64xbf16>, vector<64x128xbf16>, vector<256x128xf32> -> vector<256x128xf32>
    %c0_3 = arith.constant 0 : index
    %c0_4 = arith.constant 0 : index
    %3 = vector.load %arg3[%c0_3, %c0_4] : memref<1x128xf32, #tpu.memory_space<vmem>>, vector<1x128xf32>
    %4 = vector.broadcast %3 : vector<1x128xf32> to vector<256x128xf32>
    %5 = arith.addf %2, %4 : vector<256x128xf32>
    %c0_5 = arith.constant 0 : index
    %c0_6 = arith.constant 0 : index
    %6 = vector.load %arg4[%c0_5, %c0_6] : memref<256x128xf32, #tpu.memory_space<vmem>>, vector<256x128xf32>
    tpu.vector_store %arg4[%c0_5, %c0_6], %5 {strides = array<i32>} : memref<256x128xf32, #tpu.memory_space<vmem>>, vector<256x128xf32>,
    return
  }
  func.func @transform_0(%arg0: i32) -> (i32, i32) {
    %c0_i32 = arith.constant 0 : i32
    %c0_i32_0 = arith.constant 0 : i32
    return %arg0, %c0_i32 : i32, i32
  }
  func.func @transform_1(%arg0: i32) -> (i32, i32) {
    %c0_i32 = arith.constant 0 : i32
    %c0_i32_0 = arith.constant 0 : i32
    %c0_i32_1 = arith.constant 0 : i32
    return %c0_i32, %c0_i32_0 : i32, i32
  }
  func.func @transform_2(%arg0: i32) -> (i32, i32) {
    %c0_i32 = arith.constant 0 : i32
    %c0_i32_0 = arith.constant 0 : i32
    %c0_i32_1 = arith.constant 0 : i32
    return %c0_i32, %c0_i32_0 : i32, i32
  }
  func.func @transform_3(%arg0: i32) -> (i32, i32) {
    %c0_i32 = arith.constant 0 : i32
    %c0_i32_0 = arith.constant 0 : i32
    return %arg0, %c0_i32 : i32, i32
  }
}

</mosaic_0001>

<bundles_post_ra>
// kernel: fully_cnet_forward.6
= control target key start
LH: loop header
LB: loop body
LE: loop exit
PB: predicated region body
PF: predicated region fallthrough
CT: control target
= control target key end

     0   :  { %8 = vsyncpa [#allocation3], 0  ;;  %s841_s12 = smov 0   ;;  %s1011_s0 = inlined_call_operand.vmem [shape: bf16[512,27], index: 0, kind: input, shape index: {}]   ;;  %s1012_s1 = inlined_call_operand.vmem [shape: bf16[27,64], index: 1, kind: input, shape index: {}]   ;;  %s1013_s2 = inlined_call_operand.hbm [shape: f32[1,64], index: 2, kind: input, shape index: {}]   ;;  %s1014_s3 = inlined_call_operand.vmem [shape: bf16[512,64], index: 3, kind: output, shape index: {}]  }
   0x1 LB: > { %s631_s13 = sadd.s32 4294967295, %s817_s12   ;;  %p633_p0 = scmp.ge.s32.totalorder %s817_s12, 1  ;;  %s817_s12 = sphi %s841_s12, %s14_s12  }
   0x2   : > { %p113_p1 = scmp.lt.s32.totalorder %s817_s12, 3  ;;  %s128_s16 = sshll.u32 %s1013_s2, 4  ;;  %s129_s16 = int_to_ptr.hbm [resolvable:$true] %s128_s16 }
   0x3   : > { %p764_p3 = scmp.eq.s32.totalorder %s631_s13, 0  ;;  %s819_s17 = smov [#allocation2]  }
   0x4   : > { %p114_p2 = pnand %p633_p0, %p113_p1  ;;  %s130_s18 = sshll.u32 %s819_s17, 4  ;;  %s131_s18 = int_to_ptr.vmem [resolvable:$true] %s130_s18 }
   0x6   : > { %p760_p4 = pneg %p114_p2  ;;  %152 = sbr.rel (%p114_p2) target bundleno = 222 (0xde), region = 32 }
   0x8   : > { %p761_p5 = pnand %p764_p3, %p760_p4 }
   0xa   : > { %763 = dma.hbm_to_vmem [thread:$0]  (!%p761_p5), %s129_s16, 16, %s131_s18, [#allocation3]  }
   0xb   : > { %812 = dma.done.wait (%p764_p3), [#allocation3], 16  }
   0xc   : > { %814 = vsyncadd (%p764_p3), [#allocation3], 4294967280  ;;  %s638_s19 = sshll.u32 %s631_s13, 5  ;;  %vm370_vm0 = vcmask 1044480   ;;  %vm371_vm1 = vcmask 1045504   ;;  %v820_v0 = vmov 65535  }
   0xd   : > { %p178_p6 = scmp.lt.s32.totalorder %s638_s19, 63  ;;  %v372_v1 = vsel %vm370_vm0, 4294967295, %v820_v0  ;;  %v712_v2 = vld [vmem:[%s1012_s1 + $0x8] sm:$0xf]  ;;  %v749_v3 = vld [vmem:[%s1012_s1 + $0x8] sm:$0x30] }
   0xe   : > { %v373_v4 = vsel %vm371_vm1, %v372_v1, 0  ;;  %v713_v5 = vor.u32 %v749_v3, %v712_v2  ;;  %v748_v7 = vld [vmem:[%s1012_s1] sm:$0xff]  ;;  %vm321_vm2 = vcmask 220160   ;;  %vm530_vm3 = vcmask 519168  }
   0xf   : > { %s1016_s19 = smov (!%p178_p6, %s638_s19), 63  ;;  %v903_v24 = vld [vmem:[#allocation2] ss:$0 sm:$0xff] }
  0x10   : > { %s639_s24 = sshll.u32 %s1016_s19, 2  ;;  %v375_v6 = vand.u32 %v713_v5, %v373_v4 }
  0x11   : > { %s869_s29 = scalar_lea.vmem %s1011_s0, %s639_s24  ;;  %s912_s5 = scalar_lea.vmem %s1014_s3, %s639_s24 }
  0x12   : > { %383 = vmatpush.bf16.msra.mxu0 %v375_v6  ;;  %750 = vmatpush.bf16.msra.mxu1 %v375_v6  ;;  %v732_v8 = vld [vmem:[%s869_s29] sm:$0xff]  ;;  %v733_v12 = vld [vmem:[%s869_s29 + $0x8] sm:$0xff]  ;;  %v734_v16 = vld [vmem:[%s869_s29 + $0x10] sm:$0xff] }
  0x13   : > { %751 = vmatpush.bf16.msra.mxu2 %v375_v6  ;;  %752 = vmatpush.bf16.msra.mxu3 %v375_v6  ;;  %v736_v9 = vld [vmem:[%s869_s29 + $0x20] sm:$0xff]  ;;  %v737_v13 = vld [vmem:[%s869_s29 + $0x28] sm:$0xff]  ;;  %v738_v17 = vld [vmem:[%s869_s29 + $0x30] sm:$0xff] }
  0x14   : > { %v740_v10 = vld [vmem:[%s869_s29 + $0x40] sm:$0xff]  ;;  %v741_v14 = vld [vmem:[%s869_s29 + $0x48] sm:$0xff]  ;;  %v742_v18 = vld [vmem:[%s869_s29 + $0x50] sm:$0xff] }
  0x15   : > { %v744_v11 = vld [vmem:[%s869_s29 + $0x60] sm:$0xff]  ;;  %v745_v15 = vld [vmem:[%s869_s29 + $0x68] sm:$0xff]  ;;  %v746_v19 = vld [vmem:[%s869_s29 + $0x70] sm:$0xff] }
  0x16   : > { %384 = vmatpush.bf16.msra.mxu0 %v748_v7  ;;  %753 = vmatpush.bf16.msra.mxu1 %v748_v7  ;;  %v735_v20 = vld [vmem:[%s869_s29 + $0x18] sm:$0xff] }
  0x17   : > { %754 = vmatpush.bf16.msra.mxu2 %v748_v7  ;;  %755 = vmatpush.bf16.msra.mxu3 %v748_v7  ;;  %v739_v21 = vld [vmem:[%s869_s29 + $0x38] sm:$0xff] }
  0x18   : > { %v743_v22 = vld [vmem:[%s869_s29 + $0x58] sm:$0xff] }
  0x19   : > { %714 = vmatmul.msk.bf16.vlgmr.msra.gmra.mxu0 %vm321_vm2, %v732_v8  ;;  %718 = vmatmul.msk.bf16.vlgmr.msra.gmra.mxu1 %vm321_vm2, %v736_v9  ;;  %v747_v23 = vld [vmem:[%s869_s29 + $0x78] sm:$0xff] }
  0x1a   : > { %722 = vmatmul.msk.bf16.vlgmr.msra.gmra.mxu2 %vm321_vm2, %v740_v10  ;;  %726 = vmatmul.msk.bf16.vlgmr.msra.gmra.mxu3 %vm321_vm2, %v744_v11 }
  0x29   : > { %715 = vmatmul.msk.bf16.gmra.mxu0 %vm321_vm2, %v733_v12  ;;  %719 = vmatmul.msk.bf16.gmra.mxu1 %vm321_vm2, %v737_v13 }
  0x2a   : > { %723 = vmatmul.msk.bf16.gmra.mxu2 %vm321_vm2, %v741_v14  ;;  %727 = vmatmul.msk.bf16.gmra.mxu3 %vm321_vm2, %v745_v15 }
  0x39   : > { %716 = vmatmul.msk.bf16.gmra.mxu0 %vm321_vm2, %v734_v16  ;;  %720 = vmatmul.msk.bf16.gmra.mxu1 %vm321_vm2, %v738_v17 }
  0x3a   : > { %724 = vmatmul.msk.bf16.gmra.mxu2 %vm321_vm2, %v742_v18  ;;  %728 = vmatmul.msk.bf16.gmra.mxu3 %vm321_vm2, %v746_v19 }
  0x49   : > { %717 = vmatmul.msk.bf16.gmra.mxu0 %vm321_vm2, %v735_v20  ;;  %721 = vmatmul.msk.bf16.gmra.mxu1 %vm321_vm2, %v739_v21 }
  0x4a   : > { %725 = vmatmul.msk.bf16.gmra.mxu2 %vm321_vm2, %v743_v22  ;;  %729 = vmatmul.msk.bf16.gmra.mxu3 %vm321_vm2, %v747_v23 }
  0x96   : > { %v386_v25 = vpop.f32.mrf.mxu0  ;;  %v406_v26 = vpop.f32.mrf.mxu1 }
  0x97   : > { %v387_v27 = vadd.f32 %v903_v24, %v386_v25  ;;  %v407_v28 = vadd.f32 %v903_v24, %v406_v26 }
  0x99   : > { %v466_v29 = vmax.f32 %v387_v27, 0.0  ;;  %v474_v30 = vmax.f32 %v407_v28, 0.0 }
  0x9b   : > { %v498_v31 = vpack.c.bf16 %v466_v29, %v466_v29  ;;  %v506_v32 = vpack.c.bf16 %v474_v30, %v474_v30 }
  0x9d   : > { %531 = vst.msk [vmem:[%s912_s5] sm:$0xf] %vm530_vm3, %v498_v31  ;;  %v426_v33 = vpop.f32.mrf.mxu2  ;;  %v446_v34 = vpop.f32.mrf.mxu3 }
  0x9e   : > { %539 = vst.msk [vmem:[%s912_s5 + $0x20] sm:$0xf] %vm530_vm3, %v506_v32  ;;  %v427_v35 = vadd.f32 %v903_v24, %v426_v33  ;;  %v447_v36 = vadd.f32 %v903_v24, %v446_v34  ;;  %v388_v37 = vpop.f32.mrf.mxu0  ;;  %v408_v38 = vpop.f32.mrf.mxu1 }
  0x9f   : > { %v389_v39 = vadd.f32 %v903_v24, %v388_v37  ;;  %v409_v40 = vadd.f32 %v903_v24, %v408_v38 }
  0xa0   : > { %v482_v41 = vmax.f32 %v427_v35, 0.0  ;;  %v490_v42 = vmax.f32 %v447_v36, 0.0 }
  0xa1   : > { %v467_v43 = vmax.f32 %v389_v39, 0.0  ;;  %v475_v44 = vmax.f32 %v409_v40, 0.0 }
  0xa2   : > { %v514_v45 = vpack.c.bf16 %v482_v41, %v482_v41  ;;  %v522_v46 = vpack.c.bf16 %v490_v42, %v490_v42 }
  0xa3   : > { %v499_v47 = vpack.c.bf16 %v467_v43, %v467_v43  ;;  %v507_v48 = vpack.c.bf16 %v475_v44, %v475_v44 }
  0xa4   : > { %547 = vst.msk [vmem:[%s912_s5 + $0x40] sm:$0xf] %vm530_vm3, %v514_v45 }
  0xa5   : > { %555 = vst.msk [vmem:[%s912_s5 + $0x60] sm:$0xf] %vm530_vm3, %v522_v46  ;;  %v428_v49 = vpop.f32.mrf.mxu2  ;;  %v448_v50 = vpop.f32.mrf.mxu3 }
  0xa6   : > { %532 = vst.msk [vmem:[%s912_s5 + $0x4] sm:$0xf] %vm530_vm3, %v499_v47  ;;  %v429_v51 = vadd.f32 %v903_v24, %v428_v49  ;;  %v449_v52 = vadd.f32 %v903_v24, %v448_v50  ;;  %v391_v53 = vpop.f32.mrf.mxu0  ;;  %v411_v54 = vpop.f32.mrf.mxu1 }
  0xa7   : > { %540 = vst.msk [vmem:[%s912_s5 + $0x24] sm:$0xf] %vm530_vm3, %v507_v48  ;;  %v392_v55 = vadd.f32 %v903_v24, %v391_v53  ;;  %v412_v56 = vadd.f32 %v903_v24, %v411_v54 }
  0xa8   : > { %v483_v57 = vmax.f32 %v429_v51, 0.0  ;;  %v491_v58 = vmax.f32 %v449_v52, 0.0 }
  0xa9   : > { %v468_v59 = vmax.f32 %v392_v55, 0.0  ;;  %v476_v60 = vmax.f32 %v412_v56, 0.0 }
  0xaa   : > { %v515_v61 = vpack.c.bf16 %v483_v57, %v483_v57  ;;  %v523_v62 = vpack.c.bf16 %v491_v58, %v491_v58 }
  0xab   : > { %v500_v63 = vpack.c.bf16 %v468_v59, %v468_v59  ;;  %v508_v0 = vpack.c.bf16 %v476_v60, %v476_v60 }
  0xac   : > { %548 = vst.msk [vmem:[%s912_s5 + $0x44] sm:$0xf] %vm530_vm3, %v515_v61 }
  0xad   : > { %556 = vst.msk [vmem:[%s912_s5 + $0x64] sm:$0xf] %vm530_vm3, %v523_v62  ;;  %v431_v1 = vpop.f32.mrf.mxu2  ;;  %v451_v2 = vpop.f32.mrf.mxu3 }
  0xae   : > { %533 = vst.msk [vmem:[%s912_s5 + $0x8] sm:$0xf] %vm530_vm3, %v500_v63  ;;  %v432_v3 = vadd.f32 %v903_v24, %v431_v1  ;;  %v452_v4 = vadd.f32 %v903_v24, %v451_v2  ;;  %v393_v5 = vpop.f32.mrf.mxu0  ;;  %v413_v6 = vpop.f32.mrf.mxu1 }
  0xaf   : > { %541 = vst.msk [vmem:[%s912_s5 + $0x28] sm:$0xf] %vm530_vm3, %v508_v0  ;;  %v394_v7 = vadd.f32 %v903_v24, %v393_v5  ;;  %v414_v8 = vadd.f32 %v903_v24, %v413_v6 }
  0xb0   : > { %v484_v9 = vmax.f32 %v432_v3, 0.0  ;;  %v492_v10 = vmax.f32 %v452_v4, 0.0 }
  0xb1   : > { %v469_v11 = vmax.f32 %v394_v7, 0.0  ;;  %v477_v12 = vmax.f32 %v414_v8, 0.0 }
  0xb2   : > { %v516_v13 = vpack.c.bf16 %v484_v9, %v484_v9  ;;  %v524_v14 = vpack.c.bf16 %v492_v10, %v492_v10 }
  0xb3   : > { %v501_v15 = vpack.c.bf16 %v469_v11, %v469_v11  ;;  %v509_v16 = vpack.c.bf16 %v477_v12, %v477_v12 }
  0xb4   : > { %549 = vst.msk [vmem:[%s912_s5 + $0x48] sm:$0xf] %vm530_vm3, %v516_v13 }
  0xb5   : > { %557 = vst.msk [vmem:[%s912_s5 + $0x68] sm:$0xf] %vm530_vm3, %v524_v14  ;;  %v433_v17 = vpop.f32.mrf.mxu2  ;;  %v453_v18 = vpop.f32.mrf.mxu3 }
  0xb6   : > { %534 = vst.msk [vmem:[%s912_s5 + $0xc] sm:$0xf] %vm530_vm3, %v501_v15  ;;  %v434_v19 = vadd.f32 %v903_v24, %v433_v17  ;;  %v454_v20 = vadd.f32 %v903_v24, %v453_v18  ;;  %v396_v21 = vpop.f32.mrf.mxu0  ;;  %v416_v22 = vpop.f32.mrf.mxu1 }
  0xb7   : > { %542 = vst.msk [vmem:[%s912_s5 + $0x2c] sm:$0xf] %vm530_vm3, %v509_v16  ;;  %v397_v23 = vadd.f32 %v903_v24, %v396_v21  ;;  %v417_v25 = vadd.f32 %v903_v24, %v416_v22 }
  0xb8   : > { %v485_v26 = vmax.f32 %v434_v19, 0.0  ;;  %v493_v27 = vmax.f32 %v454_v20, 0.0 }
  0xb9   : > { %v470_v28 = vmax.f32 %v397_v23, 0.0  ;;  %v478_v29 = vmax.f32 %v417_v25, 0.0 }
  0xba   : > { %v517_v30 = vpack.c.bf16 %v485_v26, %v485_v26  ;;  %v525_v31 = vpack.c.bf16 %v493_v27, %v493_v27 }
  0xbb   : > { %v502_v32 = vpack.c.bf16 %v470_v28, %v470_v28  ;;  %v510_v33 = vpack.c.bf16 %v478_v29, %v478_v29 }
  0xbc   : > { %550 = vst.msk [vmem:[%s912_s5 + $0x4c] sm:$0xf] %vm530_vm3, %v517_v30 }
  0xbd   : > { %558 = vst.msk [vmem:[%s912_s5 + $0x6c] sm:$0xf] %vm530_vm3, %v525_v31  ;;  %v436_v34 = vpop.f32.mrf.mxu2  ;;  %v456_v35 = vpop.f32.mrf.mxu3 }
  0xbe   : > { %535 = vst.msk [vmem:[%s912_s5 + $0x10] sm:$0xf] %vm530_vm3, %v502_v32  ;;  %v437_v36 = vadd.f32 %v903_v24, %v436_v34  ;;  %v457_v37 = vadd.f32 %v903_v24, %v456_v35  ;;  %v398_v38 = vpop.f32.mrf.mxu0  ;;  %v418_v39 = vpop.f32.mrf.mxu1 }
  0xbf   : > { %543 = vst.msk [vmem:[%s912_s5 + $0x30] sm:$0xf] %vm530_vm3, %v510_v33  ;;  %v399_v40 = vadd.f32 %v903_v24, %v398_v38  ;;  %v419_v41 = vadd.f32 %v903_v24, %v418_v39 }
  0xc0   : > { %v486_v42 = vmax.f32 %v437_v36, 0.0  ;;  %v494_v43 = vmax.f32 %v457_v37, 0.0 }
  0xc1   : > { %v471_v44 = vmax.f32 %v399_v40, 0.0  ;;  %v479_v45 = vmax.f32 %v419_v41, 0.0 }
  0xc2   : > { %v518_v46 = vpack.c.bf16 %v486_v42, %v486_v42  ;;  %v526_v47 = vpack.c.bf16 %v494_v43, %v494_v43 }
  0xc3   : > { %v503_v48 = vpack.c.bf16 %v471_v44, %v471_v44  ;;  %v511_v49 = vpack.c.bf16 %v479_v45, %v479_v45 }
  0xc4   : > { %551 = vst.msk [vmem:[%s912_s5 + $0x50] sm:$0xf] %vm530_vm3, %v518_v46 }
  0xc5   : > { %559 = vst.msk [vmem:[%s912_s5 + $0x70] sm:$0xf] %vm530_vm3, %v526_v47  ;;  %v438_v50 = vpop.f32.mrf.mxu2  ;;  %v458_v51 = vpop.f32.mrf.mxu3 }
  0xc6   : > { %536 = vst.msk [vmem:[%s912_s5 + $0x14] sm:$0xf] %vm530_vm3, %v503_v48  ;;  %v439_v52 = vadd.f32 %v903_v24, %v438_v50  ;;  %v459_v53 = vadd.f32 %v903_v24, %v458_v51  ;;  %v401_v54 = vpop.f32.mrf.mxu0  ;;  %v421_v55 = vpop.f32.mrf.mxu1 }
  0xc7   : > { %544 = vst.msk [vmem:[%s912_s5 + $0x34] sm:$0xf] %vm530_vm3, %v511_v49  ;;  %v402_v56 = vadd.f32 %v903_v24, %v401_v54  ;;  %v422_v57 = vadd.f32 %v903_v24, %v421_v55 }
  0xc8   : > { %v487_v58 = vmax.f32 %v439_v52, 0.0  ;;  %v495_v59 = vmax.f32 %v459_v53, 0.0 }
  0xc9   : > { %v472_v60 = vmax.f32 %v402_v56, 0.0  ;;  %v480_v61 = vmax.f32 %v422_v57, 0.0 }
  0xca   : > { %v519_v62 = vpack.c.bf16 %v487_v58, %v487_v58  ;;  %v527_v63 = vpack.c.bf16 %v495_v59, %v495_v59 }
  0xcb   : > { %v504_v0 = vpack.c.bf16 %v472_v60, %v472_v60  ;;  %v512_v1 = vpack.c.bf16 %v480_v61, %v480_v61 }
  0xcc   : > { %552 = vst.msk [vmem:[%s912_s5 + $0x54] sm:$0xf] %vm530_vm3, %v519_v62 }
  0xcd   : > { %560 = vst.msk [vmem:[%s912_s5 + $0x74] sm:$0xf] %vm530_vm3, %v527_v63  ;;  %v441_v2 = vpop.f32.mrf.mxu2  ;;  %v461_v3 = vpop.f32.mrf.mxu3 }
  0xce   : > { %537 = vst.msk [vmem:[%s912_s5 + $0x18] sm:$0xf] %vm530_vm3, %v504_v0  ;;  %v442_v4 = vadd.f32 %v903_v24, %v441_v2  ;;  %v462_v5 = vadd.f32 %v903_v24, %v461_v3  ;;  %v403_v6 = vpop.f32.mrf.mxu0  ;;  %v423_v7 = vpop.f32.mrf.mxu1 }
  0xcf   : > { %545 = vst.msk [vmem:[%s912_s5 + $0x38] sm:$0xf] %vm530_vm3, %v512_v1  ;;  %v404_v8 = vadd.f32 %v903_v24, %v403_v6  ;;  %v424_v9 = vadd.f32 %v903_v24, %v423_v7 }
  0xd0   : > { %v488_v10 = vmax.f32 %v442_v4, 0.0  ;;  %v496_v11 = vmax.f32 %v462_v5, 0.0 }
  0xd1   : > { %v473_v12 = vmax.f32 %v404_v8, 0.0  ;;  %v481_v13 = vmax.f32 %v424_v9, 0.0 }
  0xd2   : > { %v520_v14 = vpack.c.bf16 %v488_v10, %v488_v10  ;;  %v528_v15 = vpack.c.bf16 %v496_v11, %v496_v11 }
  0xd3   : > { %v505_v16 = vpack.c.bf16 %v473_v12, %v473_v12  ;;  %v513_v17 = vpack.c.bf16 %v481_v13, %v481_v13 }
  0xd4   : > { %553 = vst.msk [vmem:[%s912_s5 + $0x58] sm:$0xf] %vm530_vm3, %v520_v14 }
  0xd5   : > { %561 = vst.msk [vmem:[%s912_s5 + $0x78] sm:$0xf] %vm530_vm3, %v528_v15  ;;  %v443_v18 = vpop.f32.mrf.mxu2  ;;  %v463_v19 = vpop.f32.mrf.mxu3 }
  0xd6   : > { %538 = vst.msk [vmem:[%s912_s5 + $0x1c] sm:$0xf] %vm530_vm3, %v505_v16  ;;  %v444_v20 = vadd.f32 %v903_v24, %v443_v18  ;;  %v464_v21 = vadd.f32 %v903_v24, %v463_v19 }
  0xd7   : > { %546 = vst.msk [vmem:[%s912_s5 + $0x3c] sm:$0xf] %vm530_vm3, %v513_v17 }
  0xd8   : > { %v489_v22 = vmax.f32 %v444_v20, 0.0  ;;  %v497_v23 = vmax.f32 %v464_v21, 0.0 }
  0xda   : > { %v521_v25 = vpack.c.bf16 %v489_v22, %v489_v22  ;;  %v529_v26 = vpack.c.bf16 %v497_v23, %v497_v23 }
  0xdc   : > { %554 = vst.msk [vmem:[%s912_s5 + $0x5c] sm:$0xf] %vm530_vm3, %v521_v25 }
  0xdd   : > { %562 = vst.msk [vmem:[%s912_s5 + $0x7c] sm:$0xf] %vm530_vm3, %v529_v26 }
  0xde PF: > { %s14_s12 = sadd.s32 1, %s817_s12  }
  0xdf   : > { %p11_p7 = scmp.ge.s32.totalorder %s14_s12, 4  }
  0xe1   :  { %13 = sbr.rel (!%p11_p7) target bundleno = 1 (0x1), region = 67 }
  0xe6   :  { %585 = vsyncpa [#allocation3], 1 }
  0xe7   :  { %587 = vsyncpa [#allocation3 + $0x1], 1 }

// kernel: fully_cnet_forward.7
= control target key start
LH: loop header
LB: loop body
LE: loop exit
PB: predicated region body
PF: predicated region fallthrough
CT: control target
= control target key end

     0   :  { %vm555_vm0 = vcmask 523264   ;;  %s5580_s1 = inlined_call_operand.vmem [shape: bf16[576,128], index: 1, kind: input, shape index: {}]   ;;  %s5581_s2 = inlined_call_operand.vmem [shape: f32[1,128], index: 2, kind: input, shape index: {}]   ;;  %s5582_s0 = inlined_call_operand.vmem [shape: bf16[4,128,576], index: 0, kind: input, shape index: {}]   ;;  %s5583_s3 = inlined_call_operand.vmem [shape: bf16[128,128], index: 3, kind: output, shape index: {}]  }
   0x1   :  { %v3780_v0 = vld [vmem:[%s5580_s1 + $0x38] sm:$0xff]  ;;  %v3802_v4 = vld [vmem:[%s5580_s1 + $0x30] sm:$0xff]  ;;  %v3826_v8 = vld [vmem:[%s5580_s1 + $0x28] sm:$0xff] }
   0x2   :  { %v3785_v1 = vld [vmem:[%s5580_s1 + $0x78] sm:$0xff]  ;;  %580 = vmatpush.bf16.msra.mxu0 %v3780_v0  ;;  %v3807_v5 = vld [vmem:[%s5580_s1 + $0x70] sm:$0xff]  ;;  %v3831_v9 = vld [vmem:[%s5580_s1 + $0x68] sm:$0xff] }
   0x3   :  { %v3790_v2 = vld [vmem:[%s5580_s1 + $0xb8] sm:$0xff]  ;;  %629 = vmatpush.bf16.msra.mxu1 %v3785_v1  ;;  %v3814_v6 = vld [vmem:[%s5580_s1 + $0xb0] sm:$0xff]  ;;  %v3838_v10 = vld [vmem:[%s5580_s1 + $0xa8] sm:$0xff] }
   0x4   :  { %v3795_v3 = vld [vmem:[%s5580_s1 + $0xf8] sm:$0xff]  ;;  %678 = vmatpush.bf16.msra.mxu2 %v3790_v2  ;;  %v3819_v7 = vld [vmem:[%s5580_s1 + $0xf0] sm:$0xff]  ;;  %v3843_v11 = vld [vmem:[%s5580_s1 + $0xe8] sm:$0xff] }
   0x5   :  { %727 = vmatpush.bf16.msra.mxu3 %v3795_v3  ;;  %v3850_v12 = vld [vmem:[%s5580_s1 + $0x20] sm:$0xff]  ;;  %v3874_v16 = vld [vmem:[%s5580_s1 + $0x18] sm:$0xff]  ;;  %v3898_v20 = vld [vmem:[%s5580_s1 + $0x10] sm:$0xff] }
   0x6   :  { %581 = vmatpush.bf16.msra.mxu0 %v3802_v4  ;;  %v3855_v13 = vld [vmem:[%s5580_s1 + $0x60] sm:$0xff]  ;;  %v3879_v17 = vld [vmem:[%s5580_s1 + $0x58] sm:$0xff]  ;;  %v3903_v21 = vld [vmem:[%s5580_s1 + $0x50] sm:$0xff] }
   0x7   :  { %630 = vmatpush.bf16.msra.mxu1 %v3807_v5  ;;  %v3862_v14 = vld [vmem:[%s5580_s1 + $0xa0] sm:$0xff]  ;;  %v3886_v18 = vld [vmem:[%s5580_s1 + $0x98] sm:$0xff]  ;;  %v3910_v22 = vld [vmem:[%s5580_s1 + $0x90] sm:$0xff] }
   0x8   :  { %679 = vmatpush.bf16.msra.mxu2 %v3814_v6  ;;  %v3867_v15 = vld [vmem:[%s5580_s1 + $0xe0] sm:$0xff]  ;;  %v3891_v19 = vld [vmem:[%s5580_s1 + $0xd8] sm:$0xff]  ;;  %v3915_v23 = vld [vmem:[%s5580_s1 + $0xd0] sm:$0xff] }
   0x9   :  { %728 = vmatpush.bf16.msra.mxu3 %v3819_v7  ;;  %v3922_v24 = vld [vmem:[%s5580_s1 + $0x8] sm:$0xff]  ;;  %v3944_v28 = vld [vmem:[%s5580_s1] sm:$0xff]  ;;  %v3525_v33 = vld [vmem:[%s5582_s0 + $0x10] sm:$0xf0] }
   0xa   :  { %582 = vmatpush.bf16.msra.mxu0 %v3826_v8  ;;  %v3927_v25 = vld [vmem:[%s5580_s1 + $0x48] sm:$0xff]  ;;  %v3949_v29 = vld [vmem:[%s5580_s1 + $0x40] sm:$0xff]  ;;  %v2531_v35 = vld [vmem:[%s5582_s0 + $0x14] sm:$0xf0] }
   0xb   :  { %631 = vmatpush.bf16.msra.mxu1 %v3831_v9  ;;  %v3934_v26 = vld [vmem:[%s5580_s1 + $0x88] sm:$0xff]  ;;  %v3954_v30 = vld [vmem:[%s5580_s1 + $0x80] sm:$0xff]  ;;  %v3526_v37 = vld [vmem:[%s5582_s0 + $0x18] sm:$0xf0] }
   0xc   :  { %680 = vmatpush.bf16.msra.mxu2 %v3838_v10  ;;  %v3939_v27 = vld [vmem:[%s5580_s1 + $0xc8] sm:$0xff]  ;;  %v3959_v31 = vld [vmem:[%s5580_s1 + $0xc0] sm:$0xff]  ;;  %v3992_v40 = vld [vmem:[%s5580_s1 + $0x118] sm:$0xff] }
   0xd   :  { %729 = vmatpush.bf16.msra.mxu3 %v3843_v11  ;;  %v2529_v32 = vld [vmem:[%s5582_s0] sm:$0xf]  ;;  %v3523_v34 = vld [vmem:[%s5582_s0 + $0x4] sm:$0xf]  ;;  %v2537_v36 = vld [vmem:[%s5582_s0 + $0x8] sm:$0xf] }
   0xe   :  { %583 = vmatpush.bf16.msra.mxu0 %v3850_v12  ;;  %v3524_v38 = vld [vmem:[%s5582_s0 + $0xc] sm:$0xf]  ;;  %v2539_v39 = vld [vmem:[%s5582_s0 + $0x1c] sm:$0xf0]  ;;  %v2530_v41 = vor.u32 %v3525_v33, %v2529_v32  ;;  %v2534_v42 = vor.u32 %v3523_v34, %v2531_v35  ;;  %v2538_v43 = vor.u32 %v3526_v37, %v2537_v36  ;;  %v4003_v45 = vld [vmem:[%s5580_s1 + $0x110] sm:$0xff] }
   0xf   :  { %632 = vmatpush.bf16.msra.mxu1 %v3855_v13  ;;  %v2542_v44 = vor.u32 %v3524_v38, %v2539_v39  ;;  %v2549_v46 = vld [vmem:[%s5582_s0 + $0x28] sm:$0xf]  ;;  %v3530_v47 = vld [vmem:[%s5582_s0 + $0x38] sm:$0xf0]  ;;  %v3528_v48 = vld [vmem:[%s5582_s0 + $0x2c] sm:$0xf] }
  0x10   :  { %681 = vmatpush.bf16.msra.mxu2 %v3862_v14  ;;  %v2551_v49 = vld [vmem:[%s5582_s0 + $0x3c] sm:$0xf0]  ;;  %v2557_v50 = vld [vmem:[%s5582_s0 + $0x30] sm:$0xf]  ;;  %v3531_v51 = vld [vmem:[%s5582_s0 + $0x40] sm:$0xf0]  ;;  %v2550_v54 = vor.u32 %v3530_v47, %v2549_v46 }
  0x11   :  { %730 = vmatpush.bf16.msra.mxu3 %v3867_v15  ;;  %v3529_v52 = vld [vmem:[%s5582_s0 + $0x34] sm:$0xf]  ;;  %v2559_v53 = vld [vmem:[%s5582_s0 + $0x44] sm:$0xf0]  ;;  %v2554_v55 = vor.u32 %v3528_v48, %v2551_v49  ;;  %v2558_v56 = vor.u32 %v3531_v51, %v2557_v50  ;;  %v2569_v58 = vld [vmem:[%s5582_s0 + $0x50] sm:$0xf] }
  0x12   :  { %584 = vmatpush.bf16.msra.mxu0 %v3874_v16  ;;  %v2562_v57 = vor.u32 %v3529_v52, %v2559_v53  ;;  %v3535_v59 = vld [vmem:[%s5582_s0 + $0x60] sm:$0xf0]  ;;  %v3533_v60 = vld [vmem:[%s5582_s0 + $0x54] sm:$0xf]  ;;  %v2571_v61 = vld [vmem:[%s5582_s0 + $0x64] sm:$0xf0] }
  0x13   :  { %633 = vmatpush.bf16.msra.mxu1 %v3879_v17  ;;  %v2577_v62 = vld [vmem:[%s5582_s0 + $0x58] sm:$0xf]  ;;  %v3536_v63 = vld [vmem:[%s5582_s0 + $0x68] sm:$0xf0]  ;;  %v3534_v32 = vld [vmem:[%s5582_s0 + $0x5c] sm:$0xf]  ;;  %v2570_v34 = vor.u32 %v3535_v59, %v2569_v58  ;;  %v2574_v35 = vor.u32 %v3533_v60, %v2571_v61 }
  0x14   :  { %682 = vmatpush.bf16.msra.mxu2 %v3886_v18  ;;  %v2579_v33 = vld [vmem:[%s5582_s0 + $0x6c] sm:$0xf0]  ;;  %v2578_v36 = vor.u32 %v3536_v63, %v2577_v62  ;;  %v4083_v38 = vld [vmem:[%s5580_s1 + $0x108] sm:$0xff]  ;;  %v3543_v50 = vld [vmem:[%s5582_s0 + $0xa4] sm:$0xf] }
  0x15   :  { %731 = vmatpush.bf16.msra.mxu3 %v3891_v19  ;;  %v2582_v37 = vor.u32 %v3534_v32, %v2579_v33  ;;  %v3540_v39 = vld [vmem:[%s5582_s0 + $0x88] sm:$0xf0]  ;;  %v3546_v51 = vld [vmem:[%s5582_s0 + $0xb8] sm:$0xf0]  ;;  %v2619_v53 = vld [vmem:[%s5582_s0 + $0xbc] sm:$0xf0] }
  0x16   :  { %585 = vmatpush.bf16.msra.mxu0 %v3898_v20  ;;  %v3544_v52 = vld [vmem:[%s5582_s0 + $0xac] sm:$0xf]  ;;  %v4153_v58 = vld [vmem:[%s5580_s1 + $0x100] sm:$0xff]  ;;  %v3550_v59 = vld [vmem:[%s5582_s0 + $0xd8] sm:$0xf0] }
  0x17   :  { %634 = vmatpush.bf16.msra.mxu1 %v3903_v21  ;;  %v3548_v60 = vld [vmem:[%s5582_s0 + $0xcc] sm:$0xf]  ;;  %v2631_v61 = vld [vmem:[%s5582_s0 + $0xdc] sm:$0xf0]  ;;  %v2637_v62 = vld [vmem:[%s5582_s0 + $0xd0] sm:$0xf] }
  0x18   :  { %683 = vmatpush.bf16.msra.mxu2 %v3910_v22  ;;  %v3551_v63 = vld [vmem:[%s5582_s0 + $0xe0] sm:$0xf0]  ;;  %v3549_v32 = vld [vmem:[%s5582_s0 + $0xd4] sm:$0xf]  ;;  %v2639_v33 = vld [vmem:[%s5582_s0 + $0xe4] sm:$0xf0] }
  0x19   :  { %732 = vmatpush.bf16.msra.mxu3 %v3915_v23 }
  0x1a   :  { %586 = vmatpush.bf16.msra.mxu0 %v3922_v24 }
  0x1b   :  { %635 = vmatpush.bf16.msra.mxu1 %v3927_v25 }
  0x1c   :  { %684 = vmatpush.bf16.msra.mxu2 %v3934_v26 }
  0x1d   :  { %733 = vmatpush.bf16.msra.mxu3 %v3939_v27 }
  0x1e   :  { %587 = vmatpush.bf16.msra.mxu0 %v3944_v28 }
  0x1f   :  { %636 = vmatpush.bf16.msra.mxu1 %v3949_v29 }
  0x20   :  { %685 = vmatpush.bf16.msra.mxu2 %v3954_v30 }
  0x21   :  { %734 = vmatpush.bf16.msra.mxu3 %v3959_v31  ;;  %588 = vmatmul.bf16.vlgmr.msra.gmra.mxu0 %v2530_v41  ;;  %v2591_v41 = vld [vmem:[%s5582_s0 + $0x8c] sm:$0xf0] }
  0x22   :  { %780 = vmatpush.bf16.msrb.mxu0 %v3992_v40  ;;  %637 = vmatmul.bf16.vlgmr.msra.gmra.mxu1 %v2534_v42  ;;  %v3541_v42 = vld [vmem:[%s5582_s0 + $0x90] sm:$0xf0] }
  0x23   :  { %686 = vmatmul.bf16.vlgmr.msra.gmra.mxu2 %v2538_v43  ;;  %1114 = vmatpush.bf16.msrb.mxu1 %v3780_v0  ;;  %v3539_v43 = vld [vmem:[%s5582_s0 + $0x84] sm:$0xf] }
  0x24   :  { %1163 = vmatpush.bf16.msrb.mxu2 %v3785_v1  ;;  %735 = vmatmul.bf16.vlgmr.msra.gmra.mxu3 %v2542_v44  ;;  %v2599_v44 = vld [vmem:[%s5582_s0 + $0x94] sm:$0xf0] }
  0x25   :  { %1212 = vmatpush.bf16.msrb.mxu3 %v3790_v2  ;;  %v2602_v49 = vor.u32 %v3539_v43, %v2599_v44  ;;  %v3554_v43 = vld [vmem:[%s5582_s0 + $0xfc] sm:$0xf]  ;;  %v2659_v44 = vld [vmem:[%s5582_s0 + $0x10c] sm:$0xf0] }
  0x26   :  { %781 = vmatpush.bf16.msrb.mxu0 %v4003_v45 }
  0x27   :  { %1115 = vmatpush.bf16.msrb.mxu1 %v3802_v4 }
  0x28   :  { %1164 = vmatpush.bf16.msrb.mxu2 %v3807_v5 }
  0x29   :  { %1213 = vmatpush.bf16.msrb.mxu3 %v3814_v6 }
  0x2a   :  { %782 = vmatpush.bf16.msrb.mxu0 %v4083_v38 }
  0x2b   :  { %1116 = vmatpush.bf16.msrb.mxu1 %v3826_v8 }
  0x2c   :  { %1165 = vmatpush.bf16.msrb.mxu2 %v3831_v9 }
  0x2d   :  { %1214 = vmatpush.bf16.msrb.mxu3 %v3838_v10 }
  0x2e   :  { %783 = vmatpush.bf16.msrb.mxu0 %v4153_v58 }
  0x2f   :  { %1117 = vmatpush.bf16.msrb.mxu1 %v3850_v12 }
  0x30   :  { %1166 = vmatpush.bf16.msrb.mxu2 %v3855_v13 }
  0x31   :  { %1215 = vmatpush.bf16.msrb.mxu3 %v3862_v14  ;;  %593 = vmatmul.bf16.gmra.mxu0 %v2550_v54 }
  0x32   :  { %642 = vmatmul.bf16.gmra.mxu1 %v2554_v55  ;;  %1261 = vmatpush.bf16.msra.mxu0 %v3795_v3 }
  0x33   :  { %691 = vmatmul.bf16.gmra.mxu2 %v2558_v56  ;;  %1118 = vmatpush.bf16.msrb.mxu1 %v3874_v16 }
  0x34   :  { %1167 = vmatpush.bf16.msrb.mxu2 %v3879_v17  ;;  %740 = vmatmul.bf16.gmra.mxu3 %v2562_v57  ;;  %v2622_v57 = vor.u32 %v3544_v52, %v2619_v53  ;;  %v3559_v52 = vld [vmem:[%s5582_s0 + $0x124] sm:$0xf]  ;;  %v2679_v53 = vld [vmem:[%s5582_s0 + $0x134] sm:$0xf0] }
  0x35   :  { %1216 = vmatpush.bf16.msrb.mxu3 %v3886_v18 }
  0x36   :  { %1262 = vmatpush.bf16.msra.mxu0 %v3819_v7 }
  0x37   :  { %1119 = vmatpush.bf16.msrb.mxu1 %v3898_v20 }
  0x38   :  { %1168 = vmatpush.bf16.msrb.mxu2 %v3903_v21 }
  0x39   :  { %1217 = vmatpush.bf16.msrb.mxu3 %v3910_v22 }
  0x3a   :  { %1263 = vmatpush.bf16.msra.mxu0 %v3843_v11 }
  0x3b   :  { %1120 = vmatpush.bf16.msrb.mxu1 %v3922_v24 }
  0x3c   :  { %1169 = vmatpush.bf16.msrb.mxu2 %v3927_v25 }
  0x3d   :  { %1218 = vmatpush.bf16.msrb.mxu3 %v3934_v26 }
  0x3e   :  { %1264 = vmatpush.bf16.msra.mxu0 %v3867_v15 }
  0x3f   :  { %1121 = vmatpush.bf16.msrb.mxu1 %v3944_v28 }
  0x40   :  { %1170 = vmatpush.bf16.msrb.mxu2 %v3949_v29 }
  0x41   :  { %1219 = vmatpush.bf16.msrb.mxu3 %v3954_v30  ;;  %598 = vmatmul.bf16.gmra.mxu0 %v2570_v34 }
  0x42   :  { %647 = vmatmul.bf16.gmra.mxu1 %v2574_v35  ;;  %v2634_v35 = vor.u32 %v3548_v60, %v2631_v61  ;;  %1265 = vmatpush.bf16.msra.mxu0 %v3891_v19  ;;  %v3527_v60 = vld [vmem:[%s5582_s0 + $0x20] sm:$0xf0]  ;;  %v2889_v61 = vld [vmem:[%s5582_s0 + $0x140] sm:$0xf] }
  0x43   :  { %1314 = vmatpush.bf16.msra.mxu1 %v3992_v40  ;;  %696 = vmatmul.bf16.gmra.mxu2 %v2578_v36  ;;  %v2638_v36 = vor.u32 %v3551_v63, %v2637_v62  ;;  %v3565_v62 = vld [vmem:[%s5582_s0 + $0x150] sm:$0xf0]  ;;  %v3563_v63 = vld [vmem:[%s5582_s0 + $0x144] sm:$0xf] }
  0x44   :  { %1664 = vmatpush.bf16.msra.mxu2 %v3780_v0  ;;  %745 = vmatmul.bf16.gmra.mxu3 %v2582_v37  ;;  %v2642_v37 = vor.u32 %v3549_v32, %v2639_v33  ;;  %v2891_v32 = vld [vmem:[%s5582_s0 + $0x154] sm:$0xf0]  ;;  %v2897_v33 = vld [vmem:[%s5582_s0 + $0x148] sm:$0xf] }
  0x45   :  { %1713 = vmatpush.bf16.msra.mxu3 %v3785_v1  ;;  %v2589_v1 = vld [vmem:[%s5582_s0 + $0x78] sm:$0xf] }
  0x46   :  { %v2590_v46 = vor.u32 %v3540_v39, %v2589_v1  ;;  %v2649_v1 = vld [vmem:[%s5582_s0 + $0xf0] sm:$0xf]  ;;  %v3555_v39 = vld [vmem:[%s5582_s0 + $0x100] sm:$0xf0]  ;;  %1266 = vmatpush.bf16.msra.mxu0 %v3915_v23 }
  0x47   :  { %1315 = vmatpush.bf16.msra.mxu1 %v4003_v45 }
  0x48   :  { %1665 = vmatpush.bf16.msra.mxu2 %v3802_v4 }
  0x49   :  { %1714 = vmatpush.bf16.msra.mxu3 %v3807_v5  ;;  %v3538_v5 = vld [vmem:[%s5582_s0 + $0x7c] sm:$0xf] }
  0x4a   :  { %v2594_v47 = vor.u32 %v3538_v5, %v2591_v41  ;;  %v3553_v5 = vld [vmem:[%s5582_s0 + $0xf4] sm:$0xf]  ;;  %v2651_v41 = vld [vmem:[%s5582_s0 + $0x104] sm:$0xf0]  ;;  %1267 = vmatpush.bf16.msra.mxu0 %v3939_v27 }
  0x4b   :  { %1316 = vmatpush.bf16.msra.mxu1 %v4083_v38 }
  0x4c   :  { %1666 = vmatpush.bf16.msra.mxu2 %v3826_v8 }
  0x4d   :  { %1715 = vmatpush.bf16.msra.mxu3 %v3831_v9  ;;  %v2597_v9 = vld [vmem:[%s5582_s0 + $0x80] sm:$0xf] }
  0x4e   :  { %v2598_v48 = vor.u32 %v3541_v42, %v2597_v9  ;;  %v2657_v9 = vld [vmem:[%s5582_s0 + $0xf8] sm:$0xf]  ;;  %v3556_v42 = vld [vmem:[%s5582_s0 + $0x108] sm:$0xf0]  ;;  %1268 = vmatpush.bf16.msra.mxu0 %v3959_v31 }
  0x4f   :  { %1317 = vmatpush.bf16.msra.mxu1 %v4153_v58 }
  0x50   :  { %1667 = vmatpush.bf16.msra.mxu2 %v3850_v12 }
  0x51   :  { %1716 = vmatpush.bf16.msra.mxu3 %v3855_v13  ;;  %603 = vmatmul.bf16.gmra.mxu0 %v2590_v46  ;;  %v2609_v13 = vld [vmem:[%s5582_s0 + $0xa0] sm:$0xf]  ;;  %v2650_v46 = vor.u32 %v3555_v39, %v2649_v1  ;;  %v2894_v39 = vor.u32 %v3563_v63, %v2891_v32  ;;  %v2929_v63 = vld [vmem:[%s5582_s0 + $0x190] sm:$0xf]  ;;  %v2937_v32 = vld [vmem:[%s5582_s0 + $0x198] sm:$0xf] }
  0x52   :  { %652 = vmatmul.bf16.gmra.mxu1 %v2594_v47  ;;  %v2654_v47 = vor.u32 %v3553_v5, %v2651_v41 }
  0x53   :  { %701 = vmatmul.bf16.gmra.mxu2 %v2598_v48  ;;  %v2658_v48 = vor.u32 %v3556_v42, %v2657_v9 }
  0x54   :  { %1668 = vmatpush.bf16.msra.mxu2 %v3874_v16  ;;  %750 = vmatmul.bf16.gmra.mxu3 %v2602_v49  ;;  %v2662_v49 = vor.u32 %v3554_v43, %v2659_v44 }
  0x55   :  { %1717 = vmatpush.bf16.msra.mxu3 %v3879_v17  ;;  %v3545_v17 = vld [vmem:[%s5582_s0 + $0xb0] sm:$0xf0] }
  0x56   :  { %v2610_v54 = vor.u32 %v3545_v17, %v2609_v13  ;;  %v2669_v13 = vld [vmem:[%s5582_s0 + $0x118] sm:$0xf]  ;;  %v3560_v17 = vld [vmem:[%s5582_s0 + $0x128] sm:$0xf0] }
  0x58   :  { %1669 = vmatpush.bf16.msra.mxu2 %v3898_v20 }
  0x59   :  { %1718 = vmatpush.bf16.msra.mxu3 %v3903_v21  ;;  %v2611_v21 = vld [vmem:[%s5582_s0 + $0xb4] sm:$0xf0] }
  0x5a   :  { %v2614_v55 = vor.u32 %v3543_v50, %v2611_v21  ;;  %v3558_v50 = vld [vmem:[%s5582_s0 + $0x11c] sm:$0xf]  ;;  %v2671_v21 = vld [vmem:[%s5582_s0 + $0x12c] sm:$0xf0] }
  0x5c   :  { %1670 = vmatpush.bf16.msra.mxu2 %v3922_v24 }
  0x5d   :  { %1719 = vmatpush.bf16.msra.mxu3 %v3927_v25  ;;  %v2617_v25 = vld [vmem:[%s5582_s0 + $0xa8] sm:$0xf] }
  0x5e   :  { %v2618_v56 = vor.u32 %v3546_v51, %v2617_v25  ;;  %v2677_v25 = vld [vmem:[%s5582_s0 + $0x120] sm:$0xf]  ;;  %v3561_v51 = vld [vmem:[%s5582_s0 + $0x130] sm:$0xf0] }
  0x60   :  { %1671 = vmatpush.bf16.msra.mxu2 %v3944_v28 }
  0x61   :  { %1720 = vmatpush.bf16.msra.mxu3 %v3949_v29  ;;  %608 = vmatmul.bf16.gmra.mxu0 %v2610_v54  ;;  %v2629_v29 = vld [vmem:[%s5582_s0 + $0xc8] sm:$0xf]  ;;  %v2670_v54 = vor.u32 %v3560_v17, %v2669_v13  ;;  %v3570_v13 = vld [vmem:[%s5582_s0 + $0x178] sm:$0xf0]  ;;  %v2917_v17 = vld [vmem:[%s5582_s0 + $0x170] sm:$0xf] }
  0x62   :  { %657 = vmatmul.bf16.gmra.mxu1 %v2614_v55  ;;  %v2630_v34 = vor.u32 %v3550_v59, %v2629_v29  ;;  %v2674_v55 = vor.u32 %v3558_v50, %v2671_v21  ;;  %v4240_v29 = vld [vmem:[%s5581_s2] ss:$0 sm:$0xff]  ;;  %v2545_v59 = vld [vmem:[%s5582_s0 + $0x10] sm:$0xf]  ;;  %v3571_v50 = vld [vmem:[%s5582_s0 + $0x180] sm:$0xf0] }
  0x63   :  { %706 = vmatmul.bf16.gmra.mxu2 %v2618_v56  ;;  %v2678_v56 = vor.u32 %v3561_v51, %v2677_v25 }
  0x64   :  { %755 = vmatmul.bf16.gmra.mxu3 %v2622_v57  ;;  %v2682_v57 = vor.u32 %v3559_v52, %v2679_v53 }
  0x71   :  { %613 = vmatmul.bf16.gmra.mxu0 %v2630_v34  ;;  %v3566_v34 = vld [vmem:[%s5582_s0 + $0x158] sm:$0xf0] }
  0x72   :  { %662 = vmatmul.bf16.gmra.mxu1 %v2634_v35  ;;  %v2546_v35 = vor.u32 %v3527_v60, %v2545_v59  ;;  %v2898_v5 = vor.u32 %v3566_v34, %v2897_v33  ;;  %v3576_v33 = vld [vmem:[%s5582_s0 + $0x1a8] sm:$0xf0] }
  0x73   :  { %711 = vmatmul.bf16.gmra.mxu2 %v2638_v36  ;;  %v2890_v36 = vor.u32 %v3565_v62, %v2889_v61 }
  0x74   :  { %760 = vmatmul.bf16.gmra.mxu3 %v2642_v37 }
  0x81   :  { %618 = vmatmul.bf16.gmra.mxu0 %v2650_v46 }
  0x82   :  { %667 = vmatmul.bf16.gmra.mxu1 %v2654_v47 }
  0x83   :  { %716 = vmatmul.bf16.gmra.mxu2 %v2658_v48 }
  0x84   :  { %765 = vmatmul.bf16.gmra.mxu3 %v2662_v49 }
  0x91   :  { %623 = vmatmul.bf16.gmra.mxu0 %v2670_v54 }
  0x92   :  { %672 = vmatmul.bf16.gmra.mxu1 %v2674_v55 }
  0x93   :  { %721 = vmatmul.bf16.gmra.mxu2 %v2678_v56 }
  0x94   :  { %770 = vmatmul.bf16.gmra.mxu3 %v2682_v57  ;;  %v2918_v57 = vor.u32 %v3571_v50, %v2917_v17 }
  0x9e   :  { %v589_v37 = vpop.f32.mrf.mxu0 }
  0x9f   :  { %v638_v1 = vpop.f32.mrf.mxu1  ;;  %v590_v41 = vadd.f32 %v4240_v29, %v589_v37 }
  0xa1   :  { %v639_v9 = vadd.f32 %v638_v1, %v590_v41  ;;  %2831 = vmatmul.msk.bf16.vlgmr.msrb.gmra.mxu0 %vm555_vm0, %v2546_v35 }
  0xa2   :  { %1122 = vmatmul.bf16.vlgmr.msrb.gmra.mxu1 %v2890_v36  ;;  %1762 = vmatpush.bf16.msrb.mxu0 %v3790_v2  ;;  %v2565_v2 = vld [vmem:[%s5582_s0 + $0x38] sm:$0xf] }
  0xa3   :  { %1171 = vmatmul.bf16.vlgmr.msrb.gmra.mxu2 %v2894_v39  ;;  %1811 = vmatpush.bf16.msrb.mxu1 %v3795_v3  ;;  %v3532_v3 = vld [vmem:[%s5582_s0 + $0x48] sm:$0xf0] }
  0xa4   :  { %1220 = vmatmul.bf16.vlgmr.msrb.gmra.mxu3 %v2898_v5  ;;  %1864 = vmatpush.bf16.msrb.mxu2 %v3992_v40  ;;  %v2566_v51 = vor.u32 %v3532_v3, %v2565_v2  ;;  %v2949_v2 = vld [vmem:[%s5582_s0 + $0x1b8] sm:$0xf]  ;;  %v3580_v3 = vld [vmem:[%s5582_s0 + $0x1c8] sm:$0xf0] }
  0xa5   :  { %2214 = vmatpush.bf16.msrb.mxu3 %v3780_v0 }
  0xa6   :  { %v687_v42 = vpop.f32.mrf.mxu2  ;;  %v591_v46 = vpop.f32.mrf.mxu0  ;;  %1763 = vmatpush.bf16.msrb.mxu0 %v3814_v6  ;;  %v2909_v6 = vld [vmem:[%s5582_s0 + $0x168] sm:$0xf] }
  0xa7   :  { %v736_v43 = vpop.f32.mrf.mxu3  ;;  %v688_v44 = vadd.f32 %v687_v42, %v639_v9  ;;  %v640_v47 = vpop.f32.mrf.mxu1  ;;  %v592_v48 = vadd.f32 %v4240_v29, %v591_v46  ;;  %1812 = vmatpush.bf16.msrb.mxu1 %v3819_v7  ;;  %v2911_v7 = vld [vmem:[%s5582_s0 + $0x17c] sm:$0xf0]  ;;  %v2910_v52 = vor.u32 %v3570_v13, %v2909_v6  ;;  %v2938_v9 = vor.u32 %v3576_v33, %v2937_v32  ;;  %v3578_v6 = vld [vmem:[%s5582_s0 + $0x1bc] sm:$0xf]  ;;  %v2951_v13 = vld [vmem:[%s5582_s0 + $0x1cc] sm:$0xf0] }
  0xa8   :  { %1865 = vmatpush.bf16.msrb.mxu2 %v4003_v45  ;;  %v2977_v32 = vld [vmem:[%s5582_s0 + $0x1e8] sm:$0xf]  ;;  %v3586_v33 = vld [vmem:[%s5582_s0 + $0x1f8] sm:$0xf0] }
  0xa9   :  { %v4275_v49 = vadd.f32 %v736_v43, %v688_v44  ;;  %2215 = vmatpush.bf16.msrb.mxu3 %v3802_v4  ;;  %v641_v0 = vadd.f32 %v640_v47, %v592_v48  ;;  %v3568_v4 = vld [vmem:[%s5582_s0 + $0x16c] sm:$0xf] }
  0xaa   :  { %1764 = vmatpush.bf16.msrb.mxu0 %v3838_v10  ;;  %v2914_v56 = vor.u32 %v3568_v4, %v2911_v7  ;;  %v2957_v4 = vld [vmem:[%s5582_s0 + $0x1c0] sm:$0xf]  ;;  %v3581_v7 = vld [vmem:[%s5582_s0 + $0x1d0] sm:$0xf0] }
  0xab   :  { %1813 = vmatpush.bf16.msrb.mxu1 %v3843_v11 }
  0xac   :  { %1866 = vmatpush.bf16.msrb.mxu2 %v4083_v38 }
  0xad   :  { %2216 = vmatpush.bf16.msrb.mxu3 %v3826_v8 }
  0xae   :  { %v689_v21 = vpop.f32.mrf.mxu2  ;;  %v594_v54 = vpop.f32.mrf.mxu0  ;;  %1765 = vmatpush.bf16.msrb.mxu0 %v3862_v14 }
  0xaf   :  { %v738_v25 = vpop.f32.mrf.mxu3  ;;  %v690_v53 = vadd.f32 %v689_v21, %v641_v0  ;;  %v643_v55 = vpop.f32.mrf.mxu1  ;;  %v595_v59 = vadd.f32 %v4240_v29, %v594_v54  ;;  %1814 = vmatpush.bf16.msrb.mxu1 %v3867_v15  ;;  %v2954_v54 = vor.u32 %v3578_v6, %v2951_v13  ;;  %v2989_v6 = vld [vmem:[%s5582_s0 + $0x208] sm:$0xf]  ;;  %v3590_v13 = vld [vmem:[%s5582_s0 + $0x218] sm:$0xf0] }
  0xb0   :  { %1867 = vmatpush.bf16.msrb.mxu2 %v4153_v58 }
  0xb1   :  { %v4310_v10 = vadd.f32 %v738_v25, %v690_v53  ;;  %2217 = vmatpush.bf16.msrb.mxu3 %v3850_v12  ;;  %v644_v8 = vadd.f32 %v643_v55, %v595_v59  ;;  %2832 = vmatmul.msk.bf16.gmra.mxu0 %vm555_vm0, %v2566_v51  ;;  %v2950_v25 = vor.u32 %v3580_v3, %v2949_v2  ;;  %v2645_v2 = vld [vmem:[%s5582_s0 + $0xd8] sm:$0xf]  ;;  %v3552_v3 = vld [vmem:[%s5582_s0 + $0xe8] sm:$0xf0] }
  0xb2   :  { %1127 = vmatmul.bf16.gmra.mxu1 %v2910_v52  ;;  %1766 = vmatpush.bf16.msrb.mxu0 %v3886_v18  ;;  %v2958_v55 = vor.u32 %v3581_v7, %v2957_v4  ;;  %v3588_v4 = vld [vmem:[%s5582_s0 + $0x20c] sm:$0xf]  ;;  %v2991_v7 = vld [vmem:[%s5582_s0 + $0x21c] sm:$0xf0] }
  0xb3   :  { %1176 = vmatmul.bf16.gmra.mxu2 %v2914_v56  ;;  %1815 = vmatpush.bf16.msrb.mxu1 %v3891_v19  ;;  %v3537_v19 = vld [vmem:[%s5582_s0 + $0x70] sm:$0xf0] }
  0xb4   :  { %1225 = vmatmul.bf16.gmra.mxu3 %v2918_v57 }
  0xb5   :  { %2218 = vmatpush.bf16.msrb.mxu3 %v3874_v16  ;;  %v2585_v16 = vld [vmem:[%s5582_s0 + $0x60] sm:$0xf] }
  0xb6   :  { %v692_v11 = vpop.f32.mrf.mxu2  ;;  %v596_v61 = vpop.f32.mrf.mxu0  ;;  %1767 = vmatpush.bf16.msrb.mxu0 %v3910_v22  ;;  %v3575_v22 = vld [vmem:[%s5582_s0 + $0x1a0] sm:$0xf0]  ;;  %v2586_v36 = vor.u32 %v3537_v19, %v2585_v16  ;;  %v2625_v16 = vld [vmem:[%s5582_s0 + $0xb0] sm:$0xf] }
  0xb7   :  { %v741_v14 = vpop.f32.mrf.mxu3  ;;  %v693_v60 = vadd.f32 %v692_v11, %v644_v8  ;;  %v645_v62 = vpop.f32.mrf.mxu1  ;;  %v597_v12 = vadd.f32 %v4240_v29, %v596_v61  ;;  %1816 = vmatpush.bf16.msrb.mxu1 %v3915_v23  ;;  %v2931_v23 = vld [vmem:[%s5582_s0 + $0x1a4] sm:$0xf0]  ;;  %v2930_v37 = vor.u32 %v3575_v22, %v2929_v63  ;;  %v3547_v19 = vld [vmem:[%s5582_s0 + $0xc0] sm:$0xf0]  ;;  %v2969_v63 = vld [vmem:[%s5582_s0 + $0x1e0] sm:$0xf] }
  0xb8   :  { %v3585_v22 = vld [vmem:[%s5582_s0 + $0x1f0] sm:$0xf0] }
  0xb9   :  { %v4320_v15 = vadd.f32 %v741_v14, %v693_v60  ;;  %2219 = vmatpush.bf16.msrb.mxu3 %v3898_v20  ;;  %v646_v18 = vadd.f32 %v645_v62, %v597_v12  ;;  %v3573_v20 = vld [vmem:[%s5582_s0 + $0x194] sm:$0xf] }
  0xba   :  { %1768 = vmatpush.bf16.msrb.mxu0 %v3934_v26  ;;  %v2934_v41 = vor.u32 %v3573_v20, %v2931_v23  ;;  %v3583_v20 = vld [vmem:[%s5582_s0 + $0x1e4] sm:$0xf]  ;;  %v2971_v23 = vld [vmem:[%s5582_s0 + $0x1f4] sm:$0xf0] }
  0xbb   :  { %1817 = vmatpush.bf16.msrb.mxu1 %v3939_v27 }
  0xbd   :  { %2220 = vmatpush.bf16.msrb.mxu3 %v3922_v24 }
  0xbe   :  { %v694_v34 = vpop.f32.mrf.mxu2  ;;  %v599_v39 = vpop.f32.mrf.mxu0  ;;  %1769 = vmatpush.bf16.msrb.mxu0 %v3954_v30 }
  0xbf   :  { %v743_v35 = vpop.f32.mrf.mxu3  ;;  %v695_v1 = vadd.f32 %v694_v34, %v646_v18  ;;  %v648_v5 = vpop.f32.mrf.mxu1  ;;  %v600_v42 = vadd.f32 %v4240_v29, %v599_v39  ;;  %1818 = vmatpush.bf16.msrb.mxu1 %v3959_v31  ;;  %v3542_v31 = vld [vmem:[%s5582_s0 + $0x98] sm:$0xf0] }
  0xc1   :  { %v4353_v43 = vadd.f32 %v743_v35, %v695_v1  ;;  %2221 = vmatpush.bf16.msrb.mxu3 %v3944_v28  ;;  %v649_v24 = vadd.f32 %v648_v5, %v600_v42  ;;  %2833 = vmatmul.msk.bf16.gmra.mxu0 %vm555_vm0, %v2586_v36  ;;  %v2605_v28 = vld [vmem:[%s5582_s0 + $0x88] sm:$0xf]  ;;  %v2626_v36 = vor.u32 %v3547_v19, %v2625_v16 }
  0xc2   :  { %1132 = vmatmul.bf16.gmra.mxu1 %v2930_v37  ;;  %v2606_v21 = vor.u32 %v3542_v31, %v2605_v28  ;;  %v2970_v37 = vor.u32 %v3585_v22, %v2969_v63 }
  0xc3   :  { %1181 = vmatmul.bf16.gmra.mxu2 %v2934_v41  ;;  %v2974_v41 = vor.u32 %v3583_v20, %v2971_v23  ;;  %v2665_v20 = vld [vmem:[%s5582_s0 + $0x100] sm:$0xf]  ;;  %v3557_v23 = vld [vmem:[%s5582_s0 + $0x110] sm:$0xf0] }
  0xc4   :  { %1230 = vmatmul.bf16.gmra.mxu3 %v2938_v9  ;;  %v2978_v9 = vor.u32 %v3586_v33, %v2977_v32  ;;  %v3009_v32 = vld [vmem:[%s5582_s0 + $0x230] sm:$0xf]  ;;  %v3595_v33 = vld [vmem:[%s5582_s0 + $0x240] sm:$0xf0] }
  0xc6   :  { %v697_v26 = vpop.f32.mrf.mxu2  ;;  %v601_v46 = vpop.f32.mrf.mxu0 }
  0xc7   :  { %v746_v27 = vpop.f32.mrf.mxu3  ;;  %v698_v44 = vadd.f32 %v697_v26, %v649_v24  ;;  %v650_v47 = vpop.f32.mrf.mxu1  ;;  %v602_v48 = vadd.f32 %v4240_v29, %v601_v46 }
  0xc9   :  { %v4359_v30 = vadd.f32 %v746_v27, %v698_v44  ;;  %v651_v0 = vadd.f32 %v650_v47, %v602_v48 }
  0xce   :  { %v699_v17 = vpop.f32.mrf.mxu2  ;;  %v604_v52 = vpop.f32.mrf.mxu0 }
  0xcf   :  { %v748_v50 = vpop.f32.mrf.mxu3  ;;  %v700_v51 = vadd.f32 %v699_v17, %v651_v0  ;;  %v653_v53 = vpop.f32.mrf.mxu1  ;;  %v605_v56 = vadd.f32 %v4240_v29, %v604_v52  ;;  %v2997_v17 = vld [vmem:[%s5582_s0 + $0x210] sm:$0xf]  ;;  %v2990_v52 = vor.u32 %v3590_v13, %v2989_v6 }
  0xd1   :  { %v4386_v57 = vadd.f32 %v748_v50, %v700_v51  ;;  %v654_v59 = vadd.f32 %v653_v53, %v605_v56  ;;  %2834 = vmatmul.msk.bf16.gmra.mxu0 %vm555_vm0, %v2606_v21  ;;  %v3591_v50 = vld [vmem:[%s5582_s0 + $0x220] sm:$0xf0]  ;;  %v2646_v51 = vor.u32 %v3552_v3, %v2645_v2  ;;  %v2994_v56 = vor.u32 %v3588_v4, %v2991_v7 }
  0xd2   :  { %1137 = vmatmul.bf16.gmra.mxu1 %v2950_v25 }
  0xd3   :  { %1186 = vmatmul.bf16.gmra.mxu2 %v2954_v54 }
  0xd4   :  { %1235 = vmatmul.bf16.gmra.mxu3 %v2958_v55 }
  0xd6   :  { %v702_v8 = vpop.f32.mrf.mxu2  ;;  %v606_v60 = vpop.f32.mrf.mxu0 }
  0xd7   :  { %v751_v11 = vpop.f32.mrf.mxu3  ;;  %v703_v14 = vadd.f32 %v702_v8, %v654_v59  ;;  %v655_v61 = vpop.f32.mrf.mxu1  ;;  %v607_v62 = vadd.f32 %v4240_v29, %v606_v60  ;;  %v2998_v59 = vor.u32 %v3591_v50, %v2997_v17  ;;  %v2685_v17 = vld [vmem:[%s5582_s0 + $0x128] sm:$0xf]  ;;  %v3562_v50 = vld [vmem:[%s5582_s0 + $0x138] sm:$0xf0] }
  0xd9   :  { %v4390_v12 = vadd.f32 %v751_v11, %v703_v14  ;;  %v656_v18 = vadd.f32 %v655_v61, %v607_v62 }
  0xde   :  { %v704_v34 = vpop.f32.mrf.mxu2  ;;  %v609_v39 = vpop.f32.mrf.mxu0 }
  0xdf   :  { %v753_v35 = vpop.f32.mrf.mxu3  ;;  %v705_v1 = vadd.f32 %v704_v34, %v656_v18  ;;  %v658_v5 = vpop.f32.mrf.mxu1  ;;  %v610_v42 = vadd.f32 %v4240_v29, %v609_v39  ;;  %v3593_v34 = vld [vmem:[%s5582_s0 + $0x234] sm:$0xf] }
  0xe1   :  { %v4417_v24 = vadd.f32 %v753_v35, %v705_v1  ;;  %v659_v26 = vadd.f32 %v658_v5, %v610_v42  ;;  %2835 = vmatmul.msk.bf16.gmra.mxu0 %vm555_vm0, %v2626_v36  ;;  %v3011_v35 = vld [vmem:[%s5582_s0 + $0x244] sm:$0xf0]  ;;  %v3017_v36 = vld [vmem:[%s5582_s0 + $0x238] sm:$0xf]  ;;  %v2666_v5 = vor.u32 %v3557_v23, %v2665_v20 }
  0xe2   :  { %1142 = vmatmul.bf16.gmra.mxu1 %v2970_v37  ;;  %v3596_v37 = vld [vmem:[%s5582_s0 + $0x248] sm:$0xf0] }
  0xe3   :  { %1191 = vmatmul.bf16.gmra.mxu2 %v2974_v41  ;;  %v3010_v41 = vor.u32 %v3595_v33, %v3009_v32 }
  0xe4   :  { %1240 = vmatmul.bf16.gmra.mxu3 %v2978_v9 }
  0xe6   :  { %v707_v27 = vpop.f32.mrf.mxu2  ;;  %v611_v47 = vpop.f32.mrf.mxu0 }
  0xe7   :  { %v756_v44 = vpop.f32.mrf.mxu3  ;;  %v708_v46 = vadd.f32 %v707_v27, %v659_v26  ;;  %v660_v48 = vpop.f32.mrf.mxu1  ;;  %v612_v0 = vadd.f32 %v4240_v29, %v611_v47  ;;  %v3014_v27 = vor.u32 %v3593_v34, %v3011_v35 }
  0xe9   :  { %v4421_v28 = vadd.f32 %v756_v44, %v708_v46  ;;  %v661_v31 = vadd.f32 %v660_v48, %v612_v0  ;;  %v3018_v44 = vor.u32 %v3596_v37, %v3017_v36 }
  0xee   :  { %v709_v21 = vpop.f32.mrf.mxu2  ;;  %v614_v54 = vpop.f32.mrf.mxu0 }
  0xef   :  { %v758_v25 = vpop.f32.mrf.mxu3  ;;  %v710_v53 = vadd.f32 %v709_v21, %v661_v31  ;;  %v663_v55 = vpop.f32.mrf.mxu1  ;;  %v615_v8 = vadd.f32 %v4240_v29, %v614_v54  ;;  %v3029_v21 = vld [vmem:[%s5582_s0 + $0x258] sm:$0xf]  ;;  %v3601_v54 = vld [vmem:[%s5582_s0 + $0x270] sm:$0xf0] }
  0xf1   :  { %v4448_v11 = vadd.f32 %v758_v25, %v710_v53  ;;  %v664_v14 = vadd.f32 %v663_v55, %v615_v8  ;;  %2836 = vmatmul.msk.bf16.gmra.mxu0 %vm555_vm0, %v2646_v51  ;;  %v3600_v25 = vld [vmem:[%s5582_s0 + $0x268] sm:$0xf0]  ;;  %v3598_v51 = vld [vmem:[%s5582_s0 + $0x25c] sm:$0xf]  ;;  %v3037_v53 = vld [vmem:[%s5582_s0 + $0x260] sm:$0xf] }
  0xf2   :  { %1147 = vmatmul.bf16.gmra.mxu1 %v2990_v52  ;;  %v3031_v52 = vld [vmem:[%s5582_s0 + $0x26c] sm:$0xf0]  ;;  %v3030_v8 = vor.u32 %v3600_v25, %v3029_v21  ;;  %v3731_v21 = vld [vmem:[%s5580_s1 + $0xf8] sm:$0xff] }
  0xf3   :  { %1196 = vmatmul.bf16.gmra.mxu2 %v2994_v56  ;;  %v3732_v25 = vld [vmem:[%s5580_s1 + $0x78] sm:$0xff] }
  0xf4   :  { %1245 = vmatmul.bf16.gmra.mxu3 %v2998_v59  ;;  %v2686_v59 = vor.u32 %v3562_v50, %v2685_v17 }
  0xf6   :  { %v712_v60 = vpop.f32.mrf.mxu2  ;;  %v616_v18 = vpop.f32.mrf.mxu0 }
  0xf7   :  { %v761_v61 = vpop.f32.mrf.mxu3  ;;  %v713_v62 = vadd.f32 %v712_v60, %v664_v14  ;;  %v665_v16 = vpop.f32.mrf.mxu1  ;;  %v617_v19 = vadd.f32 %v4240_v29, %v616_v18  ;;  %v3038_v18 = vor.u32 %v3601_v54, %v3037_v53 }
  0xf9   :  { %v4452_v63 = vadd.f32 %v761_v61, %v713_v62  ;;  %v666_v22 = vadd.f32 %v665_v16, %v617_v19  ;;  %v3034_v62 = vor.u32 %v3598_v51, %v3031_v52 }
  0xfe   :  { %v714_v1 = vpop.f32.mrf.mxu2  ;;  %v619_v42 = vpop.f32.mrf.mxu0 }
  0xff   :  { %v763_v39 = vpop.f32.mrf.mxu3  ;;  %v715_v9 = vadd.f32 %v714_v1, %v666_v22  ;;  %v668_v26 = vpop.f32.mrf.mxu1  ;;  %v620_v46 = vadd.f32 %v4240_v29, %v619_v42  ;;  %v3564_v1 = vld [vmem:[%s5582_s0 + $0x14c] sm:$0xf]  ;;  %v3605_v42 = vld [vmem:[%s5582_s0 + $0x290] sm:$0xf0] }
 0x101   :  { %v4479_v47 = vadd.f32 %v763_v39, %v715_v9  ;;  %v669_v48 = vadd.f32 %v668_v26, %v620_v46  ;;  %2837 = vmatmul.msk.bf16.gmra.mxu0 %vm555_vm0, %v2666_v5  ;;  %v2899_v39 = vld [vmem:[%s5582_s0 + $0x15c] sm:$0xf0]  ;;  %v2905_v5 = vld [vmem:[%s5582_s0 + $0x150] sm:$0xf]  ;;  %v3603_v26 = vld [vmem:[%s5582_s0 + $0x284] sm:$0xf] }
 0x102   :  { %1152 = vmatmul.bf16.gmra.mxu1 %v3010_v41  ;;  %v3567_v41 = vld [vmem:[%s5582_s0 + $0x160] sm:$0xf0]  ;;  %v3105_v9 = vld [vmem:[%s5582_s0 + $0x280] sm:$0xf] }
 0x103   :  { %1201 = vmatmul.bf16.gmra.mxu2 %v3014_v27  ;;  %v3107_v27 = vld [vmem:[%s5582_s0 + $0x294] sm:$0xf0] }
 0x104   :  { %1250 = vmatmul.bf16.gmra.mxu3 %v3018_v44 }
 0x106   :  { %v717_v0 = vpop.f32.mrf.mxu2  ;;  %v621_v3 = vpop.f32.mrf.mxu0 }
 0x107   :  { %v766_v31 = vpop.f32.mrf.mxu3  ;;  %v718_v2 = vadd.f32 %v717_v0, %v669_v48  ;;  %v670_v6 = vpop.f32.mrf.mxu1  ;;  %v622_v13 = vadd.f32 %v4240_v29, %v621_v3  ;;  %v2902_v48 = vor.u32 %v3564_v1, %v2899_v39  ;;  %v2906_v0 = vor.u32 %v3567_v41, %v2905_v5 }
 0x109   :  { %v4483_v4 = vadd.f32 %v766_v31, %v718_v2  ;;  %v671_v7 = vadd.f32 %v670_v6, %v622_v13  ;;  %v3106_v6 = vor.u32 %v3605_v42, %v3105_v9  ;;  %v3110_v13 = vor.u32 %v3603_v26, %v3107_v27  ;;  %v3740_v27 = vld [vmem:[%s5580_s1 + $0xe0] sm:$0xff] }
 0x10e   :  { %v719_v55 = vpop.f32.mrf.mxu2  ;;  %v624_v60 = vpop.f32.mrf.mxu0 }
 0x10f   :  { %v768_v56 = vpop.f32.mrf.mxu3  ;;  %v720_v14 = vadd.f32 %v719_v55, %v671_v7  ;;  %v673_v61 = vpop.f32.mrf.mxu1  ;;  %v625_v16 = vadd.f32 %v4240_v29, %v624_v60  ;;  %v2919_v60 = vld [vmem:[%s5582_s0 + $0x184] sm:$0xf0] }
 0x111   :  { %v4510_v19 = vadd.f32 %v768_v56, %v720_v14  ;;  %v674_v22 = vadd.f32 %v673_v61, %v625_v16  ;;  %2838 = vmatmul.msk.bf16.gmra.mxu0 %vm555_vm0, %v2686_v59  ;;  %v3734_v59 = vld [vmem:[%s5580_s1 + $0xf0] sm:$0xff]  ;;  %v2925_v61 = vld [vmem:[%s5582_s0 + $0x178] sm:$0xf]  ;;  %v3608_v16 = vld [vmem:[%s5582_s0 + $0x2ac] sm:$0xf] }
 0x112   :  { %1157 = vmatmul.bf16.gmra.mxu1 %v3030_v8  ;;  %v3736_v14 = vld [vmem:[%s5580_s1 + $0xb0] sm:$0xff] }
 0x113   :  { %1206 = vmatmul.bf16.gmra.mxu2 %v3034_v62  ;;  %v3572_v62 = vld [vmem:[%s5582_s0 + $0x188] sm:$0xf0] }
 0x114   :  { %1255 = vmatmul.bf16.gmra.mxu3 %v3038_v18  ;;  %v3610_v18 = vld [vmem:[%s5582_s0 + $0x2b8] sm:$0xf0]  ;;  %v2926_v1 = vor.u32 %v3572_v62, %v2925_v61  ;;  %v3751_v62 = vld [vmem:[%s5580_s1 + $0x88] sm:$0xff] }
 0x116   :  { %v722_v20 = vpop.f32.mrf.mxu2  ;;  %v626_v33 = vpop.f32.mrf.mxu0 }
 0x117   :  { %v771_v23 = vpop.f32.mrf.mxu3  ;;  %v723_v32 = vadd.f32 %v722_v20, %v674_v22  ;;  %v675_v34 = vpop.f32.mrf.mxu1  ;;  %v627_v35 = vadd.f32 %v4240_v29, %v626_v33  ;;  %v3127_v22 = vld [vmem:[%s5582_s0 + $0x2bc] sm:$0xf0]  ;;  %v3737_v20 = vld [vmem:[%s5580_s1 + $0xe8] sm:$0xff] }
 0x118   :  { %v3739_v33 = vld [vmem:[%s5580_s1 + $0xa8] sm:$0xff]  ;;  %v3130_v42 = vor.u32 %v3608_v16, %v3127_v22 }
 0x119   :  { %v4514_v36 = vadd.f32 %v771_v23, %v723_v32  ;;  %v676_v37 = vadd.f32 %v675_v34, %v627_v35  ;;  %v3738_v23 = vld [vmem:[%s5580_s1 + $0x68] sm:$0xff] }
 0x11e   :  { %v724_v44 = vpop.f32.mrf.mxu2  ;;  %v785_v2 = vpop.f32.mrf.mxu0 }
 0x11f   :  { %v773_v46 = vpop.f32.mrf.mxu3  ;;  %v725_v31 = vadd.f32 %v724_v44, %v676_v37  ;;  %v1123_v3 = vpop.f32.mrf.mxu1  ;;  %v4541_v7 = vadd.f32 %v785_v2, %v4275_v49  ;;  %v3733_v49 = vld [vmem:[%s5580_s1 + $0xb8] sm:$0xff] }
 0x120   :  { %v1124_v50 = vadd.f32 %v4240_v29, %v1123_v3 }
 0x121   :  { %v4543_v17 = vadd.f32 %v773_v46, %v725_v31  ;;  %1269 = vmatmul.bf16.vlgmr.msra.gmra.mxu0 %v2902_v48  ;;  %v3742_v46 = vld [vmem:[%s5580_s1 + $0xa0] sm:$0xff]  ;;  %v3743_v48 = vld [vmem:[%s5580_s1 + $0xd8] sm:$0xff] }
 0x122   :  { %3047 = vmatmul.msk.bf16.vlgmr.msra.gmra.mxu1 %vm555_vm0, %v2906_v0  ;;  %2263 = vmatpush.bf16.msra.mxu0 %v3732_v25  ;;  %v3744_v0 = vld [vmem:[%s5580_s1 + $0x58] sm:$0xff]  ;;  %v3747_v25 = vld [vmem:[%s5580_s1 + $0x50] sm:$0xff] }
 0x123   :  { %1672 = vmatmul.bf16.vlgmr.msra.gmra.mxu2 %v3106_v6  ;;  %2312 = vmatpush.bf16.msra.mxu1 %v3733_v49 }
 0x124   :  { %1721 = vmatmul.bf16.vlgmr.msra.gmra.mxu3 %v3110_v13  ;;  %2361 = vmatpush.bf16.msra.mxu2 %v3731_v21  ;;  %v3746_v21 = vld [vmem:[%s5580_s1 + $0xd0] sm:$0xff] }
 0x125   :  { %2414 = vmatpush.bf16.msra.mxu3 %v3992_v40  ;;  %v3735_v40 = vld [vmem:[%s5580_s1 + $0x70] sm:$0xff] }
 0x126   :  { %v1172_v51 = vpop.f32.mrf.mxu2  ;;  %v787_v54 = vpop.f32.mrf.mxu0  ;;  %2264 = vmatpush.bf16.msra.mxu0 %v3735_v40  ;;  %v3613_v40 = vld [vmem:[%s5582_s0 + $0x2d4] sm:$0xf] }
 0x127   :  { %v1221_v52 = vpop.f32.mrf.mxu3  ;;  %v1173_v53 = vadd.f32 %v1172_v51, %v1124_v50  ;;  %v1125_v55 = vpop.f32.mrf.mxu1  ;;  %v4558_v56 = vadd.f32 %v787_v54, %v4310_v10  ;;  %2313 = vmatpush.bf16.msra.mxu1 %v3736_v14  ;;  %v3569_v10 = vld [vmem:[%s5582_s0 + $0x174] sm:$0xf]  ;;  %v3147_v14 = vld [vmem:[%s5582_s0 + $0x2e4] sm:$0xf0] }
 0x128   :  { %2362 = vmatpush.bf16.msra.mxu2 %v3734_v59  ;;  %v1126_v32 = vadd.f32 %v4240_v29, %v1125_v55  ;;  %v2922_v37 = vor.u32 %v3569_v10, %v2919_v60  ;;  %v3748_v51 = vld [vmem:[%s5580_s1 + $0x90] sm:$0xff]  ;;  %v3615_v59 = vld [vmem:[%s5582_s0 + $0x2e0] sm:$0xf0]  ;;  %v3749_v10 = vld [vmem:[%s5580_s1 + $0xc8] sm:$0xff] }
 0x129   :  { %v4566_v8 = vadd.f32 %v1221_v52, %v1173_v53  ;;  %2415 = vmatpush.bf16.msra.mxu3 %v4003_v45  ;;  %v3125_v45 = vld [vmem:[%s5582_s0 + $0x2a8] sm:$0xf]  ;;  %v2939_v52 = vld [vmem:[%s5582_s0 + $0x1ac] sm:$0xf0]  ;;  %v2945_v53 = vld [vmem:[%s5582_s0 + $0x1a0] sm:$0xf] }
 0x12a   :  { %2265 = vmatpush.bf16.msra.mxu0 %v3738_v23  ;;  %v3126_v9 = vor.u32 %v3610_v18, %v3125_v45  ;;  %v3577_v54 = vld [vmem:[%s5582_s0 + $0x1b0] sm:$0xf0]  ;;  %v3145_v55 = vld [vmem:[%s5582_s0 + $0x2d0] sm:$0xf]  ;;  %v3750_v60 = vld [vmem:[%s5580_s1 + $0x48] sm:$0xff] }
 0x12b   :  { %2314 = vmatpush.bf16.msra.mxu1 %v3739_v33  ;;  %v2946_v22 = vor.u32 %v3577_v54, %v2945_v53  ;;  %v3146_v33 = vor.u32 %v3615_v59, %v3145_v55 }
 0x12c   :  { %2363 = vmatpush.bf16.msra.mxu2 %v3737_v20 }
 0x12d   :  { %2416 = vmatpush.bf16.msra.mxu3 %v4083_v38  ;;  %v3741_v38 = vld [vmem:[%s5580_s1 + $0x60] sm:$0xff] }
 0x12e   :  { %v1174_v34 = vpop.f32.mrf.mxu2  ;;  %v790_v5 = vpop.f32.mrf.mxu0  ;;  %2266 = vmatpush.bf16.msra.mxu0 %v3741_v38 }
 0x12f   :  { %v1223_v35 = vpop.f32.mrf.mxu3  ;;  %v1175_v39 = vadd.f32 %v1174_v34, %v1126_v32  ;;  %v1128_v41 = vpop.f32.mrf.mxu1  ;;  %v4608_v26 = vadd.f32 %v790_v5, %v4320_v15  ;;  %2315 = vmatpush.bf16.msra.mxu1 %v3742_v46  ;;  %v3150_v34 = vor.u32 %v3613_v40, %v3147_v14  ;;  %v3754_v5 = vld [vmem:[%s5580_s1 + $0x80] sm:$0xff] }
 0x130   :  { %2364 = vmatpush.bf16.msra.mxu2 %v3740_v27  ;;  %v1129_v15 = vadd.f32 %v4240_v29, %v1128_v41 }
 0x131   :  { %v4616_v44 = vadd.f32 %v1223_v35, %v1175_v39  ;;  %2417 = vmatpush.bf16.msra.mxu3 %v4153_v58  ;;  %1274 = vmatmul.bf16.gmra.mxu0 %v2922_v37  ;;  %v3745_v58 = vld [vmem:[%s5580_s1 + $0x98] sm:$0xff]  ;;  %v3752_v37 = vld [vmem:[%s5580_s1 + $0xc0] sm:$0xff] }
 0x132   :  { %3048 = vmatmul.msk.bf16.gmra.mxu1 %vm555_vm0, %v2926_v1  ;;  %2267 = vmatpush.bf16.msra.mxu0 %v3744_v0  ;;  %v3753_v1 = vld [vmem:[%s5580_s1 + $0x40] sm:$0xff]  ;;  %v2959_v0 = vld [vmem:[%s5582_s0 + $0x1d4] sm:$0xf0] }
 0x133   :  { %1677 = vmatmul.bf16.gmra.mxu2 %v3126_v9  ;;  %2316 = vmatpush.bf16.msra.mxu1 %v3745_v58  ;;  %v2965_v58 = vld [vmem:[%s5582_s0 + $0x1c8] sm:$0xf] }
 0x134   :  { %1726 = vmatmul.bf16.gmra.mxu3 %v3130_v42  ;;  %2365 = vmatpush.bf16.msra.mxu2 %v3743_v48  ;;  %v3579_v48 = vld [vmem:[%s5582_s0 + $0x1c4] sm:$0xf] }
 0x136   :  { %v1177_v31 = vpop.f32.mrf.mxu2  ;;  %v792_v6 = vpop.f32.mrf.mxu0  ;;  %2268 = vmatpush.bf16.msra.mxu0 %v3747_v25 }
 0x137   :  { %v1226_v2 = vpop.f32.mrf.mxu3  ;;  %v1178_v3 = vadd.f32 %v1177_v31, %v1129_v15  ;;  %v1130_v13 = vpop.f32.mrf.mxu1  ;;  %v4634_v50 = vadd.f32 %v792_v6, %v4353_v43  ;;  %2317 = vmatpush.bf16.msra.mxu1 %v3748_v51  ;;  %v3574_v43 = vld [vmem:[%s5582_s0 + $0x19c] sm:$0xf]  ;;  %v3167_v6 = vld [vmem:[%s5582_s0 + $0x30c] sm:$0xf0]  ;;  %v2962_v51 = vor.u32 %v3579_v48, %v2959_v0 }
 0x138   :  { %2366 = vmatpush.bf16.msra.mxu2 %v3746_v21  ;;  %v1131_v61 = vadd.f32 %v4240_v29, %v1130_v13  ;;  %v2942_v16 = vor.u32 %v3574_v43, %v2939_v52  ;;  %v3582_v31 = vld [vmem:[%s5582_s0 + $0x1d8] sm:$0xf0] }
 0x139   :  { %v4642_v49 = vadd.f32 %v1226_v2, %v1178_v3  ;;  %v3620_v2 = vld [vmem:[%s5582_s0 + $0x308] sm:$0xf0]  ;;  %v3618_v3 = vld [vmem:[%s5582_s0 + $0x2fc] sm:$0xf]  ;;  %v2966_v43 = vor.u32 %v3582_v31, %v2965_v58 }
 0x13a   :  { %2269 = vmatpush.bf16.msra.mxu0 %v3750_v60  ;;  %v3170_v59 = vor.u32 %v3618_v3, %v3167_v6 }
 0x13b   :  { %2318 = vmatpush.bf16.msra.mxu1 %v3751_v62 }
 0x13c   :  { %2367 = vmatpush.bf16.msra.mxu2 %v3749_v10 }
 0x13e   :  { %v1179_v45 = vpop.f32.mrf.mxu2  ;;  %v795_v23 = vpop.f32.mrf.mxu0  ;;  %2270 = vmatpush.bf16.msra.mxu0 %v3753_v1 }
 0x13f   :  { %v1228_v18 = vpop.f32.mrf.mxu3  ;;  %v1180_v20 = vadd.f32 %v1179_v45, %v1131_v61  ;;  %v1133_v32 = vpop.f32.mrf.mxu1  ;;  %v4682_v35 = vadd.f32 %v795_v23, %v4359_v30  ;;  %2319 = vmatpush.bf16.msra.mxu1 %v3754_v5  ;;  %v2985_v23 = vld [vmem:[%s5582_s0 + $0x1f0] sm:$0xf] }
 0x140   :  { %2368 = vmatpush.bf16.msra.mxu2 %v3752_v37  ;;  %v1134_v30 = vadd.f32 %v4240_v29, %v1133_v32  ;;  %v3587_v32 = vld [vmem:[%s5582_s0 + $0x200] sm:$0xf0]  ;;  %v3187_v37 = vld [vmem:[%s5582_s0 + $0x334] sm:$0xf0] }
 0x141   :  { %v4690_v39 = vadd.f32 %v1228_v18, %v1180_v20  ;;  %1279 = vmatmul.bf16.gmra.mxu0 %v2942_v16  ;;  %v2979_v20 = vld [vmem:[%s5582_s0 + $0x1fc] sm:$0xf0] }
 0x142   :  { %3049 = vmatmul.msk.bf16.gmra.mxu1 %vm555_vm0, %v2946_v22 }
 0x143   :  { %1682 = vmatmul.bf16.gmra.mxu2 %v3146_v33  ;;  %v3625_v33 = vld [vmem:[%s5582_s0 + $0x330] sm:$0xf0] }
 0x144   :  { %1731 = vmatmul.bf16.gmra.mxu3 %v3150_v34  ;;  %v3623_v34 = vld [vmem:[%s5582_s0 + $0x324] sm:$0xf] }
 0x145   :  { %v3190_v0 = vor.u32 %v3623_v34, %v3187_v37 }
 0x146   :  { %v1182_v41 = vpop.f32.mrf.mxu2  ;;  %v797_v27 = vpop.f32.mrf.mxu0 }
 0x147   :  { %v1231_v9 = vpop.f32.mrf.mxu3  ;;  %v1183_v42 = vadd.f32 %v1182_v41, %v1134_v30  ;;  %v1135_v38 = vpop.f32.mrf.mxu1  ;;  %v4698_v46 = vadd.f32 %v797_v27, %v4386_v57  ;;  %v3165_v57 = vld [vmem:[%s5582_s0 + $0x2f8] sm:$0xf] }
 0x148   :  { %v1136_v13 = vadd.f32 %v4240_v29, %v1135_v38  ;;  %v3166_v55 = vor.u32 %v3620_v2, %v3165_v57 }
 0x149   :  { %v4700_v15 = vadd.f32 %v1231_v9, %v1183_v42  ;;  %v2986_v9 = vor.u32 %v3587_v32, %v2985_v23 }
 0x14e   :  { %v1184_v21 = vpop.f32.mrf.mxu2  ;;  %v800_v53 = vpop.f32.mrf.mxu0 }
 0x14f   :  { %v1233_v25 = vpop.f32.mrf.mxu3  ;;  %v1185_v52 = vadd.f32 %v1184_v21, %v1136_v13  ;;  %v1138_v54 = vpop.f32.mrf.mxu1  ;;  %v4728_v40 = vadd.f32 %v800_v53, %v4390_v12  ;;  %v3584_v12 = vld [vmem:[%s5582_s0 + $0x1ec] sm:$0xf] }
 0x150   :  { %v1139_v10 = vadd.f32 %v4240_v29, %v1138_v54  ;;  %v2982_v41 = vor.u32 %v3584_v12, %v2979_v20  ;;  %v3592_v53 = vld [vmem:[%s5582_s0 + $0x228] sm:$0xf0]  ;;  %v3630_v54 = vld [vmem:[%s5582_s0 + $0x358] sm:$0xf0] }
 0x151   :  { %v4730_v14 = vadd.f32 %v1233_v25, %v1185_v52  ;;  %1284 = vmatmul.bf16.gmra.mxu0 %v2962_v51  ;;  %v3005_v52 = vld [vmem:[%s5582_s0 + $0x218] sm:$0xf] }
 0x152   :  { %3050 = vmatmul.msk.bf16.gmra.mxu1 %vm555_vm0, %v2966_v43  ;;  %v2999_v43 = vld [vmem:[%s5582_s0 + $0x224] sm:$0xf0] }
 0x153   :  { %1687 = vmatmul.bf16.gmra.mxu2 %v3166_v55  ;;  %v3628_v55 = vld [vmem:[%s5582_s0 + $0x34c] sm:$0xf] }
 0x154   :  { %1736 = vmatmul.bf16.gmra.mxu3 %v3170_v59  ;;  %v3207_v59 = vld [vmem:[%s5582_s0 + $0x35c] sm:$0xf0] }
 0x155   :  { %v3210_v32 = vor.u32 %v3628_v55, %v3207_v59 }
 0x156   :  { %v1187_v60 = vpop.f32.mrf.mxu2  ;;  %v802_v45 = vpop.f32.mrf.mxu0 }
 0x157   :  { %v1236_v61 = vpop.f32.mrf.mxu3  ;;  %v1188_v62 = vadd.f32 %v1187_v60, %v1139_v10  ;;  %v1140_v18 = vpop.f32.mrf.mxu1  ;;  %v4735_v16 = vadd.f32 %v802_v45, %v4417_v24  ;;  %v3185_v24 = vld [vmem:[%s5582_s0 + $0x320] sm:$0xf]  ;;  %v3006_v45 = vor.u32 %v3592_v53, %v3005_v52 }
 0x158   :  { %v1141_v1 = vadd.f32 %v4240_v29, %v1140_v18  ;;  %v3186_v48 = vor.u32 %v3625_v33, %v3185_v24 }
 0x159   :  { %v4737_v22 = vadd.f32 %v1236_v61, %v1188_v62 }
 0x15e   :  { %v1189_v5 = vpop.f32.mrf.mxu2  ;;  %v805_v27 = vpop.f32.mrf.mxu0 }
 0x15f   :  { %v1238_v30 = vpop.f32.mrf.mxu3  ;;  %v1190_v42 = vadd.f32 %v1189_v5, %v1141_v1  ;;  %v1143_v38 = vpop.f32.mrf.mxu1  ;;  %v4765_v58 = vadd.f32 %v805_v27, %v4421_v28  ;;  %v3589_v28 = vld [vmem:[%s5582_s0 + $0x214] sm:$0xf]  ;;  %v3019_v27 = vld [vmem:[%s5582_s0 + $0x24c] sm:$0xf0] }
 0x160   :  { %v1144_v57 = vadd.f32 %v4240_v29, %v1143_v38  ;;  %v3002_v62 = vor.u32 %v3589_v28, %v2999_v43  ;;  %v3025_v38 = vld [vmem:[%s5582_s0 + $0x240] sm:$0xf] }
 0x161   :  { %v4767_v31 = vadd.f32 %v1238_v30, %v1190_v42  ;;  %1289 = vmatmul.bf16.gmra.mxu0 %v2982_v41 }
 0x162   :  { %3051 = vmatmul.msk.bf16.gmra.mxu1 %vm555_vm0, %v2986_v9 }
 0x163   :  { %1692 = vmatmul.bf16.gmra.mxu2 %v3186_v48  ;;  %v3597_v48 = vld [vmem:[%s5582_s0 + $0x250] sm:$0xf0] }
 0x164   :  { %1741 = vmatmul.bf16.gmra.mxu3 %v3190_v0  ;;  %v3635_v0 = vld [vmem:[%s5582_s0 + $0x380] sm:$0xf0]  ;;  %v3026_v28 = vor.u32 %v3597_v48, %v3025_v38 }
 0x166   :  { %v1192_v2 = vpop.f32.mrf.mxu2  ;;  %v807_v13 = vpop.f32.mrf.mxu0 }
 0x167   :  { %v1241_v3 = vpop.f32.mrf.mxu3  ;;  %v1193_v6 = vadd.f32 %v1192_v2, %v1144_v57  ;;  %v1145_v21 = vpop.f32.mrf.mxu1  ;;  %v4772_v25 = vadd.f32 %v807_v13, %v4448_v11  ;;  %v3205_v11 = vld [vmem:[%s5582_s0 + $0x348] sm:$0xf]  ;;  %v3633_v57 = vld [vmem:[%s5582_s0 + $0x374] sm:$0xf] }
 0x168   :  { %v1146_v10 = vadd.f32 %v4240_v29, %v1145_v21  ;;  %v3206_v23 = vor.u32 %v3630_v54, %v3205_v11  ;;  %v3227_v2 = vld [vmem:[%s5582_s0 + $0x384] sm:$0xf0] }
 0x169   :  { %v4774_v51 = vadd.f32 %v1241_v3, %v1193_v6  ;;  %v3230_v54 = vor.u32 %v3633_v57, %v3227_v2 }
 0x16e   :  { %v1194_v60 = vpop.f32.mrf.mxu2  ;;  %v810_v12 = vpop.f32.mrf.mxu0 }
 0x16f   :  { %v1243_v61 = vpop.f32.mrf.mxu3  ;;  %v1195_v18 = vadd.f32 %v1194_v60, %v1146_v10  ;;  %v1148_v20 = vpop.f32.mrf.mxu1  ;;  %v4802_v24 = vadd.f32 %v810_v12, %v4452_v63  ;;  %v3594_v63 = vld [vmem:[%s5582_s0 + $0x23c] sm:$0xf] }
 0x170   :  { %v1149_v34 = vadd.f32 %v4240_v29, %v1148_v20  ;;  %v3022_v21 = vor.u32 %v3594_v63, %v3019_v27  ;;  %v3599_v20 = vld [vmem:[%s5582_s0 + $0x264] sm:$0xf] }
 0x171   :  { %v4804_v33 = vadd.f32 %v1243_v61, %v1195_v18  ;;  %1294 = vmatmul.bf16.gmra.mxu0 %v3002_v62 }
 0x172   :  { %3052 = vmatmul.msk.bf16.gmra.mxu1 %vm555_vm0, %v3006_v45 }
 0x173   :  { %1697 = vmatmul.bf16.gmra.mxu2 %v3206_v23  ;;  %v3039_v23 = vld [vmem:[%s5582_s0 + $0x274] sm:$0xf0] }
 0x174   :  { %1746 = vmatmul.bf16.gmra.mxu3 %v3210_v32  ;;  %v3045_v32 = vld [vmem:[%s5582_s0 + $0x268] sm:$0xf]  ;;  %v3042_v27 = vor.u32 %v3599_v20, %v3039_v23 }
 0x176   :  { %v1197_v37 = vpop.f32.mrf.mxu2  ;;  %v812_v30 = vpop.f32.mrf.mxu0 }
 0x177   :  { %v1246_v1 = vpop.f32.mrf.mxu3  ;;  %v1198_v5 = vadd.f32 %v1197_v37, %v1149_v34  ;;  %v1150_v41 = vpop.f32.mrf.mxu1  ;;  %v4809_v9 = vadd.f32 %v812_v30, %v4479_v47  ;;  %v3225_v47 = vld [vmem:[%s5582_s0 + $0x370] sm:$0xf]  ;;  %v3602_v34 = vld [vmem:[%s5582_s0 + $0x278] sm:$0xf0]  ;;  %v3640_v37 = vld [vmem:[%s5582_s0 + $0x3a8] sm:$0xf0] }
 0x178   :  { %v1151_v3 = vadd.f32 %v4240_v29, %v1150_v41  ;;  %v3226_v11 = vor.u32 %v3635_v0, %v3225_v47  ;;  %v4847_v29 = vld [vmem:[%s5581_s2] ss:$0 sm:$0xff]  ;;  %v3046_v38 = vor.u32 %v3602_v34, %v3045_v32 }
 0x179   :  { %v4811_v42 = vadd.f32 %v1246_v1, %v1198_v5  ;;  %v3638_v1 = vld [vmem:[%s5582_s0 + $0x39c] sm:$0xf]  ;;  %v3247_v5 = vld [vmem:[%s5582_s0 + $0x3ac] sm:$0xf0] }
 0x17a   :  { %v3250_v2 = vor.u32 %v3638_v1, %v3247_v5 }
 0x17e   :  { %v1199_v6 = vpop.f32.mrf.mxu2  ;;  %v815_v52 = vpop.f32.mrf.mxu0 }
 0x17f   :  { %v1248_v13 = vpop.f32.mrf.mxu3  ;;  %v1200_v43 = vadd.f32 %v1199_v6, %v1151_v3  ;;  %v1153_v53 = vpop.f32.mrf.mxu1  ;;  %v4839_v55 = vadd.f32 %v815_v52, %v4483_v4 }
 0x180   :  { %v1154_v10 = vadd.f32 %v4847_v29, %v1153_v53 }
 0x181   :  { %v4841_v59 = vadd.f32 %v1248_v13, %v1200_v43  ;;  %1299 = vmatmul.bf16.gmra.mxu0 %v3022_v21 }
 0x182   :  { %3053 = vmatmul.msk.bf16.gmra.mxu1 %vm555_vm0, %v3026_v28 }
 0x183   :  { %1702 = vmatmul.bf16.gmra.mxu2 %v3226_v11 }
 0x184   :  { %1751 = vmatmul.bf16.gmra.mxu3 %v3230_v54 }
 0x186   :  { %v1202_v60 = vpop.f32.mrf.mxu2  ;;  %v817_v45 = vpop.f32.mrf.mxu0 }
 0x187   :  { %v1251_v61 = vpop.f32.mrf.mxu3  ;;  %v1203_v62 = vadd.f32 %v1202_v60, %v1154_v10  ;;  %v1155_v4 = vpop.f32.mrf.mxu1  ;;  %v4851_v18 = vadd.f32 %v817_v45, %v4510_v19  ;;  %v3245_v19 = vld [vmem:[%s5582_s0 + $0x398] sm:$0xf]  ;;  %v3606_v10 = vld [vmem:[%s5582_s0 + $0x298] sm:$0xf0]  ;;  %v3604_v60 = vld [vmem:[%s5582_s0 + $0x28c] sm:$0xf] }
 0x188   :  { %v1156_v30 = vadd.f32 %v4847_v29, %v1155_v4  ;;  %v3246_v57 = vor.u32 %v3640_v37, %v3245_v19  ;;  %v3321_v45 = vld [vmem:[%s5582_s0 + $0x3c0] sm:$0xf]  ;;  %v3645_v4 = vld [vmem:[%s5582_s0 + $0x3d0] sm:$0xf0] }
 0x189   :  { %v4853_v12 = vadd.f32 %v1251_v61, %v1203_v62  ;;  %v3115_v61 = vld [vmem:[%s5582_s0 + $0x29c] sm:$0xf0]  ;;  %v3607_v62 = vld [vmem:[%s5582_s0 + $0x2a0] sm:$0xf0] }
 0x18a   :  { %v3118_v19 = vor.u32 %v3604_v60, %v3115_v61  ;;  %v3612_v60 = vld [vmem:[%s5582_s0 + $0x2c8] sm:$0xf0]  ;;  %v826_v61 = vmax.f32 %v4558_v56, 0.0 }
 0x18e   :  { %v1204_v41 = vpop.f32.mrf.mxu2  ;;  %v820_v47 = vpop.f32.mrf.mxu0 }
 0x18f   :  { %v1253_v63 = vpop.f32.mrf.mxu3  ;;  %v1205_v48 = vadd.f32 %v1204_v41, %v1156_v30  ;;  %v1158_v0 = vpop.f32.mrf.mxu1  ;;  %v4881_v3 = vadd.f32 %v820_v47, %v4514_v36  ;;  %v3113_v36 = vld [vmem:[%s5582_s0 + $0x288] sm:$0xf]  ;;  %v3322_v41 = vor.u32 %v3645_v4, %v3321_v45  ;;  %v3650_v45 = vld [vmem:[%s5582_s0 + $0x3f8] sm:$0xf0] }
 0x190   :  { %v1159_v13 = vadd.f32 %v4847_v29, %v1158_v0  ;;  %v3114_v34 = vor.u32 %v3606_v10, %v3113_v36  ;;  %v3609_v36 = vld [vmem:[%s5582_s0 + $0x2b4] sm:$0xf]  ;;  %v3135_v10 = vld [vmem:[%s5582_s0 + $0x2c4] sm:$0xf0] }
 0x191   :  { %v4883_v6 = vadd.f32 %v1253_v63, %v1205_v48  ;;  %1304 = vmatmul.bf16.gmra.mxu0 %v3042_v27  ;;  %v825_v48 = vmax.f32 %v4541_v7, 0.0  ;;  %v3611_v7 = vld [vmem:[%s5582_s0 + $0x2c0] sm:$0xf0] }
 0x192   :  { %3054 = vmatmul.msk.bf16.gmra.mxu1 %vm555_vm0, %v3046_v38 }
 0x193   :  { %1707 = vmatmul.bf16.gmra.mxu2 %v3246_v57 }
 0x194   :  { %1756 = vmatmul.bf16.gmra.mxu3 %v3250_v2 }
 0x196   :  { %v1207_v21 = vpop.f32.mrf.mxu2  ;;  %v822_v52 = vpop.f32.mrf.mxu0 }
 0x197   :  { %v1256_v28 = vpop.f32.mrf.mxu3  ;;  %v1208_v43 = vadd.f32 %v1207_v21, %v1159_v13  ;;  %v1160_v53 = vpop.f32.mrf.mxu1  ;;  %v4888_v11 = vadd.f32 %v822_v52, %v4543_v17  ;;  %v3121_v17 = vld [vmem:[%s5582_s0 + $0x290] sm:$0xf] }
 0x198   :  { %v1161_v20 = vadd.f32 %v4847_v29, %v1160_v53  ;;  %v3122_v30 = vor.u32 %v3607_v62, %v3121_v17  ;;  %v3133_v53 = vld [vmem:[%s5582_s0 + $0x2b0] sm:$0xf]  ;;  %v3341_v62 = vld [vmem:[%s5582_s0 + $0x3e8] sm:$0xf] }
 0x199   :  { %v4890_v54 = vadd.f32 %v1256_v28, %v1208_v43 }
 0x19e   :  { %v1209_v23 = vpop.f32.mrf.mxu2  ;;  %v1270_v1 = vpop.f32.mrf.mxu0 }
 0x19f   :  { %v1258_v32 = vpop.f32.mrf.mxu3  ;;  %v1210_v37 = vadd.f32 %v1209_v23, %v1161_v20  ;;  %v1319_v5 = vpop.f32.mrf.mxu1  ;;  %v1271_v63 = vadd.f32 %v1270_v1, %v4566_v8 }
 0x1a1   :  { %v4918_v27 = vadd.f32 %v1258_v32, %v1210_v37  ;;  %v1320_v38 = vadd.f32 %v1319_v5, %v1271_v63  ;;  %1770 = vmatmul.bf16.vlgmr.msrb.gmra.mxu0 %v3114_v34  ;;  %v3134_v32 = vor.u32 %v3611_v7, %v3133_v53  ;;  %v3138_v34 = vor.u32 %v3609_v36, %v3135_v10  ;;  %v3153_v53 = vld [vmem:[%s5582_s0 + $0x2d8] sm:$0xf]  ;;  %v3614_v7 = vld [vmem:[%s5582_s0 + $0x2dc] sm:$0xf]  ;;  %v3155_v36 = vld [vmem:[%s5582_s0 + $0x2ec] sm:$0xf0] }
 0x1a2   :  { %1819 = vmatmul.bf16.vlgmr.msrb.gmra.mxu1 %v3118_v19  ;;  %v3342_v5 = vor.u32 %v3650_v45, %v3341_v62  ;;  %v3617_v10 = vld [vmem:[%s5582_s0 + $0x2f0] sm:$0xf0] }
 0x1a3   :  { %3263 = vmatmul.msk.bf16.vlgmr.msrb.gmra.mxu2 %vm555_vm0, %v3122_v30  ;;  %v1359_v47 = vmax.f32 %v1320_v38, 0.0  ;;  %v827_v38 = vmax.f32 %v4608_v26, 0.0  ;;  %v3616_v26 = vld [vmem:[%s5582_s0 + $0x2e8] sm:$0xf0] }
 0x1a4   :  { %2222 = vmatmul.bf16.vlgmr.msrb.gmra.mxu3 %v3322_v41 }
 0x1a5   :  { %v4922_v0 = vmax.f32 %v825_v48, %v1359_v47 }
 0x1a6   :  { %v1673_v57 = vpop.f32.mrf.mxu2  ;;  %v1272_v21 = vpop.f32.mrf.mxu0 }
 0x1a7   :  { %v1722_v2 = vpop.f32.mrf.mxu3  ;;  %v1674_v13 = vadd.f32 %v4847_v29, %v1673_v57  ;;  %v1321_v28 = vpop.f32.mrf.mxu1  ;;  %v1273_v8 = vadd.f32 %v1272_v21, %v4616_v44  ;;  %v3141_v44 = vld [vmem:[%s5582_s0 + $0x2b8] sm:$0xf] }
 0x1a8   :  { %v3142_v56 = vor.u32 %v3612_v60, %v3141_v44  ;;  %v828_v44 = vmax.f32 %v4634_v50, 0.0 }
 0x1a9   :  { %v4926_v43 = vadd.f32 %v1722_v2, %v1674_v13  ;;  %v1322_v52 = vadd.f32 %v1321_v28, %v1273_v8 }
 0x1ab   :  { %v1360_v17 = vmax.f32 %v1322_v52, 0.0 }
 0x1ad   :  { %v4953_v4 = vmax.f32 %v826_v61, %v1360_v17  ;;  %v3361_v61 = vld [vmem:[%s5582_s0 + $0x410] sm:$0xf]  ;;  %v3655_v17 = vld [vmem:[%s5582_s0 + $0x420] sm:$0xf0] }
 0x1ae   :  { %v1675_v20 = vpop.f32.mrf.mxu2  ;;  %v1275_v37 = vpop.f32.mrf.mxu0 }
 0x1af   :  { %v1724_v23 = vpop.f32.mrf.mxu3  ;;  %v1676_v19 = vadd.f32 %v4847_v29, %v1675_v20  ;;  %v1324_v1 = vpop.f32.mrf.mxu1  ;;  %v1276_v30 = vadd.f32 %v1275_v37, %v4642_v49 }
 0x1b1   :  { %v4957_v41 = vadd.f32 %v1724_v23, %v1676_v19  ;;  %v1325_v63 = vadd.f32 %v1324_v1, %v1276_v30  ;;  %1775 = vmatmul.bf16.gmra.mxu0 %v3134_v32  ;;  %v3154_v23 = vor.u32 %v3616_v26, %v3153_v53  ;;  %v3158_v32 = vor.u32 %v3614_v7, %v3155_v36  ;;  %v3173_v53 = vld [vmem:[%s5582_s0 + $0x300] sm:$0xf]  ;;  %v3619_v26 = vld [vmem:[%s5582_s0 + $0x304] sm:$0xf]  ;;  %v3175_v7 = vld [vmem:[%s5582_s0 + $0x314] sm:$0xf0] }
 0x1b2   :  { %1824 = vmatmul.bf16.gmra.mxu1 %v3138_v34  ;;  %v3362_v1 = vor.u32 %v3655_v17, %v3361_v61  ;;  %v3622_v36 = vld [vmem:[%s5582_s0 + $0x318] sm:$0xf0] }
 0x1b3   :  { %3264 = vmatmul.msk.bf16.gmra.mxu2 %vm555_vm0, %v3142_v56  ;;  %v1361_v48 = vmax.f32 %v1325_v63, 0.0  ;;  %v829_v63 = vmax.f32 %v4682_v35, 0.0  ;;  %v3621_v35 = vld [vmem:[%s5582_s0 + $0x310] sm:$0xf0] }
 0x1b4   :  { %2227 = vmatmul.bf16.gmra.mxu3 %v3342_v5 }
 0x1b5   :  { %v4961_v47 = vmax.f32 %v827_v38, %v1361_v48 }
 0x1b6   :  { %v1678_v57 = vpop.f32.mrf.mxu2  ;;  %v1277_v21 = vpop.f32.mrf.mxu0 }
 0x1b7   :  { %v1727_v2 = vpop.f32.mrf.mxu3  ;;  %v1679_v13 = vadd.f32 %v4847_v29, %v1678_v57  ;;  %v1326_v28 = vpop.f32.mrf.mxu1  ;;  %v1278_v49 = vadd.f32 %v1277_v21, %v4690_v39  ;;  %v3161_v39 = vld [vmem:[%s5582_s0 + $0x2e0] sm:$0xf] }
 0x1b8   :  { %v3162_v50 = vor.u32 %v3617_v10, %v3161_v39  ;;  %v830_v39 = vmax.f32 %v4698_v46, 0.0 }
 0x1b9   :  { %v4965_v8 = vadd.f32 %v1727_v2, %v1679_v13  ;;  %v1327_v52 = vadd.f32 %v1326_v28, %v1278_v49 }
 0x1bb   :  { %v1362_v60 = vmax.f32 %v1327_v52, 0.0 }
 0x1bd   :  { %v4992_v62 = vmax.f32 %v828_v44, %v1362_v60  ;;  %v3381_v44 = vld [vmem:[%s5582_s0 + $0x438] sm:$0xf]  ;;  %v3660_v60 = vld [vmem:[%s5582_s0 + $0x448] sm:$0xf0] }
 0x1be   :  { %v1680_v45 = vpop.f32.mrf.mxu2  ;;  %v1280_v19 = vpop.f32.mrf.mxu0 }
 0x1bf   :  { %v1729_v20 = vpop.f32.mrf.mxu3  ;;  %v1681_v34 = vadd.f32 %v4847_v29, %v1680_v45  ;;  %v1329_v37 = vpop.f32.mrf.mxu1  ;;  %v1281_v56 = vadd.f32 %v1280_v19, %v4700_v15 }
 0x1c1   :  { %v4996_v5 = vadd.f32 %v1729_v20, %v1681_v34  ;;  %v1330_v30 = vadd.f32 %v1329_v37, %v1281_v56  ;;  %1780 = vmatmul.bf16.gmra.mxu0 %v3154_v23  ;;  %v3174_v20 = vor.u32 %v3621_v35, %v3173_v53  ;;  %v3178_v23 = vor.u32 %v3619_v26, %v3175_v7  ;;  %v3193_v53 = vld [vmem:[%s5582_s0 + $0x328] sm:$0xf]  ;;  %v3624_v35 = vld [vmem:[%s5582_s0 + $0x32c] sm:$0xf]  ;;  %v3195_v26 = vld [vmem:[%s5582_s0 + $0x33c] sm:$0xf0] }
 0x1c2   :  { %1829 = vmatmul.bf16.gmra.mxu1 %v3158_v32  ;;  %v3382_v37 = vor.u32 %v3660_v60, %v3381_v44  ;;  %v3627_v7 = vld [vmem:[%s5582_s0 + $0x340] sm:$0xf0] }
 0x1c3   :  { %3265 = vmatmul.msk.bf16.gmra.mxu2 %vm555_vm0, %v3162_v50  ;;  %v1363_v38 = vmax.f32 %v1330_v30, 0.0  ;;  %v831_v30 = vmax.f32 %v4728_v40, 0.0  ;;  %v3626_v40 = vld [vmem:[%s5582_s0 + $0x338] sm:$0xf0] }
 0x1c4   :  { %2232 = vmatmul.bf16.gmra.mxu3 %v3362_v1 }
 0x1c5   :  { %v5000_v48 = vmax.f32 %v829_v63, %v1363_v38 }
 0x1c6   :  { %v1683_v57 = vpop.f32.mrf.mxu2  ;;  %v1282_v21 = vpop.f32.mrf.mxu0 }
 0x1c7   :  { %v1732_v2 = vpop.f32.mrf.mxu3  ;;  %v1684_v13 = vadd.f32 %v4847_v29, %v1683_v57  ;;  %v1331_v28 = vpop.f32.mrf.mxu1  ;;  %v1283_v15 = vadd.f32 %v1282_v21, %v4730_v14  ;;  %v3181_v14 = vld [vmem:[%s5582_s0 + $0x308] sm:$0xf] }
 0x1c8   :  { %v3182_v46 = vor.u32 %v3622_v36, %v3181_v14  ;;  %v832_v14 = vmax.f32 %v4735_v16, 0.0 }
 0x1c9   :  { %v5004_v49 = vadd.f32 %v1732_v2, %v1684_v13  ;;  %v1332_v52 = vadd.f32 %v1331_v28, %v1283_v15 }
 0x1cb   :  { %v1364_v10 = vmax.f32 %v1332_v52, 0.0 }
 0x1cd   :  { %v5031_v61 = vmax.f32 %v830_v39, %v1364_v10  ;;  %v3401_v39 = vld [vmem:[%s5582_s0 + $0x460] sm:$0xf]  ;;  %v3665_v10 = vld [vmem:[%s5582_s0 + $0x470] sm:$0xf0] }
 0x1ce   :  { %v1685_v17 = vpop.f32.mrf.mxu2  ;;  %v1285_v34 = vpop.f32.mrf.mxu0 }
 0x1cf   :  { %v1734_v45 = vpop.f32.mrf.mxu3  ;;  %v1686_v32 = vadd.f32 %v4847_v29, %v1685_v17  ;;  %v1334_v19 = vpop.f32.mrf.mxu1  ;;  %v1286_v50 = vadd.f32 %v1285_v34, %v4737_v22 }
 0x1d1   :  { %v5035_v1 = vadd.f32 %v1734_v45, %v1686_v32  ;;  %v1335_v56 = vadd.f32 %v1334_v19, %v1286_v50  ;;  %1785 = vmatmul.bf16.gmra.mxu0 %v3174_v20  ;;  %v3194_v45 = vor.u32 %v3626_v40, %v3193_v53  ;;  %v3198_v20 = vor.u32 %v3624_v35, %v3195_v26  ;;  %v3213_v53 = vld [vmem:[%s5582_s0 + $0x350] sm:$0xf]  ;;  %v3629_v40 = vld [vmem:[%s5582_s0 + $0x354] sm:$0xf]  ;;  %v3215_v35 = vld [vmem:[%s5582_s0 + $0x364] sm:$0xf0] }
 0x1d2   :  { %1834 = vmatmul.bf16.gmra.mxu1 %v3178_v23  ;;  %v3402_v19 = vor.u32 %v3665_v10, %v3401_v39  ;;  %v3632_v26 = vld [vmem:[%s5582_s0 + $0x368] sm:$0xf0] }
 0x1d3   :  { %3266 = vmatmul.msk.bf16.gmra.mxu2 %vm555_vm0, %v3182_v46  ;;  %v1365_v63 = vmax.f32 %v1335_v56, 0.0  ;;  %v833_v56 = vmax.f32 %v4765_v58, 0.0  ;;  %v3631_v58 = vld [vmem:[%s5582_s0 + $0x360] sm:$0xf0] }
 0x1d4   :  { %2237 = vmatmul.bf16.gmra.mxu3 %v3382_v37 }
 0x1d5   :  { %v5039_v38 = vmax.f32 %v831_v30, %v1365_v63 }
 0x1d6   :  { %v1688_v57 = vpop.f32.mrf.mxu2  ;;  %v1287_v21 = vpop.f32.mrf.mxu0 }
 0x1d7   :  { %v1737_v2 = vpop.f32.mrf.mxu3  ;;  %v1689_v13 = vadd.f32 %v4847_v29, %v1688_v57  ;;  %v1336_v28 = vpop.f32.mrf.mxu1  ;;  %v1288_v22 = vadd.f32 %v1287_v21, %v4767_v31  ;;  %v3201_v31 = vld [vmem:[%s5582_s0 + $0x330] sm:$0xf] }
 0x1d8   :  { %v3202_v16 = vor.u32 %v3627_v7, %v3201_v31  ;;  %v834_v31 = vmax.f32 %v4772_v25, 0.0 }
 0x1d9   :  { %v5043_v15 = vadd.f32 %v1737_v2, %v1689_v13  ;;  %v1337_v52 = vadd.f32 %v1336_v28, %v1288_v22 }
 0x1db   :  { %v1366_v36 = vmax.f32 %v1337_v52, 0.0 }
 0x1dd   :  { %v5070_v44 = vmax.f32 %v832_v14, %v1366_v36  ;;  %v3421_v14 = vld [vmem:[%s5582_s0 + $0x488] sm:$0xf]  ;;  %v3670_v36 = vld [vmem:[%s5582_s0 + $0x498] sm:$0xf0] }
 0x1de   :  { %v1690_v60 = vpop.f32.mrf.mxu2  ;;  %v1290_v32 = vpop.f32.mrf.mxu0 }
 0x1df   :  { %v1739_v17 = vpop.f32.mrf.mxu3  ;;  %v1691_v23 = vadd.f32 %v4847_v29, %v1690_v60  ;;  %v1339_v34 = vpop.f32.mrf.mxu1  ;;  %v1291_v46 = vadd.f32 %v1290_v32, %v4774_v51 }
 0x1e1   :  { %v5074_v37 = vadd.f32 %v1739_v17, %v1691_v23  ;;  %v1340_v50 = vadd.f32 %v1339_v34, %v1291_v46  ;;  %1790 = vmatmul.bf16.gmra.mxu0 %v3194_v45  ;;  %v3214_v17 = vor.u32 %v3631_v58, %v3213_v53  ;;  %v3218_v45 = vor.u32 %v3629_v40, %v3215_v35  ;;  %v3233_v53 = vld [vmem:[%s5582_s0 + $0x378] sm:$0xf]  ;;  %v3634_v58 = vld [vmem:[%s5582_s0 + $0x37c] sm:$0xf]  ;;  %v3235_v40 = vld [vmem:[%s5582_s0 + $0x38c] sm:$0xf0] }
 0x1e2   :  { %1839 = vmatmul.bf16.gmra.mxu1 %v3198_v20  ;;  %v3422_v34 = vor.u32 %v3670_v36, %v3421_v14  ;;  %v3637_v35 = vld [vmem:[%s5582_s0 + $0x390] sm:$0xf0] }
 0x1e3   :  { %3267 = vmatmul.msk.bf16.gmra.mxu2 %vm555_vm0, %v3202_v16  ;;  %v1367_v30 = vmax.f32 %v1340_v50, 0.0  ;;  %v835_v50 = vmax.f32 %v4802_v24, 0.0  ;;  %v3636_v24 = vld [vmem:[%s5582_s0 + $0x388] sm:$0xf0] }
 0x1e4   :  { %2242 = vmatmul.bf16.gmra.mxu3 %v3402_v19 }
 0x1e5   :  { %v5078_v63 = vmax.f32 %v833_v56, %v1367_v30 }
 0x1e6   :  { %v1693_v57 = vpop.f32.mrf.mxu2  ;;  %v1292_v21 = vpop.f32.mrf.mxu0 }
 0x1e7   :  { %v1742_v2 = vpop.f32.mrf.mxu3  ;;  %v1694_v13 = vadd.f32 %v4847_v29, %v1693_v57  ;;  %v1341_v28 = vpop.f32.mrf.mxu1  ;;  %v1293_v51 = vadd.f32 %v1292_v21, %v4804_v33  ;;  %v3221_v33 = vld [vmem:[%s5582_s0 + $0x358] sm:$0xf] }
 0x1e8   :  { %v3222_v25 = vor.u32 %v3632_v26, %v3221_v33  ;;  %v836_v33 = vmax.f32 %v4809_v9, 0.0 }
 0x1e9   :  { %v5082_v22 = vadd.f32 %v1742_v2, %v1694_v13  ;;  %v1342_v52 = vadd.f32 %v1341_v28, %v1293_v51 }
 0x1eb   :  { %v1368_v7 = vmax.f32 %v1342_v52, 0.0 }
 0x1ed   :  { %v5109_v39 = vmax.f32 %v834_v31, %v1368_v7  ;;  %v3441_v31 = vld [vmem:[%s5582_s0 + $0x4b0] sm:$0xf]  ;;  %v3675_v7 = vld [vmem:[%s5582_s0 + $0x4c0] sm:$0xf0] }
 0x1ee   :  { %v1695_v10 = vpop.f32.mrf.mxu2  ;;  %v1295_v23 = vpop.f32.mrf.mxu0 }
 0x1ef   :  { %v1744_v60 = vpop.f32.mrf.mxu3  ;;  %v1696_v20 = vadd.f32 %v4847_v29, %v1695_v10  ;;  %v1344_v32 = vpop.f32.mrf.mxu1  ;;  %v1296_v16 = vadd.f32 %v1295_v23, %v4811_v42 }
 0x1f1   :  { %v5113_v19 = vadd.f32 %v1744_v60, %v1696_v20  ;;  %v1345_v46 = vadd.f32 %v1344_v32, %v1296_v16  ;;  %1795 = vmatmul.bf16.gmra.mxu0 %v3214_v17  ;;  %v3234_v60 = vor.u32 %v3636_v24, %v3233_v53  ;;  %v3238_v17 = vor.u32 %v3634_v58, %v3235_v40  ;;  %v3253_v53 = vld [vmem:[%s5582_s0 + $0x3a0] sm:$0xf]  ;;  %v3639_v24 = vld [vmem:[%s5582_s0 + $0x3a4] sm:$0xf]  ;;  %v3255_v58 = vld [vmem:[%s5582_s0 + $0x3b4] sm:$0xf0] }
 0x1f2   :  { %1844 = vmatmul.bf16.gmra.mxu1 %v3218_v45  ;;  %v3442_v32 = vor.u32 %v3675_v7, %v3441_v31  ;;  %v3642_v40 = vld [vmem:[%s5582_s0 + $0x3b8] sm:$0xf0] }
 0x1f3   :  { %3268 = vmatmul.msk.bf16.gmra.mxu2 %vm555_vm0, %v3222_v25  ;;  %v1369_v56 = vmax.f32 %v1345_v46, 0.0  ;;  %v837_v46 = vmax.f32 %v4839_v55, 0.0  ;;  %v3641_v55 = vld [vmem:[%s5582_s0 + $0x3b0] sm:$0xf0] }
 0x1f4   :  { %2247 = vmatmul.bf16.gmra.mxu3 %v3422_v34 }
 0x1f5   :  { %v5117_v30 = vmax.f32 %v835_v50, %v1369_v56 }
 0x1f6   :  { %v1698_v57 = vpop.f32.mrf.mxu2  ;;  %v1297_v21 = vpop.f32.mrf.mxu0 }
 0x1f7   :  { %v1747_v2 = vpop.f32.mrf.mxu3  ;;  %v1699_v13 = vadd.f32 %v4847_v29, %v1698_v57  ;;  %v1346_v28 = vpop.f32.mrf.mxu1  ;;  %v1298_v42 = vadd.f32 %v1297_v21, %v4841_v59  ;;  %v3241_v59 = vld [vmem:[%s5582_s0 + $0x380] sm:$0xf] }
 0x1f8   :  { %v3242_v9 = vor.u32 %v3637_v35, %v3241_v59  ;;  %v838_v59 = vmax.f32 %v4851_v18, 0.0 }
 0x1f9   :  { %v5121_v51 = vadd.f32 %v1747_v2, %v1699_v13  ;;  %v1347_v52 = vadd.f32 %v1346_v28, %v1298_v42 }
 0x1fb   :  { %v1370_v26 = vmax.f32 %v1347_v52, 0.0 }
 0x1fd   :  { %v5148_v14 = vmax.f32 %v836_v33, %v1370_v26  ;;  %v3461_v33 = vld [vmem:[%s5582_s0 + $0x4d8] sm:$0xf]  ;;  %v3680_v26 = vld [vmem:[%s5582_s0 + $0x4e8] sm:$0xf0] }
 0x1fe   :  { %v1700_v36 = vpop.f32.mrf.mxu2  ;;  %v1300_v20 = vpop.f32.mrf.mxu0 }
 0x1ff   :  { %v1749_v10 = vpop.f32.mrf.mxu3  ;;  %v1701_v45 = vadd.f32 %v4847_v29, %v1700_v36  ;;  %v1349_v23 = vpop.f32.mrf.mxu1  ;;  %v1301_v25 = vadd.f32 %v1300_v20, %v4853_v12 }
 0x201   :  { %v5152_v34 = vadd.f32 %v1749_v10, %v1701_v45  ;;  %v1350_v16 = vadd.f32 %v1349_v23, %v1301_v25  ;;  %1800 = vmatmul.bf16.gmra.mxu0 %v3234_v60  ;;  %v3254_v10 = vor.u32 %v3641_v55, %v3253_v53  ;;  %v3258_v60 = vor.u32 %v3639_v24, %v3255_v58  ;;  %v3643_v53 = vld [vmem:[%s5582_s0 + $0x3c4] sm:$0xf]  ;;  %v3329_v55 = vld [vmem:[%s5582_s0 + $0x3c8] sm:$0xf]  ;;  %v3646_v24 = vld [vmem:[%s5582_s0 + $0x3d8] sm:$0xf0] }
 0x202   :  { %1849 = vmatmul.bf16.gmra.mxu1 %v3238_v17  ;;  %v3462_v23 = vor.u32 %v3680_v26, %v3461_v33  ;;  %v3331_v58 = vld [vmem:[%s5582_s0 + $0x3dc] sm:$0xf0] }
 0x203   :  { %3269 = vmatmul.msk.bf16.gmra.mxu2 %vm555_vm0, %v3242_v9  ;;  %v1371_v50 = vmax.f32 %v1350_v16, 0.0  ;;  %v839_v16 = vmax.f32 %v4881_v3, 0.0  ;;  %v3323_v3 = vld [vmem:[%s5582_s0 + $0x3d4] sm:$0xf0] }
 0x204   :  { %2252 = vmatmul.bf16.gmra.mxu3 %v3442_v32 }
 0x205   :  { %v5156_v56 = vmax.f32 %v837_v46, %v1371_v50 }
 0x206   :  { %v1703_v57 = vpop.f32.mrf.mxu2  ;;  %v1302_v21 = vpop.f32.mrf.mxu0 }
 0x207   :  { %v1752_v2 = vpop.f32.mrf.mxu3  ;;  %v1704_v13 = vadd.f32 %v4847_v29, %v1703_v57  ;;  %v1351_v28 = vpop.f32.mrf.mxu1  ;;  %v1303_v12 = vadd.f32 %v1302_v21, %v4883_v6  ;;  %v3261_v6 = vld [vmem:[%s5582_s0 + $0x3a8] sm:$0xf] }
 0x208   :  { %v3262_v18 = vor.u32 %v3642_v40, %v3261_v6  ;;  %v840_v6 = vmax.f32 %v4888_v11, 0.0 }
 0x209   :  { %v5160_v42 = vadd.f32 %v1752_v2, %v1704_v13  ;;  %v1352_v52 = vadd.f32 %v1351_v28, %v1303_v12 }
 0x20b   :  { %v1372_v35 = vmax.f32 %v1352_v52, 0.0 }
 0x20d   :  { %v5187_v31 = vmax.f32 %v838_v59, %v1372_v35  ;;  %v3337_v59 = vld [vmem:[%s5582_s0 + $0x3d0] sm:$0xf]  ;;  %v3647_v35 = vld [vmem:[%s5582_s0 + $0x3e0] sm:$0xf0] }
 0x20e   :  { %v1705_v7 = vpop.f32.mrf.mxu2  ;;  %v1305_v45 = vpop.f32.mrf.mxu0 }
 0x20f   :  { %v1754_v36 = vpop.f32.mrf.mxu3  ;;  %v1706_v17 = vadd.f32 %v4847_v29, %v1705_v7  ;;  %v1354_v20 = vpop.f32.mrf.mxu1  ;;  %v1306_v9 = vadd.f32 %v1305_v45, %v4890_v54 }
 0x211   :  { %v5191_v32 = vadd.f32 %v1754_v36, %v1706_v17  ;;  %v1355_v25 = vadd.f32 %v1354_v20, %v1306_v9  ;;  %1805 = vmatmul.bf16.gmra.mxu0 %v3254_v10  ;;  %v3326_v36 = vor.u32 %v3643_v53, %v3323_v3  ;;  %v3330_v10 = vor.u32 %v3646_v24, %v3329_v55  ;;  %v3649_v53 = vld [vmem:[%s5582_s0 + $0x3f4] sm:$0xf]  ;;  %v3351_v3 = vld [vmem:[%s5582_s0 + $0x404] sm:$0xf0]  ;;  %v3652_v55 = vld [vmem:[%s5582_s0 + $0x408] sm:$0xf0] }
 0x212   :  { %1854 = vmatmul.bf16.gmra.mxu1 %v3258_v60  ;;  %v3338_v20 = vor.u32 %v3647_v35, %v3337_v59 }
 0x213   :  { %3270 = vmatmul.msk.bf16.gmra.mxu2 %vm555_vm0, %v3262_v18  ;;  %v1373_v46 = vmax.f32 %v1355_v25, 0.0 }
 0x214   :  { %2257 = vmatmul.bf16.gmra.mxu3 %v3462_v23 }
 0x215   :  { %v5195_v50 = vmax.f32 %v839_v16, %v1373_v46 }
 0x216   :  { %v1708_v57 = vpop.f32.mrf.mxu2  ;;  %v1307_v21 = vpop.f32.mrf.mxu0 }
 0x217   :  { %v1757_v2 = vpop.f32.mrf.mxu3  ;;  %v1709_v13 = vadd.f32 %v4847_v29, %v1708_v57  ;;  %v1356_v28 = vpop.f32.mrf.mxu1  ;;  %v1308_v54 = vadd.f32 %v1307_v21, %v4918_v27  ;;  %v3644_v27 = vld [vmem:[%s5582_s0 + $0x3cc] sm:$0xf] }
 0x218   :  { %v3334_v11 = vor.u32 %v3644_v27, %v3331_v58 }
 0x219   :  { %v5199_v12 = vadd.f32 %v1757_v2, %v1709_v13  ;;  %v1357_v52 = vadd.f32 %v1356_v28, %v1308_v54  ;;  %v3343_v28 = vld [vmem:[%s5582_s0 + $0x3fc] sm:$0xf0] }
 0x21b   :  { %v1374_v40 = vmax.f32 %v1357_v52, 0.0  ;;  %v3349_v52 = vld [vmem:[%s5582_s0 + $0x3f0] sm:$0xf] }
 0x21d   :  { %v5226_v33 = vmax.f32 %v840_v6, %v1374_v40 }
 0x21e   :  { %v1710_v26 = vpop.f32.mrf.mxu2  ;;  %v1771_v17 = vpop.f32.mrf.mxu0 }
 0x21f   :  { %v1759_v7 = vpop.f32.mrf.mxu3  ;;  %v1711_v60 = vadd.f32 %v4847_v29, %v1710_v26  ;;  %v1820_v45 = vpop.f32.mrf.mxu1  ;;  %v1772_v18 = vadd.f32 %v1771_v17, %v4926_v43  ;;  %v3648_v43 = vld [vmem:[%s5582_s0 + $0x3ec] sm:$0xf]  ;;  %v3354_v26 = vor.u32 %v3649_v53, %v3351_v3 }
 0x220   :  { %v3346_v58 = vor.u32 %v3648_v43, %v3343_v28  ;;  %v3657_v43 = vld [vmem:[%s5582_s0 + $0x430] sm:$0xf0] }
 0x221   :  { %v5230_v23 = vadd.f32 %v1759_v7, %v1711_v60  ;;  %v1821_v9 = vadd.f32 %v1820_v45, %v1772_v18  ;;  %2271 = vmatmul.bf16.vlgmr.msra.gmra.mxu0 %v3326_v36 }
 0x222   :  { %2320 = vmatmul.bf16.vlgmr.msra.gmra.mxu1 %v3330_v10 }
 0x223   :  { %2369 = vmatmul.bf16.vlgmr.msra.gmra.mxu2 %v3334_v11 }
 0x224   :  { %3479 = vmatmul.msk.bf16.vlgmr.msra.gmra.mxu3 %vm555_vm0, %v3338_v20 }
 0x226   :  { %v1869_v25 = vpop.f32.mrf.mxu2  ;;  %v1773_v57 = vpop.f32.mrf.mxu0 }
 0x227   :  { %v5233_v16 = vpop.f32.mrf.mxu3  ;;  %v1870_v46 = vadd.f32 %v1869_v25, %v1821_v9  ;;  %v1822_v29 = vpop.f32.mrf.mxu1  ;;  %v1774_v2 = vadd.f32 %v1773_v57, %v4957_v41  ;;  %v3651_v41 = vld [vmem:[%s5582_s0 + $0x400] sm:$0xf0]  ;;  %v3653_v57 = vld [vmem:[%s5582_s0 + $0x414] sm:$0xf] }
 0x228   :  { %v3350_v6 = vor.u32 %v3651_v41, %v3349_v52 }
 0x229   :  { %v1909_v13 = vmax.f32 %v1870_v46, 0.0  ;;  %v1823_v21 = vadd.f32 %v1822_v29, %v1774_v2  ;;  %v3369_v2 = vld [vmem:[%s5582_s0 + $0x418] sm:$0xf] }
 0x22b   :  { %v5243_v54 = vmax.f32 %v4922_v0, %v1909_v13  ;;  %v3357_v0 = vld [vmem:[%s5582_s0 + $0x3f8] sm:$0xf]  ;;  %v3654_v13 = vld [vmem:[%s5582_s0 + $0x41c] sm:$0xf] }
 0x22c   :  { %v3358_v7 = vor.u32 %v3652_v55, %v3357_v0 }
 0x22e   :  { %v1871_v24 = vpop.f32.mrf.mxu2  ;;  %v1776_v59 = vpop.f32.mrf.mxu0 }
 0x22f   :  { %v5263_v27 = vpop.f32.mrf.mxu3  ;;  %v1872_v40 = vadd.f32 %v1871_v24, %v1823_v21  ;;  %v1825_v35 = vpop.f32.mrf.mxu1  ;;  %v1777_v36 = vadd.f32 %v1776_v59, %v4965_v8  ;;  %v3371_v21 = vld [vmem:[%s5582_s0 + $0x42c] sm:$0xf0] }
 0x230   :  { %v3374_v24 = vor.u32 %v3654_v13, %v3371_v21 }
 0x231   :  { %v1910_v10 = vmax.f32 %v1872_v40, 0.0  ;;  %v1826_v60 = vadd.f32 %v1825_v35, %v1777_v36  ;;  %2276 = vmatmul.bf16.gmra.mxu0 %v3346_v58 }
 0x232   :  { %2325 = vmatmul.bf16.gmra.mxu1 %v3350_v6 }
 0x233   :  { %v5267_v17 = vmax.f32 %v4953_v4, %v1910_v10  ;;  %2374 = vmatmul.bf16.gmra.mxu2 %v3354_v26  ;;  %v3363_v4 = vld [vmem:[%s5582_s0 + $0x424] sm:$0xf0] }
 0x234   :  { %3480 = vmatmul.msk.bf16.gmra.mxu3 %vm555_vm0, %v3358_v7  ;;  %v3366_v41 = vor.u32 %v3653_v57, %v3363_v4  ;;  %v3662_v57 = vld [vmem:[%s5582_s0 + $0x458] sm:$0xf0] }
 0x236   :  { %v1874_v45 = vpop.f32.mrf.mxu2  ;;  %v1778_v18 = vpop.f32.mrf.mxu0 }
 0x237   :  { %v5270_v11 = vpop.f32.mrf.mxu3  ;;  %v1875_v20 = vadd.f32 %v1874_v45, %v1826_v60  ;;  %v1827_v9 = vpop.f32.mrf.mxu1  ;;  %v1779_v25 = vadd.f32 %v1778_v18, %v4996_v5  ;;  %v3656_v5 = vld [vmem:[%s5582_s0 + $0x428] sm:$0xf0]  ;;  %v3658_v18 = vld [vmem:[%s5582_s0 + $0x43c] sm:$0xf] }
 0x238   :  { %v3370_v53 = vor.u32 %v3656_v5, %v3369_v2 }
 0x239   :  { %v1911_v46 = vmax.f32 %v1875_v20, 0.0  ;;  %v1828_v8 = vadd.f32 %v1827_v9, %v1779_v25  ;;  %v3389_v25 = vld [vmem:[%s5582_s0 + $0x440] sm:$0xf] }
 0x23b   :  { %v5280_v29 = vmax.f32 %v4961_v47, %v1911_v46  ;;  %v3377_v47 = vld [vmem:[%s5582_s0 + $0x420] sm:$0xf]  ;;  %v3659_v46 = vld [vmem:[%s5582_s0 + $0x444] sm:$0xf] }
 0x23c   :  { %v3378_v58 = vor.u32 %v3657_v43, %v3377_v47 }
 0x23e   :  { %v1876_v28 = vpop.f32.mrf.mxu2  ;;  %v1781_v0 = vpop.f32.mrf.mxu0 }
 0x23f   :  { %v5300_v52 = vpop.f32.mrf.mxu3  ;;  %v1877_v3 = vadd.f32 %v1876_v28, %v1828_v8  ;;  %v1830_v55 = vpop.f32.mrf.mxu1  ;;  %v1782_v6 = vadd.f32 %v1781_v0, %v5004_v49  ;;  %v3391_v8 = vld [vmem:[%s5582_s0 + $0x454] sm:$0xf0] }
 0x240   :  { %v3394_v28 = vor.u32 %v3659_v46, %v3391_v8 }
 0x241   :  { %v1912_v40 = vmax.f32 %v1877_v3, 0.0  ;;  %v1831_v59 = vadd.f32 %v1830_v55, %v1782_v6  ;;  %2281 = vmatmul.bf16.gmra.mxu0 %v3366_v41 }
 0x242   :  { %2330 = vmatmul.bf16.gmra.mxu1 %v3370_v53 }
 0x243   :  { %v5304_v35 = vmax.f32 %v4992_v62, %v1912_v40  ;;  %2379 = vmatmul.bf16.gmra.mxu2 %v3374_v24  ;;  %v3383_v62 = vld [vmem:[%s5582_s0 + $0x44c] sm:$0xf0] }
 0x244   :  { %3481 = vmatmul.msk.bf16.gmra.mxu3 %vm555_vm0, %v3378_v58  ;;  %v3386_v5 = vor.u32 %v3658_v18, %v3383_v62  ;;  %v3667_v18 = vld [vmem:[%s5582_s0 + $0x480] sm:$0xf0] }
 0x246   :  { %v1879_v26 = vpop.f32.mrf.mxu2  ;;  %v1783_v10 = vpop.f32.mrf.mxu0 }
 0x247   :  { %v5307_v7 = vpop.f32.mrf.mxu3  ;;  %v1880_v36 = vadd.f32 %v1879_v26, %v1831_v59  ;;  %v1832_v60 = vpop.f32.mrf.mxu1  ;;  %v1784_v45 = vadd.f32 %v1783_v10, %v5035_v1  ;;  %v3661_v1 = vld [vmem:[%s5582_s0 + $0x450] sm:$0xf0]  ;;  %v3663_v10 = vld [vmem:[%s5582_s0 + $0x464] sm:$0xf] }
 0x248   :  { %v3390_v13 = vor.u32 %v3661_v1, %v3389_v25 }
 0x249   :  { %v1913_v20 = vmax.f32 %v1880_v36, 0.0  ;;  %v1833_v49 = vadd.f32 %v1832_v60, %v1784_v45  ;;  %v3409_v45 = vld [vmem:[%s5582_s0 + $0x468] sm:$0xf] }
 0x24b   :  { %v5317_v9 = vmax.f32 %v5000_v48, %v1913_v20  ;;  %v3397_v48 = vld [vmem:[%s5582_s0 + $0x448] sm:$0xf]  ;;  %v3664_v20 = vld [vmem:[%s5582_s0 + $0x46c] sm:$0xf] }
 0x24c   :  { %v3398_v41 = vor.u32 %v3662_v57, %v3397_v48 }
 0x24e   :  { %v1881_v4 = vpop.f32.mrf.mxu2  ;;  %v1786_v47 = vpop.f32.mrf.mxu0 }
 0x24f   :  { %v5337_v2 = vpop.f32.mrf.mxu3  ;;  %v1882_v21 = vadd.f32 %v1881_v4, %v1833_v49  ;;  %v1835_v43 = vpop.f32.mrf.mxu1  ;;  %v1787_v53 = vadd.f32 %v1786_v47, %v5043_v15  ;;  %v3411_v49 = vld [vmem:[%s5582_s0 + $0x47c] sm:$0xf0] }
 0x250   :  { %v3414_v4 = vor.u32 %v3664_v20, %v3411_v49 }
 0x251   :  { %v1914_v3 = vmax.f32 %v1882_v21, 0.0  ;;  %v1836_v0 = vadd.f32 %v1835_v43, %v1787_v53  ;;  %2286 = vmatmul.bf16.gmra.mxu0 %v3386_v5 }
 0x252   :  { %2335 = vmatmul.bf16.gmra.mxu1 %v3390_v13 }
 0x253   :  { %v5341_v55 = vmax.f32 %v5031_v61, %v1914_v3  ;;  %2384 = vmatmul.bf16.gmra.mxu2 %v3394_v28  ;;  %v3403_v61 = vld [vmem:[%s5582_s0 + $0x474] sm:$0xf0] }
 0x254   :  { %3482 = vmatmul.msk.bf16.gmra.mxu3 %vm555_vm0, %v3398_v41  ;;  %v3406_v1 = vor.u32 %v3663_v10, %v3403_v61  ;;  %v3672_v10 = vld [vmem:[%s5582_s0 + $0x4a8] sm:$0xf0] }
 0x256   :  { %v1884_v24 = vpop.f32.mrf.mxu2  ;;  %v1788_v40 = vpop.f32.mrf.mxu0 }
 0x257   :  { %v5344_v58 = vpop.f32.mrf.mxu3  ;;  %v1885_v6 = vadd.f32 %v1884_v24, %v1836_v0  ;;  %v1837_v59 = vpop.f32.mrf.mxu1  ;;  %v1789_v26 = vadd.f32 %v1788_v40, %v5074_v37  ;;  %v3666_v37 = vld [vmem:[%s5582_s0 + $0x478] sm:$0xf0]  ;;  %v3668_v40 = vld [vmem:[%s5582_s0 + $0x48c] sm:$0xf] }
 0x258   :  { %v3410_v46 = vor.u32 %v3666_v37, %v3409_v45 }
 0x259   :  { %v1915_v36 = vmax.f32 %v1885_v6, 0.0  ;;  %v1838_v15 = vadd.f32 %v1837_v59, %v1789_v26  ;;  %v3429_v26 = vld [vmem:[%s5582_s0 + $0x490] sm:$0xf] }
 0x25b   :  { %v5354_v60 = vmax.f32 %v5039_v38, %v1915_v36  ;;  %v3417_v38 = vld [vmem:[%s5582_s0 + $0x470] sm:$0xf]  ;;  %v3669_v36 = vld [vmem:[%s5582_s0 + $0x494] sm:$0xf] }
 0x25c   :  { %v3418_v5 = vor.u32 %v3667_v18, %v3417_v38 }
 0x25e   :  { %v1886_v62 = vpop.f32.mrf.mxu2  ;;  %v1791_v48 = vpop.f32.mrf.mxu0 }
 0x25f   :  { %v5374_v25 = vpop.f32.mrf.mxu3  ;;  %v1887_v8 = vadd.f32 %v1886_v62, %v1838_v15  ;;  %v1840_v57 = vpop.f32.mrf.mxu1  ;;  %v1792_v13 = vadd.f32 %v1791_v48, %v5082_v22  ;;  %v3431_v15 = vld [vmem:[%s5582_s0 + $0x4a4] sm:$0xf0] }
 0x260   :  { %v3434_v62 = vor.u32 %v3669_v36, %v3431_v15 }
 0x261   :  { %v1916_v21 = vmax.f32 %v1887_v8, 0.0  ;;  %v1841_v47 = vadd.f32 %v1840_v57, %v1792_v13  ;;  %2291 = vmatmul.bf16.gmra.mxu0 %v3406_v1 }
 0x262   :  { %2340 = vmatmul.bf16.gmra.mxu1 %v3410_v46 }
 0x263   :  { %v5378_v43 = vmax.f32 %v5070_v44, %v1916_v21  ;;  %2389 = vmatmul.bf16.gmra.mxu2 %v3414_v4  ;;  %v3423_v44 = vld [vmem:[%s5582_s0 + $0x49c] sm:$0xf0] }
 0x264   :  { %3483 = vmatmul.msk.bf16.gmra.mxu3 %vm555_vm0, %v3418_v5  ;;  %v3426_v37 = vor.u32 %v3668_v40, %v3423_v44  ;;  %v3677_v40 = vld [vmem:[%s5582_s0 + $0x4d0] sm:$0xf0] }
 0x266   :  { %v1889_v28 = vpop.f32.mrf.mxu2  ;;  %v1793_v3 = vpop.f32.mrf.mxu0 }
 0x267   :  { %v5381_v41 = vpop.f32.mrf.mxu3  ;;  %v1890_v53 = vadd.f32 %v1889_v28, %v1841_v47  ;;  %v1842_v0 = vpop.f32.mrf.mxu1  ;;  %v1794_v24 = vadd.f32 %v1793_v3, %v5113_v19  ;;  %v3671_v19 = vld [vmem:[%s5582_s0 + $0x4a0] sm:$0xf0]  ;;  %v3673_v3 = vld [vmem:[%s5582_s0 + $0x4b4] sm:$0xf] }
 0x268   :  { %v3430_v20 = vor.u32 %v3671_v19, %v3429_v26 }
 0x269   :  { %v1917_v6 = vmax.f32 %v1890_v53, 0.0  ;;  %v1843_v22 = vadd.f32 %v1842_v0, %v1794_v24  ;;  %v3449_v24 = vld [vmem:[%s5582_s0 + $0x4b8] sm:$0xf] }
 0x26b   :  { %v5391_v59 = vmax.f32 %v5078_v63, %v1917_v6  ;;  %v3437_v63 = vld [vmem:[%s5582_s0 + $0x498] sm:$0xf]  ;;  %v3674_v6 = vld [vmem:[%s5582_s0 + $0x4bc] sm:$0xf] }
 0x26c   :  { %v3438_v1 = vor.u32 %v3672_v10, %v3437_v63 }
 0x26e   :  { %v1891_v61 = vpop.f32.mrf.mxu2  ;;  %v1796_v38 = vpop.f32.mrf.mxu0 }
 0x26f   :  { %v5411_v45 = vpop.f32.mrf.mxu3  ;;  %v1892_v49 = vadd.f32 %v1891_v61, %v1843_v22  ;;  %v1845_v18 = vpop.f32.mrf.mxu1  ;;  %v1797_v46 = vadd.f32 %v1796_v38, %v5121_v51  ;;  %v3451_v22 = vld [vmem:[%s5582_s0 + $0x4cc] sm:$0xf0] }
 0x270   :  { %v3454_v61 = vor.u32 %v3674_v6, %v3451_v22 }
 0x271   :  { %v1918_v8 = vmax.f32 %v1892_v49, 0.0  ;;  %v1846_v48 = vadd.f32 %v1845_v18, %v1797_v46  ;;  %2296 = vmatmul.bf16.gmra.mxu0 %v3426_v37 }
 0x272   :  { %2345 = vmatmul.bf16.gmra.mxu1 %v3430_v20 }
 0x273   :  { %v5415_v57 = vmax.f32 %v5109_v39, %v1918_v8  ;;  %2394 = vmatmul.bf16.gmra.mxu2 %v3434_v62  ;;  %v3443_v39 = vld [vmem:[%s5582_s0 + $0x4c4] sm:$0xf0] }
 0x274   :  { %3484 = vmatmul.msk.bf16.gmra.mxu3 %vm555_vm0, %v3438_v1  ;;  %v3446_v19 = vor.u32 %v3673_v3, %v3443_v39  ;;  %v3682_v3 = vld [vmem:[%s5582_s0 + $0x4f8] sm:$0xf0] }
 0x276   :  { %v1894_v4 = vpop.f32.mrf.mxu2  ;;  %v1798_v21 = vpop.f32.mrf.mxu0 }
 0x277   :  { %v5418_v5 = vpop.f32.mrf.mxu3  ;;  %v1895_v13 = vadd.f32 %v1894_v4, %v1846_v48  ;;  %v1847_v47 = vpop.f32.mrf.mxu1  ;;  %v1799_v28 = vadd.f32 %v1798_v21, %v5152_v34  ;;  %v3676_v34 = vld [vmem:[%s5582_s0 + $0x4c8] sm:$0xf0]  ;;  %v3678_v21 = vld [vmem:[%s5582_s0 + $0x4dc] sm:$0xf] }
 0x278   :  { %v3450_v36 = vor.u32 %v3676_v34, %v3449_v24 }
 0x279   :  { %v1919_v53 = vmax.f32 %v1895_v13, 0.0  ;;  %v1848_v51 = vadd.f32 %v1847_v47, %v1799_v28  ;;  %v3469_v28 = vld [vmem:[%s5582_s0 + $0x4e0] sm:$0xf] }
 0x27b   :  { %v5428_v0 = vmax.f32 %v5117_v30, %v1919_v53  ;;  %v3457_v30 = vld [vmem:[%s5582_s0 + $0x4c0] sm:$0xf]  ;;  %v3679_v53 = vld [vmem:[%s5582_s0 + $0x4e4] sm:$0xf] }
 0x27c   :  { %v3458_v37 = vor.u32 %v3677_v40, %v3457_v30 }
 0x27e   :  { %v1896_v44 = vpop.f32.mrf.mxu2  ;;  %v1801_v63 = vpop.f32.mrf.mxu0 }
 0x27f   :  { %v5448_v26 = vpop.f32.mrf.mxu3  ;;  %v1897_v15 = vadd.f32 %v1896_v44, %v1848_v51  ;;  %v1850_v10 = vpop.f32.mrf.mxu1  ;;  %v1802_v20 = vadd.f32 %v1801_v63, %v5160_v42  ;;  %v3471_v51 = vld [vmem:[%s5582_s0 + $0x4f4] sm:$0xf0] }
 0x280   :  { %v3474_v44 = vor.u32 %v3679_v53, %v3471_v51 }
 0x281   :  { %v1920_v49 = vmax.f32 %v1897_v15, 0.0  ;;  %v1851_v38 = vadd.f32 %v1850_v10, %v1802_v20  ;;  %2301 = vmatmul.bf16.gmra.mxu0 %v3446_v19 }
 0x282   :  { %2350 = vmatmul.bf16.gmra.mxu1 %v3450_v36 }
 0x283   :  { %v5452_v18 = vmax.f32 %v5148_v14, %v1920_v49  ;;  %2399 = vmatmul.bf16.gmra.mxu2 %v3454_v61  ;;  %v3463_v14 = vld [vmem:[%s5582_s0 + $0x4ec] sm:$0xf0] }
 0x284   :  { %3485 = vmatmul.msk.bf16.gmra.mxu3 %vm555_vm0, %v3458_v37  ;;  %v3466_v34 = vor.u32 %v3678_v21, %v3463_v14 }
 0x286   :  { %v1899_v62 = vpop.f32.mrf.mxu2  ;;  %v1803_v8 = vpop.f32.mrf.mxu0 }
 0x287   :  { %v5455_v1 = vpop.f32.mrf.mxu3  ;;  %v1900_v46 = vadd.f32 %v1899_v62, %v1851_v38  ;;  %v1852_v48 = vpop.f32.mrf.mxu1  ;;  %v1804_v4 = vadd.f32 %v1803_v8, %v5191_v32  ;;  %v3681_v32 = vld [vmem:[%s5582_s0 + $0x4f0] sm:$0xf0] }
 0x288   :  { %v3470_v6 = vor.u32 %v3681_v32, %v3469_v28 }
 0x289   :  { %v1921_v13 = vmax.f32 %v1900_v46, 0.0  ;;  %v1853_v42 = vadd.f32 %v1852_v48, %v1804_v4 }
 0x28b   :  { %v5465_v47 = vmax.f32 %v5156_v56, %v1921_v13  ;;  %v3477_v56 = vld [vmem:[%s5582_s0 + $0x4e8] sm:$0xf] }
 0x28c   :  { %v3478_v19 = vor.u32 %v3682_v3, %v3477_v56 }
 0x28e   :  { %v1901_v39 = vpop.f32.mrf.mxu2  ;;  %v1806_v30 = vpop.f32.mrf.mxu0 }
 0x28f   :  { %v5485_v24 = vpop.f32.mrf.mxu3  ;;  %v1902_v22 = vadd.f32 %v1901_v39, %v1853_v42  ;;  %v1855_v40 = vpop.f32.mrf.mxu1  ;;  %v1807_v36 = vadd.f32 %v1806_v30, %v5199_v12 }
 0x291   :  { %v1922_v15 = vmax.f32 %v1902_v22, 0.0  ;;  %v1856_v63 = vadd.f32 %v1855_v40, %v1807_v36  ;;  %2306 = vmatmul.bf16.gmra.mxu0 %v3466_v34 }
 0x292   :  { %2355 = vmatmul.bf16.gmra.mxu1 %v3470_v6 }
 0x293   :  { %v5489_v10 = vmax.f32 %v5187_v31, %v1922_v15  ;;  %2404 = vmatmul.bf16.gmra.mxu2 %v3474_v44  ;;  %v5503_v31 = vld [vmem:[%s5581_s2] ss:$0 sm:$0xff] }
 0x294   :  { %3486 = vmatmul.msk.bf16.gmra.mxu3 %vm555_vm0, %v3478_v19  ;;  %v2224_v13 = vadd.f32 %v5503_v31, %v5233_v16  ;;  %v2226_v56 = vadd.f32 %v5503_v31, %v5263_v27 }
 0x296   :  { %v1904_v61 = vpop.f32.mrf.mxu2  ;;  %v1808_v49 = vpop.f32.mrf.mxu0 }
 0x297   :  { %v5492_v37 = vpop.f32.mrf.mxu3  ;;  %v1905_v20 = vadd.f32 %v1904_v61, %v1856_v63  ;;  %v1857_v38 = vpop.f32.mrf.mxu1  ;;  %v1809_v62 = vadd.f32 %v1808_v49, %v5230_v23 }
 0x299   :  { %v1923_v46 = vmax.f32 %v1905_v20, 0.0  ;;  %v1858_v12 = vadd.f32 %v1857_v38, %v1809_v62 }
 0x29b   :  { %v5496_v8 = vmax.f32 %v5195_v50, %v1923_v46 }
 0x29e   :  { %v1906_v48 = vpop.f32.mrf.mxu2  ;;  %v2272_v21 = vpop.f32.mrf.mxu0 }
 0x29f   :  { %v5498_v4 = vpop.f32.mrf.mxu3  ;;  %v1907_v42 = vadd.f32 %v1906_v48, %v1858_v12  ;;  %v2321_v14 = vpop.f32.mrf.mxu1  ;;  %v2273_v28 = vadd.f32 %v2272_v21, %v2224_v13 }
 0x2a1   :  { %v1924_v23 = vmax.f32 %v1907_v42, 0.0  ;;  %v2322_v50 = vadd.f32 %v2321_v14, %v2273_v28 }
 0x2a3   :  { %v5508_v32 = vmax.f32 %v5226_v33, %v1924_v23  ;;  %v2229_v33 = vadd.f32 %v5503_v31, %v5270_v11 }
 0x2a6   :  { %v2370_v53 = vpop.f32.mrf.mxu2  ;;  %v2274_v39 = vpop.f32.mrf.mxu0 }
 0x2a7   :  { %v2419_v51 = vpop.f32.mrf.mxu3  ;;  %v2371_v3 = vadd.f32 %v2370_v53, %v2322_v50  ;;  %v2323_v34 = vpop.f32.mrf.mxu1  ;;  %v2275_v22 = vadd.f32 %v2274_v39, %v2226_v56  ;;  %v2234_v53 = vadd.f32 %v5503_v31, %v5307_v7 }
 0x2a9   :  { %v2420_v6 = vadd.f32 %v2419_v51, %v2371_v3  ;;  %v2324_v40 = vadd.f32 %v2323_v34, %v2275_v22 }
 0x2ab   :  { %v2459_v16 = vmax.f32 %v2420_v6, 0.0 }
 0x2ad   :  { %v2475_v30 = vmax.f32 %v5243_v54, %v2459_v16  ;;  %v2231_v54 = vadd.f32 %v5503_v31, %v5300_v52 }
 0x2ae   :  { %v2372_v44 = vpop.f32.mrf.mxu2  ;;  %v2277_v15 = vpop.f32.mrf.mxu0 }
 0x2af   :  { %v2421_v19 = vpop.f32.mrf.mxu3  ;;  %v2373_v36 = vadd.f32 %v2372_v44, %v2324_v40  ;;  %v2326_v63 = vpop.f32.mrf.mxu1  ;;  %v2278_v20 = vadd.f32 %v2277_v15, %v2229_v33 }
 0x2b1   :  { %v2422_v61 = vadd.f32 %v2421_v19, %v2373_v36  ;;  %v2327_v38 = vadd.f32 %v2326_v63, %v2278_v20 }
 0x2b3   :  { %v2460_v27 = vmax.f32 %v2422_v61, 0.0 }
 0x2b5   :  { %v2476_v49 = vmax.f32 %v5267_v17, %v2460_v27  ;;  %v2239_v27 = vadd.f32 %v5503_v31, %v5344_v58 }
 0x2b6   :  { %v2375_v62 = vpop.f32.mrf.mxu2  ;;  %v2279_v13 = vpop.f32.mrf.mxu0 }
 0x2b7   :  { %v2424_v46 = vpop.f32.mrf.mxu3  ;;  %v3686_v12 = vpack.c.bf16 %v2476_v49, %v2475_v30  ;;  %v2376_v48 = vadd.f32 %v2375_v62, %v2327_v38  ;;  %v2328_v42 = vpop.f32.mrf.mxu1  ;;  %v2280_v21 = vadd.f32 %v2279_v13, %v2231_v54 }
 0x2b9   :  { %3687 = vst [vmem:[%s5583_s3] sm:$0xff] %v3686_v12   ;;  %v2425_v11 = vadd.f32 %v2424_v46, %v2376_v48  ;;  %v2329_v17 = vadd.f32 %v2328_v42, %v2280_v21 }
 0x2bb   :  { %v2461_v14 = vmax.f32 %v2425_v11, 0.0 }
 0x2bd   :  { %v2477_v23 = vmax.f32 %v5280_v29, %v2461_v14  ;;  %v2236_v29 = vadd.f32 %v5503_v31, %v5337_v2 }
 0x2be   :  { %v2377_v28 = vpop.f32.mrf.mxu2  ;;  %v2282_v51 = vpop.f32.mrf.mxu0 }
 0x2bf   :  { %v2426_v50 = vpop.f32.mrf.mxu3  ;;  %v2378_v52 = vadd.f32 %v2377_v28, %v2329_v17  ;;  %v2331_v56 = vpop.f32.mrf.mxu1  ;;  %v2283_v39 = vadd.f32 %v2282_v51, %v2234_v53  ;;  %v2244_v51 = vadd.f32 %v5503_v31, %v5381_v41 }
 0x2c1   :  { %v2427_v3 = vadd.f32 %v2426_v50, %v2378_v52  ;;  %v2332_v22 = vadd.f32 %v2331_v56, %v2283_v39 }
 0x2c3   :  { %v2462_v34 = vmax.f32 %v2427_v3, 0.0 }
 0x2c5   :  { %v2478_v6 = vmax.f32 %v5304_v35, %v2462_v34 }
 0x2c6   :  { %v2380_v16 = vpop.f32.mrf.mxu2  ;;  %v2284_v19 = vpop.f32.mrf.mxu0 }
 0x2c7   :  { %v2429_v30 = vpop.f32.mrf.mxu3  ;;  %v3691_v40 = vpack.c.bf16 %v2478_v6, %v2477_v23  ;;  %v2381_v44 = vadd.f32 %v2380_v16, %v2332_v22  ;;  %v2333_v33 = vpop.f32.mrf.mxu1  ;;  %v2285_v36 = vadd.f32 %v2284_v19, %v2236_v29 }
 0x2c9   :  { %3723 = vst [vmem:[%s5583_s3 + $0x8] sm:$0xff] %v3691_v40   ;;  %v2430_v7 = vadd.f32 %v2429_v30, %v2381_v44  ;;  %v2334_v35 = vadd.f32 %v2333_v33, %v2285_v36 }
 0x2cb   :  { %v2463_v15 = vmax.f32 %v2430_v7, 0.0 }
 0x2cd   :  { %v2479_v63 = vmax.f32 %v5317_v9, %v2463_v15  ;;  %v2241_v9 = vadd.f32 %v5503_v31, %v5374_v25 }
 0x2ce   :  { %v2382_v61 = vpop.f32.mrf.mxu2  ;;  %v2287_v49 = vpop.f32.mrf.mxu0 }
 0x2cf   :  { %v2431_v20 = vpop.f32.mrf.mxu3  ;;  %v2383_v2 = vadd.f32 %v2382_v61, %v2334_v35  ;;  %v2336_v38 = vpop.f32.mrf.mxu1  ;;  %v2288_v46 = vadd.f32 %v2287_v49, %v2239_v27  ;;  %v2249_v61 = vadd.f32 %v5503_v31, %v5418_v5 }
 0x2d1   :  { %v2432_v62 = vadd.f32 %v2431_v20, %v2383_v2  ;;  %v2337_v48 = vadd.f32 %v2336_v38, %v2288_v46 }
 0x2d3   :  { %v2464_v54 = vmax.f32 %v2432_v62, 0.0 }
 0x2d5   :  { %v2480_v12 = vmax.f32 %v5341_v55, %v2464_v54 }
 0x2d6   :  { %v2385_v13 = vpop.f32.mrf.mxu2  ;;  %v2289_v14 = vpop.f32.mrf.mxu0 }
 0x2d7   :  { %v2434_v42 = vpop.f32.mrf.mxu3  ;;  %v3696_v11 = vpack.c.bf16 %v2480_v12, %v2479_v63  ;;  %v2386_v21 = vadd.f32 %v2385_v13, %v2337_v48  ;;  %v2338_v23 = vpop.f32.mrf.mxu1  ;;  %v2290_v17 = vadd.f32 %v2289_v14, %v2241_v9 }
 0x2d9   :  { %3724 = vst [vmem:[%s5583_s3 + $0x10] sm:$0xff] %v3696_v11   ;;  %v2435_v58 = vadd.f32 %v2434_v42, %v2386_v21  ;;  %v2339_v55 = vadd.f32 %v2338_v23, %v2290_v17  ;;  %v2254_v17 = vadd.f32 %v5503_v31, %v5455_v1 }
 0x2db   :  { %v2465_v28 = vmax.f32 %v2435_v58, 0.0 }
 0x2dd   :  { %v2481_v50 = vmax.f32 %v5354_v60, %v2465_v28  ;;  %v2246_v60 = vadd.f32 %v5503_v31, %v5411_v45 }
 0x2de   :  { %v2387_v53 = vpop.f32.mrf.mxu2  ;;  %v2292_v56 = vpop.f32.mrf.mxu0 }
 0x2df   :  { %v2436_v52 = vpop.f32.mrf.mxu3  ;;  %v2388_v25 = vadd.f32 %v2387_v53, %v2339_v55  ;;  %v2341_v3 = vpop.f32.mrf.mxu1  ;;  %v2293_v34 = vadd.f32 %v2292_v56, %v2244_v51 }
 0x2e1   :  { %v2437_v39 = vadd.f32 %v2436_v52, %v2388_v25  ;;  %v2342_v16 = vadd.f32 %v2341_v3, %v2293_v34 }
 0x2e3   :  { %v2466_v6 = vmax.f32 %v2437_v39, 0.0 }
 0x2e5   :  { %v2482_v22 = vmax.f32 %v5378_v43, %v2466_v6 }
 0x2e6   :  { %v2390_v30 = vpop.f32.mrf.mxu2  ;;  %v2294_v19 = vpop.f32.mrf.mxu0 }
 0x2e7   :  { %v2439_v29 = vpop.f32.mrf.mxu3  ;;  %v3701_v40 = vpack.c.bf16 %v2482_v22, %v2481_v50  ;;  %v2391_v44 = vadd.f32 %v2390_v30, %v2342_v16  ;;  %v2343_v33 = vpop.f32.mrf.mxu1  ;;  %v2295_v7 = vadd.f32 %v2294_v19, %v2246_v60 }
 0x2e9   :  { %3725 = vst [vmem:[%s5583_s3 + $0x18] sm:$0xff] %v3701_v40   ;;  %v2440_v41 = vadd.f32 %v2439_v29, %v2391_v44  ;;  %v2344_v43 = vadd.f32 %v2343_v33, %v2295_v7  ;;  %v2259_v44 = vadd.f32 %v5503_v31, %v5492_v37 }
 0x2eb   :  { %v2467_v36 = vmax.f32 %v2440_v41, 0.0 }
 0x2ed   :  { %v2483_v15 = vmax.f32 %v5391_v59, %v2467_v36  ;;  %v2251_v59 = vadd.f32 %v5503_v31, %v5448_v26 }
 0x2ee   :  { %v2392_v63 = vpop.f32.mrf.mxu2  ;;  %v2297_v20 = vpop.f32.mrf.mxu0 }
 0x2ef   :  { %v2441_v35 = vpop.f32.mrf.mxu3  ;;  %v2393_v45 = vadd.f32 %v2392_v63, %v2344_v43  ;;  %v2346_v27 = vpop.f32.mrf.mxu1  ;;  %v2298_v49 = vadd.f32 %v2297_v20, %v2249_v61 }
 0x2f1   :  { %v2442_v2 = vadd.f32 %v2441_v35, %v2393_v45  ;;  %v2347_v46 = vadd.f32 %v2346_v27, %v2298_v49 }
 0x2f3   :  { %v2468_v38 = vmax.f32 %v2442_v2, 0.0 }
 0x2f5   :  { %v2484_v62 = vmax.f32 %v5415_v57, %v2468_v38 }
 0x2f6   :  { %v2395_v54 = vpop.f32.mrf.mxu2  ;;  %v2299_v42 = vpop.f32.mrf.mxu0 }
 0x2f7   :  { %v2444_v12 = vpop.f32.mrf.mxu3  ;;  %v3706_v48 = vpack.c.bf16 %v2484_v62, %v2483_v15  ;;  %v2396_v13 = vadd.f32 %v2395_v54, %v2347_v46  ;;  %v2348_v9 = vpop.f32.mrf.mxu1  ;;  %v2300_v11 = vadd.f32 %v2299_v42, %v2251_v59 }
 0x2f9   :  { %3726 = vst [vmem:[%s5583_s3 + $0x20] sm:$0xff] %v3706_v48   ;;  %v2445_v5 = vadd.f32 %v2444_v12, %v2396_v13  ;;  %v2349_v57 = vadd.f32 %v2348_v9, %v2300_v11 }
 0x2fb   :  { %v2469_v21 = vmax.f32 %v2445_v5, 0.0 }
 0x2fd   :  { %v2485_v14 = vmax.f32 %v5428_v0, %v2469_v21  ;;  %v2256_v0 = vadd.f32 %v5503_v31, %v5485_v24 }
 0x2fe   :  { %v2397_v23 = vpop.f32.mrf.mxu2  ;;  %v2302_v28 = vpop.f32.mrf.mxu0 }
 0x2ff   :  { %v2446_v58 = vpop.f32.mrf.mxu3  ;;  %v2398_v26 = vadd.f32 %v2397_v23, %v2349_v57  ;;  %v2351_v50 = vpop.f32.mrf.mxu1  ;;  %v2303_v53 = vadd.f32 %v2302_v28, %v2254_v17 }
 0x301   :  { %v2447_v55 = vadd.f32 %v2446_v58, %v2398_v26  ;;  %v2352_v25 = vadd.f32 %v2351_v50, %v2303_v53 }
 0x303   :  { %v2470_v52 = vmax.f32 %v2447_v55, 0.0 }
 0x305   :  { %v2486_v51 = vmax.f32 %v5452_v18, %v2470_v52 }
 0x306   :  { %v2400_v56 = vpop.f32.mrf.mxu2  ;;  %v2304_v6 = vpop.f32.mrf.mxu0 }
 0x307   :  { %v2449_v3 = vpop.f32.mrf.mxu3  ;;  %v3711_v39 = vpack.c.bf16 %v2486_v51, %v2485_v14  ;;  %v2401_v34 = vadd.f32 %v2400_v56, %v2352_v25  ;;  %v2353_v22 = vpop.f32.mrf.mxu1  ;;  %v2305_v16 = vadd.f32 %v2304_v6, %v2256_v0 }
 0x309   :  { %3727 = vst [vmem:[%s5583_s3 + $0x28] sm:$0xff] %v3711_v39   ;;  %v2450_v1 = vadd.f32 %v2449_v3, %v2401_v34  ;;  %v2354_v18 = vadd.f32 %v2353_v22, %v2305_v16 }
 0x30b   :  { %v2471_v30 = vmax.f32 %v2450_v1, 0.0 }
 0x30d   :  { %v2487_v29 = vmax.f32 %v5465_v47, %v2471_v30  ;;  %v2261_v47 = vadd.f32 %v5503_v31, %v5498_v4 }
 0x30e   :  { %v2402_v60 = vpop.f32.mrf.mxu2  ;;  %v2307_v19 = vpop.f32.mrf.mxu0 }
 0x30f   :  { %v2451_v40 = vpop.f32.mrf.mxu3  ;;  %v2403_v24 = vadd.f32 %v2402_v60, %v2354_v18  ;;  %v2308_v41 = vadd.f32 %v2307_v19, %v2259_v44  ;;  %v2356_v7 = vpop.f32.mrf.mxu1 }
 0x311   :  { %v2452_v33 = vadd.f32 %v2451_v40, %v2403_v24  ;;  %v2357_v43 = vadd.f32 %v2356_v7, %v2308_v41 }
 0x313   :  { %v2472_v36 = vmax.f32 %v2452_v33, 0.0 }
 0x315   :  { %v2488_v15 = vmax.f32 %v5489_v10, %v2472_v36 }
 0x316   :  { %v2405_v63 = vpop.f32.mrf.mxu2  ;;  %v2309_v20 = vpop.f32.mrf.mxu0 }
 0x317   :  { %v2454_v35 = vpop.f32.mrf.mxu3  ;;  %v3716_v61 = vpack.c.bf16 %v2488_v15, %v2487_v29  ;;  %v2406_v45 = vadd.f32 %v2405_v63, %v2357_v43  ;;  %v2310_v27 = vadd.f32 %v2309_v20, %v2261_v47  ;;  %v2358_v49 = vpop.f32.mrf.mxu1 }
 0x319   :  { %3728 = vst [vmem:[%s5583_s3 + $0x30] sm:$0xff] %v3716_v61   ;;  %v2455_v37 = vadd.f32 %v2454_v35, %v2406_v45  ;;  %v2359_v10 = vadd.f32 %v2358_v49, %v2310_v27 }
 0x31b   :  { %v2473_v2 = vmax.f32 %v2455_v37, 0.0 }
 0x31d   :  { %v2489_v38 = vmax.f32 %v5496_v8, %v2473_v2 }
 0x31e   :  { %v2407_v62 = vpop.f32.mrf.mxu2 }
 0x31f   :  { %v2408_v46 = vadd.f32 %v2407_v62, %v2359_v10  ;;  %v2456_v54 = vpop.f32.mrf.mxu3 }
 0x321   :  { %v2457_v12 = vadd.f32 %v2456_v54, %v2408_v46 }
 0x323   :  { %v2474_v59 = vmax.f32 %v2457_v12, 0.0 }
 0x325   :  { %v2490_v4 = vmax.f32 %v5508_v32, %v2474_v59 }
 0x327   :  { %v3721_v31 = vpack.c.bf16 %v2490_v4, %v2489_v38 }
 0x329   :  { %3729 = vst [vmem:[%s5583_s3 + $0x38] sm:$0xff] %v3721_v31  }

// kernel: tile.13
= control target key start
LH: loop header
LB: loop body
LE: loop exit
PB: predicated region body
PF: predicated region fallthrough
CT: control target
= control target key end

     0   :  { %s22_s0 = inlined_call_operand.vmem [shape: f32[128], index: 0, kind: input, shape index: {}]   ;;  %s23_s1 = inlined_call_operand.vmem [shape: f32[4,128], index: 1, kind: output, shape index: {}]  }
   0x1   :  { %v4_v0 = vld [vmem:[%s22_s0] ss:$0 sm:$0xff] }
   0x2   :  { %5 = vst [vmem:[%s23_s1] sm:$0xf] %v4_v0 }

// kernel: tile.18
= control target key start
LH: loop header
LB: loop body
LE: loop exit
PB: predicated region body
PF: predicated region fallthrough
CT: control target
= control target key end

     0   :  { %s22_s0 = inlined_call_operand.vmem [shape: f32[64], index: 0, kind: input, shape index: {}]   ;;  %s23_s1 = inlined_call_operand.vmem [shape: f32[4,64], index: 1, kind: output, shape index: {}]  }
   0x1   :  { %v4_v0 = vld [vmem:[%s22_s0] ss:$0 sm:$0xff] }
   0x2   :  { %5 = vst [vmem:[%s23_s1] sm:$0xf] %v4_v0 }

// kernel: fully_cnet_forward.9
= control target key start
LH: loop header
LB: loop body
LE: loop exit
PB: predicated region body
PF: predicated region fallthrough
CT: control target
= control target key end

     0   :  { %s1439_s1 = inlined_call_operand.vmem [shape: bf16[256,512], index: 1, kind: input, shape index: {}]   ;;  %s1440_s0 = inlined_call_operand.vmem [shape: bf16[32,256], index: 0, kind: input, shape index: {}]   ;;  %s1441_s2 = inlined_call_operand.vmem [shape: f32[1,512], index: 2, kind: input, shape index: {}]   ;;  %s1442_s3 = inlined_call_operand.vmem [shape: bf16[32,512], index: 3, kind: output, shape index: {}]  }
   0x1   :  { %v750_v0 = vld [vmem:[%s1439_s1 + $0xe0] sm:$0xf]  ;;  %v926_v1 = vld [vmem:[%s1439_s1 + $0xec] sm:$0xf0]  ;;  %v924_v5 = vld [vmem:[%s1439_s1 + $0xe4] sm:$0xf] }
   0x2   :  { %v878_v2 = vld [vmem:[%s1439_s1 + $0x1e0] sm:$0xf]  ;;  %v751_v3 = vor.u32 %v926_v1, %v750_v0  ;;  %v958_v4 = vld [vmem:[%s1439_s1 + $0x1ec] sm:$0xf0]  ;;  %v752_v6 = vld [vmem:[%s1439_s1 + $0xf0] sm:$0xf0] }
   0x3   :  { %v879_v7 = vor.u32 %v958_v4, %v878_v2  ;;  %v755_v8 = vor.u32 %v924_v5, %v752_v6  ;;  %v956_v9 = vld [vmem:[%s1439_s1 + $0x1e4] sm:$0xf]  ;;  %v880_v10 = vld [vmem:[%s1439_s1 + $0x1f0] sm:$0xf0]  ;;  %v734_v11 = vld [vmem:[%s1439_s1 + $0xc0] sm:$0xf] }
   0x4   :  { %432 = vmatpush.bf16.msra.mxu0 %v751_v3  ;;  %v883_v12 = vor.u32 %v956_v9, %v880_v10  ;;  %v922_v13 = vld [vmem:[%s1439_s1 + $0xcc] sm:$0xf0]  ;;  %v862_v14 = vld [vmem:[%s1439_s1 + $0x1c0] sm:$0xf]  ;;  %v920_v18 = vld [vmem:[%s1439_s1 + $0xc4] sm:$0xf] }
   0x5   :  { %v954_v15 = vld [vmem:[%s1439_s1 + $0x1cc] sm:$0xf0]  ;;  %451 = vmatpush.bf16.msra.mxu1 %v879_v7  ;;  %470 = vmatpush.bf16.msra.mxu2 %v755_v8  ;;  %v735_v16 = vor.u32 %v922_v13, %v734_v11  ;;  %v736_v19 = vld [vmem:[%s1439_s1 + $0xd0] sm:$0xf0]  ;;  %v952_v20 = vld [vmem:[%s1439_s1 + $0x1c4] sm:$0xf] }
   0x6   :  { %v863_v17 = vor.u32 %v954_v15, %v862_v14  ;;  %489 = vmatpush.bf16.msra.mxu3 %v883_v12  ;;  %v739_v21 = vor.u32 %v920_v18, %v736_v19  ;;  %v864_v22 = vld [vmem:[%s1439_s1 + $0x1d0] sm:$0xf0]  ;;  %v718_v23 = vld [vmem:[%s1439_s1 + $0xa0] sm:$0xf]  ;;  %v918_v24 = vld [vmem:[%s1439_s1 + $0xac] sm:$0xf0] }
   0x7   :  { %v867_v25 = vor.u32 %v952_v20, %v864_v22  ;;  %v846_v26 = vld [vmem:[%s1439_s1 + $0x1a0] sm:$0xf]  ;;  %v950_v27 = vld [vmem:[%s1439_s1 + $0x1ac] sm:$0xf0]  ;;  %v916_v28 = vld [vmem:[%s1439_s1 + $0xa4] sm:$0xf]  ;;  %v719_v29 = vor.u32 %v918_v24, %v718_v23 }
   0x8   :  { %433 = vmatpush.bf16.msra.mxu0 %v735_v16  ;;  %v720_v30 = vld [vmem:[%s1439_s1 + $0xb0] sm:$0xf0]  ;;  %v948_v31 = vld [vmem:[%s1439_s1 + $0x1a4] sm:$0xf]  ;;  %v847_v33 = vor.u32 %v950_v27, %v846_v26  ;;  %v702_v35 = vld [vmem:[%s1439_s1 + $0x80] sm:$0xf] }
   0x9   :  { %v848_v32 = vld [vmem:[%s1439_s1 + $0x1b0] sm:$0xf0]  ;;  %452 = vmatpush.bf16.msra.mxu1 %v863_v17  ;;  %471 = vmatpush.bf16.msra.mxu2 %v739_v21  ;;  %v723_v34 = vor.u32 %v916_v28, %v720_v30  ;;  %v914_v36 = vld [vmem:[%s1439_s1 + $0x8c] sm:$0xf0]  ;;  %v830_v37 = vld [vmem:[%s1439_s1 + $0x180] sm:$0xf] }
   0xa   :  { %490 = vmatpush.bf16.msra.mxu3 %v867_v25  ;;  %v851_v38 = vor.u32 %v948_v31, %v848_v32  ;;  %v946_v39 = vld [vmem:[%s1439_s1 + $0x18c] sm:$0xf0]  ;;  %v912_v40 = vld [vmem:[%s1439_s1 + $0x84] sm:$0xf]  ;;  %v704_v41 = vld [vmem:[%s1439_s1 + $0x90] sm:$0xf0]  ;;  %v703_v44 = vor.u32 %v914_v36, %v702_v35 }
   0xb   :  { %v944_v42 = vld [vmem:[%s1439_s1 + $0x184] sm:$0xf]  ;;  %v832_v43 = vld [vmem:[%s1439_s1 + $0x190] sm:$0xf0]  ;;  %v831_v45 = vor.u32 %v946_v39, %v830_v37  ;;  %v707_v46 = vor.u32 %v912_v40, %v704_v41  ;;  %v686_v47 = vld [vmem:[%s1439_s1 + $0x60] sm:$0xf] }
   0xc   :  { %434 = vmatpush.bf16.msra.mxu0 %v719_v29  ;;  %v910_v48 = vld [vmem:[%s1439_s1 + $0x6c] sm:$0xf0]  ;;  %v814_v49 = vld [vmem:[%s1439_s1 + $0x160] sm:$0xf]  ;;  %v835_v50 = vor.u32 %v944_v42, %v832_v43  ;;  %v908_v52 = vld [vmem:[%s1439_s1 + $0x64] sm:$0xf] }
   0xd   :  { %453 = vmatpush.bf16.msra.mxu1 %v847_v33  ;;  %472 = vmatpush.bf16.msra.mxu2 %v723_v34  ;;  %v942_v51 = vld [vmem:[%s1439_s1 + $0x16c] sm:$0xf0]  ;;  %v688_v53 = vld [vmem:[%s1439_s1 + $0x70] sm:$0xf0]  ;;  %v940_v54 = vld [vmem:[%s1439_s1 + $0x164] sm:$0xf]  ;;  %v687_v56 = vor.u32 %v910_v48, %v686_v47 }
   0xe   :  { %491 = vmatpush.bf16.msra.mxu3 %v851_v38  ;;  %v816_v55 = vld [vmem:[%s1439_s1 + $0x170] sm:$0xf0]  ;;  %v815_v57 = vor.u32 %v942_v51, %v814_v49  ;;  %v691_v58 = vor.u32 %v908_v52, %v688_v53  ;;  %v670_v59 = vld [vmem:[%s1439_s1 + $0x40] sm:$0xf]  ;;  %v906_v60 = vld [vmem:[%s1439_s1 + $0x4c] sm:$0xf0] }
   0xf   :  { %v798_v61 = vld [vmem:[%s1439_s1 + $0x140] sm:$0xf]  ;;  %v819_v62 = vor.u32 %v940_v54, %v816_v55  ;;  %v938_v63 = vld [vmem:[%s1439_s1 + $0x14c] sm:$0xf0]  ;;  %v904_v0 = vld [vmem:[%s1439_s1 + $0x44] sm:$0xf]  ;;  %v671_v4 = vor.u32 %v906_v60, %v670_v59 }
  0x10   :  { %435 = vmatpush.bf16.msra.mxu0 %v703_v44  ;;  %v672_v1 = vld [vmem:[%s1439_s1 + $0x50] sm:$0xf0]  ;;  %v936_v2 = vld [vmem:[%s1439_s1 + $0x144] sm:$0xf]  ;;  %v799_v5 = vor.u32 %v938_v63, %v798_v61  ;;  %v654_v7 = vld [vmem:[%s1439_s1 + $0x20] sm:$0xf] }
  0x11   :  { %454 = vmatpush.bf16.msra.mxu1 %v831_v45  ;;  %473 = vmatpush.bf16.msra.mxu2 %v707_v46  ;;  %v800_v3 = vld [vmem:[%s1439_s1 + $0x150] sm:$0xf0]  ;;  %v675_v6 = vor.u32 %v904_v0, %v672_v1  ;;  %v902_v8 = vld [vmem:[%s1439_s1 + $0x2c] sm:$0xf0]  ;;  %v782_v9 = vld [vmem:[%s1439_s1 + $0x120] sm:$0xf] }
  0x12   :  { %492 = vmatpush.bf16.msra.mxu3 %v835_v50  ;;  %v803_v10 = vor.u32 %v936_v2, %v800_v3  ;;  %v934_v11 = vld [vmem:[%s1439_s1 + $0x12c] sm:$0xf0]  ;;  %v900_v12 = vld [vmem:[%s1439_s1 + $0x24] sm:$0xf]  ;;  %v656_v13 = vld [vmem:[%s1439_s1 + $0x30] sm:$0xf0]  ;;  %v655_v16 = vor.u32 %v902_v8, %v654_v7 }
  0x13   :  { %v932_v14 = vld [vmem:[%s1439_s1 + $0x124] sm:$0xf]  ;;  %v784_v15 = vld [vmem:[%s1439_s1 + $0x130] sm:$0xf0]  ;;  %v638_v17 = vld [vmem:[%s1439_s1] sm:$0xf]  ;;  %v783_v19 = vor.u32 %v934_v11, %v782_v9  ;;  %v659_v20 = vor.u32 %v900_v12, %v656_v13 }
  0x14   :  { %436 = vmatpush.bf16.msra.mxu0 %v687_v56  ;;  %v898_v18 = vld [vmem:[%s1439_s1 + $0xc] sm:$0xf0]  ;;  %v766_v21 = vld [vmem:[%s1439_s1 + $0x100] sm:$0xf]  ;;  %v896_v23 = vld [vmem:[%s1439_s1 + $0x4] sm:$0xf]  ;;  %v787_v24 = vor.u32 %v932_v14, %v784_v15 }
  0x15   :  { %455 = vmatpush.bf16.msra.mxu1 %v815_v57  ;;  %474 = vmatpush.bf16.msra.mxu2 %v691_v58  ;;  %v930_v22 = vld [vmem:[%s1439_s1 + $0x10c] sm:$0xf0]  ;;  %v640_v25 = vld [vmem:[%s1439_s1 + $0x10] sm:$0xf0]  ;;  %v928_v26 = vld [vmem:[%s1439_s1 + $0x104] sm:$0xf]  ;;  %v639_v31 = vor.u32 %v898_v18, %v638_v17 }
  0x16   :  { %493 = vmatpush.bf16.msra.mxu3 %v819_v62  ;;  %v768_v27 = vld [vmem:[%s1439_s1 + $0x110] sm:$0xf0]  ;;  %v622_v28 = vld [vmem:[%s1440_s0] sm:$0xf]  ;;  %v925_v29 = vld [vmem:[%s1439_s1 + $0xec] sm:$0xf]  ;;  %v767_v35 = vor.u32 %v930_v22, %v766_v21  ;;  %v643_v36 = vor.u32 %v896_v23, %v640_v25 }
  0x17   :  { %v760_v30 = vld [vmem:[%s1439_s1 + $0xf8] sm:$0xf0]  ;;  %v893_v32 = vld [vmem:[%s1440_s0 + $0x4] sm:$0xf0]  ;;  %v959_v34 = vld [vmem:[%s1439_s1 + $0x1f4] sm:$0xf0]  ;;  %v771_v39 = vor.u32 %v928_v26, %v768_v27 }
  0x18   :  { %437 = vmatpush.bf16.msra.mxu0 %v671_v4  ;;  %v886_v33 = vld [vmem:[%s1439_s1 + $0x1e8] sm:$0xf]  ;;  %v892_v37 = vld [vmem:[%s1440_s0 + $0x4] sm:$0xf]  ;;  %v624_v38 = vld [vmem:[%s1440_s0 + $0x8] sm:$0xf0]  ;;  %v763_v40 = vor.u32 %v925_v29, %v760_v30  ;;  %v1205_v44 = vor.u32 %v893_v32, %v622_v28 }
  0x19   :  { %456 = vmatpush.bf16.msra.mxu1 %v799_v5  ;;  %475 = vmatpush.bf16.msra.mxu2 %v675_v6  ;;  %v758_v41 = vld [vmem:[%s1439_s1 + $0xe8] sm:$0xf]  ;;  %v927_v42 = vld [vmem:[%s1439_s1 + $0xf4] sm:$0xf0]  ;;  %v957_v43 = vld [vmem:[%s1439_s1 + $0x1ec] sm:$0xf]  ;;  %v887_v45 = vor.u32 %v959_v34, %v886_v33  ;;  %v1216_v49 = vor.u32 %v892_v37, %v624_v38 }
  0x1a   :  { %494 = vmatpush.bf16.msra.mxu3 %v803_v10  ;;  %v888_v46 = vld [vmem:[%s1439_s1 + $0x1f8] sm:$0xf0]  ;;  %v921_v47 = vld [vmem:[%s1439_s1 + $0xcc] sm:$0xf]  ;;  %v870_v50 = vld [vmem:[%s1439_s1 + $0x1c8] sm:$0xf]  ;;  %v759_v52 = vor.u32 %v927_v42, %v758_v41 }
  0x1b   :  { %v744_v48 = vld [vmem:[%s1439_s1 + $0xd8] sm:$0xf0]  ;;  %v955_v51 = vld [vmem:[%s1439_s1 + $0x1d4] sm:$0xf0]  ;;  %v891_v53 = vor.u32 %v957_v43, %v888_v46  ;;  %v742_v55 = vld [vmem:[%s1439_s1 + $0xc8] sm:$0xf] }
  0x1c   :  { %438 = vmatpush.bf16.msra.mxu0 %v655_v16  ;;  %v747_v54 = vor.u32 %v921_v47, %v744_v48  ;;  %v923_v56 = vld [vmem:[%s1439_s1 + $0xd4] sm:$0xf0]  ;;  %v953_v57 = vld [vmem:[%s1439_s1 + $0x1cc] sm:$0xf]  ;;  %v871_v58 = vor.u32 %v955_v51, %v870_v50  ;;  %v872_v59 = vld [vmem:[%s1439_s1 + $0x1d8] sm:$0xf0] }
  0x1d   :  { %457 = vmatpush.bf16.msra.mxu1 %v783_v19  ;;  %476 = vmatpush.bf16.msra.mxu2 %v659_v20  ;;  %v917_v60 = vld [vmem:[%s1439_s1 + $0xac] sm:$0xf]  ;;  %v728_v61 = vld [vmem:[%s1439_s1 + $0xb8] sm:$0xf0]  ;;  %v854_v62 = vld [vmem:[%s1439_s1 + $0x1a8] sm:$0xf]  ;;  %v743_v0 = vor.u32 %v923_v56, %v742_v55  ;;  %v875_v1 = vor.u32 %v953_v57, %v872_v59 }
  0x1e   :  { %495 = vmatpush.bf16.msra.mxu3 %v787_v24  ;;  %v951_v63 = vld [vmem:[%s1439_s1 + $0x1b4] sm:$0xf0]  ;;  %v731_v2 = vor.u32 %v917_v60, %v728_v61  ;;  %v726_v3 = vld [vmem:[%s1439_s1 + $0xa8] sm:$0xf]  ;;  %v949_v5 = vld [vmem:[%s1439_s1 + $0x1ac] sm:$0xf] }
  0x1f   :  { %v919_v4 = vld [vmem:[%s1439_s1 + $0xb4] sm:$0xf0]  ;;  %v855_v6 = vor.u32 %v951_v63, %v854_v62  ;;  %v856_v7 = vld [vmem:[%s1439_s1 + $0x1b8] sm:$0xf0]  ;;  %v913_v8 = vld [vmem:[%s1439_s1 + $0x8c] sm:$0xf] }
  0x20   :  { %439 = vmatpush.bf16.msra.mxu0 %v639_v31  ;;  %v712_v9 = vld [vmem:[%s1439_s1 + $0x98] sm:$0xf0]  ;;  %v838_v10 = vld [vmem:[%s1439_s1 + $0x188] sm:$0xf]  ;;  %v947_v11 = vld [vmem:[%s1439_s1 + $0x194] sm:$0xf0]  ;;  %v727_v12 = vor.u32 %v919_v4, %v726_v3  ;;  %v859_v14 = vor.u32 %v949_v5, %v856_v7 }
  0x21   :  { %458 = vmatpush.bf16.msra.mxu1 %v767_v35  ;;  %477 = vmatpush.bf16.msra.mxu2 %v643_v36  ;;  %v710_v13 = vld [vmem:[%s1439_s1 + $0x88] sm:$0xf]  ;;  %v715_v15 = vor.u32 %v913_v8, %v712_v9  ;;  %v915_v16 = vld [vmem:[%s1439_s1 + $0x94] sm:$0xf0]  ;;  %v945_v17 = vld [vmem:[%s1439_s1 + $0x18c] sm:$0xf]  ;;  %v839_v19 = vor.u32 %v947_v11, %v838_v10 }
  0x22   :  { %496 = vmatpush.bf16.msra.mxu3 %v771_v39  ;;  %v840_v18 = vld [vmem:[%s1439_s1 + $0x198] sm:$0xf0]  ;;  %v630_v20 = vld [vmem:[%s1440_s0 + $0x10] sm:$0xf]  ;;  %v909_v21 = vld [vmem:[%s1439_s1 + $0x6c] sm:$0xf]  ;;  %v711_v26 = vor.u32 %v915_v16, %v710_v13 }
  0x23   :  { %440 = vmatmul.bf16.vlgmr.msra.gmra.mxu0 %v1205_v44  ;;  %v696_v22 = vld [vmem:[%s1439_s1 + $0x78] sm:$0xf0]  ;;  %v895_v23 = vld [vmem:[%s1440_s0 + $0x14] sm:$0xf0]  ;;  %v822_v24 = vld [vmem:[%s1439_s1 + $0x168] sm:$0xf]  ;;  %v843_v29 = vor.u32 %v945_v17, %v840_v18 }
  0x24   :  { %459 = vmatmul.bf16.vlgmr.msra.gmra.mxu1 %v1216_v49  ;;  %478 = vmatmul.bf16.vlgmr.msra.gmra.mxu2 %v1205_v44  ;;  %v943_v25 = vld [vmem:[%s1439_s1 + $0x174] sm:$0xf0]  ;;  %v894_v27 = vld [vmem:[%s1440_s0 + $0x14] sm:$0xf]  ;;  %v632_v28 = vld [vmem:[%s1440_s0 + $0x18] sm:$0xf0]  ;;  %v699_v30 = vor.u32 %v909_v21, %v696_v22  ;;  %v1321_v34 = vor.u32 %v895_v23, %v630_v20 }
  0x25   :  { %546 = vmatpush.bf16.msrb.mxu2 %v763_v40  ;;  %527 = vmatpush.bf16.msrb.mxu1 %v887_v45  ;;  %v694_v31 = vld [vmem:[%s1439_s1 + $0x68] sm:$0xf]  ;;  %v911_v32 = vld [vmem:[%s1439_s1 + $0x74] sm:$0xf0]  ;;  %v941_v33 = vld [vmem:[%s1439_s1 + $0x16c] sm:$0xf]  ;;  %v823_v35 = vor.u32 %v943_v25, %v822_v24  ;;  %v1332_v39 = vor.u32 %v894_v27, %v632_v28 }
  0x26   :  { %497 = vmatmul.bf16.vlgmr.msra.gmra.mxu3 %v1216_v49  ;;  %508 = vmatpush.bf16.msrb.mxu0 %v759_v52  ;;  %v824_v36 = vld [vmem:[%s1439_s1 + $0x178] sm:$0xf0]  ;;  %v905_v37 = vld [vmem:[%s1439_s1 + $0x4c] sm:$0xf]  ;;  %v806_v40 = vld [vmem:[%s1439_s1 + $0x148] sm:$0xf]  ;;  %v695_v42 = vor.u32 %v911_v32, %v694_v31 }
  0x27   :  { %565 = vmatpush.bf16.msrb.mxu3 %v891_v53  ;;  %v680_v38 = vld [vmem:[%s1439_s1 + $0x58] sm:$0xf0]  ;;  %v939_v41 = vld [vmem:[%s1439_s1 + $0x154] sm:$0xf0]  ;;  %v827_v43 = vor.u32 %v941_v33, %v824_v36  ;;  %v678_v46 = vld [vmem:[%s1439_s1 + $0x48] sm:$0xf] }
  0x28   :  { %v683_v45 = vor.u32 %v905_v37, %v680_v38  ;;  %v907_v47 = vld [vmem:[%s1439_s1 + $0x54] sm:$0xf0]  ;;  %v937_v48 = vld [vmem:[%s1439_s1 + $0x14c] sm:$0xf]  ;;  %v807_v50 = vor.u32 %v939_v41, %v806_v40  ;;  %v808_v51 = vld [vmem:[%s1439_s1 + $0x158] sm:$0xf0] }
  0x29   :  { %547 = vmatpush.bf16.msrb.mxu2 %v747_v54  ;;  %528 = vmatpush.bf16.msrb.mxu1 %v871_v58  ;;  %v901_v52 = vld [vmem:[%s1439_s1 + $0x2c] sm:$0xf]  ;;  %v664_v53 = vld [vmem:[%s1439_s1 + $0x38] sm:$0xf0]  ;;  %v790_v54 = vld [vmem:[%s1439_s1 + $0x128] sm:$0xf]  ;;  %v679_v56 = vor.u32 %v907_v47, %v678_v46  ;;  %v811_v57 = vor.u32 %v937_v48, %v808_v51 }
  0x2a   :  { %509 = vmatpush.bf16.msrb.mxu0 %v743_v0  ;;  %v935_v55 = vld [vmem:[%s1439_s1 + $0x134] sm:$0xf0]  ;;  %v667_v58 = vor.u32 %v901_v52, %v664_v53  ;;  %v662_v59 = vld [vmem:[%s1439_s1 + $0x28] sm:$0xf]  ;;  %v933_v61 = vld [vmem:[%s1439_s1 + $0x12c] sm:$0xf] }
  0x2b   :  { %566 = vmatpush.bf16.msrb.mxu3 %v875_v1  ;;  %v903_v60 = vld [vmem:[%s1439_s1 + $0x34] sm:$0xf0]  ;;  %v791_v62 = vor.u32 %v935_v55, %v790_v54  ;;  %v792_v63 = vld [vmem:[%s1439_s1 + $0x138] sm:$0xf0]  ;;  %v897_v0 = vld [vmem:[%s1439_s1 + $0xc] sm:$0xf] }
  0x2c   :  { %v648_v1 = vld [vmem:[%s1439_s1 + $0x18] sm:$0xf0]  ;;  %v931_v3 = vld [vmem:[%s1439_s1 + $0x114] sm:$0xf0]  ;;  %v663_v4 = vor.u32 %v903_v60, %v662_v59  ;;  %v795_v5 = vor.u32 %v933_v61, %v792_v63  ;;  %v646_v7 = vld [vmem:[%s1439_s1 + $0x8] sm:$0xf] }
  0x2d   :  { %548 = vmatpush.bf16.msrb.mxu2 %v731_v2  ;;  %529 = vmatpush.bf16.msrb.mxu1 %v855_v6  ;;  %v774_v2 = vld [vmem:[%s1439_s1 + $0x108] sm:$0xf]  ;;  %v651_v6 = vor.u32 %v897_v0, %v648_v1  ;;  %v899_v8 = vld [vmem:[%s1439_s1 + $0x14] sm:$0xf0]  ;;  %v929_v10 = vld [vmem:[%s1439_s1 + $0x10c] sm:$0xf] }
  0x2e   :  { %510 = vmatpush.bf16.msrb.mxu0 %v727_v12  ;;  %v775_v9 = vor.u32 %v931_v3, %v774_v2  ;;  %v776_v11 = vld [vmem:[%s1439_s1 + $0x118] sm:$0xf0]  ;;  %v647_v12 = vor.u32 %v899_v8, %v646_v7 }
  0x2f   :  { %567 = vmatpush.bf16.msrb.mxu3 %v859_v14  ;;  %v779_v13 = vor.u32 %v929_v10, %v776_v11  ;;  %v82_v14 = vld [vmem:[%s1441_s2] sm:$0xf] }
  0x30   :  { %v86_v54 = vperm.slane %v82_v14, 2  ;;  %v87_v0 = vperm.slane %v82_v14, 3 }
  0x31   :  { %549 = vmatpush.bf16.msrb.mxu2 %v715_v15  ;;  %530 = vmatpush.bf16.msrb.mxu1 %v839_v19  ;;  %v84_v15 = vperm.slane %v82_v14, 0  ;;  %v85_v19 = vperm.slane %v82_v14, 1 }
  0x32   :  { %511 = vmatpush.bf16.msrb.mxu0 %v711_v26 }
  0x33   :  { %568 = vmatpush.bf16.msrb.mxu3 %v843_v29  ;;  %445 = vmatmul.bf16.gmra.mxu0 %v1321_v34 }
  0x34   :  { %464 = vmatmul.bf16.gmra.mxu1 %v1332_v39  ;;  %483 = vmatmul.bf16.gmra.mxu2 %v1321_v34 }
  0x35   :  { %550 = vmatpush.bf16.msrb.mxu2 %v699_v30  ;;  %531 = vmatpush.bf16.msrb.mxu1 %v823_v35 }
  0x36   :  { %502 = vmatmul.bf16.gmra.mxu3 %v1332_v39  ;;  %512 = vmatpush.bf16.msrb.mxu0 %v695_v42 }
  0x37   :  { %569 = vmatpush.bf16.msrb.mxu3 %v827_v43 }
  0x39   :  { %551 = vmatpush.bf16.msrb.mxu2 %v683_v45  ;;  %532 = vmatpush.bf16.msrb.mxu1 %v807_v50 }
  0x3a   :  { %513 = vmatpush.bf16.msrb.mxu0 %v679_v56 }
  0x3b   :  { %570 = vmatpush.bf16.msrb.mxu3 %v811_v57 }
  0x3d   :  { %552 = vmatpush.bf16.msrb.mxu2 %v667_v58  ;;  %533 = vmatpush.bf16.msrb.mxu1 %v791_v62 }
  0x3e   :  { %514 = vmatpush.bf16.msrb.mxu0 %v663_v4 }
  0x3f   :  { %571 = vmatpush.bf16.msrb.mxu3 %v795_v5 }
  0x41   :  { %553 = vmatpush.bf16.msrb.mxu2 %v651_v6  ;;  %534 = vmatpush.bf16.msrb.mxu1 %v775_v9 }
  0x42   :  { %515 = vmatpush.bf16.msrb.mxu0 %v647_v12 }
  0x43   :  { %572 = vmatpush.bf16.msrb.mxu3 %v779_v13 }
  0x44   :  { %535 = vmatmul.bf16.vlgmr.msrb.gmra.mxu1 %v1216_v49  ;;  %554 = vmatmul.bf16.vlgmr.msrb.gmra.mxu2 %v1205_v44 }
  0x45   :  { %516 = vmatmul.bf16.vlgmr.msrb.gmra.mxu0 %v1205_v44 }
  0x46   :  { %573 = vmatmul.bf16.vlgmr.msrb.gmra.mxu3 %v1216_v49 }
  0x54   :  { %540 = vmatmul.bf16.gmra.mxu1 %v1332_v39  ;;  %559 = vmatmul.bf16.gmra.mxu2 %v1321_v34 }
  0x55   :  { %521 = vmatmul.bf16.gmra.mxu0 %v1321_v34 }
  0x56   :  { %578 = vmatmul.bf16.gmra.mxu3 %v1332_v39 }
  0xa0   :  { %v441_v16 = vpop.f32.mrf.mxu0 }
  0xa1   :  { %v460_v17 = vpop.f32.mrf.mxu1  ;;  %v442_v18 = vadd.f32 %v441_v16, %v84_v15 }
  0xa3   :  { %v461_v44 = vadd.f32 %v460_v17, %v442_v18 }
  0xa5   :  { %v584_v24 = vmax.f32 %v461_v44, 0.0 }
  0xa7   :  { %v479_v20 = vpop.f32.mrf.mxu2 }
  0xa8   :  { %v480_v49 = vadd.f32 %v479_v20, %v85_v19  ;;  %v443_v22 = vpop.f32.mrf.mxu0 }
  0xa9   :  { %v498_v21 = vpop.f32.mrf.mxu3  ;;  %v462_v23 = vpop.f32.mrf.mxu1  ;;  %v444_v27 = vadd.f32 %v443_v22, %v84_v15 }
  0xaa   :  { %v499_v25 = vadd.f32 %v498_v21, %v480_v49 }
  0xab   :  { %v463_v30 = vadd.f32 %v462_v23, %v444_v27 }
  0xac   :  { %v585_v26 = vmax.f32 %v499_v25, 0.0 }
  0xad   :  { %v588_v37 = vmax.f32 %v463_v30, 0.0 }
  0xae   :  { %v600_v28 = vpack.c.bf16 %v585_v26, %v584_v24 }
  0xaf   :  { %v481_v29 = vpop.f32.mrf.mxu2 }
  0xb0   :  { %608 = vst [vmem:[%s1442_s3] sm:$0xff] %v600_v28  ;;  %v482_v31 = vadd.f32 %v481_v29, %v85_v19  ;;  %v446_v33 = vpop.f32.mrf.mxu0 }
  0xb1   :  { %v500_v32 = vpop.f32.mrf.mxu3  ;;  %v465_v34 = vpop.f32.mrf.mxu1  ;;  %v447_v36 = vadd.f32 %v446_v33, %v84_v15 }
  0xb2   :  { %v501_v35 = vadd.f32 %v500_v32, %v482_v31 }
  0xb3   :  { %v466_v40 = vadd.f32 %v465_v34, %v447_v36 }
  0xb4   :  { %v589_v38 = vmax.f32 %v501_v35, 0.0 }
  0xb5   :  { %v592_v47 = vmax.f32 %v466_v40, 0.0 }
  0xb6   :  { %v602_v39 = vpack.c.bf16 %v589_v38, %v588_v37 }
  0xb7   :  { %v484_v41 = vpop.f32.mrf.mxu2 }
  0xb8   :  { %610 = vst [vmem:[%s1442_s3 + $0x10] sm:$0xff] %v602_v39  ;;  %v485_v42 = vadd.f32 %v484_v41, %v85_v19  ;;  %v448_v45 = vpop.f32.mrf.mxu0 }
  0xb9   :  { %v503_v43 = vpop.f32.mrf.mxu3  ;;  %v467_v46 = vpop.f32.mrf.mxu1  ;;  %v449_v51 = vadd.f32 %v448_v45, %v84_v15 }
  0xba   :  { %v504_v48 = vadd.f32 %v503_v43, %v485_v42 }
  0xbb   :  { %v468_v55 = vadd.f32 %v467_v46, %v449_v51 }
  0xbc   :  { %v593_v50 = vmax.f32 %v504_v48, 0.0 }
  0xbd   :  { %v596_v62 = vmax.f32 %v468_v55, 0.0 }
  0xbe   :  { %v604_v52 = vpack.c.bf16 %v593_v50, %v592_v47 }
  0xbf   :  { %v486_v53 = vpop.f32.mrf.mxu2 }
  0xc0   :  { %612 = vst [vmem:[%s1442_s3 + $0x20] sm:$0xff] %v604_v52  ;;  %v487_v56 = vadd.f32 %v486_v53, %v85_v19 }
  0xc1   :  { %v505_v57 = vpop.f32.mrf.mxu3  ;;  %v536_v60 = vpop.f32.mrf.mxu1 }
  0xc2   :  { %v517_v58 = vpop.f32.mrf.mxu0  ;;  %v506_v59 = vadd.f32 %v505_v57, %v487_v56 }
  0xc3   :  { %v518_v61 = vadd.f32 %v517_v58, %v86_v54 }
  0xc4   :  { %v597_v63 = vmax.f32 %v506_v59, 0.0 }
  0xc5   :  { %v537_v2 = vadd.f32 %v536_v60, %v518_v61 }
  0xc6   :  { %v606_v1 = vpack.c.bf16 %v597_v63, %v596_v62 }
  0xc7   :  { %v555_v3 = vpop.f32.mrf.mxu2  ;;  %v586_v7 = vmax.f32 %v537_v2, 0.0 }
  0xc8   :  { %614 = vst [vmem:[%s1442_s3 + $0x30] sm:$0xff] %v606_v1  ;;  %v556_v5 = vadd.f32 %v555_v3, %v87_v0 }
  0xc9   :  { %v574_v4 = vpop.f32.mrf.mxu3  ;;  %v538_v9 = vpop.f32.mrf.mxu1 }
  0xca   :  { %v519_v6 = vpop.f32.mrf.mxu0  ;;  %v575_v8 = vadd.f32 %v574_v4, %v556_v5 }
  0xcb   :  { %v520_v11 = vadd.f32 %v519_v6, %v86_v54 }
  0xcc   :  { %v587_v10 = vmax.f32 %v575_v8, 0.0 }
  0xcd   :  { %v539_v14 = vadd.f32 %v538_v9, %v520_v11 }
  0xce   :  { %v601_v12 = vpack.c.bf16 %v587_v10, %v586_v7 }
  0xcf   :  { %v557_v13 = vpop.f32.mrf.mxu2  ;;  %v590_v44 = vmax.f32 %v539_v14, 0.0 }
  0xd0   :  { %609 = vst [vmem:[%s1442_s3 + $0x8] sm:$0xff] %v601_v12  ;;  %v558_v16 = vadd.f32 %v557_v13, %v87_v0 }
  0xd1   :  { %v576_v15 = vpop.f32.mrf.mxu3  ;;  %v541_v49 = vpop.f32.mrf.mxu1 }
  0xd2   :  { %v522_v17 = vpop.f32.mrf.mxu0  ;;  %v577_v18 = vadd.f32 %v576_v15, %v558_v16 }
  0xd3   :  { %v523_v19 = vadd.f32 %v522_v17, %v86_v54 }
  0xd4   :  { %v591_v20 = vmax.f32 %v577_v18, 0.0 }
  0xd5   :  { %v542_v22 = vadd.f32 %v541_v49, %v523_v19 }
  0xd6   :  { %v603_v21 = vpack.c.bf16 %v591_v20, %v590_v44 }
  0xd7   :  { %v560_v23 = vpop.f32.mrf.mxu2  ;;  %v594_v27 = vmax.f32 %v542_v22, 0.0 }
  0xd8   :  { %611 = vst [vmem:[%s1442_s3 + $0x18] sm:$0xff] %v603_v21  ;;  %v561_v25 = vadd.f32 %v560_v23, %v87_v0 }
  0xd9   :  { %v579_v24 = vpop.f32.mrf.mxu3  ;;  %v543_v32 = vpop.f32.mrf.mxu1 }
  0xda   :  { %v524_v26 = vpop.f32.mrf.mxu0  ;;  %v580_v28 = vadd.f32 %v579_v24, %v561_v25 }
  0xdb   :  { %v525_v30 = vadd.f32 %v524_v26, %v86_v54 }
  0xdc   :  { %v595_v29 = vmax.f32 %v580_v28, 0.0 }
  0xdd   :  { %v544_v34 = vadd.f32 %v543_v32, %v525_v30 }
  0xde   :  { %v605_v31 = vpack.c.bf16 %v595_v29, %v594_v27 }
  0xdf   :  { %v562_v33 = vpop.f32.mrf.mxu2  ;;  %v598_v38 = vmax.f32 %v544_v34, 0.0 }
  0xe0   :  { %613 = vst [vmem:[%s1442_s3 + $0x28] sm:$0xff] %v605_v31  ;;  %v563_v35 = vadd.f32 %v562_v33, %v87_v0 }
  0xe1   :  { %v581_v36 = vpop.f32.mrf.mxu3 }
  0xe2   :  { %v582_v37 = vadd.f32 %v581_v36, %v563_v35 }
  0xe4   :  { %v599_v39 = vmax.f32 %v582_v37, 0.0 }
  0xe6   :  { %v607_v40 = vpack.c.bf16 %v599_v39, %v598_v38 }
  0xe8   :  { %615 = vst [vmem:[%s1442_s3 + $0x38] sm:$0xff] %v607_v40 }

// kernel: tile.19
= control target key start
LH: loop header
LB: loop body
LE: loop exit
PB: predicated region body
PF: predicated region fallthrough
CT: control target
= control target key end

     0   :  { %s6_s8 = smov 3  ;;  %vm8_vm0 = vcmask 523264   ;;  %s31_s9 = smov 64   ;;  %vm15_vm1 = vcmask 1048064   ;;  %s51_s0 = inlined_call_operand.vmem [shape: f32[4,64], index: 0, kind: input, shape index: {}]   ;;  %s52_s1 = inlined_call_operand.vmem [shape: f32[1,256], index: 1, kind: output, shape index: {}]  }
   0x1   :  { %v4_v0 = vld [vmem:[%s51_s0] sm:$0xf]  ;;  %s11_s0 = smov 3 }
   0x2   :  { %5 = vst [vmem:[#allocation1] sm:$0xf] %v4_v0 }
   0x9   :  { %v12_v1 = vld [vmem:[#allocation1 + $0x1] ss:$2 sm:%s11_s0]   ;;  %v7_v2 = vld [vmem:[#allocation1] ss:$2 sm:%s6_s8]  }
   0xa   :  { %13 = vrot.lane.b32.xlu0 %v12_v1, %s31_s9  ;;  %9 = vst.msk [vmem:[#allocation0] ss:$8 sm:$0x3] %vm8_vm0, %v7_v2  }
  0x7c   :  { %v14_v3 = vpop.permute.xlu0 %13  }
  0x7d   :  { %16 = vst.msk [vmem:[#allocation0] ss:$8 sm:$0x3] %vm15_vm1, %v14_v3  }
  0x84   :  { %v19_v4 = vld [vmem:[#allocation0] sm:$0x1]  ;;  %v24_v5 = vld [vmem:[#allocation0 + $0x8] sm:$0x1] }
  0x85   :  { %22 = vst [vmem:[%s52_s1] sm:$0x1] %v19_v4 }
  0x86   :  { %29 = vst [vmem:[%s52_s1 + $0x1] sm:$0x1] %v24_v5 }

// kernel: fully_cnet_forward.8
= control target key start
LH: loop header
LB: loop body
LE: loop exit
PB: predicated region body
PF: predicated region fallthrough
CT: control target
= control target key end

     0   :  { %s6599_s1 = inlined_call_operand.vmem [shape: bf16[1152,256], index: 1, kind: input, shape index: {}]   ;;  %s6600_s0 = inlined_call_operand.vmem [shape: bf16[4,32,1152], index: 0, kind: input, shape index: {}]   ;;  %s6601_s2 = inlined_call_operand.vmem [shape: f32[1,256], index: 2, kind: input, shape index: {}]   ;;  %s6602_s3 = inlined_call_operand.vmem [shape: bf16[32,256], index: 3, kind: output, shape index: {}]  }
   0x1   :  { %v2901_v0 = vld [vmem:[%s6599_s1 + $0x70] sm:$0xf]  ;;  %v3710_v1 = vld [vmem:[%s6599_s1 + $0x74] sm:$0xf0]  ;;  %v2893_v11 = vld [vmem:[%s6599_s1 + $0x60] sm:$0xf] }
   0x2   :  { %v2965_v2 = vld [vmem:[%s6599_s1 + $0xf0] sm:$0xf]  ;;  %v3940_v3 = vor.u32 %v3710_v1, %v2901_v0  ;;  %v3726_v4 = vld [vmem:[%s6599_s1 + $0xf4] sm:$0xf0]  ;;  %v3708_v13 = vld [vmem:[%s6599_s1 + $0x64] sm:$0xf0] }
   0x3   :  { %v3029_v5 = vld [vmem:[%s6599_s1 + $0x170] sm:$0xf]  ;;  %v3742_v6 = vld [vmem:[%s6599_s1 + $0x174] sm:$0xf0]  ;;  %v3951_v7 = vor.u32 %v3726_v4, %v2965_v2  ;;  %v2957_v14 = vld [vmem:[%s6599_s1 + $0xe0] sm:$0xf]  ;;  %v3978_v16 = vor.u32 %v3708_v13, %v2893_v11 }
   0x4   :  { %6916 = vst [vmem:[#allocation2_spill] sm:$0xff] %v3940_v3  ;;  %v3953_v8 = vor.u32 %v3742_v6, %v3029_v5  ;;  %v3093_v9 = vld [vmem:[%s6599_s1 + $0x1f0] sm:$0xf]  ;;  %v3758_v10 = vld [vmem:[%s6599_s1 + $0x1f4] sm:$0xf0]  ;;  %996 = vmatpush.bf16.msra.mxu0 %v3940_v3 }
   0x5   :  { %6917 = vst [vmem:[#allocation3_spill] sm:$0xff] %v3951_v7  ;;  %v3965_v12 = vor.u32 %v3758_v10, %v3093_v9  ;;  %v3724_v15 = vld [vmem:[%s6599_s1 + $0xe4] sm:$0xf0]  ;;  %1015 = vmatpush.bf16.msra.mxu1 %v3951_v7  ;;  %v3021_v18 = vld [vmem:[%s6599_s1 + $0x160] sm:$0xf] }
   0x6   :  { %6918 = vst [vmem:[#allocation4_spill] sm:$0xff] %v3953_v8  ;;  %1034 = vmatpush.bf16.msra.mxu2 %v3953_v8  ;;  %v3980_v17 = vor.u32 %v3724_v15, %v2957_v14  ;;  %v3740_v19 = vld [vmem:[%s6599_s1 + $0x164] sm:$0xf0]  ;;  %v3085_v20 = vld [vmem:[%s6599_s1 + $0x1e0] sm:$0xf] }
   0x7   :  { %6919 = vst [vmem:[#allocation5_spill] sm:$0xff] %v3965_v12  ;;  %1053 = vmatpush.bf16.msra.mxu3 %v3965_v12  ;;  %v3992_v21 = vor.u32 %v3740_v19, %v3021_v18  ;;  %v3756_v22 = vld [vmem:[%s6599_s1 + $0x1e4] sm:$0xf0]  ;;  %v2885_v23 = vld [vmem:[%s6599_s1 + $0x50] sm:$0xf] }
   0x8   :  { %6920 = vst [vmem:[#allocation6_spill] sm:$0xff] %v3978_v16  ;;  %v3706_v24 = vld [vmem:[%s6599_s1 + $0x54] sm:$0xf0]  ;;  %v4003_v25 = vor.u32 %v3756_v22, %v3085_v20  ;;  %v2949_v26 = vld [vmem:[%s6599_s1 + $0xd0] sm:$0xf]  ;;  %997 = vmatpush.bf16.msra.mxu0 %v3978_v16 }
   0x9   :  { %6921 = vst [vmem:[#allocation7_spill] sm:$0xff] %v3980_v17  ;;  %v3722_v27 = vld [vmem:[%s6599_s1 + $0xd4] sm:$0xf0]  ;;  %v3013_v28 = vld [vmem:[%s6599_s1 + $0x150] sm:$0xf]  ;;  %v4015_v29 = vor.u32 %v3706_v24, %v2885_v23  ;;  %1016 = vmatpush.bf16.msra.mxu1 %v3980_v17 }
   0xa   :  { %6922 = vst [vmem:[#allocation8_spill] sm:$0xff] %v3992_v21  ;;  %v3738_v30 = vld [vmem:[%s6599_s1 + $0x154] sm:$0xf0]  ;;  %v3077_v31 = vld [vmem:[%s6599_s1 + $0x1d0] sm:$0xf]  ;;  %1035 = vmatpush.bf16.msra.mxu2 %v3992_v21  ;;  %v4028_v33 = vor.u32 %v3722_v27, %v2949_v26 }
   0xb   :  { %6923 = vst [vmem:[#allocation9_spill] sm:$0xff] %v4003_v25  ;;  %v3754_v32 = vld [vmem:[%s6599_s1 + $0x1d4] sm:$0xf0]  ;;  %v4030_v34 = vor.u32 %v3738_v30, %v3013_v28  ;;  %v2877_v35 = vld [vmem:[%s6599_s1 + $0x40] sm:$0xf]  ;;  %1054 = vmatpush.bf16.msra.mxu3 %v4003_v25 }
   0xc   :  { %6924 = vst [vmem:[#allocation10_spill] sm:$0xff] %v4015_v29  ;;  %v3704_v36 = vld [vmem:[%s6599_s1 + $0x44] sm:$0xf0]  ;;  %v2941_v37 = vld [vmem:[%s6599_s1 + $0xc0] sm:$0xf]  ;;  %v4042_v38 = vor.u32 %v3754_v32, %v3077_v31  ;;  %998 = vmatpush.bf16.msra.mxu0 %v4015_v29 }
   0xd   :  { %6925 = vst [vmem:[#allocation11_spill] sm:$0xff] %v4028_v33  ;;  %v3720_v39 = vld [vmem:[%s6599_s1 + $0xc4] sm:$0xf0]  ;;  %v3005_v40 = vld [vmem:[%s6599_s1 + $0x140] sm:$0xf]  ;;  %v4060_v44 = vor.u32 %v3704_v36, %v2877_v35  ;;  %1017 = vmatpush.bf16.msra.mxu1 %v4028_v33 }
   0xe   :  { %6926 = vst [vmem:[#allocation12_spill] sm:$0xff] %v4030_v34  ;;  %v3736_v41 = vld [vmem:[%s6599_s1 + $0x144] sm:$0xf0]  ;;  %v3069_v42 = vld [vmem:[%s6599_s1 + $0x1c0] sm:$0xf]  ;;  %1036 = vmatpush.bf16.msra.mxu2 %v4030_v34  ;;  %v4064_v45 = vor.u32 %v3720_v39, %v2941_v37 }
   0xf   :  { %6927 = vst [vmem:[#allocation13_spill] sm:$0xff] %v4042_v38  ;;  %v3752_v43 = vld [vmem:[%s6599_s1 + $0x1c4] sm:$0xf0]  ;;  %v4066_v46 = vor.u32 %v3736_v41, %v3005_v40  ;;  %v2869_v47 = vld [vmem:[%s6599_s1 + $0x30] sm:$0xf]  ;;  %1055 = vmatpush.bf16.msra.mxu3 %v4042_v38 }
  0x10   :  { %6928 = vst [vmem:[#allocation14_spill] sm:$0xff] %v4060_v44  ;;  %v3702_v48 = vld [vmem:[%s6599_s1 + $0x34] sm:$0xf0]  ;;  %v2933_v49 = vld [vmem:[%s6599_s1 + $0xb0] sm:$0xf]  ;;  %v4078_v50 = vor.u32 %v3752_v43, %v3069_v42  ;;  %999 = vmatpush.bf16.msra.mxu0 %v4060_v44 }
  0x11   :  { %6929 = vst [vmem:[#allocation15_spill] sm:$0xff] %v4064_v45  ;;  %v3718_v51 = vld [vmem:[%s6599_s1 + $0xb4] sm:$0xf0]  ;;  %v2997_v52 = vld [vmem:[%s6599_s1 + $0x130] sm:$0xf]  ;;  %v4096_v56 = vor.u32 %v3702_v48, %v2869_v47  ;;  %1018 = vmatpush.bf16.msra.mxu1 %v4064_v45 }
  0x12   :  { %6930 = vst [vmem:[#allocation16_spill] sm:$0xff] %v4066_v46  ;;  %v3734_v53 = vld [vmem:[%s6599_s1 + $0x134] sm:$0xf0]  ;;  %v3061_v54 = vld [vmem:[%s6599_s1 + $0x1b0] sm:$0xf]  ;;  %1037 = vmatpush.bf16.msra.mxu2 %v4066_v46  ;;  %v4100_v57 = vor.u32 %v3718_v51, %v2933_v49 }
  0x13   :  { %6931 = vst [vmem:[#allocation17_spill] sm:$0xff] %v4078_v50  ;;  %v3750_v55 = vld [vmem:[%s6599_s1 + $0x1b4] sm:$0xf0]  ;;  %v4102_v58 = vor.u32 %v3734_v53, %v2997_v52  ;;  %v2861_v59 = vld [vmem:[%s6599_s1 + $0x20] sm:$0xf]  ;;  %1056 = vmatpush.bf16.msra.mxu3 %v4078_v50 }
  0x14   :  { %6932 = vst [vmem:[#allocation18_spill] sm:$0xff] %v4096_v56  ;;  %v3700_v60 = vld [vmem:[%s6599_s1 + $0x24] sm:$0xf0]  ;;  %v2925_v61 = vld [vmem:[%s6599_s1 + $0xa0] sm:$0xf]  ;;  %v4114_v62 = vor.u32 %v3750_v55, %v3061_v54  ;;  %1000 = vmatpush.bf16.msra.mxu0 %v4096_v56 }
  0x15   :  { %6933 = vst [vmem:[#allocation19_spill] sm:$0xff] %v4100_v57  ;;  %v3716_v63 = vld [vmem:[%s6599_s1 + $0xa4] sm:$0xf0]  ;;  %v2989_v0 = vld [vmem:[%s6599_s1 + $0x120] sm:$0xf]  ;;  %v4132_v5 = vor.u32 %v3700_v60, %v2861_v59  ;;  %1019 = vmatpush.bf16.msra.mxu1 %v4100_v57 }
  0x16   :  { %6934 = vst [vmem:[#allocation20_spill] sm:$0xff] %v4102_v58  ;;  %v3732_v1 = vld [vmem:[%s6599_s1 + $0x124] sm:$0xf0]  ;;  %v3053_v2 = vld [vmem:[%s6599_s1 + $0x1a0] sm:$0xf]  ;;  %1038 = vmatpush.bf16.msra.mxu2 %v4102_v58  ;;  %v4136_v6 = vor.u32 %v3716_v63, %v2925_v61 }
  0x17   :  { %6935 = vst [vmem:[#allocation21_spill] sm:$0xff] %v4114_v62  ;;  %v3748_v4 = vld [vmem:[%s6599_s1 + $0x1a4] sm:$0xf0]  ;;  %v4138_v9 = vor.u32 %v3732_v1, %v2989_v0  ;;  %v2853_v10 = vld [vmem:[%s6599_s1 + $0x10] sm:$0xf]  ;;  %1057 = vmatpush.bf16.msra.mxu3 %v4114_v62 }
  0x18   :  { %6936 = vst [vmem:[#allocation22_spill] sm:$0xff] %v4132_v5  ;;  %v3698_v11 = vld [vmem:[%s6599_s1 + $0x14] sm:$0xf0]  ;;  %v2917_v13 = vld [vmem:[%s6599_s1 + $0x90] sm:$0xf]  ;;  %v4150_v14 = vor.u32 %v3748_v4, %v3053_v2  ;;  %1001 = vmatpush.bf16.msra.mxu0 %v4132_v5 }
  0x19   :  { %6937 = vst [vmem:[#allocation23_spill] sm:$0xff] %v4136_v6  ;;  %v3714_v15 = vld [vmem:[%s6599_s1 + $0x94] sm:$0xf0]  ;;  %v2981_v18 = vld [vmem:[%s6599_s1 + $0x110] sm:$0xf]  ;;  %v4171_v24 = vor.u32 %v3698_v11, %v2853_v10  ;;  %1020 = vmatpush.bf16.msra.mxu1 %v4136_v6 }
  0x1a   :  { %6938 = vst [vmem:[#allocation24_spill] sm:$0xff] %v4138_v9  ;;  %v3730_v19 = vld [vmem:[%s6599_s1 + $0x114] sm:$0xf0]  ;;  %v3045_v20 = vld [vmem:[%s6599_s1 + $0x190] sm:$0xf]  ;;  %1039 = vmatpush.bf16.msra.mxu2 %v4138_v9  ;;  %v4184_v30 = vor.u32 %v3714_v15, %v2917_v13 }
  0x1b   :  { %6939 = vst [vmem:[#allocation25_spill] sm:$0xff] %v4150_v14  ;;  %v3746_v22 = vld [vmem:[%s6599_s1 + $0x194] sm:$0xf0]  ;;  %v2845_v23 = vld [vmem:[%s6599_s1] sm:$0xf]  ;;  %v4186_v31 = vor.u32 %v3730_v19, %v2981_v18  ;;  %1058 = vmatpush.bf16.msra.mxu3 %v4150_v14 }
  0x1c   :  { %6940 = vst [vmem:[#allocation26_spill] sm:$0xff] %v4171_v24  ;;  %v3696_v26 = vld [vmem:[%s6599_s1 + $0x4] sm:$0xf0]  ;;  %v2909_v27 = vld [vmem:[%s6599_s1 + $0x80] sm:$0xf]  ;;  %v4198_v37 = vor.u32 %v3746_v22, %v3045_v20  ;;  %1002 = vmatpush.bf16.msra.mxu0 %v4171_v24 }
  0x1d   :  { %v3712_v28 = vld [vmem:[%s6599_s1 + $0x84] sm:$0xf0]  ;;  %6941 = vst [vmem:[#allocation27_spill] sm:$0xff] %v4184_v30  ;;  %v2973_v32 = vld [vmem:[%s6599_s1 + $0x100] sm:$0xf]  ;;  %v4222_v49 = vor.u32 %v3696_v26, %v2845_v23  ;;  %1021 = vmatpush.bf16.msra.mxu1 %v4184_v30 }
  0x1e   :  { %6942 = vst [vmem:[#allocation28_spill] sm:$0xff] %v4186_v31  ;;  %v3728_v35 = vld [vmem:[%s6599_s1 + $0x104] sm:$0xf0]  ;;  %v3037_v36 = vld [vmem:[%s6599_s1 + $0x180] sm:$0xf]  ;;  %1040 = vmatpush.bf16.msra.mxu2 %v4186_v31  ;;  %v4235_v54 = vor.u32 %v3712_v28, %v2909_v27 }
  0x1f   :  { %6943 = vst [vmem:[#allocation29_spill] sm:$0xff] %v4198_v37  ;;  %v3744_v39 = vld [vmem:[%s6599_s1 + $0x184] sm:$0xf0]  ;;  %v2773_v40 = vld [vmem:[%s6600_s0] sm:$0xf]  ;;  %v4237_v55 = vor.u32 %v3728_v35, %v2973_v32  ;;  %1059 = vmatpush.bf16.msra.mxu3 %v4198_v37 }
  0x20   :  { %v3843_v41 = vld [vmem:[%s6600_s0 + $0x20] sm:$0xf0]  ;;  %v2775_v43 = vld [vmem:[%s6600_s0 + $0x24] sm:$0xf0]  ;;  %v3285_v47 = vld [vmem:[%s6599_s1 + $0x370] sm:$0xf]  ;;  %v4249_v63 = vor.u32 %v3744_v39, %v3037_v36  ;;  %1003 = vmatpush.bf16.msra.mxu0 %v4222_v49 }
  0x21   :  { %v3839_v42 = vld [vmem:[%s6600_s0 + $0x4] sm:$0xf]  ;;  %v3806_v48 = vld [vmem:[%s6599_s1 + $0x374] sm:$0xf0]  ;;  %6944 = vst [vmem:[#allocation30_spill] sm:$0xff] %v4222_v49  ;;  %v4262_v10 = vor.u32 %v3843_v41, %v2773_v40  ;;  %1022 = vmatpush.bf16.msra.mxu1 %v4235_v54 }
  0x22   :  { %v2781_v51 = vld [vmem:[%s6600_s0 + $0x8] sm:$0xf]  ;;  %v3221_v52 = vld [vmem:[%s6599_s1 + $0x2f0] sm:$0xf]  ;;  %v3790_v53 = vld [vmem:[%s6599_s1 + $0x2f4] sm:$0xf0]  ;;  %v4251_v0 = vor.u32 %v3806_v48, %v3285_v47  ;;  %v4276_v19 = vor.u32 %v3839_v42, %v2775_v43  ;;  %1041 = vmatpush.bf16.msra.mxu2 %v4237_v55 }
  0x23   :  { %6945 = vst [vmem:[#allocation31_spill] sm:$0xff] %v4235_v54  ;;  %v3844_v59 = vld [vmem:[%s6600_s0 + $0x28] sm:$0xf0]  ;;  %v2783_v61 = vld [vmem:[%s6600_s0 + $0x2c] sm:$0xf0]  ;;  %v4264_v11 = vor.u32 %v3790_v53, %v3221_v52  ;;  %1060 = vmatpush.bf16.msra.mxu3 %v4249_v63  ;;  %1004 = vmatmul.bf16.vlgmr.msra.gmra.mxu0 %v4262_v10 }
  0x24   :  { %6946 = vst [vmem:[#allocation32_spill] sm:$0xff] %v4237_v55  ;;  %v3840_v60 = vld [vmem:[%s6600_s0 + $0xc] sm:$0xf]  ;;  %v3157_v1 = vld [vmem:[%s6599_s1 + $0x270] sm:$0xf]  ;;  %v4278_v20 = vor.u32 %v3844_v59, %v2781_v51  ;;  %1023 = vmatmul.bf16.vlgmr.msra.gmra.mxu1 %v4276_v19 }
  0x25   :  { %6947 = vst [vmem:[#allocation33_spill] sm:$0xff] %v4249_v63  ;;  %v3774_v2 = vld [vmem:[%s6599_s1 + $0x274] sm:$0xf0]  ;;  %v3349_v4 = vld [vmem:[%s6599_s1 + $0x3f0] sm:$0xf]  ;;  %v4288_v26 = vor.u32 %v3840_v60, %v2783_v61  ;;  %1091 = vmatpush.bf16.msrb.mxu1 %v4264_v11 }
  0x26   :  { %6948 = vst [vmem:[#allocation34_spill] sm:$0xff] %v4251_v0  ;;  %v3822_v13 = vld [vmem:[%s6599_s1 + $0x3f4] sm:$0xf0]  ;;  %v3277_v15 = vld [vmem:[%s6599_s1 + $0x360] sm:$0xf]  ;;  %v4290_v27 = vor.u32 %v3774_v2, %v3157_v1  ;;  %1110 = vmatpush.bf16.msrb.mxu2 %v4251_v0 }
  0x27   :  { %6949 = vst [vmem:[#allocation35_spill] sm:$0xff] %v4264_v11  ;;  %v3804_v18 = vld [vmem:[%s6599_s1 + $0x364] sm:$0xf0]  ;;  %v3213_v22 = vld [vmem:[%s6599_s1 + $0x2e0] sm:$0xf]  ;;  %v4294_v28 = vor.u32 %v3822_v13, %v3349_v4  ;;  %1042 = vmatmul.bf16.vlgmr.msra.gmra.mxu2 %v4278_v20  ;;  %1061 = vmatmul.bf16.vlgmr.msra.gmra.mxu3 %v4288_v26 }
  0x28   :  { %v3788_v23 = vld [vmem:[%s6599_s1 + $0x2e4] sm:$0xf0]  ;;  %6950 = vst [vmem:[#allocation36_spill] sm:$0xff] %v4290_v27  ;;  %v4296_v32 = vor.u32 %v3804_v18, %v3277_v15  ;;  %v3149_v35 = vld [vmem:[%s6599_s1 + $0x260] sm:$0xf]  ;;  %1072 = vmatpush.bf16.msrb.mxu0 %v4290_v27 }
  0x29   :  { %6951 = vst [vmem:[#allocation37_spill] sm:$0xff] %v4294_v28  ;;  %v3772_v36 = vld [vmem:[%s6599_s1 + $0x264] sm:$0xf0]  ;;  %v3341_v39 = vld [vmem:[%s6599_s1 + $0x3e0] sm:$0xf]  ;;  %v4309_v40 = vor.u32 %v3788_v23, %v3213_v22  ;;  %1129 = vmatpush.bf16.msrb.mxu3 %v4294_v28 }
  0x2a   :  { %6952 = vst [vmem:[#allocation38_spill] sm:$0xff] %v4296_v32  ;;  %v3820_v41 = vld [vmem:[%s6599_s1 + $0x3e4] sm:$0xf0]  ;;  %v3269_v42 = vld [vmem:[%s6599_s1 + $0x350] sm:$0xf]  ;;  %v4330_v51 = vor.u32 %v3772_v36, %v3149_v35  ;;  %1111 = vmatpush.bf16.msrb.mxu2 %v4296_v32 }
  0x2b   :  { %6953 = vst [vmem:[#allocation39_spill] sm:$0xff] %v4309_v40  ;;  %v3802_v43 = vld [vmem:[%s6599_s1 + $0x354] sm:$0xf0]  ;;  %v3205_v47 = vld [vmem:[%s6599_s1 + $0x2d0] sm:$0xf]  ;;  %v4334_v52 = vor.u32 %v3820_v41, %v3341_v39  ;;  %1092 = vmatpush.bf16.msrb.mxu1 %v4309_v40 }
  0x2c   :  { %v3786_v48 = vld [vmem:[%s6599_s1 + $0x2d4] sm:$0xf0]  ;;  %6954 = vst [vmem:[#allocation40_spill] sm:$0xff] %v4330_v51  ;;  %v4336_v53 = vor.u32 %v3802_v43, %v3269_v42  ;;  %v3141_v59 = vld [vmem:[%s6599_s1 + $0x250] sm:$0xf]  ;;  %1073 = vmatpush.bf16.msrb.mxu0 %v4330_v51 }
  0x2d   :  { %6955 = vst [vmem:[#allocation41_spill] sm:$0xff] %v4334_v52  ;;  %v3770_v60 = vld [vmem:[%s6599_s1 + $0x254] sm:$0xf0]  ;;  %v3333_v61 = vld [vmem:[%s6599_s1 + $0x3d0] sm:$0xf]  ;;  %v4348_v1 = vor.u32 %v3786_v48, %v3205_v47  ;;  %1130 = vmatpush.bf16.msrb.mxu3 %v4334_v52 }
  0x2e   :  { %6956 = vst [vmem:[#allocation42_spill] sm:$0xff] %v4336_v53  ;;  %v3818_v2 = vld [vmem:[%s6599_s1 + $0x3d4] sm:$0xf0]  ;;  %v3261_v4 = vld [vmem:[%s6599_s1 + $0x340] sm:$0xf]  ;;  %v4366_v22 = vor.u32 %v3770_v60, %v3141_v59  ;;  %1112 = vmatpush.bf16.msrb.mxu2 %v4336_v53 }
  0x2f   :  { %6957 = vst [vmem:[#allocation43_spill] sm:$0xff] %v4348_v1  ;;  %v3800_v13 = vld [vmem:[%s6599_s1 + $0x344] sm:$0xf0]  ;;  %v3197_v15 = vld [vmem:[%s6599_s1 + $0x2c0] sm:$0xf]  ;;  %v4379_v39 = vor.u32 %v3818_v2, %v3333_v61  ;;  %1093 = vmatpush.bf16.msrb.mxu1 %v4348_v1 }
  0x30   :  { %v3784_v18 = vld [vmem:[%s6599_s1 + $0x2c4] sm:$0xf0]  ;;  %6958 = vst [vmem:[#allocation44_spill] sm:$0xff] %v4366_v22  ;;  %v3133_v23 = vld [vmem:[%s6599_s1 + $0x240] sm:$0xf]  ;;  %v4381_v41 = vor.u32 %v3800_v13, %v3261_v4  ;;  %1074 = vmatpush.bf16.msrb.mxu0 %v4366_v22 }
  0x31   :  { %v3768_v35 = vld [vmem:[%s6599_s1 + $0x244] sm:$0xf0]  ;;  %v3325_v36 = vld [vmem:[%s6599_s1 + $0x3c0] sm:$0xf]  ;;  %6959 = vst [vmem:[#allocation45_spill] sm:$0xff] %v4379_v39  ;;  %v4393_v48 = vor.u32 %v3784_v18, %v3197_v15  ;;  %1131 = vmatpush.bf16.msrb.mxu3 %v4379_v39 }
  0x32   :  { %6960 = vst [vmem:[#allocation46_spill] sm:$0xff] %v4381_v41  ;;  %v3816_v42 = vld [vmem:[%s6599_s1 + $0x3c4] sm:$0xf0]  ;;  %v3852_v47 = vld [vmem:[%s6600_s0 + $0x68] sm:$0xf0]  ;;  %v4417_v18 = vor.u32 %v3768_v35, %v3133_v23  ;;  %1113 = vmatpush.bf16.msrb.mxu2 %v4381_v41 }
  0x33   :  { %v2809_v43 = vld [vmem:[%s6600_s0 + $0x48] sm:$0xf]  ;;  %6961 = vst [vmem:[#allocation47_spill] sm:$0xff] %v4393_v48  ;;  %v3848_v59 = vld [vmem:[%s6600_s0 + $0x4c] sm:$0xf]  ;;  %v4430_v28 = vor.u32 %v3816_v42, %v3325_v36  ;;  %1094 = vmatpush.bf16.msrb.mxu1 %v4393_v48 }
  0x34   :  { %v2811_v60 = vld [vmem:[%s6600_s0 + $0x6c] sm:$0xf0]  ;;  %v3798_v2 = vld [vmem:[%s6599_s1 + $0x334] sm:$0xf0]  ;;  %6962 = vst [vmem:[#allocation48_spill] sm:$0xff] %v4417_v18  ;;  %v4444_v39 = vor.u32 %v3852_v47, %v2809_v43  ;;  %1075 = vmatpush.bf16.msrb.mxu0 %v4417_v18 }
  0x35   :  { %v3253_v61 = vld [vmem:[%s6599_s1 + $0x330] sm:$0xf]  ;;  %v3782_v15 = vld [vmem:[%s6599_s1 + $0x2b4] sm:$0xf0]  ;;  %v3853_v53 = vld [vmem:[%s6600_s0 + $0x70] sm:$0xf0]  ;;  %v4457_v41 = vor.u32 %v3848_v59, %v2811_v60  ;;  %1132 = vmatpush.bf16.msrb.mxu3 %v4430_v28 }
  0x36   :  { %v2817_v4 = vld [vmem:[%s6600_s0 + $0x50] sm:$0xf]  ;;  %v3849_v52 = vld [vmem:[%s6600_s0 + $0x54] sm:$0xf]  ;;  %v2819_v32 = vld [vmem:[%s6600_s0 + $0x74] sm:$0xf0]  ;;  %v4432_v23 = vor.u32 %v3798_v2, %v3253_v61  ;;  %1009 = vmatmul.bf16.gmra.mxu0 %v4444_v39 }
  0x37   :  { %v3189_v13 = vld [vmem:[%s6599_s1 + $0x2b0] sm:$0xf]  ;;  %6963 = vst [vmem:[#allocation49_spill] sm:$0xff] %v4430_v28  ;;  %v3766_v0 = vld [vmem:[%s6599_s1 + $0x234] sm:$0xf0]  ;;  %v4459_v55 = vor.u32 %v3853_v53, %v2817_v4  ;;  %1028 = vmatmul.bf16.gmra.mxu1 %v4457_v41 }
  0x38   :  { %6964 = vst [vmem:[#allocation50_spill] sm:$0xff] %v4432_v23  ;;  %v3125_v35 = vld [vmem:[%s6599_s1 + $0x230] sm:$0xf]  ;;  %v4446_v36 = vor.u32 %v3782_v15, %v3189_v13  ;;  %v3814_v42 = vld [vmem:[%s6599_s1 + $0x3b4] sm:$0xf0]  ;;  %v4468_v13 = vor.u32 %v3849_v52, %v2819_v32  ;;  %1114 = vmatpush.bf16.msrb.mxu2 %v4432_v23 }
  0x39   :  { %v3317_v63 = vld [vmem:[%s6599_s1 + $0x3b0] sm:$0xf]  ;;  %v3245_v61 = vld [vmem:[%s6599_s1 + $0x320] sm:$0xf]  ;;  %v3796_v2 = vld [vmem:[%s6599_s1 + $0x324] sm:$0xf0]  ;;  %v4470_v15 = vor.u32 %v3766_v0, %v3125_v35  ;;  %1047 = vmatmul.bf16.gmra.mxu2 %v4459_v55 }
  0x3a   :  { %6965 = vst [vmem:[#allocation51_spill] sm:$0xff] %v4446_v36  ;;  %v3181_v43 = vld [vmem:[%s6599_s1 + $0x2a0] sm:$0xf]  ;;  %v3780_v47 = vld [vmem:[%s6599_s1 + $0x2a4] sm:$0xf0]  ;;  %v4474_v53 = vor.u32 %v3814_v42, %v3317_v63  ;;  %v4476_v59 = vor.u32 %v3796_v2, %v3245_v61  ;;  %1095 = vmatpush.bf16.msrb.mxu1 %v4446_v36  ;;  %1066 = vmatmul.bf16.gmra.mxu3 %v4468_v13 }
  0x3b   :  { %6966 = vst [vmem:[#allocation52_spill] sm:$0xff] %v4470_v15  ;;  %v3117_v60 = vld [vmem:[%s6599_s1 + $0x220] sm:$0xf]  ;;  %v3764_v4 = vld [vmem:[%s6599_s1 + $0x224] sm:$0xf0]  ;;  %v4489_v63 = vor.u32 %v3780_v47, %v3181_v43  ;;  %1076 = vmatpush.bf16.msrb.mxu0 %v4470_v15 }
  0x3c   :  { %6967 = vst [vmem:[#allocation53_spill] sm:$0xff] %v4474_v53  ;;  %v3309_v0 = vld [vmem:[%s6599_s1 + $0x3a0] sm:$0xf]  ;;  %v3812_v32 = vld [vmem:[%s6599_s1 + $0x3a4] sm:$0xf0]  ;;  %v4510_v2 = vor.u32 %v3764_v4, %v3117_v60  ;;  %1133 = vmatpush.bf16.msrb.mxu3 %v4474_v53  ;;  %1115 = vmatpush.bf16.msrb.mxu2 %v4476_v59 }
  0x3d   :  { %6968 = vst [vmem:[#allocation54_spill] sm:$0xff] %v4476_v59  ;;  %v3237_v52 = vld [vmem:[%s6599_s1 + $0x310] sm:$0xf]  ;;  %v3794_v35 = vld [vmem:[%s6599_s1 + $0x314] sm:$0xf0]  ;;  %v4517_v47 = vor.u32 %v3812_v32, %v3309_v0 }
  0x3e   :  { %6969 = vst [vmem:[#allocation55_spill] sm:$0xff] %v4489_v63  ;;  %v3173_v42 = vld [vmem:[%s6599_s1 + $0x290] sm:$0xf]  ;;  %v3778_v61 = vld [vmem:[%s6599_s1 + $0x294] sm:$0xf0]  ;;  %v4519_v23 = vor.u32 %v3794_v35, %v3237_v52  ;;  %1096 = vmatpush.bf16.msrb.mxu1 %v4489_v63 }
  0x3f   :  { %6970 = vst [vmem:[#allocation56_spill] sm:$0xff] %v4510_v2  ;;  %v3109_v43 = vld [vmem:[%s6599_s1 + $0x210] sm:$0xf]  ;;  %v3762_v28 = vld [vmem:[%s6599_s1 + $0x214] sm:$0xf0]  ;;  %v4531_v53 = vor.u32 %v3778_v61, %v3173_v42  ;;  %1077 = vmatpush.bf16.msrb.mxu0 %v4510_v2 }
  0x40   :  { %6971 = vst [vmem:[#allocation57_spill] sm:$0xff] %v4517_v47  ;;  %v3301_v60 = vld [vmem:[%s6599_s1 + $0x390] sm:$0xf]  ;;  %v3810_v4 = vld [vmem:[%s6599_s1 + $0x394] sm:$0xf0]  ;;  %v4552_v59 = vor.u32 %v3762_v28, %v3109_v43  ;;  %1134 = vmatpush.bf16.msrb.mxu3 %v4517_v47  ;;  %1116 = vmatpush.bf16.msrb.mxu2 %v4519_v23 }
  0x41   :  { %6972 = vst [vmem:[#allocation58_spill] sm:$0xff] %v4519_v23  ;;  %v3229_v0 = vld [vmem:[%s6599_s1 + $0x300] sm:$0xf]  ;;  %v3792_v32 = vld [vmem:[%s6599_s1 + $0x304] sm:$0xf0]  ;;  %v4565_v14 = vor.u32 %v3810_v4, %v3301_v60 }
  0x42   :  { %6973 = vst [vmem:[#allocation59_spill] sm:$0xff] %v4531_v53  ;;  %v3165_v52 = vld [vmem:[%s6599_s1 + $0x280] sm:$0xf]  ;;  %v3776_v35 = vld [vmem:[%s6599_s1 + $0x284] sm:$0xf0]  ;;  %v4567_v28 = vor.u32 %v3792_v32, %v3229_v0  ;;  %1097 = vmatpush.bf16.msrb.mxu1 %v4531_v53 }
  0x43   :  { %v3725_v42 = vld [vmem:[%s6599_s1 + $0xf4] sm:$0xf]  ;;  %v2967_v61 = vld [vmem:[%s6599_s1 + $0xf8] sm:$0xf0]  ;;  %6974 = vst [vmem:[#allocation60_spill] sm:$0xff] %v4552_v59  ;;  %v4579_v47 = vor.u32 %v3776_v35, %v3165_v52  ;;  %1078 = vmatpush.bf16.msrb.mxu0 %v4552_v59 }
  0x44   :  { %v3101_v37 = vld [vmem:[%s6599_s1 + $0x200] sm:$0xf]  ;;  %v3709_v31 = vld [vmem:[%s6599_s1 + $0x74] sm:$0xf]  ;;  %v2903_v63 = vld [vmem:[%s6599_s1 + $0x78] sm:$0xf0]  ;;  %v4593_v23 = vor.u32 %v3725_v42, %v2967_v61  ;;  %1135 = vmatpush.bf16.msrb.mxu3 %v4565_v14  ;;  %1117 = vmatpush.bf16.msrb.mxu2 %v4567_v28 }
  0x45   :  { %6975 = vst [vmem:[#allocation61_spill] sm:$0xff] %v4565_v14  ;;  %v3760_v43 = vld [vmem:[%s6599_s1 + $0x204] sm:$0xf0]  ;;  %v3293_v9 = vld [vmem:[%s6599_s1 + $0x380] sm:$0xf]  ;;  %v4604_v36 = vor.u32 %v3709_v31, %v2903_v63 }
  0x46   :  { %6976 = vst [vmem:[#allocation62_spill] sm:$0xff] %v4567_v28  ;;  %v3808_v2 = vld [vmem:[%s6599_s1 + $0x384] sm:$0xf0]  ;;  %v2789_v60 = vld [vmem:[%s6600_s0 + $0x10] sm:$0xf]  ;;  %v4616_v58 = vor.u32 %v3760_v43, %v3101_v37  ;;  %1098 = vmatpush.bf16.msrb.mxu1 %v4579_v47 }
  0x47   :  { %6977 = vst [vmem:[#allocation63_spill] sm:$0xff] %v4579_v47  ;;  %v3845_v4 = vld [vmem:[%s6600_s0 + $0x30] sm:$0xf0]  ;;  %v2791_v32 = vld [vmem:[%s6600_s0 + $0x34] sm:$0xf0]  ;;  %v4629_v48 = vor.u32 %v3808_v2, %v3293_v9 }
  0x48   :  { %v3841_v0 = vld [vmem:[%s6600_s0 + $0x14] sm:$0xf]  ;;  %6978 = vst [vmem:[#allocation64_spill] sm:$0xff] %v4593_v23  ;;  %v3413_v52 = vld [vmem:[%s6599_s1 + $0x470] sm:$0xf]  ;;  %1186 = vmatpush.bf16.msra.mxu2 %v4593_v23  ;;  %v4657_v14 = vor.u32 %v3845_v4, %v2789_v60  ;;  %1079 = vmatpush.bf16.msrb.mxu0 %v4616_v58 }
  0x49   :  { %v3838_v35 = vld [vmem:[%s6599_s1 + $0x474] sm:$0xf0]  ;;  %v3741_v53 = vld [vmem:[%s6599_s1 + $0x174] sm:$0xf]  ;;  %6979 = vst [vmem:[#allocation65_spill] sm:$0xff] %v4604_v36  ;;  %v4659_v47 = vor.u32 %v3841_v0, %v2791_v32  ;;  %1136 = vmatpush.bf16.msrb.mxu3 %v4629_v48 }
  0x4a   :  { %v3031_v62 = vld [vmem:[%s6599_s1 + $0x178] sm:$0xf0]  ;;  %v3723_v42 = vld [vmem:[%s6599_s1 + $0xe4] sm:$0xf]  ;;  %v2959_v61 = vld [vmem:[%s6599_s1 + $0xe8] sm:$0xf0]  ;;  %v4634_v43 = vor.u32 %v3838_v35, %v3413_v52  ;;  %1167 = vmatpush.bf16.msra.mxu1 %v4604_v36 }
  0x4b   :  { %6980 = vst [vmem:[#allocation66_spill] sm:$0xff] %v4616_v58  ;;  %v2797_v31 = vld [vmem:[%s6600_s0 + $0x18] sm:$0xf]  ;;  %v3846_v63 = vld [vmem:[%s6600_s0 + $0x38] sm:$0xf0]  ;;  %v4644_v9 = vor.u32 %v3741_v53, %v3031_v62  ;;  %v4646_v2 = vor.u32 %v3723_v42, %v2959_v61  ;;  %1080 = vmatmul.bf16.vlgmr.msrb.gmra.mxu0 %v4657_v14  ;;  %1099 = vmatmul.bf16.vlgmr.msrb.gmra.mxu1 %v4659_v47 }
  0x4c   :  { %v3842_v15 = vld [vmem:[%s6600_s0 + $0x1c] sm:$0xf]  ;;  %6981 = vst [vmem:[#allocation67_spill] sm:$0xff] %v4629_v48  ;;  %v2799_v37 = vld [vmem:[%s6600_s0 + $0x3c] sm:$0xf0]  ;;  %v4672_v60 = vor.u32 %v3846_v63, %v2797_v31  ;;  %1148 = vmatpush.bf16.msra.mxu0 %v4634_v43 }
  0x4d   :  { %6982 = vst [vmem:[#allocation68_spill] sm:$0xff] %v4634_v43  ;;  %v3405_v59 = vld [vmem:[%s6599_s1 + $0x460] sm:$0xf]  ;;  %v3836_v50 = vld [vmem:[%s6599_s1 + $0x464] sm:$0xf0]  ;;  %v4674_v4 = vor.u32 %v3842_v15, %v2799_v37  ;;  %1205 = vmatpush.bf16.msra.mxu3 %v4644_v9  ;;  %1187 = vmatpush.bf16.msra.mxu2 %v4646_v2 }
  0x4e   :  { %6983 = vst [vmem:[#allocation69_spill] sm:$0xff] %v4644_v9  ;;  %v3707_v52 = vld [vmem:[%s6599_s1 + $0x64] sm:$0xf]  ;;  %v2895_v35 = vld [vmem:[%s6599_s1 + $0x68] sm:$0xf0]  ;;  %v4678_v0 = vor.u32 %v3836_v50, %v3405_v59  ;;  %1118 = vmatmul.bf16.vlgmr.msrb.gmra.mxu2 %v4672_v60 }
  0x4f   :  { %6984 = vst [vmem:[#allocation70_spill] sm:$0xff] %v4646_v2  ;;  %v3739_v28 = vld [vmem:[%s6599_s1 + $0x164] sm:$0xf]  ;;  %v3023_v62 = vld [vmem:[%s6599_s1 + $0x168] sm:$0xf0]  ;;  %v4680_v32 = vor.u32 %v3707_v52, %v2895_v35  ;;  %1137 = vmatmul.bf16.vlgmr.msrb.gmra.mxu3 %v4674_v4 }
  0x50   :  { %v3721_v53 = vld [vmem:[%s6599_s1 + $0xd4] sm:$0xf]  ;;  %v2951_v42 = vld [vmem:[%s6599_s1 + $0xd8] sm:$0xf0]  ;;  %6985 = vst [vmem:[#allocation71_spill] sm:$0xff] %v4678_v0  ;;  %v4690_v15 = vor.u32 %v3739_v28, %v3023_v62  ;;  %1149 = vmatpush.bf16.msra.mxu0 %v4678_v0 }
  0x51   :  { %6986 = vst [vmem:[#allocation72_spill] sm:$0xff] %v4680_v32  ;;  %v3397_v61 = vld [vmem:[%s6599_s1 + $0x450] sm:$0xf]  ;;  %v3834_v23 = vld [vmem:[%s6599_s1 + $0x454] sm:$0xf0]  ;;  %v4692_v31 = vor.u32 %v3721_v53, %v2951_v42  ;;  %1168 = vmatpush.bf16.msra.mxu1 %v4680_v32 }
  0x52   :  { %6987 = vst [vmem:[#allocation73_spill] sm:$0xff] %v4690_v15  ;;  %v3705_v50 = vld [vmem:[%s6599_s1 + $0x54] sm:$0xf]  ;;  %v2887_v59 = vld [vmem:[%s6599_s1 + $0x58] sm:$0xf0]  ;;  %v4718_v35 = vor.u32 %v3834_v23, %v3397_v61  ;;  %1206 = vmatpush.bf16.msra.mxu3 %v4690_v15 }
  0x53   :  { %6988 = vst [vmem:[#allocation74_spill] sm:$0xff] %v4692_v31  ;;  %v3737_v63 = vld [vmem:[%s6599_s1 + $0x154] sm:$0xf]  ;;  %v3015_v28 = vld [vmem:[%s6599_s1 + $0x158] sm:$0xf0]  ;;  %v4720_v62 = vor.u32 %v3705_v50, %v2887_v59  ;;  %1188 = vmatpush.bf16.msra.mxu2 %v4692_v31 }
  0x54   :  { %v3719_v37 = vld [vmem:[%s6599_s1 + $0xc4] sm:$0xf]  ;;  %v2943_v52 = vld [vmem:[%s6599_s1 + $0xc8] sm:$0xf0]  ;;  %6989 = vst [vmem:[#allocation75_spill] sm:$0xff] %v4718_v35  ;;  %v4730_v2 = vor.u32 %v3737_v63, %v3015_v28  ;;  %1150 = vmatpush.bf16.msra.mxu0 %v4718_v35 }
  0x55   :  { %6990 = vst [vmem:[#allocation76_spill] sm:$0xff] %v4720_v62  ;;  %v3389_v53 = vld [vmem:[%s6599_s1 + $0x440] sm:$0xf]  ;;  %v3832_v42 = vld [vmem:[%s6599_s1 + $0x444] sm:$0xf0]  ;;  %v4732_v9 = vor.u32 %v3719_v37, %v2943_v52  ;;  %1169 = vmatpush.bf16.msra.mxu1 %v4720_v62 }
  0x56   :  { %6991 = vst [vmem:[#allocation77_spill] sm:$0xff] %v4730_v2  ;;  %v3703_v23 = vld [vmem:[%s6599_s1 + $0x44] sm:$0xf]  ;;  %v2879_v61 = vld [vmem:[%s6599_s1 + $0x48] sm:$0xf0]  ;;  %v4754_v37 = vor.u32 %v3832_v42, %v3389_v53  ;;  %1207 = vmatpush.bf16.msra.mxu3 %v4730_v2 }
  0x57   :  { %6992 = vst [vmem:[#allocation78_spill] sm:$0xff] %v4732_v9  ;;  %v3735_v50 = vld [vmem:[%s6599_s1 + $0x144] sm:$0xf]  ;;  %v3007_v59 = vld [vmem:[%s6599_s1 + $0x148] sm:$0xf0]  ;;  %v4756_v52 = vor.u32 %v3703_v23, %v2879_v61  ;;  %1189 = vmatpush.bf16.msra.mxu2 %v4732_v9 }
  0x58   :  { %v3717_v63 = vld [vmem:[%s6599_s1 + $0xb4] sm:$0xf]  ;;  %v2935_v28 = vld [vmem:[%s6599_s1 + $0xb8] sm:$0xf0]  ;;  %6993 = vst [vmem:[#allocation79_spill] sm:$0xff] %v4754_v37  ;;  %v4766_v48 = vor.u32 %v3735_v50, %v3007_v59  ;;  %1151 = vmatpush.bf16.msra.mxu0 %v4754_v37 }
  0x59   :  { %6994 = vst [vmem:[#allocation80_spill] sm:$0xff] %v4756_v52  ;;  %v3381_v31 = vld [vmem:[%s6599_s1 + $0x430] sm:$0xf]  ;;  %v3830_v15 = vld [vmem:[%s6599_s1 + $0x434] sm:$0xf0]  ;;  %v4780_v2 = vor.u32 %v3717_v63, %v2935_v28  ;;  %1170 = vmatpush.bf16.msra.mxu1 %v4756_v52 }
  0x5a   :  { %6995 = vst [vmem:[#allocation81_spill] sm:$0xff] %v4766_v48  ;;  %v2825_v53 = vld [vmem:[%s6600_s0 + $0x58] sm:$0xf]  ;;  %v3854_v42 = vld [vmem:[%s6600_s0 + $0x78] sm:$0xf0]  ;;  %v4814_v43 = vor.u32 %v3830_v15, %v3381_v31  ;;  %1208 = vmatpush.bf16.msra.mxu3 %v4766_v48 }
  0x5b   :  { %v3850_v23 = vld [vmem:[%s6600_s0 + $0x5c] sm:$0xf]  ;;  %v2827_v61 = vld [vmem:[%s6600_s0 + $0x7c] sm:$0xf0]  ;;  %6996 = vst [vmem:[#allocation82_spill] sm:$0xff] %v4780_v2  ;;  %1190 = vmatpush.bf16.msra.mxu2 %v4780_v2 }
  0x5c   :  { %v3701_v50 = vld [vmem:[%s6599_s1 + $0x34] sm:$0xf]  ;;  %v2871_v59 = vld [vmem:[%s6599_s1 + $0x38] sm:$0xf0]  ;;  %v3715_v63 = vld [vmem:[%s6599_s1 + $0xa4] sm:$0xf]  ;;  %v4841_v48 = vor.u32 %v3850_v23, %v2827_v61  ;;  %1152 = vmatpush.bf16.msra.mxu0 %v4814_v43 }
  0x5d   :  { %v3733_v9 = vld [vmem:[%s6599_s1 + $0x134] sm:$0xf]  ;;  %v2999_v62 = vld [vmem:[%s6599_s1 + $0x138] sm:$0xf0]  ;;  %v2927_v28 = vld [vmem:[%s6599_s1 + $0xa8] sm:$0xf0]  ;;  %v4816_v58 = vor.u32 %v3701_v50, %v2871_v59  ;;  %v4839_v59 = vor.u32 %v3854_v42, %v2825_v53 }
  0x5e   :  { %v2833_v35 = vld [vmem:[%s6600_s0 + $0x60] sm:$0xf]  ;;  %v3855_v32 = vld [vmem:[%s6600_s0 + $0x80] sm:$0xf0]  ;;  %v2835_v36 = vld [vmem:[%s6600_s0 + $0x84] sm:$0xf0]  ;;  %v4826_v52 = vor.u32 %v3733_v9, %v2999_v62  ;;  %v4828_v37 = vor.u32 %v3715_v63, %v2927_v28  ;;  %1104 = vmatmul.bf16.gmra.mxu1 %v4841_v48 }
  0x5f   :  { %v3851_v0 = vld [vmem:[%s6600_s0 + $0x64] sm:$0xf]  ;;  %6997 = vst [vmem:[#allocation83_spill] sm:$0xff] %v4814_v43  ;;  %v3373_v46 = vld [vmem:[%s6599_s1 + $0x420] sm:$0xf]  ;;  %v4852_v28 = vor.u32 %v3855_v32, %v2833_v35  ;;  %1171 = vmatpush.bf16.msra.mxu1 %v4816_v58  ;;  %1085 = vmatmul.bf16.gmra.mxu0 %v4839_v59 }
  0x60   :  { %6998 = vst [vmem:[#allocation84_spill] sm:$0xff] %v4816_v58  ;;  %v3828_v18 = vld [vmem:[%s6599_s1 + $0x424] sm:$0xf0]  ;;  %v3699_v15 = vld [vmem:[%s6599_s1 + $0x24] sm:$0xf]  ;;  %v4854_v2 = vor.u32 %v3851_v0, %v2835_v36  ;;  %1209 = vmatpush.bf16.msra.mxu3 %v4826_v52  ;;  %1191 = vmatpush.bf16.msra.mxu2 %v4828_v37 }
  0x61   :  { %6999 = vst [vmem:[#allocation85_spill] sm:$0xff] %v4826_v52  ;;  %v2863_v31 = vld [vmem:[%s6599_s1 + $0x28] sm:$0xf0]  ;;  %v3731_v50 = vld [vmem:[%s6599_s1 + $0x124] sm:$0xf]  ;;  %v4858_v53 = vor.u32 %v3828_v18, %v3373_v46  ;;  %1123 = vmatmul.bf16.gmra.mxu2 %v4852_v28 }
  0x62   :  { %7000 = vst [vmem:[#allocation86_spill] sm:$0xff] %v4828_v37  ;;  %v2991_v9 = vld [vmem:[%s6599_s1 + $0x128] sm:$0xf0]  ;;  %v3713_v62 = vld [vmem:[%s6599_s1 + $0x94] sm:$0xf]  ;;  %v4860_v42 = vor.u32 %v3699_v15, %v2863_v31  ;;  %1142 = vmatmul.bf16.gmra.mxu3 %v4854_v2 }
  0x63   :  { %v2919_v63 = vld [vmem:[%s6599_s1 + $0x98] sm:$0xf0]  ;;  %7001 = vst [vmem:[#allocation87_spill] sm:$0xff] %v4854_v2  ;;  %v3365_v23 = vld [vmem:[%s6599_s1 + $0x410] sm:$0xf]  ;;  %v4870_v36 = vor.u32 %v3731_v50, %v2991_v9  ;;  %1153 = vmatpush.bf16.msra.mxu0 %v4858_v53 }
  0x64   :  { %7002 = vst [vmem:[#allocation88_spill] sm:$0xff] %v4858_v53  ;;  %v3826_v61 = vld [vmem:[%s6599_s1 + $0x414] sm:$0xf0]  ;;  %v4872_v0 = vor.u32 %v3713_v62, %v2919_v63  ;;  %v3697_v46 = vld [vmem:[%s6599_s1 + $0x14] sm:$0xf]  ;;  %1172 = vmatpush.bf16.msra.mxu1 %v4860_v42 }
  0x65   :  { %7003 = vst [vmem:[#allocation89_spill] sm:$0xff] %v4860_v42  ;;  %v2855_v18 = vld [vmem:[%s6599_s1 + $0x18] sm:$0xf0]  ;;  %v3729_v32 = vld [vmem:[%s6599_s1 + $0x114] sm:$0xf]  ;;  %v4904_v62 = vor.u32 %v3826_v61, %v3365_v23  ;;  %1210 = vmatpush.bf16.msra.mxu3 %v4870_v36 }
  0x66   :  { %7004 = vst [vmem:[#allocation90_spill] sm:$0xff] %v4870_v36  ;;  %v2983_v35 = vld [vmem:[%s6599_s1 + $0x118] sm:$0xf0]  ;;  %v3711_v15 = vld [vmem:[%s6599_s1 + $0x84] sm:$0xf]  ;;  %v4906_v63 = vor.u32 %v3697_v46, %v2855_v18  ;;  %1192 = vmatpush.bf16.msra.mxu2 %v4872_v0 }
  0x67   :  { %7005 = vst [vmem:[#allocation91_spill] sm:$0xff] %v4872_v0  ;;  %v2911_v31 = vld [vmem:[%s6599_s1 + $0x88] sm:$0xf0]  ;;  %v3789_v50 = vld [vmem:[%s6599_s1 + $0x2f4] sm:$0xf]  ;;  %v4919_v23 = vor.u32 %v3729_v32, %v2983_v35  ;;  %1154 = vmatpush.bf16.msra.mxu0 %v4904_v62 }
  0x68   :  { %v3223_v9 = vld [vmem:[%s6599_s1 + $0x2f8] sm:$0xf0]  ;;  %7006 = vst [vmem:[#allocation92_spill] sm:$0xff] %v4904_v62  ;;  %v3357_v37 = vld [vmem:[%s6599_s1 + $0x400] sm:$0xf]  ;;  %v4921_v61 = vor.u32 %v3711_v15, %v2911_v31  ;;  %1173 = vmatpush.bf16.msra.mxu1 %v4906_v63 }
  0x69   :  { %7007 = vst [vmem:[#allocation93_spill] sm:$0xff] %v4906_v63  ;;  %v3824_v52 = vld [vmem:[%s6599_s1 + $0x404] sm:$0xf0]  ;;  %v3695_v58 = vld [vmem:[%s6599_s1 + $0x4] sm:$0xf]  ;;  %v4932_v53 = vor.u32 %v3789_v50, %v3223_v9  ;;  %1211 = vmatpush.bf16.msra.mxu3 %v4919_v23 }
  0x6a   :  { %7008 = vst [vmem:[#allocation94_spill] sm:$0xff] %v4919_v23  ;;  %v2847_v46 = vld [vmem:[%s6599_s1 + $0x8] sm:$0xf0]  ;;  %v3727_v18 = vld [vmem:[%s6599_s1 + $0x104] sm:$0xf]  ;;  %v4954_v0 = vor.u32 %v3824_v52, %v3357_v37  ;;  %1193 = vmatpush.bf16.msra.mxu2 %v4921_v61 }
  0x6b   :  { %7009 = vst [vmem:[#allocation95_spill] sm:$0xff] %v4921_v61  ;;  %v2975_v42 = vld [vmem:[%s6599_s1 + $0x108] sm:$0xf0]  ;;  %v3757_v32 = vld [vmem:[%s6599_s1 + $0x1f4] sm:$0xf]  ;;  %v4956_v36 = vor.u32 %v3695_v58, %v2847_v46 }
  0x6c   :  { %7010 = vst [vmem:[#allocation96_spill] sm:$0xff] %v4932_v53  ;;  %v3095_v35 = vld [vmem:[%s6599_s1 + $0x1f8] sm:$0xf0]  ;;  %v3773_v15 = vld [vmem:[%s6599_s1 + $0x274] sm:$0xf]  ;;  %v4966_v1 = vor.u32 %v3727_v18, %v2975_v42  ;;  %1155 = vmatpush.bf16.msra.mxu0 %v4954_v0 }
  0x6d   :  { %v3159_v31 = vld [vmem:[%s6599_s1 + $0x278] sm:$0xf0]  ;;  %v3805_v50 = vld [vmem:[%s6599_s1 + $0x374] sm:$0xf]  ;;  %7011 = vst [vmem:[#allocation97_spill] sm:$0xff] %v4954_v0  ;;  %v4968_v62 = vor.u32 %v3757_v32, %v3095_v35  ;;  %1174 = vmatpush.bf16.msra.mxu1 %v4956_v36 }
  0x6e   :  { %v3287_v9 = vld [vmem:[%s6599_s1 + $0x378] sm:$0xf0]  ;;  %7012 = vst [vmem:[#allocation98_spill] sm:$0xff] %v4956_v36  ;;  %v3787_v43 = vld [vmem:[%s6599_s1 + $0x2e4] sm:$0xf]  ;;  %1262 = vmatpush.bf16.msrb.mxu2 %v4932_v53  ;;  %v4971_v58 = vor.u32 %v3773_v15, %v3159_v31  ;;  %1212 = vmatpush.bf16.msra.mxu3 %v4966_v1 }
  0x6f   :  { %v3215_v2 = vld [vmem:[%s6599_s1 + $0x2e8] sm:$0xf0]  ;;  %7013 = vst [vmem:[#allocation99_spill] sm:$0xff] %v4966_v1  ;;  %v4973_v37 = vor.u32 %v3805_v50, %v3287_v9  ;;  %v3755_v52 = vld [vmem:[%s6599_s1 + $0x1e4] sm:$0xf] }
  0x70   :  { %7014 = vst [vmem:[#allocation100_spill] sm:$0xff] %v4968_v62  ;;  %v3087_v46 = vld [vmem:[%s6599_s1 + $0x1e8] sm:$0xf0]  ;;  %v2805_v42 = vld [vmem:[%s6600_s0 + $0x20] sm:$0xf]  ;;  %v4987_v32 = vor.u32 %v3787_v43, %v3215_v2  ;;  %1224 = vmatpush.bf16.msrb.mxu0 %v4968_v62  ;;  %1175 = vmatmul.bf16.vlgmr.msra.gmra.mxu1 %v4262_v10 }
  0x71   :  { %7015 = vst [vmem:[#allocation101_spill] sm:$0xff] %v4971_v58  ;;  %v3847_v18 = vld [vmem:[%s6600_s0 + $0x40] sm:$0xf0]  ;;  %v3151_v15 = vld [vmem:[%s6599_s1 + $0x268] sm:$0xf0]  ;;  %v4999_v31 = vor.u32 %v3755_v52, %v3087_v46  ;;  %1243 = vmatpush.bf16.msrb.mxu1 %v4971_v58  ;;  %1194 = vmatmul.bf16.vlgmr.msra.gmra.mxu2 %v4276_v19 }
  0x72   :  { %7016 = vst [vmem:[#allocation102_spill] sm:$0xff] %v4973_v37  ;;  %v3771_v35 = vld [vmem:[%s6599_s1 + $0x264] sm:$0xf]  ;;  %v3279_v2 = vld [vmem:[%s6599_s1 + $0x368] sm:$0xf0]  ;;  %v5010_v9 = vor.u32 %v3847_v18, %v2805_v42  ;;  %1281 = vmatpush.bf16.msrb.mxu3 %v4973_v37  ;;  %1263 = vmatpush.bf16.msrb.mxu2 %v4987_v32 }
  0x73   :  { %7017 = vst [vmem:[#allocation103_spill] sm:$0xff] %v4987_v32  ;;  %v3803_v43 = vld [vmem:[%s6599_s1 + $0x364] sm:$0xf]  ;;  %v3785_v50 = vld [vmem:[%s6599_s1 + $0x2d4] sm:$0xf]  ;;  %v5024_v42 = vor.u32 %v3771_v35, %v3151_v15  ;;  %1213 = vmatmul.bf16.vlgmr.msra.gmra.mxu3 %v4278_v20 }
  0x74   :  { %7018 = vst [vmem:[#allocation104_spill] sm:$0xff] %v4999_v31  ;;  %v3207_v52 = vld [vmem:[%s6599_s1 + $0x2d8] sm:$0xf0]  ;;  %v3753_v46 = vld [vmem:[%s6599_s1 + $0x1d4] sm:$0xf]  ;;  %v5026_v18 = vor.u32 %v3803_v43, %v3279_v2  ;;  %1225 = vmatpush.bf16.msrb.mxu0 %v4999_v31 }
  0x75   :  { %v3079_v53 = vld [vmem:[%s6599_s1 + $0x1d8] sm:$0xf0]  ;;  %7019 = vst [vmem:[#allocation105_spill] sm:$0xff] %v5024_v42  ;;  %v3769_v37 = vld [vmem:[%s6599_s1 + $0x254] sm:$0xf]  ;;  %v5035_v61 = vor.u32 %v3785_v50, %v3207_v52  ;;  %1156 = vmatmul.bf16.vlgmr.msra.gmra.mxu0 %v5010_v9  ;;  %1244 = vmatpush.bf16.msrb.mxu1 %v5024_v42 }
  0x76   :  { %7020 = vst [vmem:[#allocation106_spill] sm:$0xff] %v5026_v18  ;;  %v3143_v1 = vld [vmem:[%s6599_s1 + $0x258] sm:$0xf0]  ;;  %v5037_v23 = vor.u32 %v3753_v46, %v3079_v53  ;;  %v3801_v35 = vld [vmem:[%s6599_s1 + $0x354] sm:$0xf]  ;;  %1282 = vmatpush.bf16.msrb.mxu3 %v5026_v18 }
  0x77   :  { %7021 = vst [vmem:[#allocation107_spill] sm:$0xff] %v5035_v61  ;;  %v3271_v15 = vld [vmem:[%s6599_s1 + $0x358] sm:$0xf0]  ;;  %v3783_v43 = vld [vmem:[%s6599_s1 + $0x2c4] sm:$0xf]  ;;  %v5063_v10 = vor.u32 %v3769_v37, %v3143_v1  ;;  %1264 = vmatpush.bf16.msrb.mxu2 %v5035_v61 }
  0x78   :  { %7022 = vst [vmem:[#allocation108_spill] sm:$0xff] %v5037_v23  ;;  %v3199_v53 = vld [vmem:[%s6599_s1 + $0x2c8] sm:$0xf0]  ;;  %v3751_v2 = vld [vmem:[%s6599_s1 + $0x1c4] sm:$0xf]  ;;  %v5065_v52 = vor.u32 %v3801_v35, %v3271_v15  ;;  %1226 = vmatpush.bf16.msrb.mxu0 %v5037_v23 }
  0x79   :  { %v3071_v50 = vld [vmem:[%s6599_s1 + $0x1c8] sm:$0xf0]  ;;  %7023 = vst [vmem:[#allocation109_spill] sm:$0xff] %v5063_v10  ;;  %v3767_v46 = vld [vmem:[%s6599_s1 + $0x244] sm:$0xf]  ;;  %v5075_v19 = vor.u32 %v3783_v43, %v3199_v53  ;;  %1245 = vmatpush.bf16.msrb.mxu1 %v5063_v10 }
  0x7a   :  { %7024 = vst [vmem:[#allocation110_spill] sm:$0xff] %v5065_v52  ;;  %v3135_v32 = vld [vmem:[%s6599_s1 + $0x248] sm:$0xf0]  ;;  %v5077_v20 = vor.u32 %v3751_v2, %v3071_v50  ;;  %v3799_v1 = vld [vmem:[%s6599_s1 + $0x344] sm:$0xf]  ;;  %1283 = vmatpush.bf16.msrb.mxu3 %v5065_v52 }
  0x7b   :  { %7025 = vst [vmem:[#allocation111_spill] sm:$0xff] %v5075_v19  ;;  %v3263_v37 = vld [vmem:[%s6599_s1 + $0x348] sm:$0xf0]  ;;  %v3781_v35 = vld [vmem:[%s6599_s1 + $0x2b4] sm:$0xf]  ;;  %v5099_v2 = vor.u32 %v3767_v46, %v3135_v32  ;;  %1265 = vmatpush.bf16.msrb.mxu2 %v5075_v19 }
  0x7c   :  { %7026 = vst [vmem:[#allocation112_spill] sm:$0xff] %v5077_v20  ;;  %v3191_v15 = vld [vmem:[%s6599_s1 + $0x2b8] sm:$0xf0]  ;;  %v3749_v43 = vld [vmem:[%s6599_s1 + $0x1b4] sm:$0xf]  ;;  %v5101_v50 = vor.u32 %v3799_v1, %v3263_v37  ;;  %1227 = vmatpush.bf16.msrb.mxu0 %v5077_v20 }
  0x7d   :  { %v3063_v53 = vld [vmem:[%s6599_s1 + $0x1b8] sm:$0xf0]  ;;  %7027 = vst [vmem:[#allocation113_spill] sm:$0xff] %v5099_v2  ;;  %v3765_v61 = vld [vmem:[%s6599_s1 + $0x234] sm:$0xf]  ;;  %v5111_v23 = vor.u32 %v3781_v35, %v3191_v15  ;;  %1246 = vmatpush.bf16.msrb.mxu1 %v5099_v2 }
  0x7e   :  { %7028 = vst [vmem:[#allocation114_spill] sm:$0xff] %v5101_v50  ;;  %v3127_v18 = vld [vmem:[%s6599_s1 + $0x238] sm:$0xf0]  ;;  %v5113_v10 = vor.u32 %v3749_v43, %v3063_v53  ;;  %v3797_v32 = vld [vmem:[%s6599_s1 + $0x334] sm:$0xf]  ;;  %1284 = vmatpush.bf16.msrb.mxu3 %v5101_v50 }
  0x7f   :  { %7029 = vst [vmem:[#allocation115_spill] sm:$0xff] %v5111_v23  ;;  %v3255_v46 = vld [vmem:[%s6599_s1 + $0x338] sm:$0xf0]  ;;  %v3779_v1 = vld [vmem:[%s6599_s1 + $0x2a4] sm:$0xf]  ;;  %v5141_v19 = vor.u32 %v3765_v61, %v3127_v18  ;;  %1266 = vmatpush.bf16.msrb.mxu2 %v5111_v23 }
  0x80   :  { %7030 = vst [vmem:[#allocation116_spill] sm:$0xff] %v5113_v10  ;;  %v3183_v37 = vld [vmem:[%s6599_s1 + $0x2a8] sm:$0xf0]  ;;  %v3747_v35 = vld [vmem:[%s6599_s1 + $0x1a4] sm:$0xf]  ;;  %v5143_v52 = vor.u32 %v3797_v32, %v3255_v46  ;;  %1228 = vmatpush.bf16.msrb.mxu0 %v5113_v10  ;;  %1180 = vmatmul.bf16.gmra.mxu1 %v4444_v39 }
  0x81   :  { %v3055_v15 = vld [vmem:[%s6599_s1 + $0x1a8] sm:$0xf0]  ;;  %v2841_v43 = vld [vmem:[%s6600_s0 + $0x68] sm:$0xf]  ;;  %7031 = vst [vmem:[#allocation117_spill] sm:$0xff] %v5141_v19  ;;  %v5153_v31 = vor.u32 %v3779_v1, %v3183_v37  ;;  %1247 = vmatpush.bf16.msrb.mxu1 %v5141_v19  ;;  %1199 = vmatmul.bf16.gmra.mxu2 %v4457_v41 }
  0x82   :  { %v3856_v53 = vld [vmem:[%s6600_s0 + $0x88] sm:$0xf0]  ;;  %7032 = vst [vmem:[#allocation118_spill] sm:$0xff] %v5143_v52  ;;  %v3763_v20 = vld [vmem:[%s6599_s1 + $0x224] sm:$0xf]  ;;  %v5155_v2 = vor.u32 %v3747_v35, %v3055_v15  ;;  %1285 = vmatpush.bf16.msrb.mxu3 %v5143_v52 }
  0x83   :  { %v3119_v42 = vld [vmem:[%s6599_s1 + $0x228] sm:$0xf0]  ;;  %7033 = vst [vmem:[#allocation119_spill] sm:$0xff] %v5153_v31  ;;  %v3795_v61 = vld [vmem:[%s6599_s1 + $0x324] sm:$0xf]  ;;  %v5166_v46 = vor.u32 %v3856_v53, %v2841_v43  ;;  %1267 = vmatpush.bf16.msrb.mxu2 %v5153_v31  ;;  %1218 = vmatmul.bf16.gmra.mxu3 %v4459_v55 }
  0x84   :  { %v3247_v18 = vld [vmem:[%s6599_s1 + $0x328] sm:$0xf0]  ;;  %v3777_v32 = vld [vmem:[%s6599_s1 + $0x294] sm:$0xf]  ;;  %v3175_v1 = vld [vmem:[%s6599_s1 + $0x298] sm:$0xf0]  ;;  %v5179_v15 = vor.u32 %v3763_v20, %v3119_v42  ;;  %1229 = vmatpush.bf16.msrb.mxu0 %v5155_v2 }
  0x85   :  { %v3745_v37 = vld [vmem:[%s6599_s1 + $0x194] sm:$0xf]  ;;  %v3047_v35 = vld [vmem:[%s6599_s1 + $0x198] sm:$0xf0]  ;;  %v5181_v43 = vor.u32 %v3795_v61, %v3247_v18  ;;  %v5191_v50 = vor.u32 %v3777_v32, %v3175_v1  ;;  %v3775_v61 = vld [vmem:[%s6599_s1 + $0x284] sm:$0xf]  ;;  %1161 = vmatmul.bf16.gmra.mxu0 %v5166_v46 }
  0x86   :  { %v3761_v53 = vld [vmem:[%s6599_s1 + $0x214] sm:$0xf]  ;;  %v3111_v23 = vld [vmem:[%s6599_s1 + $0x218] sm:$0xf0]  ;;  %v5193_v19 = vor.u32 %v3745_v37, %v3047_v35  ;;  %v3167_v18 = vld [vmem:[%s6599_s1 + $0x288] sm:$0xf0]  ;;  %1248 = vmatpush.bf16.msrb.mxu1 %v5179_v15 }
  0x87   :  { %7034 = vst [vmem:[#allocation120_spill] sm:$0xff] %v5181_v43  ;;  %v3793_v42 = vld [vmem:[%s6599_s1 + $0x314] sm:$0xf]  ;;  %v3239_v20 = vld [vmem:[%s6599_s1 + $0x318] sm:$0xf0]  ;;  %1286 = vmatpush.bf16.msrb.mxu3 %v5181_v43  ;;  %v5225_v35 = vor.u32 %v3761_v53, %v3111_v23  ;;  %1268 = vmatpush.bf16.msrb.mxu2 %v5191_v50  ;;  %v5234_v41 = vor.u32 %v3775_v61, %v3167_v18 }
  0x88   :  { %7035 = vst [vmem:[#allocation121_spill] sm:$0xff] %v5191_v50  ;;  %v3743_v32 = vld [vmem:[%s6599_s1 + $0x184] sm:$0xf]  ;;  %v3039_v1 = vld [vmem:[%s6599_s1 + $0x188] sm:$0xf0]  ;;  %v5227_v31 = vor.u32 %v3793_v42, %v3239_v20  ;;  %1230 = vmatpush.bf16.msrb.mxu0 %v5193_v19 }
  0x89   :  { %7036 = vst [vmem:[#allocation122_spill] sm:$0xff] %v5193_v19  ;;  %v3821_v39 = vld [vmem:[%s6599_s1 + $0x3f4] sm:$0xf]  ;;  %v3351_v37 = vld [vmem:[%s6599_s1 + $0x3f8] sm:$0xf0]  ;;  %v5236_v52 = vor.u32 %v3743_v32, %v3039_v1 }
  0x8a   :  { %7037 = vst [vmem:[#allocation123_spill] sm:$0xff] %v5225_v35  ;;  %v3759_v55 = vld [vmem:[%s6599_s1 + $0x204] sm:$0xf]  ;;  %v3103_v43 = vld [vmem:[%s6599_s1 + $0x208] sm:$0xf0]  ;;  %v5247_v42 = vor.u32 %v3821_v39, %v3351_v37  ;;  %1249 = vmatpush.bf16.msrb.mxu1 %v5225_v35 }
  0x8b   :  { %7038 = vst [vmem:[#allocation124_spill] sm:$0xff] %v5227_v31  ;;  %v3791_v23 = vld [vmem:[%s6599_s1 + $0x304] sm:$0xf]  ;;  %v3231_v53 = vld [vmem:[%s6599_s1 + $0x308] sm:$0xf0]  ;;  %1287 = vmatpush.bf16.msrb.mxu3 %v5227_v31  ;;  %v5263_v1 = vor.u32 %v3759_v55, %v3103_v43  ;;  %1269 = vmatpush.bf16.msrb.mxu2 %v5234_v41 }
  0x8c   :  { %7039 = vst [vmem:[#allocation125_spill] sm:$0xff] %v5234_v41  ;;  %v3837_v20 = vld [vmem:[%s6599_s1 + $0x474] sm:$0xf]  ;;  %v3415_v61 = vld [vmem:[%s6599_s1 + $0x478] sm:$0xf0]  ;;  %v5265_v39 = vor.u32 %v3791_v23, %v3231_v53  ;;  %1231 = vmatpush.bf16.msrb.mxu0 %v5236_v52 }
  0x8d   :  { %7040 = vst [vmem:[#allocation126_spill] sm:$0xff] %v5236_v52  ;;  %v3819_v18 = vld [vmem:[%s6599_s1 + $0x3e4] sm:$0xf]  ;;  %v3343_v32 = vld [vmem:[%s6599_s1 + $0x3e8] sm:$0xf0]  ;;  %v5269_v37 = vor.u32 %v3837_v20, %v3415_v61 }
  0x8e   :  { %7041 = vst [vmem:[#allocation127_spill] sm:$0xff] %v5247_v42  ;;  %v5273_v50 = vor.u32 %v3819_v18, %v3343_v32  ;;  %v3835_v31 = vld [vmem:[%s6599_s1 + $0x464] sm:$0xf]  ;;  %v3407_v43 = vld [vmem:[%s6599_s1 + $0x468] sm:$0xf0]  ;;  %1250 = vmatpush.bf16.msrb.mxu1 %v5263_v1 }
  0x8f   :  { %7042 = vst [vmem:[#allocation128_spill] sm:$0xff] %v5263_v1  ;;  %1459 = vmatpush.bf16.msra.mxu2 %v3940_v3  ;;  %1288 = vmatpush.bf16.msrb.mxu3 %v5265_v39  ;;  %v5285_v55 = vor.u32 %v3835_v31, %v3407_v43  ;;  %v3817_v23 = vld [vmem:[%s6599_s1 + $0x3d4] sm:$0xf]  ;;  %v3335_v53 = vld [vmem:[%s6599_s1 + $0x3d8] sm:$0xf0] }
  0x90   :  { %7043 = vst [vmem:[#allocation129_spill] sm:$0xff] %v5265_v39  ;;  %1300 = vmatpush.bf16.msra.mxu0 %v5247_v42  ;;  %v3833_v20 = vld [vmem:[%s6599_s1 + $0x454] sm:$0xf]  ;;  %v3399_v31 = vld [vmem:[%s6599_s1 + $0x458] sm:$0xf0]  ;;  %v5301_v61 = vor.u32 %v3817_v23, %v3335_v53 }
  0x91   :  { %7044 = vst [vmem:[#allocation130_spill] sm:$0xff] %v5285_v55  ;;  %v5305_v18 = vor.u32 %v3833_v20, %v3399_v31  ;;  %v3815_v32 = vld [vmem:[%s6599_s1 + $0x3c4] sm:$0xf]  ;;  %v3327_v43 = vld [vmem:[%s6599_s1 + $0x3c8] sm:$0xf0]  ;;  %1251 = vmatmul.bf16.vlgmr.msrb.gmra.mxu1 %v4657_v14  ;;  %1270 = vmatmul.bf16.vlgmr.msrb.gmra.mxu2 %v4659_v47 }
  0x92   :  { %1319 = vmatpush.bf16.msra.mxu1 %v5269_v37  ;;  %7045 = vst [vmem:[#allocation131_spill] sm:$0xff] %v5301_v61  ;;  %v3831_v23 = vld [vmem:[%s6599_s1 + $0x444] sm:$0xf]  ;;  %v3391_v53 = vld [vmem:[%s6599_s1 + $0x448] sm:$0xf0]  ;;  %v5325_v20 = vor.u32 %v3815_v32, %v3327_v43 }
  0x93   :  { %1478 = vmatpush.bf16.msra.mxu3 %v3951_v7  ;;  %1460 = vmatpush.bf16.msra.mxu2 %v3978_v16  ;;  %7046 = vst [vmem:[#allocation132_spill] sm:$0xff] %v5305_v18  ;;  %v5329_v14 = vor.u32 %v3831_v23, %v3391_v53  ;;  %v3319_v47 = vld [vmem:[%s6599_s1 + $0x3b8] sm:$0xf0]  ;;  %v3811_v23 = vld [vmem:[%s6599_s1 + $0x3a4] sm:$0xf] }
  0x94   :  { %1301 = vmatpush.bf16.msra.mxu0 %v5273_v50  ;;  %1289 = vmatmul.bf16.vlgmr.msrb.gmra.mxu3 %v4672_v60  ;;  %7047 = vst [vmem:[#allocation133_spill] sm:$0xff] %v5325_v20  ;;  %v3829_v60 = vld [vmem:[%s6599_s1 + $0x434] sm:$0xf]  ;;  %v3383_v31 = vld [vmem:[%s6599_s1 + $0x438] sm:$0xf0] }
  0x95   :  { %1232 = vmatmul.bf16.vlgmr.msrb.gmra.mxu0 %v4288_v26  ;;  %7048 = vst [vmem:[#allocation134_spill] sm:$0xff] %v5329_v14  ;;  %v3813_v26 = vld [vmem:[%s6599_s1 + $0x3b4] sm:$0xf]  ;;  %v5349_v43 = vor.u32 %v3829_v60, %v3383_v31  ;;  %v3311_v53 = vld [vmem:[%s6599_s1 + $0x3a8] sm:$0xf0]  ;;  %v7087_v16 = vld [vmem:[#allocation41_spill] sm:$0xff] }
  0x96   :  { %1320 = vmatpush.bf16.msra.mxu1 %v5285_v55  ;;  %v5345_v32 = vor.u32 %v3813_v26, %v3319_v47  ;;  %v3375_v26 = vld [vmem:[%s6599_s1 + $0x428] sm:$0xf0]  ;;  %v5365_v47 = vor.u32 %v3811_v23, %v3311_v53  ;;  %v3809_v31 = vld [vmem:[%s6599_s1 + $0x394] sm:$0xf]  ;;  %v3367_v23 = vld [vmem:[%s6599_s1 + $0x418] sm:$0xf0] }
  0x97   :  { %1479 = vmatpush.bf16.msra.mxu3 %v3980_v17  ;;  %1461 = vmatpush.bf16.msra.mxu2 %v4015_v29  ;;  %7050 = vst [vmem:[#allocation136_spill] sm:$0xff] %v5349_v43 }
  0x98   :  { %1302 = vmatpush.bf16.msra.mxu0 %v5301_v61  ;;  %7049 = vst [vmem:[#allocation135_spill] sm:$0xff] %v5345_v32 }
  0x99   :  { %7051 = vst [vmem:[#allocation137_spill] sm:$0xff] %v5365_v47 }
  0x9a   :  { %1321 = vmatpush.bf16.msra.mxu1 %v5305_v18 }
  0x9b   :  { %1480 = vmatpush.bf16.msra.mxu3 %v4028_v33  ;;  %1462 = vmatpush.bf16.msra.mxu2 %v4060_v44  ;;  %v3827_v44 = vld [vmem:[%s6599_s1 + $0x424] sm:$0xf] }
  0x9c   :  { %1303 = vmatpush.bf16.msra.mxu0 %v5325_v20  ;;  %v5369_v60 = vor.u32 %v3827_v44, %v3375_v26  ;;  %v3807_v26 = vld [vmem:[%s6599_s1 + $0x384] sm:$0xf] }
  0x9e   :  { %1322 = vmatpush.bf16.msra.mxu1 %v5329_v14  ;;  %7052 = vst [vmem:[#allocation138_spill] sm:$0xff] %v5369_v60 }
  0x9f   :  { %1481 = vmatpush.bf16.msra.mxu3 %v4064_v45  ;;  %1463 = vmatpush.bf16.msra.mxu2 %v4096_v56  ;;  %v3303_v45 = vld [vmem:[%s6599_s1 + $0x398] sm:$0xf0]  ;;  %v3825_v56 = vld [vmem:[%s6599_s1 + $0x414] sm:$0xf] }
  0xa0   :  { %1304 = vmatpush.bf16.msra.mxu0 %v5345_v32  ;;  %v5385_v44 = vor.u32 %v3809_v31, %v3303_v45  ;;  %v5389_v53 = vor.u32 %v3825_v56, %v3367_v23  ;;  %v3823_v45 = vld [vmem:[%s6599_s1 + $0x404] sm:$0xf]  ;;  %v3359_v56 = vld [vmem:[%s6599_s1 + $0x408] sm:$0xf0]  ;;  %v3857_v23 = vld [vmem:[%s6600_s0 + $0x94] sm:$0xf] }
  0xa1   :  { %1256 = vmatmul.bf16.gmra.mxu1 %v4839_v59  ;;  %1275 = vmatmul.bf16.gmra.mxu2 %v4841_v48  ;;  %v5419_v48 = vld [vmem:[%s6601_s2] sm:$0x3]  ;;  %v3441_v59 = vld [vmem:[%s6600_s0 + $0x90] sm:$0xf] }
  0xa2   :  { %1323 = vmatpush.bf16.msra.mxu1 %v5349_v43  ;;  %7053 = vst [vmem:[#allocation139_spill] sm:$0xff] %v5385_v44 }
  0xa3   :  { %1482 = vmatpush.bf16.msra.mxu3 %v4100_v57  ;;  %1464 = vmatpush.bf16.msra.mxu2 %v4132_v5  ;;  %7054 = vst [vmem:[#allocation140_spill] sm:$0xff] %v5389_v53  ;;  %v3295_v57 = vld [vmem:[%s6599_s1 + $0x388] sm:$0xf0] }
  0xa4   :  { %1305 = vmatpush.bf16.msra.mxu0 %v5365_v47  ;;  %1294 = vmatmul.bf16.gmra.mxu3 %v4852_v28  ;;  %v5409_v31 = vor.u32 %v3807_v26, %v3295_v57  ;;  %v5427_v57 = vperm.slane %v5419_v48, 0  ;;  %v3861_v28 = vld [vmem:[%s6600_s0 + $0xb0] sm:$0xf0]  ;;  %v3443_v26 = vld [vmem:[%s6600_s0 + $0xb4] sm:$0xf0] }
  0xa5   :  { %1237 = vmatmul.bf16.gmra.mxu0 %v4468_v13  ;;  %v5413_v13 = vor.u32 %v3823_v45, %v3359_v56  ;;  %v1005_v45 = vpop.f32.mrf.mxu0 }
  0xa6   :  { %1324 = vmatpush.bf16.msra.mxu1 %v5369_v60  ;;  %7055 = vst [vmem:[#allocation141_spill] sm:$0xff] %v5409_v31  ;;  %v1006_v56 = vadd.f32 %v1005_v45, %v5427_v57 }
  0xa7   :  { %1483 = vmatpush.bf16.msra.mxu3 %v4136_v6  ;;  %1465 = vmatpush.bf16.msra.mxu2 %v4171_v24  ;;  %7056 = vst [vmem:[#allocation142_spill] sm:$0xff] %v5413_v13 }
  0xa8   :  { %1306 = vmatpush.bf16.msra.mxu0 %v5385_v44  ;;  %7057 = vst [vmem:[#allocation143_spill] sm:$0xff] %v5427_v57 }
  0xaa   :  { %1325 = vmatpush.bf16.msra.mxu1 %v5389_v53 }
  0xab   :  { %1484 = vmatpush.bf16.msra.mxu3 %v4184_v30  ;;  %1466 = vmatpush.bf16.msra.mxu2 %v4222_v49  ;;  %v7062_v30 = vld [vmem:[#allocation47_spill] sm:$0xff] }
  0xac   :  { %1307 = vmatpush.bf16.msra.mxu0 %v5409_v31 }
  0xae   :  { %1326 = vmatpush.bf16.msra.mxu1 %v5413_v13 }
  0xaf   :  { %1485 = vmatpush.bf16.msra.mxu3 %v4235_v54  ;;  %1535 = vmatpush.bf16.msrb.mxu2 %v4290_v27  ;;  %v5446_v27 = vor.u32 %v3861_v28, %v3441_v59  ;;  %v5448_v54 = vor.u32 %v3857_v23, %v3443_v26  ;;  %v1043_v59 = vpop.f32.mrf.mxu2  ;;  %v7058_v28 = vld [vmem:[#allocation43_spill] sm:$0xff]  ;;  %v1062_v26 = vpop.f32.mrf.mxu3 }
  0xb0   :  { %1497 = vmatpush.bf16.msrb.mxu0 %v3953_v8  ;;  %v7103_v8 = vld [vmem:[#allocation57_spill] sm:$0xff] }
  0xb1   :  { %1327 = vmatmul.bf16.vlgmr.msra.gmra.mxu1 %v5010_v9  ;;  %1467 = vmatmul.bf16.vlgmr.msra.gmra.mxu2 %v5446_v27 }
  0xb2   :  { %1516 = vmatpush.bf16.msrb.mxu1 %v3965_v12 }
  0xb3   :  { %1554 = vmatpush.bf16.msrb.mxu3 %v4264_v11  ;;  %1536 = vmatpush.bf16.msrb.mxu2 %v4330_v51  ;;  %v1024_v11 = vpop.f32.mrf.mxu1  ;;  %v7061_v51 = vld [vmem:[#allocation17_spill] sm:$0xff] }
  0xb4   :  { %1498 = vmatpush.bf16.msrb.mxu0 %v3992_v21  ;;  %v1025_v49 = vadd.f32 %v1024_v11, %v1006_v56  ;;  %1486 = vmatmul.bf16.vlgmr.msra.gmra.mxu3 %v5448_v54  ;;  %v1007_v11 = vpop.f32.mrf.mxu0  ;;  %v7059_v56 = vld [vmem:[#allocation48_spill] sm:$0xff] }
  0xb5   :  { %1308 = vmatmul.bf16.vlgmr.msra.gmra.mxu0 %v4674_v4  ;;  %v1008_v4 = vadd.f32 %v1007_v11, %v5427_v57  ;;  %v7063_v11 = vld [vmem:[#allocation52_spill] sm:$0xff] }
  0xb6   :  { %1517 = vmatpush.bf16.msrb.mxu1 %v4003_v25  ;;  %v1044_v23 = vadd.f32 %v1043_v59, %v1025_v49  ;;  %v3477_v49 = vld [vmem:[%s6600_s0 + $0xd8] sm:$0xf]  ;;  %v3870_v59 = vld [vmem:[%s6600_s0 + $0xf8] sm:$0xf0]  ;;  %v7088_v21 = vld [vmem:[#allocation72_spill] sm:$0xff] }
  0xb7   :  { %1555 = vmatpush.bf16.msrb.mxu3 %v4309_v40  ;;  %1537 = vmatpush.bf16.msrb.mxu2 %v4366_v22  ;;  %v7060_v40 = vld [vmem:[#allocation16_spill] sm:$0xff]  ;;  %v1064_v24 = vpop.f32.mrf.mxu3 }
  0xb8   :  { %1499 = vmatpush.bf16.msrb.mxu0 %v4030_v34  ;;  %v5461_v9 = vadd.f32 %v1062_v26, %v1044_v23  ;;  %v3866_v23 = vld [vmem:[%s6600_s0 + $0xdc] sm:$0xf]  ;;  %v3479_v26 = vld [vmem:[%s6600_s0 + $0xfc] sm:$0xf0] }
  0xba   :  { %1518 = vmatpush.bf16.msrb.mxu1 %v4042_v38  ;;  %v5486_v38 = vor.u32 %v3866_v23, %v3479_v26 }
  0xbb   :  { %1556 = vmatpush.bf16.msrb.mxu3 %v7058_v28  ;;  %v1026_v45 = vpop.f32.mrf.mxu1  ;;  %1538 = vmatpush.bf16.msrb.mxu2 %v7059_v56  ;;  %v7066_v56 = vld [vmem:[#allocation51_spill] sm:$0xff] }
  0xbc   :  { %1500 = vmatpush.bf16.msrb.mxu0 %v7060_v40  ;;  %v1027_v22 = vadd.f32 %v1026_v45, %v1008_v4  ;;  %v7064_v4 = vld [vmem:[#allocation20_spill] sm:$0xff]  ;;  %v1045_v45 = vpop.f32.mrf.mxu2  ;;  %v1010_v6 = vpop.f32.mrf.mxu0  ;;  %v5484_v40 = vor.u32 %v3870_v59, %v3477_v49  ;;  %v7074_v49 = vld [vmem:[#allocation29_spill] sm:$0xff] }
  0xbd   :  { %v1011_v5 = vadd.f32 %v1010_v6, %v5427_v57  ;;  %v7072_v6 = vld [vmem:[#allocation60_spill] sm:$0xff] }
  0xbe   :  { %1519 = vmatpush.bf16.msrb.mxu1 %v7061_v51  ;;  %v1046_v28 = vadd.f32 %v1045_v45, %v1027_v22  ;;  %v7071_v22 = vld [vmem:[#allocation87_spill] sm:$0xff] }
  0xbf   :  { %1557 = vmatpush.bf16.msrb.mxu3 %v7062_v30  ;;  %1539 = vmatpush.bf16.msrb.mxu2 %v7063_v11  ;;  %v7065_v30 = vld [vmem:[#allocation21_spill] sm:$0xff]  ;;  %v7067_v11 = vld [vmem:[#allocation56_spill] sm:$0xff]  ;;  %v1067_v59 = vpop.f32.mrf.mxu3 }
  0xc0   :  { %1501 = vmatpush.bf16.msrb.mxu0 %v7064_v4  ;;  %v5488_v33 = vadd.f32 %v1064_v24, %v1046_v28  ;;  %v7068_v4 = vld [vmem:[#allocation24_spill] sm:$0xff] }
  0xc1   :  { %1332 = vmatmul.bf16.gmra.mxu1 %v5166_v46  ;;  %1472 = vmatmul.bf16.gmra.mxu2 %v5484_v40  ;;  %v7073_v24 = vld [vmem:[#allocation28_spill] sm:$0xff] }
  0xc2   :  { %1520 = vmatpush.bf16.msrb.mxu1 %v7065_v30  ;;  %v7069_v30 = vld [vmem:[#allocation25_spill] sm:$0xff] }
  0xc3   :  { %1558 = vmatpush.bf16.msrb.mxu3 %v7066_v56  ;;  %v1029_v51 = vpop.f32.mrf.mxu1  ;;  %1540 = vmatpush.bf16.msrb.mxu2 %v7067_v11  ;;  %v7070_v56 = vld [vmem:[#allocation55_spill] sm:$0xff]  ;;  %v7078_v11 = vld [vmem:[#allocation33_spill] sm:$0xff] }
  0xc4   :  { %1502 = vmatpush.bf16.msrb.mxu0 %v7068_v4  ;;  %v1030_v29 = vadd.f32 %v1029_v51, %v1011_v5  ;;  %1491 = vmatmul.bf16.gmra.mxu3 %v5486_v38  ;;  %v1048_v28 = vpop.f32.mrf.mxu2  ;;  %v7075_v5 = vld [vmem:[#allocation59_spill] sm:$0xff]  ;;  %v1012_v23 = vpop.f32.mrf.mxu0  ;;  %v7085_v4 = vld [vmem:[#allocation38_spill] sm:$0xff] }
  0xc5   :  { %1313 = vmatmul.bf16.gmra.mxu0 %v7071_v22  ;;  %v1013_v26 = vadd.f32 %v1012_v23, %v5427_v57  ;;  %v7076_v22 = vld [vmem:[#allocation66_spill] sm:$0xff]  ;;  %v7080_v23 = vld [vmem:[#allocation68_spill] sm:$0xff] }
  0xc6   :  { %1521 = vmatpush.bf16.msrb.mxu1 %v7069_v30  ;;  %v1049_v51 = vadd.f32 %v1048_v28, %v1030_v29  ;;  %v3449_v29 = vld [vmem:[%s6600_s0 + $0x98] sm:$0xf]  ;;  %v3862_v28 = vld [vmem:[%s6600_s0 + $0xb8] sm:$0xf0] }
  0xc7   :  { %1559 = vmatpush.bf16.msrb.mxu3 %v7070_v56  ;;  %1541 = vmatpush.bf16.msrb.mxu2 %v7072_v6  ;;  %v7077_v56 = vld [vmem:[#allocation32_spill] sm:$0xff]  ;;  %v5537_v30 = vor.u32 %v3862_v28, %v3449_v29  ;;  %v7089_v28 = vld [vmem:[#allocation75_spill] sm:$0xff] }
  0xc8   :  { %1503 = vmatpush.bf16.msrb.mxu0 %v7073_v24  ;;  %v5503_v46 = vadd.f32 %v1067_v59, %v1049_v51  ;;  %v7079_v24 = vld [vmem:[#allocation63_spill] sm:$0xff]  ;;  %v7081_v51 = vld [vmem:[#allocation34_spill] sm:$0xff]  ;;  %v3858_v59 = vld [vmem:[%s6600_s0 + $0x9c] sm:$0xf] }
  0xca   :  { %1522 = vmatpush.bf16.msrb.mxu1 %v7074_v49  ;;  %v1069_v49 = vpop.f32.mrf.mxu3 }
  0xcb   :  { %1560 = vmatpush.bf16.msrb.mxu3 %v7075_v5  ;;  %v1031_v45 = vpop.f32.mrf.mxu1  ;;  %1542 = vmatpush.bf16.msrb.mxu2 %v7076_v22  ;;  %v7083_v22 = vld [vmem:[#allocation65_spill] sm:$0xff]  ;;  %v3859_v5 = vld [vmem:[%s6600_s0 + $0xa4] sm:$0xf] }
  0xcc   :  { %1504 = vmatpush.bf16.msrb.mxu0 %v7077_v56  ;;  %v1032_v6 = vadd.f32 %v1031_v45, %v1013_v26  ;;  %v3451_v26 = vld [vmem:[%s6600_s0 + $0xbc] sm:$0xf0]  ;;  %v1081_v57 = vpop.f32.mrf.mxu0 }
  0xcd   :  { %v3457_v45 = vld [vmem:[%s6600_s0 + $0xa0] sm:$0xf] }
  0xce   :  { %1523 = vmatpush.bf16.msrb.mxu1 %v7078_v11  ;;  %v1050_v11 = vpop.f32.mrf.mxu2 }
  0xcf   :  { %1561 = vmatpush.bf16.msrb.mxu3 %v7079_v24  ;;  %1611 = vmatpush.bf16.msra.mxu2 %v7080_v23  ;;  %v7082_v24 = vld [vmem:[#allocation37_spill] sm:$0xff]  ;;  %v3863_v23 = vld [vmem:[%s6600_s0 + $0xc0] sm:$0xf0]  ;;  %v1051_v56 = vadd.f32 %v1050_v11, %v1032_v6  ;;  %v1082_v6 = vadd.f32 %v1081_v57, %v5461_v9 }
  0xd0   :  { %1573 = vmatpush.bf16.msra.mxu0 %v7081_v51  ;;  %v3459_v51 = vld [vmem:[%s6600_s0 + $0xc4] sm:$0xf0]  ;;  %v5543_v25 = vor.u32 %v3863_v23, %v3457_v45  ;;  %v7091_v23 = vld [vmem:[#allocation45_spill] sm:$0xff]  ;;  %v7094_v45 = vld [vmem:[#allocation46_spill] sm:$0xff] }
  0xd1   :  { %v5545_v17 = vor.u32 %v3859_v5, %v3459_v51  ;;  %v5549_v11 = vadd.f32 %v1069_v49, %v1051_v56  ;;  %v7090_v5 = vld [vmem:[#allocation42_spill] sm:$0xff]  ;;  %v7092_v51 = vld [vmem:[#allocation76_spill] sm:$0xff] }
  0xd2   :  { %1592 = vmatpush.bf16.msra.mxu1 %v7082_v24  ;;  %v5539_v24 = vor.u32 %v3858_v59, %v3451_v26  ;;  %1543 = vmatmul.bf16.vlgmr.msrb.gmra.mxu2 %v5543_v25  ;;  %v1138_v49 = vpop.f32.mrf.mxu3  ;;  %v7093_v26 = vld [vmem:[#allocation79_spill] sm:$0xff] }
  0xd3   :  { %1630 = vmatpush.bf16.msra.mxu3 %v7083_v22  ;;  %v7084_v22 = vld [vmem:[#allocation71_spill] sm:$0xff]  ;;  %v1100_v34 = vpop.f32.mrf.mxu1  ;;  %7086 = vst [vmem:[#allocation87_spill] sm:$0xff] %v5545_v17 }
  0xd4   :  { %1612 = vmatpush.bf16.msra.mxu2 %v7084_v22  ;;  %1574 = vmatpush.bf16.msra.mxu0 %v7085_v4  ;;  %v1101_v29 = vadd.f32 %v1100_v34, %v1082_v6  ;;  %v1083_v34 = vpop.f32.mrf.mxu0 }
  0xd5   :  { %1505 = vmatmul.bf16.vlgmr.msrb.gmra.mxu0 %v5537_v30  ;;  %1524 = vmatmul.bf16.vlgmr.msrb.gmra.mxu1 %v5539_v24  ;;  %v1084_v59 = vadd.f32 %v1083_v34, %v5488_v33  ;;  %v3867_v33 = vld [vmem:[%s6600_s0 + $0xe4] sm:$0xf]  ;;  %v3868_v34 = vld [vmem:[%s6600_s0 + $0xec] sm:$0xf] }
  0xd6   :  { %1593 = vmatpush.bf16.msra.mxu1 %v7087_v16  ;;  %1562 = vmatmul.bf16.vlgmr.msrb.gmra.mxu3 %v5545_v17  ;;  %v1119_v56 = vpop.f32.mrf.mxu2 }
  0xd7   :  { %1631 = vmatpush.bf16.msra.mxu3 %v7088_v21  ;;  %v1120_v57 = vadd.f32 %v1119_v56, %v1101_v29  ;;  %v7096_v21 = vld [vmem:[#allocation80_spill] sm:$0xff]  ;;  %v3871_v29 = vld [vmem:[%s6600_s0 + $0x100] sm:$0xf0]  ;;  %v3487_v56 = vld [vmem:[%s6600_s0 + $0x104] sm:$0xf0] }
  0xd8   :  { %1613 = vmatpush.bf16.msra.mxu2 %v7089_v28  ;;  %1575 = vmatpush.bf16.msra.mxu0 %v7090_v5  ;;  %v7095_v28 = vld [vmem:[#allocation49_spill] sm:$0xff]  ;;  %v5597_v16 = vor.u32 %v3867_v33, %v3487_v56 }
  0xd9   :  { %v5563_v6 = vadd.f32 %v1138_v49, %v1120_v57  ;;  %v3493_v49 = vld [vmem:[%s6600_s0 + $0xe8] sm:$0xf]  ;;  %v3872_v57 = vld [vmem:[%s6600_s0 + $0x108] sm:$0xf0] }
  0xda   :  { %1594 = vmatpush.bf16.msra.mxu1 %v7091_v23  ;;  %v1140_v23 = vpop.f32.mrf.mxu3  ;;  %v5599_v7 = vor.u32 %v3872_v57, %v3493_v49  ;;  %v7108_v49 = vld [vmem:[#allocation62_spill] sm:$0xff] }
  0xdb   :  { %1632 = vmatpush.bf16.msra.mxu3 %v7092_v51  ;;  %v1102_v9 = vpop.f32.mrf.mxu1  ;;  %v3485_v51 = vld [vmem:[%s6600_s0 + $0xe0] sm:$0xf] }
  0xdc   :  { %1614 = vmatpush.bf16.msra.mxu2 %v7093_v26  ;;  %1576 = vmatpush.bf16.msra.mxu0 %v7094_v45  ;;  %v1103_v22 = vadd.f32 %v1102_v9, %v1084_v59  ;;  %v3495_v9 = vld [vmem:[%s6600_s0 + $0x10c] sm:$0xf0]  ;;  %v7097_v59 = vld [vmem:[#allocation83_spill] sm:$0xff]  ;;  %v7099_v26 = vld [vmem:[#allocation53_spill] sm:$0xff]  ;;  %v5595_v5 = vor.u32 %v3871_v29, %v3485_v51  ;;  %v1086_v17 = vpop.f32.mrf.mxu0 }
  0xdd   :  { %v5601_v3 = vor.u32 %v3868_v34, %v3495_v9  ;;  %v7104_v51 = vld [vmem:[#allocation89_spill] sm:$0xff]  ;;  %v7109_v34 = vld [vmem:[#allocation67_spill] sm:$0xff] }
  0xde   :  { %1595 = vmatpush.bf16.msra.mxu1 %v7095_v28  ;;  %v7100_v28 = vld [vmem:[#allocation84_spill] sm:$0xff]  ;;  %v1121_v45 = vpop.f32.mrf.mxu2 }
  0xdf   :  { %1633 = vmatpush.bf16.msra.mxu3 %v7096_v21  ;;  %v7098_v21 = vld [vmem:[#allocation50_spill] sm:$0xff]  ;;  %v1122_v4 = vadd.f32 %v1121_v45, %v1103_v22  ;;  %v7107_v22 = vld [vmem:[#allocation61_spill] sm:$0xff] }
  0xe0   :  { %1615 = vmatpush.bf16.msra.mxu2 %v7097_v59  ;;  %1577 = vmatpush.bf16.msra.mxu0 %v7098_v21  ;;  %v1087_v59 = vadd.f32 %v1086_v17, %v5503_v46  ;;  %v7101_v21 = vld [vmem:[#allocation88_spill] sm:$0xff]  ;;  %v7106_v46 = vld [vmem:[#allocation58_spill] sm:$0xff] }
  0xe1   :  { %v7105_v17 = vld [vmem:[#allocation92_spill] sm:$0xff] }
  0xe2   :  { %1596 = vmatpush.bf16.msra.mxu1 %v7099_v26  ;;  %v7102_v26 = vld [vmem:[#allocation54_spill] sm:$0xff]  ;;  %1548 = vmatmul.bf16.gmra.mxu2 %v5599_v7 }
  0xe3   :  { %1634 = vmatpush.bf16.msra.mxu3 %v7100_v28  ;;  %v1105_v12 = vpop.f32.mrf.mxu1  ;;  %v5606_v28 = vadd.f32 %v1140_v23, %v1122_v4 }
  0xe4   :  { %1616 = vmatpush.bf16.msra.mxu2 %v7101_v21  ;;  %1578 = vmatpush.bf16.msra.mxu0 %v7102_v26  ;;  %v1106_v29 = vadd.f32 %v1105_v12, %v1087_v59  ;;  %v1088_v12 = vpop.f32.mrf.mxu0  ;;  %v3465_v59 = vld [vmem:[%s6600_s0 + $0xa8] sm:$0xf]  ;;  %v5654_v21 = vperm.slane %v5419_v48, 1  ;;  %v7117_v48 = vld [vmem:[#allocation108_spill] sm:$0xff] }
  0xe5   :  { %1510 = vmatmul.bf16.gmra.mxu0 %v5595_v5  ;;  %1529 = vmatmul.bf16.gmra.mxu1 %v5597_v16  ;;  %v1143_v23 = vpop.f32.mrf.mxu3  ;;  %v1089_v56 = vadd.f32 %v1088_v12, %v5549_v11  ;;  %v3864_v11 = vld [vmem:[%s6600_s0 + $0xc8] sm:$0xf0]  ;;  %v3473_v12 = vld [vmem:[%s6600_s0 + $0xb0] sm:$0xf] }
  0xe6   :  { %1597 = vmatpush.bf16.msra.mxu1 %v7103_v8  ;;  %1567 = vmatmul.bf16.gmra.mxu3 %v5601_v3  ;;  %v1124_v4 = vpop.f32.mrf.mxu2 }
  0xe7   :  { %1635 = vmatpush.bf16.msra.mxu3 %v7104_v51  ;;  %v1125_v45 = vadd.f32 %v1124_v4, %v1106_v29  ;;  %v7110_v29 = vld [vmem:[#allocation64_spill] sm:$0xff]  ;;  %v3860_v4 = vld [vmem:[%s6600_s0 + $0xac] sm:$0xf] }
  0xe8   :  { %1617 = vmatpush.bf16.msra.mxu2 %v7105_v17  ;;  %1579 = vmatpush.bf16.msra.mxu0 %v7106_v46  ;;  %v7113_v17 = vld [vmem:[#allocation70_spill] sm:$0xff] }
  0xe9   :  { %v5621_v57 = vadd.f32 %v1143_v23, %v1125_v45  ;;  %v3467_v23 = vld [vmem:[%s6600_s0 + $0xcc] sm:$0xf0]  ;;  %v7111_v45 = vld [vmem:[#allocation69_spill] sm:$0xff] }
  0xea   :  { %1598 = vmatpush.bf16.msra.mxu1 %v7107_v22 }
  0xeb   :  { %1636 = vmatpush.bf16.msra.mxu3 %v4906_v63  ;;  %v1107_v33 = vpop.f32.mrf.mxu1  ;;  %v7112_v63 = vld [vmem:[#allocation104_spill] sm:$0xff] }
  0xec   :  { %1618 = vmatpush.bf16.msra.mxu2 %v4954_v0  ;;  %1580 = vmatpush.bf16.msra.mxu0 %v7108_v49  ;;  %v1108_v9 = vadd.f32 %v1107_v33, %v1089_v56  ;;  %v3865_v33 = vld [vmem:[%s6600_s0 + $0xd0] sm:$0xf0]  ;;  %v5649_v0 = vor.u32 %v3860_v4, %v3467_v23  ;;  %v7115_v49 = vld [vmem:[#allocation105_spill] sm:$0xff]  ;;  %v7118_v4 = vld [vmem:[#allocation74_spill] sm:$0xff] }
  0xed   :  { %v7119_v23 = vld [vmem:[#allocation77_spill] sm:$0xff] }
  0xee   :  { %1599 = vmatpush.bf16.msra.mxu1 %v7109_v34  ;;  %v1126_v56 = vpop.f32.mrf.mxu2  ;;  %v7114_v34 = vld [vmem:[#allocation73_spill] sm:$0xff] }
  0xef   :  { %1637 = vmatpush.bf16.msra.mxu3 %v4956_v36  ;;  %v5647_v36 = vor.u32 %v3864_v11, %v3465_v59  ;;  %v1127_v51 = vadd.f32 %v1126_v56, %v1108_v9 }
  0xf0   :  { %1687 = vmatpush.bf16.msrb.mxu2 %v4968_v62  ;;  %1649 = vmatpush.bf16.msrb.mxu0 %v7110_v29  ;;  %v1145_v62 = vpop.f32.mrf.mxu3  ;;  %v5656_v29 = vor.u32 %v3865_v33, %v3473_v12  ;;  %v7120_v12 = vld [vmem:[#allocation109_spill] sm:$0xff] }
  0xf1   :  { %v1146_v11 = vadd.f32 %v1145_v62, %v1127_v51 }
  0xf2   :  { %1668 = vmatpush.bf16.msrb.mxu1 %v7111_v45  ;;  %1619 = vmatmul.bf16.vlgmr.msra.gmra.mxu2 %v5656_v29 }
  0xf3   :  { %1706 = vmatpush.bf16.msrb.mxu3 %v4971_v58  ;;  %v1157_v58 = vpop.f32.mrf.mxu0  ;;  %v1176_v45 = vpop.f32.mrf.mxu1 }
  0xf4   :  { %1688 = vmatpush.bf16.msrb.mxu2 %v7112_v63  ;;  %1650 = vmatpush.bf16.msrb.mxu0 %v7113_v17  ;;  %v5661_v59 = vadd.f32 %v1157_v58, %v5563_v6  ;;  %v1177_v9 = vadd.f32 %v1176_v45, %v5654_v21  ;;  %v7122_v45 = vld [vmem:[#allocation112_spill] sm:$0xff]  ;;  %v7125_v63 = vld [vmem:[#allocation113_spill] sm:$0xff] }
  0xf5   :  { %1581 = vmatmul.bf16.vlgmr.msra.gmra.mxu0 %v5647_v36  ;;  %1600 = vmatmul.bf16.vlgmr.msra.gmra.mxu1 %v5649_v0 }
  0xf6   :  { %1669 = vmatpush.bf16.msrb.mxu1 %v7114_v34  ;;  %7116 = vst [vmem:[#allocation144_spill] sm:$0xff] %v5661_v59  ;;  %1638 = vmatmul.bf16.vlgmr.msra.gmra.mxu3 %v5446_v27  ;;  %v1195_v58 = vpop.f32.mrf.mxu2 }
  0xf7   :  { %1707 = vmatpush.bf16.msrb.mxu3 %v7115_v49  ;;  %v1196_v6 = vadd.f32 %v1195_v58, %v1177_v9  ;;  %v7123_v49 = vld [vmem:[#allocation78_spill] sm:$0xff]  ;;  %v3873_v9 = vld [vmem:[%s6600_s0 + $0x110] sm:$0xf0]  ;;  %v3503_v58 = vld [vmem:[%s6600_s0 + $0x114] sm:$0xf0] }
  0xf8   :  { %1689 = vmatpush.bf16.msrb.mxu2 %v7117_v48  ;;  %1651 = vmatpush.bf16.msrb.mxu0 %v7118_v4  ;;  %v1214_v62 = vpop.f32.mrf.mxu3  ;;  %v7124_v48 = vld [vmem:[#allocation81_spill] sm:$0xff] }
  0xf9   :  { %v1215_v27 = vadd.f32 %v1214_v62, %v1196_v6  ;;  %v3509_v62 = vld [vmem:[%s6600_s0 + $0xf8] sm:$0xf]  ;;  %v3874_v6 = vld [vmem:[%s6600_s0 + $0x118] sm:$0xf0] }
  0xfa   :  { %1670 = vmatpush.bf16.msrb.mxu1 %v7119_v23  ;;  %v5706_v22 = vor.u32 %v3874_v6, %v3509_v62  ;;  %v7135_v62 = vld [vmem:[#allocation96_spill] sm:$0xff]  ;;  %v7136_v6 = vld [vmem:[#allocation102_spill] sm:$0xff] }
  0xfb   :  { %1708 = vmatpush.bf16.msrb.mxu3 %v7120_v12  ;;  %v1159_v51 = vpop.f32.mrf.mxu0  ;;  %v1178_v33 = vpop.f32.mrf.mxu1  ;;  %v3501_v12 = vld [vmem:[%s6600_s0 + $0xf0] sm:$0xf] }
  0xfc   :  { %v5673_v56 = vadd.f32 %v1159_v51, %v5606_v28  ;;  %1690 = vmatpush.bf16.msrb.mxu2 %v7122_v45  ;;  %1652 = vmatpush.bf16.msrb.mxu0 %v7123_v49  ;;  %v3869_v28 = vld [vmem:[%s6600_s0 + $0xf4] sm:$0xf]  ;;  %v7126_v51 = vld [vmem:[#allocation82_spill] sm:$0xff]  ;;  %v7127_v45 = vld [vmem:[#allocation85_spill] sm:$0xff]  ;;  %v5702_v49 = vor.u32 %v3873_v9, %v3501_v12 }
  0xfd   :  { %v5704_v23 = vor.u32 %v3869_v28, %v3503_v58  ;;  %v7134_v58 = vld [vmem:[#allocation99_spill] sm:$0xff] }
  0xfe   :  { %7121 = vst [vmem:[#allocation145_spill] sm:$0xff] %v5673_v56  ;;  %1671 = vmatpush.bf16.msrb.mxu1 %v7124_v48  ;;  %v7128_v56 = vld [vmem:[#allocation117_spill] sm:$0xff]  ;;  %v1197_v48 = vpop.f32.mrf.mxu2 }
  0xff   :  { %1709 = vmatpush.bf16.msrb.mxu3 %v7125_v63  ;;  %v1179_v63 = vadd.f32 %v1178_v33, %v5654_v21  ;;  %v7129_v33 = vld [vmem:[#allocation86_spill] sm:$0xff] }
 0x100   :  { %1691 = vmatpush.bf16.msrb.mxu2 %v5113_v10  ;;  %1653 = vmatpush.bf16.msrb.mxu0 %v7126_v51  ;;  %v1216_v59 = vpop.f32.mrf.mxu3 }
 0x101   :  { %v1198_v4 = vadd.f32 %v1197_v48, %v1179_v63 }
 0x102   :  { %1672 = vmatpush.bf16.msrb.mxu1 %v7127_v45  ;;  %1624 = vmatmul.bf16.gmra.mxu2 %v5706_v22 }
 0x103   :  { %1710 = vmatpush.bf16.msrb.mxu3 %v7128_v56  ;;  %v1162_v34 = vpop.f32.mrf.mxu0  ;;  %v1181_v17 = vpop.f32.mrf.mxu1  ;;  %v1217_v45 = vadd.f32 %v1216_v59, %v1198_v4  ;;  %v7130_v56 = vld [vmem:[#allocation90_spill] sm:$0xff] }
 0x104   :  { %v5709_v10 = vadd.f32 %v1162_v34, %v5621_v57  ;;  %1692 = vmatpush.bf16.msrb.mxu2 %v5155_v2  ;;  %1654 = vmatpush.bf16.msrb.mxu0 %v7129_v33  ;;  %v1182_v63 = vadd.f32 %v1181_v17, %v5654_v21  ;;  %v7131_v57 = vld [vmem:[#allocation91_spill] sm:$0xff]  ;;  %v7132_v34 = vld [vmem:[#allocation94_spill] sm:$0xff] }
 0x105   :  { %1586 = vmatmul.bf16.gmra.mxu0 %v5702_v49  ;;  %1605 = vmatmul.bf16.gmra.mxu1 %v5704_v23  ;;  %v7133_v17 = vld [vmem:[#allocation95_spill] sm:$0xff] }
 0x106   :  { %1673 = vmatpush.bf16.msrb.mxu1 %v7130_v56  ;;  %1643 = vmatmul.bf16.gmra.mxu3 %v5484_v40  ;;  %v1200_v59 = vpop.f32.mrf.mxu2 }
 0x107   :  { %1711 = vmatpush.bf16.msrb.mxu3 %v5179_v15  ;;  %v1201_v4 = vadd.f32 %v1200_v59, %v1182_v63 }
 0x108   :  { %1693 = vmatpush.bf16.msrb.mxu2 %v5193_v19  ;;  %1655 = vmatpush.bf16.msrb.mxu0 %v7131_v57  ;;  %v1219_v48 = vpop.f32.mrf.mxu3 }
 0x109   :  { %v1220_v40 = vadd.f32 %v1219_v48, %v1201_v4 }
 0x10a   :  { %1674 = vmatpush.bf16.msrb.mxu1 %v7132_v34 }
 0x10b   :  { %1712 = vmatpush.bf16.msrb.mxu3 %v5225_v35  ;;  %v1164_v12 = vpop.f32.mrf.mxu0  ;;  %v1183_v9 = vpop.f32.mrf.mxu1 }
 0x10c   :  { %v5724_v28 = vadd.f32 %v1164_v12, %v1146_v11  ;;  %1694 = vmatpush.bf16.msrb.mxu2 %v5236_v52  ;;  %1656 = vmatpush.bf16.msrb.mxu0 %v7133_v17  ;;  %v1184_v11 = vadd.f32 %v1183_v9, %v5654_v21  ;;  %v7137_v12 = vld [vmem:[#allocation103_spill] sm:$0xff] }
 0x10d   :  { %v7139_v9 = vld [vmem:[#allocation107_spill] sm:$0xff] }
 0x10e   :  { %1675 = vmatpush.bf16.msrb.mxu1 %v7134_v58  ;;  %v1202_v63 = vpop.f32.mrf.mxu2 }
 0x10f   :  { %1713 = vmatpush.bf16.msrb.mxu3 %v5263_v1  ;;  %v1203_v48 = vadd.f32 %v1202_v63, %v1184_v11  ;;  %v7138_v1 = vld [vmem:[#allocation106_spill] sm:$0xff] }
 0x110   :  { %1763 = vmatpush.bf16.msra.mxu2 %v5247_v42  ;;  %1725 = vmatpush.bf16.msra.mxu0 %v7135_v62  ;;  %v1221_v59 = vpop.f32.mrf.mxu3  ;;  %v7140_v11 = vld [vmem:[#allocation110_spill] sm:$0xff] }
 0x111   :  { %v1222_v35 = vadd.f32 %v1221_v59, %v1203_v48 }
 0x112   :  { %1744 = vmatpush.bf16.msra.mxu1 %v7136_v6  ;;  %1695 = vmatmul.bf16.vlgmr.msrb.gmra.mxu2 %v5539_v24 }
 0x113   :  { %1782 = vmatpush.bf16.msra.mxu3 %v5269_v37  ;;  %v1233_v4 = vpop.f32.mrf.mxu0  ;;  %v1252_v52 = vpop.f32.mrf.mxu1 }
 0x114   :  { %1764 = vmatpush.bf16.msra.mxu2 %v5273_v50  ;;  %1726 = vmatpush.bf16.msra.mxu0 %v7137_v12  ;;  %v1234_v42 = vadd.f32 %v1233_v4, %v1215_v27  ;;  %v7143_v4 = vld [vmem:[#allocation115_spill] sm:$0xff] }
 0x115   :  { %1657 = vmatmul.bf16.vlgmr.msrb.gmra.mxu0 %v5448_v54  ;;  %1676 = vmatmul.bf16.vlgmr.msrb.gmra.mxu1 %v5537_v30  ;;  %v7141_v30 = vld [vmem:[#allocation111_spill] sm:$0xff] }
 0x116   :  { %1745 = vmatpush.bf16.msra.mxu1 %v7138_v1  ;;  %v1253_v19 = vadd.f32 %v1252_v52, %v1234_v42  ;;  %1714 = vmatmul.bf16.vlgmr.msrb.gmra.mxu3 %v5543_v25  ;;  %v1271_v63 = vpop.f32.mrf.mxu2  ;;  %v7142_v25 = vld [vmem:[#allocation114_spill] sm:$0xff] }
 0x117   :  { %1783 = vmatpush.bf16.msra.mxu3 %v5285_v55 }
 0x118   :  { %1765 = vmatpush.bf16.msra.mxu2 %v5301_v61  ;;  %1727 = vmatpush.bf16.msra.mxu0 %v7139_v9  ;;  %v1290_v27 = vpop.f32.mrf.mxu3  ;;  %v1272_v59 = vadd.f32 %v1271_v63, %v1253_v19 }
 0x11a   :  { %1746 = vmatpush.bf16.msra.mxu1 %v7140_v11  ;;  %v1291_v24 = vadd.f32 %v1290_v27, %v1272_v59  ;;  %v7145_v27 = vld [vmem:[#allocation119_spill] sm:$0xff] }
 0x11b   :  { %1784 = vmatpush.bf16.msra.mxu3 %v5305_v18  ;;  %v1235_v52 = vpop.f32.mrf.mxu0  ;;  %v1254_v42 = vpop.f32.mrf.mxu1  ;;  %v7144_v18 = vld [vmem:[#allocation118_spill] sm:$0xff] }
 0x11c   :  { %v1236_v54 = vadd.f32 %v1235_v52, %v1217_v45  ;;  %1766 = vmatpush.bf16.msra.mxu2 %v5325_v20  ;;  %1728 = vmatpush.bf16.msra.mxu0 %v7141_v30 }
 0x11e   :  { %1747 = vmatpush.bf16.msra.mxu1 %v7142_v25  ;;  %v1255_v48 = vadd.f32 %v1254_v42, %v1236_v54  ;;  %v1273_v19 = vpop.f32.mrf.mxu2  ;;  %v7146_v42 = vld [vmem:[#allocation120_spill] sm:$0xff] }
 0x11f   :  { %1785 = vmatpush.bf16.msra.mxu3 %v5329_v14 }
 0x120   :  { %1767 = vmatpush.bf16.msra.mxu2 %v5345_v32  ;;  %1729 = vmatpush.bf16.msra.mxu0 %v7143_v4  ;;  %v1292_v45 = vpop.f32.mrf.mxu3  ;;  %v1274_v63 = vadd.f32 %v1273_v19, %v1255_v48  ;;  %v7148_v48 = vld [vmem:[#allocation124_spill] sm:$0xff]  ;;  %v7170_v32 = vld [vmem:[#allocation18_spill] sm:$0xff] }
 0x122   :  { %1748 = vmatpush.bf16.msra.mxu1 %v7144_v18  ;;  %v1293_v59 = vadd.f32 %v1292_v45, %v1274_v63  ;;  %1700 = vmatmul.bf16.gmra.mxu2 %v5597_v16 }
 0x123   :  { %1786 = vmatpush.bf16.msra.mxu3 %v5349_v43  ;;  %v1238_v52 = vpop.f32.mrf.mxu0  ;;  %v1257_v20 = vpop.f32.mrf.mxu1 }
 0x124   :  { %v1239_v61 = vadd.f32 %v1238_v52, %v1220_v40  ;;  %1768 = vmatpush.bf16.msra.mxu2 %v5365_v47  ;;  %1730 = vmatpush.bf16.msra.mxu0 %v7145_v27  ;;  %v7147_v40 = vld [vmem:[#allocation121_spill] sm:$0xff]  ;;  %v7150_v52 = vld [vmem:[#allocation2_spill] sm:$0xff]  ;;  %v7158_v47 = vld [vmem:[#allocation87_spill] sm:$0xff] }
 0x125   :  { %1662 = vmatmul.bf16.gmra.mxu0 %v5486_v38  ;;  %1681 = vmatmul.bf16.gmra.mxu1 %v5595_v5  ;;  %v7149_v5 = vld [vmem:[#allocation4_spill] sm:$0xff] }
 0x126   :  { %1749 = vmatpush.bf16.msra.mxu1 %v7146_v42  ;;  %v1258_v54 = vadd.f32 %v1257_v20, %v1239_v61  ;;  %1719 = vmatmul.bf16.gmra.mxu3 %v5599_v7  ;;  %v1276_v19 = vpop.f32.mrf.mxu2 }
 0x127   :  { %1787 = vmatpush.bf16.msra.mxu3 %v5369_v60  ;;  %v7155_v60 = vld [vmem:[#allocation7_spill] sm:$0xff] }
 0x128   :  { %1769 = vmatpush.bf16.msra.mxu2 %v5385_v44  ;;  %1731 = vmatpush.bf16.msra.mxu0 %v7147_v40  ;;  %v1295_v45 = vpop.f32.mrf.mxu3  ;;  %v1277_v63 = vadd.f32 %v1276_v19, %v1258_v54  ;;  %v7152_v54 = vld [vmem:[#allocation5_spill] sm:$0xff] }
 0x12a   :  { %1750 = vmatpush.bf16.msra.mxu1 %v7148_v48  ;;  %v1296_v16 = vadd.f32 %v1295_v45, %v1277_v63 }
 0x12b   :  { %1788 = vmatpush.bf16.msra.mxu3 %v5389_v53  ;;  %v1240_v61 = vpop.f32.mrf.mxu0  ;;  %v1259_v20 = vpop.f32.mrf.mxu1  ;;  %v7151_v53 = vld [vmem:[#allocation3_spill] sm:$0xff] }
 0x12c   :  { %v1241_v38 = vadd.f32 %v1240_v61, %v1222_v35  ;;  %1770 = vmatpush.bf16.msra.mxu2 %v5409_v31  ;;  %1732 = vmatpush.bf16.msra.mxu0 %v5234_v41  ;;  %v7153_v61 = vld [vmem:[#allocation8_spill] sm:$0xff]  ;;  %v7154_v31 = vld [vmem:[#allocation6_spill] sm:$0xff] }
 0x12e   :  { %1751 = vmatpush.bf16.msra.mxu1 %v5265_v39  ;;  %v1260_v7 = vadd.f32 %v1259_v20, %v1241_v38  ;;  %v1278_v19 = vpop.f32.mrf.mxu2  ;;  %v7156_v20 = vld [vmem:[#allocation9_spill] sm:$0xff] }
 0x12f   :  { %1789 = vmatpush.bf16.msra.mxu3 %v5413_v13 }
 0x130   :  { %1968 = vmatpush.bf16.msrb.mxu2 %v7149_v5  ;;  %1930 = vmatpush.bf16.msrb.mxu0 %v7150_v52  ;;  %v1297_v35 = vpop.f32.mrf.mxu3  ;;  %v1279_v45 = vadd.f32 %v1278_v19, %v1260_v7  ;;  %v7160_v7 = vld [vmem:[#allocation10_spill] sm:$0xff]  ;;  %v7161_v19 = vld [vmem:[#allocation11_spill] sm:$0xff] }
 0x132   :  { %1949 = vmatpush.bf16.msrb.mxu1 %v7151_v53  ;;  %v1298_v5 = vadd.f32 %v1297_v35, %v1279_v45  ;;  %1771 = vmatmul.bf16.vlgmr.msra.gmra.mxu2 %v5649_v0  ;;  %v7165_v0 = vld [vmem:[#allocation14_spill] sm:$0xff] }
 0x133   :  { %1987 = vmatpush.bf16.msrb.mxu3 %v7152_v54  ;;  %v1309_v63 = vpop.f32.mrf.mxu0  ;;  %v1328_v44 = vpop.f32.mrf.mxu1  ;;  %v7162_v54 = vld [vmem:[#allocation13_spill] sm:$0xff] }
 0x134   :  { %1969 = vmatpush.bf16.msrb.mxu2 %v7153_v61  ;;  %1931 = vmatpush.bf16.msrb.mxu0 %v7154_v31  ;;  %v1310_v38 = vadd.f32 %v1309_v63, %v1291_v24  ;;  %v7159_v61 = vld [vmem:[#allocation12_spill] sm:$0xff] }
 0x135   :  { %1733 = vmatmul.bf16.vlgmr.msra.gmra.mxu0 %v7158_v47  ;;  %1752 = vmatmul.bf16.vlgmr.msra.gmra.mxu1 %v5647_v36  ;;  %v7164_v36 = vld [vmem:[#allocation16_spill] sm:$0xff] }
 0x136   :  { %1950 = vmatpush.bf16.msrb.mxu1 %v7155_v60  ;;  %v5779_v13 = vadd.f32 %v1328_v44, %v1310_v38  ;;  %1790 = vmatmul.bf16.vlgmr.msra.gmra.mxu3 %v5656_v29  ;;  %v1468_v24 = vpop.f32.mrf.mxu2  ;;  %v7163_v44 = vld [vmem:[#allocation143_spill] sm:$0xff] }
 0x137   :  { %1988 = vmatpush.bf16.msrb.mxu3 %v7156_v20  ;;  %v1469_v45 = vadd.f32 %v1468_v24, %v7163_v44  ;;  %v7167_v20 = vld [vmem:[#allocation17_spill] sm:$0xff]  ;;  %v7171_v24 = vld [vmem:[#allocation19_spill] sm:$0xff] }
 0x138   :  { %7157 = vst [vmem:[#allocation86_spill] sm:$0xff] %v5779_v13  ;;  %1970 = vmatpush.bf16.msrb.mxu2 %v7159_v61  ;;  %1932 = vmatpush.bf16.msrb.mxu0 %v7160_v7  ;;  %v1487_v35 = vpop.f32.mrf.mxu3  ;;  %v7166_v61 = vld [vmem:[#allocation15_spill] sm:$0xff]  ;;  %v7172_v13 = vld [vmem:[#allocation21_spill] sm:$0xff] }
 0x139   :  { %v5792_v29 = vadd.f32 %v1487_v35, %v1469_v45 }
 0x13a   :  { %1951 = vmatpush.bf16.msrb.mxu1 %v7161_v19  ;;  %v7195_v19 = vld [vmem:[#allocation41_spill] sm:$0xff] }
 0x13b   :  { %1989 = vmatpush.bf16.msrb.mxu3 %v7162_v54  ;;  %v1311_v63 = vpop.f32.mrf.mxu0  ;;  %v1330_v47 = vpop.f32.mrf.mxu1  ;;  %v7169_v54 = vld [vmem:[#allocation20_spill] sm:$0xff] }
 0x13c   :  { %v1312_v38 = vadd.f32 %v1311_v63, %v1293_v59  ;;  %1971 = vmatpush.bf16.msrb.mxu2 %v7164_v36  ;;  %1933 = vmatpush.bf16.msrb.mxu0 %v7165_v0  ;;  %v7194_v0 = vld [vmem:[#allocation39_spill] sm:$0xff] }
 0x13e   :  { %1952 = vmatpush.bf16.msrb.mxu1 %v7166_v61  ;;  %v5796_v43 = vadd.f32 %v1330_v47, %v1312_v38  ;;  %v1470_v59 = vpop.f32.mrf.mxu2  ;;  %v7173_v61 = vld [vmem:[#allocation24_spill] sm:$0xff]  ;;  %v7175_v38 = vld [vmem:[#allocation23_spill] sm:$0xff] }
 0x13f   :  { %1990 = vmatpush.bf16.msrb.mxu3 %v7167_v20  ;;  %v1471_v36 = vadd.f32 %v1470_v59, %v7163_v44  ;;  %v7174_v20 = vld [vmem:[#allocation22_spill] sm:$0xff] }
 0x140   :  { %7168 = vst [vmem:[#allocation90_spill] sm:$0xff] %v5796_v43  ;;  %1972 = vmatpush.bf16.msrb.mxu2 %v7169_v54  ;;  %1934 = vmatpush.bf16.msrb.mxu0 %v7170_v32  ;;  %v1489_v63 = vpop.f32.mrf.mxu3  ;;  %v7176_v54 = vld [vmem:[#allocation25_spill] sm:$0xff]  ;;  %v7179_v59 = vld [vmem:[#allocation26_spill] sm:$0xff] }
 0x141   :  { %v5805_v47 = vadd.f32 %v1489_v63, %v1471_v36  ;;  %v7180_v36 = vld [vmem:[#allocation27_spill] sm:$0xff]  ;;  %v7181_v63 = vld [vmem:[#allocation29_spill] sm:$0xff] }
 0x142   :  { %1953 = vmatpush.bf16.msrb.mxu1 %v7171_v24  ;;  %1776 = vmatmul.bf16.gmra.mxu2 %v5704_v23  ;;  %v7183_v23 = vld [vmem:[#allocation30_spill] sm:$0xff] }
 0x143   :  { %1991 = vmatpush.bf16.msrb.mxu3 %v7172_v13  ;;  %v1314_v35 = vpop.f32.mrf.mxu0  ;;  %v1333_v45 = vpop.f32.mrf.mxu1  ;;  %v7185_v13 = vld [vmem:[#allocation33_spill] sm:$0xff] }
 0x144   :  { %v1315_v14 = vadd.f32 %v1314_v35, %v1296_v16  ;;  %1973 = vmatpush.bf16.msrb.mxu2 %v7173_v61  ;;  %1935 = vmatpush.bf16.msrb.mxu0 %v7174_v20  ;;  %v7178_v16 = vld [vmem:[#allocation28_spill] sm:$0xff] }
 0x145   :  { %1738 = vmatmul.bf16.gmra.mxu0 %v5601_v3  ;;  %1757 = vmatmul.bf16.gmra.mxu1 %v5702_v49  ;;  %v7182_v49 = vld [vmem:[#allocation32_spill] sm:$0xff] }
 0x146   :  { %1954 = vmatpush.bf16.msrb.mxu1 %v7175_v38  ;;  %v5809_v43 = vadd.f32 %v1333_v45, %v1315_v14  ;;  %1795 = vmatmul.bf16.gmra.mxu3 %v5706_v22  ;;  %v1473_v35 = vpop.f32.mrf.mxu2 }
 0x147   :  { %1992 = vmatpush.bf16.msrb.mxu3 %v7176_v54  ;;  %v1474_v14 = vadd.f32 %v1473_v35, %v7163_v44  ;;  %v7187_v35 = vld [vmem:[#allocation34_spill] sm:$0xff] }
 0x148   :  { %7177 = vst [vmem:[#allocation91_spill] sm:$0xff] %v5809_v43  ;;  %1974 = vmatpush.bf16.msrb.mxu2 %v7178_v16  ;;  %1936 = vmatpush.bf16.msrb.mxu0 %v7179_v59  ;;  %v1492_v54 = vpop.f32.mrf.mxu3  ;;  %v7184_v16 = vld [vmem:[#allocation31_spill] sm:$0xff] }
 0x149   :  { %v5822_v22 = vadd.f32 %v1492_v54, %v1474_v14  ;;  %v3875_v54 = vld [vmem:[%s6600_s0 + $0x124] sm:$0xf]  ;;  %v3541_v14 = vld [vmem:[%s6600_s0 + $0x128] sm:$0xf] }
 0x14a   :  { %1955 = vmatpush.bf16.msrb.mxu1 %v7180_v36 }
 0x14b   :  { %1993 = vmatpush.bf16.msrb.mxu3 %v7181_v63  ;;  %v1316_v45 = vpop.f32.mrf.mxu0  ;;  %v1335_v3 = vpop.f32.mrf.mxu1  ;;  %v3533_v63 = vld [vmem:[%s6600_s0 + $0x120] sm:$0xf] }
 0x14c   :  { %v1317_v61 = vadd.f32 %v1316_v45, %v1298_v5  ;;  %1975 = vmatpush.bf16.msrb.mxu2 %v7182_v49  ;;  %1937 = vmatpush.bf16.msrb.mxu0 %v7183_v23  ;;  %v3879_v5 = vld [vmem:[%s6600_s0 + $0x140] sm:$0xf0]  ;;  %v7188_v45 = vld [vmem:[#allocation36_spill] sm:$0xff]  ;;  %v3876_v49 = vld [vmem:[%s6600_s0 + $0x12c] sm:$0xf] }
 0x14d   :  { %v5856_v23 = vor.u32 %v3879_v5, %v3533_v63 }
 0x14e   :  { %1956 = vmatpush.bf16.msrb.mxu1 %v7184_v16  ;;  %v5826_v43 = vadd.f32 %v1335_v3, %v1317_v61  ;;  %v3535_v61 = vld [vmem:[%s6600_s0 + $0x144] sm:$0xf0] }
 0x14f   :  { %1994 = vmatpush.bf16.msrb.mxu3 %v7185_v13  ;;  %v7189_v3 = vld [vmem:[#allocation35_spill] sm:$0xff]  ;;  %v7190_v13 = vld [vmem:[#allocation37_spill] sm:$0xff]  ;;  %v5858_v36 = vor.u32 %v3875_v54, %v3535_v61 }
 0x150   :  { %7186 = vst [vmem:[#allocation103_spill] sm:$0xff] %v5826_v43  ;;  %2044 = vmatpush.bf16.msra.mxu2 %v7187_v35  ;;  %2006 = vmatpush.bf16.msra.mxu0 %v7188_v45  ;;  %v3880_v35 = vld [vmem:[%s6600_s0 + $0x148] sm:$0xf0]  ;;  %v3543_v43 = vld [vmem:[%s6600_s0 + $0x14c] sm:$0xf0]  ;;  %v1475_v45 = vpop.f32.mrf.mxu2  ;;  %v1494_v16 = vpop.f32.mrf.mxu3 }
 0x151   :  { %v1476_v59 = vadd.f32 %v1475_v45, %v7163_v44  ;;  %v5863_v24 = vor.u32 %v3880_v35, %v3541_v14  ;;  %v5865_v32 = vor.u32 %v3876_v49, %v3543_v43  ;;  %v7196_v35 = vld [vmem:[#allocation42_spill] sm:$0xff]  ;;  %v7197_v43 = vld [vmem:[#allocation44_spill] sm:$0xff]  ;;  %v7198_v49 = vld [vmem:[#allocation43_spill] sm:$0xff] }
 0x152   :  { %2025 = vmatpush.bf16.msra.mxu1 %v7189_v3  ;;  %v7191_v3 = vld [vmem:[#allocation38_spill] sm:$0xff]  ;;  %v7199_v45 = vld [vmem:[#allocation45_spill] sm:$0xff] }
 0x153   :  { %2063 = vmatpush.bf16.msra.mxu3 %v7190_v13  ;;  %v7192_v13 = vld [vmem:[#allocation40_spill] sm:$0xff]  ;;  %v1506_v38 = vpop.f32.mrf.mxu0  ;;  %v1525_v20 = vpop.f32.mrf.mxu1  ;;  %7193 = vst [vmem:[#allocation106_spill] sm:$0xff] %v5865_v32  ;;  %v5870_v5 = vadd.f32 %v1494_v16, %v1476_v59  ;;  %1976 = vmatmul.bf16.vlgmr.msrb.gmra.mxu2 %v5863_v24  ;;  %v7200_v14 = vld [vmem:[#allocation46_spill] sm:$0xff] }
 0x154   :  { %2045 = vmatpush.bf16.msra.mxu2 %v7191_v3  ;;  %2007 = vmatpush.bf16.msra.mxu0 %v7192_v13  ;;  %v1507_v63 = vadd.f32 %v1506_v38, %v5792_v29  ;;  %v7203_v3 = vld [vmem:[#allocation49_spill] sm:$0xff] }
 0x155   :  { %1938 = vmatmul.bf16.vlgmr.msrb.gmra.mxu0 %v5856_v23  ;;  %1957 = vmatmul.bf16.vlgmr.msrb.gmra.mxu1 %v5858_v36 }
 0x156   :  { %2026 = vmatpush.bf16.msra.mxu1 %v7194_v0  ;;  %v1526_v54 = vadd.f32 %v1525_v20, %v1507_v63  ;;  %1995 = vmatmul.bf16.vlgmr.msrb.gmra.mxu3 %v5865_v32  ;;  %v7201_v63 = vld [vmem:[#allocation48_spill] sm:$0xff] }
 0x157   :  { %2064 = vmatpush.bf16.msra.mxu3 %v7195_v19 }
 0x158   :  { %2046 = vmatpush.bf16.msra.mxu2 %v7196_v35  ;;  %2008 = vmatpush.bf16.msra.mxu0 %v7197_v43  ;;  %v1544_v29 = vpop.f32.mrf.mxu2  ;;  %v7202_v35 = vld [vmem:[#allocation47_spill] sm:$0xff] }
 0x159   :  { %v1563_v38 = vpop.f32.mrf.mxu3  ;;  %v1545_v16 = vadd.f32 %v1544_v29, %v1526_v54  ;;  %v3888_v54 = vld [vmem:[%s6600_s0 + $0x188] sm:$0xf0]  ;;  %v3571_v29 = vld [vmem:[%s6600_s0 + $0x18c] sm:$0xf0] }
 0x15a   :  { %2027 = vmatpush.bf16.msra.mxu1 %v7198_v49 }
 0x15b   :  { %2065 = vmatpush.bf16.msra.mxu3 %v7199_v45  ;;  %v1508_v20 = vpop.f32.mrf.mxu0  ;;  %v1527_v59 = vpop.f32.mrf.mxu1  ;;  %v5883_v19 = vadd.f32 %v1563_v38, %v1545_v16  ;;  %v3569_v45 = vld [vmem:[%s6600_s0 + $0x168] sm:$0xf]  ;;  %v3577_v38 = vld [vmem:[%s6600_s0 + $0x170] sm:$0xf]  ;;  %v3889_v16 = vld [vmem:[%s6600_s0 + $0x190] sm:$0xf0] }
 0x15c   :  { %v1509_v61 = vadd.f32 %v1508_v20, %v5805_v47  ;;  %2047 = vmatpush.bf16.msra.mxu2 %v7200_v14  ;;  %2009 = vmatpush.bf16.msra.mxu0 %v7201_v63  ;;  %v3884_v47 = vld [vmem:[%s6600_s0 + $0x16c] sm:$0xf]  ;;  %v3885_v20 = vld [vmem:[%s6600_s0 + $0x174] sm:$0xf]  ;;  %v5915_v44 = vor.u32 %v3888_v54, %v3569_v45  ;;  %v5919_v60 = vor.u32 %v3889_v16, %v3577_v38  ;;  %v7215_v38 = vld [vmem:[#allocation66_spill] sm:$0xff] }
 0x15d   :  { %v7206_v14 = vld [vmem:[#allocation51_spill] sm:$0xff]  ;;  %v5917_v0 = vor.u32 %v3884_v47, %v3571_v29  ;;  %v7214_v29 = vld [vmem:[#allocation62_spill] sm:$0xff] }
 0x15e   :  { %2028 = vmatpush.bf16.msra.mxu1 %v7202_v35  ;;  %v1528_v49 = vadd.f32 %v1527_v59, %v1509_v61  ;;  %v3579_v59 = vld [vmem:[%s6600_s0 + $0x194] sm:$0xf0]  ;;  %v7204_v61 = vld [vmem:[#allocation50_spill] sm:$0xff] }
 0x15f   :  { %2066 = vmatpush.bf16.msra.mxu3 %v7203_v3  ;;  %v7205_v3 = vld [vmem:[#allocation52_spill] sm:$0xff]  ;;  %v7207_v35 = vld [vmem:[#allocation53_spill] sm:$0xff]  ;;  %v5921_v55 = vor.u32 %v3885_v20, %v3579_v59  ;;  %v7216_v20 = vld [vmem:[#allocation63_spill] sm:$0xff] }
 0x160   :  { %2048 = vmatpush.bf16.msra.mxu2 %v7204_v61  ;;  %2010 = vmatpush.bf16.msra.mxu0 %v7205_v3  ;;  %v1546_v63 = vpop.f32.mrf.mxu2  ;;  %v7210_v3 = vld [vmem:[#allocation55_spill] sm:$0xff] }
 0x161   :  { %v1565_v43 = vpop.f32.mrf.mxu3  ;;  %v1547_v13 = vadd.f32 %v1546_v63, %v1528_v49  ;;  %7208 = vst [vmem:[#allocation2_spill] sm:$0xff] %v5921_v55  ;;  %v7217_v59 = vld [vmem:[#allocation67_spill] sm:$0xff] }
 0x162   :  { %2029 = vmatpush.bf16.msra.mxu1 %v7206_v14  ;;  %v7209_v14 = vld [vmem:[#allocation56_spill] sm:$0xff] }
 0x163   :  { %2067 = vmatpush.bf16.msra.mxu3 %v7207_v35  ;;  %v1511_v7 = vpop.f32.mrf.mxu0  ;;  %v1530_v32 = vpop.f32.mrf.mxu1  ;;  %v5926_v35 = vadd.f32 %v1565_v43, %v1547_v13  ;;  %1981 = vmatmul.bf16.gmra.mxu2 %v5919_v60  ;;  %v7213_v13 = vld [vmem:[#allocation61_spill] sm:$0xff] }
 0x164   :  { %v1512_v61 = vadd.f32 %v1511_v7, %v5822_v22  ;;  %2049 = vmatpush.bf16.msra.mxu2 %v7102_v26  ;;  %2011 = vmatpush.bf16.msra.mxu0 %v7209_v14  ;;  %v7211_v7 = vld [vmem:[#allocation60_spill] sm:$0xff]  ;;  %v7212_v22 = vld [vmem:[#allocation59_spill] sm:$0xff] }
 0x165   :  { %1943 = vmatmul.bf16.gmra.mxu0 %v5915_v44  ;;  %1962 = vmatmul.bf16.gmra.mxu1 %v5917_v0  ;;  %v7228_v14 = vld [vmem:[#allocation72_spill] sm:$0xff] }
 0x166   :  { %2030 = vmatpush.bf16.msra.mxu1 %v7210_v3  ;;  %v1531_v45 = vadd.f32 %v1530_v32, %v1512_v61  ;;  %2000 = vmatmul.bf16.gmra.mxu3 %v5921_v55  ;;  %v7229_v55 = vld [vmem:[#allocation73_spill] sm:$0xff] }
 0x167   :  { %2068 = vmatpush.bf16.msra.mxu3 %v7103_v8 }
 0x168   :  { %2050 = vmatpush.bf16.msra.mxu2 %v7106_v46  ;;  %2012 = vmatpush.bf16.msra.mxu0 %v7211_v7  ;;  %v1549_v43 = vpop.f32.mrf.mxu2 }
 0x169   :  { %v1568_v49 = vpop.f32.mrf.mxu3  ;;  %v1550_v63 = vadd.f32 %v1549_v43, %v1531_v45  ;;  %v3881_v45 = vld [vmem:[%s6600_s0 + $0x150] sm:$0xf0] }
 0x16a   :  { %2031 = vmatpush.bf16.msra.mxu1 %v7212_v22  ;;  %v7219_v43 = vld [vmem:[#allocation68_spill] sm:$0xff] }
 0x16b   :  { %2069 = vmatpush.bf16.msra.mxu3 %v7213_v13  ;;  %v1513_v32 = vpop.f32.mrf.mxu0  ;;  %v1532_v54 = vpop.f32.mrf.mxu1  ;;  %v5941_v16 = vadd.f32 %v1568_v49, %v1550_v63  ;;  %v3549_v13 = vld [vmem:[%s6600_s0 + $0x130] sm:$0xf]  ;;  %v3877_v49 = vld [vmem:[%s6600_s0 + $0x134] sm:$0xf]  ;;  %v3551_v63 = vld [vmem:[%s6600_s0 + $0x154] sm:$0xf0] }
 0x16c   :  { %v1514_v47 = vadd.f32 %v1513_v32, %v5870_v5  ;;  %2051 = vmatpush.bf16.msra.mxu2 %v7214_v29  ;;  %2013 = vmatpush.bf16.msra.mxu0 %v7215_v38  ;;  %v7218_v5 = vld [vmem:[#allocation64_spill] sm:$0xff]  ;;  %v3557_v32 = vld [vmem:[%s6600_s0 + $0x138] sm:$0xf]  ;;  %v3559_v29 = vld [vmem:[%s6600_s0 + $0x15c] sm:$0xf0]  ;;  %v5973_v26 = vor.u32 %v3881_v45, %v3549_v13 }
 0x16e   :  { %2032 = vmatpush.bf16.msra.mxu1 %v7216_v20  ;;  %v1533_v61 = vadd.f32 %v1532_v54, %v1514_v47  ;;  %v7220_v54 = vld [vmem:[#allocation65_spill] sm:$0xff]  ;;  %7222 = vst [vmem:[#allocation3_spill] sm:$0xff] %v5973_v26 }
 0x16f   :  { %2070 = vmatpush.bf16.msra.mxu3 %v7217_v59  ;;  %v7221_v47 = vld [vmem:[#allocation69_spill] sm:$0xff] }
 0x170   :  { %2120 = vmatpush.bf16.msrb.mxu2 %v7218_v5  ;;  %2082 = vmatpush.bf16.msrb.mxu0 %v7219_v43  ;;  %v3882_v5 = vld [vmem:[%s6600_s0 + $0x158] sm:$0xf0]  ;;  %v1551_v46 = vpop.f32.mrf.mxu2  ;;  %v5975_v43 = vor.u32 %v3877_v49, %v3551_v63  ;;  %v7234_v63 = vld [vmem:[#allocation78_spill] sm:$0xff] }
 0x171   :  { %v3878_v59 = vld [vmem:[%s6600_s0 + $0x13c] sm:$0xf]  ;;  %v1570_v8 = vpop.f32.mrf.mxu3  ;;  %v1552_v20 = vadd.f32 %v1551_v46, %v1533_v61  ;;  %v5979_v7 = vor.u32 %v3882_v5, %v3557_v32  ;;  %v7230_v46 = vld [vmem:[#allocation74_spill] sm:$0xff]  ;;  %v7235_v32 = vld [vmem:[#allocation79_spill] sm:$0xff] }
 0x172   :  { %2101 = vmatpush.bf16.msrb.mxu1 %v7220_v54  ;;  %7223 = vst [vmem:[#allocation6_spill] sm:$0xff] %v5975_v43  ;;  %v7224_v54 = vld [vmem:[#allocation70_spill] sm:$0xff]  ;;  %v5981_v3 = vor.u32 %v3878_v59, %v3559_v29  ;;  %v7231_v29 = vld [vmem:[#allocation75_spill] sm:$0xff]  ;;  %v7232_v59 = vld [vmem:[#allocation76_spill] sm:$0xff] }
 0x173   :  { %2139 = vmatpush.bf16.msrb.mxu3 %v7221_v47  ;;  %v7225_v47 = vld [vmem:[#allocation71_spill] sm:$0xff]  ;;  %v1582_v38 = vpop.f32.mrf.mxu0  ;;  %v1601_v22 = vpop.f32.mrf.mxu1  ;;  %7226 = vst [vmem:[#allocation87_spill] sm:$0xff] %v5979_v7  ;;  %v5986_v45 = vadd.f32 %v1570_v8, %v1552_v20  ;;  %2052 = vmatmul.bf16.vlgmr.msra.gmra.mxu2 %v5979_v7  ;;  %v7233_v61 = vld [vmem:[#allocation77_spill] sm:$0xff] }
 0x174   :  { %2121 = vmatpush.bf16.msrb.mxu2 %v7224_v54  ;;  %2083 = vmatpush.bf16.msrb.mxu0 %v7225_v47  ;;  %7227 = vst [vmem:[#allocation146_spill] sm:$0xff] %v5981_v3  ;;  %v1583_v13 = vadd.f32 %v1582_v38, %v5883_v19  ;;  %v7237_v54 = vld [vmem:[#allocation80_spill] sm:$0xff] }
 0x175   :  { %2014 = vmatmul.bf16.vlgmr.msra.gmra.mxu0 %v5973_v26  ;;  %2033 = vmatmul.bf16.vlgmr.msra.gmra.mxu1 %v5975_v43 }
 0x176   :  { %2102 = vmatpush.bf16.msrb.mxu1 %v7228_v14  ;;  %v1602_v49 = vadd.f32 %v1601_v22, %v1583_v13  ;;  %2071 = vmatmul.bf16.vlgmr.msra.gmra.mxu3 %v5981_v3  ;;  %v7236_v13 = vld [vmem:[#allocation144_spill] sm:$0xff] }
 0x177   :  { %2140 = vmatpush.bf16.msrb.mxu3 %v7229_v55 }
 0x178   :  { %2122 = vmatpush.bf16.msrb.mxu2 %v7230_v46  ;;  %2084 = vmatpush.bf16.msrb.mxu0 %v7231_v29  ;;  %v1620_v19 = vpop.f32.mrf.mxu2  ;;  %v1338_v46 = vmax.f32 %v7236_v13, 0.0  ;;  %v7240_v13 = vld [vmem:[#allocation83_spill] sm:$0xff] }
 0x179   :  { %v5996_v8 = vpop.f32.mrf.mxu3  ;;  %v1621_v22 = vadd.f32 %v1620_v19, %v1602_v49  ;;  %v3585_v49 = vld [vmem:[%s6600_s0 + $0x178] sm:$0xf] }
 0x17a   :  { %2103 = vmatpush.bf16.msrb.mxu1 %v7232_v59  ;;  %v7238_v59 = vld [vmem:[#allocation81_spill] sm:$0xff] }
 0x17b   :  { %2141 = vmatpush.bf16.msrb.mxu3 %v7233_v61  ;;  %v1584_v38 = vpop.f32.mrf.mxu0  ;;  %v1603_v20 = vpop.f32.mrf.mxu1  ;;  %v1801_v55 = vmax.f32 %v1621_v22, 0.0  ;;  %v3587_v22 = vld [vmem:[%s6600_s0 + $0x19c] sm:$0xf0] }
 0x17c   :  { %v1585_v5 = vadd.f32 %v1584_v38, %v5926_v35  ;;  %2123 = vmatpush.bf16.msrb.mxu2 %v7234_v63  ;;  %2085 = vmatpush.bf16.msrb.mxu0 %v7235_v32  ;;  %v3890_v35 = vld [vmem:[%s6600_s0 + $0x198] sm:$0xf0] }
 0x17d   :  { %v6010_v19 = vmax.f32 %v1338_v46, %v1801_v55  ;;  %v3886_v38 = vld [vmem:[%s6600_s0 + $0x17c] sm:$0xf]  ;;  %v3887_v55 = vld [vmem:[%s6600_s0 + $0x184] sm:$0xf]  ;;  %v3595_v46 = vld [vmem:[%s6600_s0 + $0x1a4] sm:$0xf0]  ;;  %v6036_v32 = vor.u32 %v3890_v35, %v3585_v49 }
 0x17e   :  { %2104 = vmatpush.bf16.msrb.mxu1 %v7237_v54  ;;  %v1604_v61 = vadd.f32 %v1603_v20, %v1585_v5  ;;  %v3593_v20 = vld [vmem:[%s6600_s0 + $0x180] sm:$0xf]  ;;  %v3891_v5 = vld [vmem:[%s6600_s0 + $0x1a0] sm:$0xf0]  ;;  %v7242_v63 = vld [vmem:[#allocation85_spill] sm:$0xff]  ;;  %v6038_v29 = vor.u32 %v3886_v38, %v3587_v22  ;;  %v6042_v43 = vor.u32 %v3887_v55, %v3595_v46  ;;  %v1342_v22 = vmax.f32 %v5709_v10, 0.0 }
 0x17f   :  { %2142 = vmatpush.bf16.msrb.mxu3 %v7238_v59  ;;  %7239 = vst [vmem:[#allocation144_spill] sm:$0xff] %v6010_v19  ;;  %v7241_v59 = vld [vmem:[#allocation84_spill] sm:$0xff]  ;;  %v6040_v7 = vor.u32 %v3891_v5, %v3593_v20  ;;  %v7245_v49 = vld [vmem:[#allocation89_spill] sm:$0xff]  ;;  %v7249_v5 = vld [vmem:[#allocation98_spill] sm:$0xff] }
 0x180   :  { %2124 = vmatpush.bf16.msrb.mxu2 %v7126_v51  ;;  %2086 = vmatpush.bf16.msrb.mxu0 %v7240_v13  ;;  %v1622_v19 = vpop.f32.mrf.mxu2  ;;  %v7248_v38 = vld [vmem:[#allocation97_spill] sm:$0xff]  ;;  %v7250_v46 = vld [vmem:[#allocation100_spill] sm:$0xff]  ;;  %v3883_v10 = vld [vmem:[%s6600_s0 + $0x160] sm:$0xf0] }
 0x181   :  { %v6034_v54 = vpop.f32.mrf.mxu3  ;;  %v1623_v14 = vadd.f32 %v1622_v19, %v1604_v61 }
 0x182   :  { %2105 = vmatpush.bf16.msrb.mxu1 %v7241_v59  ;;  %v7243_v59 = vld [vmem:[#allocation88_spill] sm:$0xff] }
 0x183   :  { %2143 = vmatpush.bf16.msrb.mxu3 %v7242_v63  ;;  %v1587_v47 = vpop.f32.mrf.mxu0  ;;  %v1606_v3 = vpop.f32.mrf.mxu1  ;;  %v7244_v63 = vld [vmem:[#allocation145_spill] sm:$0xff]  ;;  %v1803_v26 = vmax.f32 %v1623_v14, 0.0  ;;  %2057 = vmatmul.bf16.gmra.mxu2 %v6040_v7 }
 0x184   :  { %v1588_v51 = vadd.f32 %v1587_v47, %v5941_v16  ;;  %2125 = vmatpush.bf16.msrb.mxu2 %v7129_v33  ;;  %2087 = vmatpush.bf16.msrb.mxu0 %v7243_v59  ;;  %v1340_v13 = vmax.f32 %v7244_v63, 0.0  ;;  %v7246_v16 = vld [vmem:[#allocation92_spill] sm:$0xff]  ;;  %v7247_v14 = vld [vmem:[#allocation93_spill] sm:$0xff] }
 0x185   :  { %2019 = vmatmul.bf16.gmra.mxu0 %v6036_v32  ;;  %2038 = vmatmul.bf16.gmra.mxu1 %v6038_v29 }
 0x186   :  { %2106 = vmatpush.bf16.msrb.mxu1 %v7245_v49  ;;  %v1607_v61 = vadd.f32 %v1606_v3, %v1588_v51  ;;  %v6052_v35 = vmax.f32 %v1340_v13, %v1803_v26  ;;  %2076 = vmatmul.bf16.gmra.mxu3 %v6042_v43 }
 0x187   :  { %2144 = vmatpush.bf16.msrb.mxu3 %v7130_v56 }
 0x188   :  { %2126 = vmatpush.bf16.msrb.mxu2 %v7131_v57  ;;  %2088 = vmatpush.bf16.msrb.mxu0 %v7246_v16  ;;  %v1625_v47 = vpop.f32.mrf.mxu2 }
 0x189   :  { %v1644_v51 = vpop.f32.mrf.mxu3  ;;  %v1626_v3 = vadd.f32 %v1625_v47, %v1607_v61  ;;  %v7251_v61 = vld [vmem:[#allocation101_spill] sm:$0xff]  ;;  %v1640_v47 = vadd.f32 %v5996_v8, %v5654_v21 }
 0x18a   :  { %2107 = vmatpush.bf16.msrb.mxu1 %v7247_v14 }
 0x18b   :  { %2145 = vmatpush.bf16.msrb.mxu3 %v7132_v34  ;;  %v1589_v63 = vpop.f32.mrf.mxu0  ;;  %v1608_v19 = vpop.f32.mrf.mxu1  ;;  %v1805_v20 = vmax.f32 %v1626_v3, 0.0 }
 0x18c   :  { %v1590_v26 = vadd.f32 %v1589_v63, %v5986_v45  ;;  %2127 = vmatpush.bf16.msrb.mxu2 %v7133_v17  ;;  %2089 = vmatpush.bf16.msrb.mxu0 %v7248_v38  ;;  %v3565_v45 = vld [vmem:[%s6600_s0 + $0x140] sm:$0xf]  ;;  %v1344_v17 = vmax.f32 %v5724_v28, 0.0  ;;  %v1642_v28 = vadd.f32 %v6034_v54, %v5654_v21  ;;  %v3601_v54 = vld [vmem:[%s6600_s0 + $0x188] sm:$0xf] }
 0x18d   :  { %v6068_v13 = vmax.f32 %v1342_v22, %v1805_v20 }
 0x18e   :  { %2108 = vmatpush.bf16.msrb.mxu1 %v7249_v5  ;;  %v1609_v55 = vadd.f32 %v1608_v19, %v1590_v26  ;;  %v6082_v19 = vor.u32 %v3883_v10, %v3565_v45  ;;  %v7252_v26 = vld [vmem:[#allocation104_spill] sm:$0xff]  ;;  %v7255_v10 = vld [vmem:[#allocation109_spill] sm:$0xff] }
 0x18f   :  { %2146 = vmatpush.bf16.msrb.mxu3 %v7134_v58  ;;  %v7253_v58 = vld [vmem:[#allocation105_spill] sm:$0xff] }
 0x190   :  { %2196 = vmatpush.bf16.msra.mxu2 %v7135_v62  ;;  %2158 = vmatpush.bf16.msra.mxu0 %v7250_v46  ;;  %v1627_v3 = vpop.f32.mrf.mxu2 }
 0x191   :  { %v6080_v63 = vpop.f32.mrf.mxu3  ;;  %v1628_v22 = vadd.f32 %v1627_v3, %v1609_v55  ;;  %v7254_v55 = vld [vmem:[#allocation108_spill] sm:$0xff] }
 0x192   :  { %2177 = vmatpush.bf16.msra.mxu1 %v7251_v61 }
 0x193   :  { %2215 = vmatpush.bf16.msra.mxu3 %v7136_v6  ;;  %v1658_v20 = vpop.f32.mrf.mxu0  ;;  %v1677_v62 = vpop.f32.mrf.mxu1  ;;  %v1807_v8 = vmax.f32 %v1628_v22, 0.0  ;;  %2128 = vmatmul.bf16.vlgmr.msrb.gmra.mxu2 %v5858_v36  ;;  %v7257_v22 = vld [vmem:[#allocation113_spill] sm:$0xff] }
 0x194   :  { %2197 = vmatpush.bf16.msra.mxu2 %v7137_v12  ;;  %2159 = vmatpush.bf16.msra.mxu0 %v7252_v26  ;;  %v1659_v6 = vadd.f32 %v1658_v20, %v1640_v47 }
 0x195   :  { %2090 = vmatmul.bf16.vlgmr.msrb.gmra.mxu0 %v6082_v19  ;;  %2109 = vmatmul.bf16.vlgmr.msrb.gmra.mxu1 %v5856_v23  ;;  %v6091_v45 = vmax.f32 %v1344_v17, %v1807_v8  ;;  %v7258_v8 = vld [vmem:[#allocation116_spill] sm:$0xff] }
 0x196   :  { %2178 = vmatpush.bf16.msra.mxu1 %v7253_v58  ;;  %v1678_v34 = vadd.f32 %v1677_v62, %v1659_v6  ;;  %2147 = vmatmul.bf16.vlgmr.msrb.gmra.mxu3 %v5863_v24  ;;  %v7256_v24 = vld [vmem:[#allocation112_spill] sm:$0xff] }
 0x197   :  { %2216 = vmatpush.bf16.msra.mxu3 %v7138_v1 }
 0x198   :  { %2198 = vmatpush.bf16.msra.mxu2 %v7139_v9  ;;  %2160 = vmatpush.bf16.msra.mxu0 %v7254_v55  ;;  %v1696_v62 = vpop.f32.mrf.mxu2  ;;  %v7349_v9 = vld [vmem:[#allocation72_spill] sm:$0xff] }
 0x199   :  { %v1715_v6 = vpop.f32.mrf.mxu3  ;;  %v1697_v23 = vadd.f32 %v1696_v62, %v1678_v34  ;;  %v3892_v34 = vld [vmem:[%s6600_s0 + $0x1a8] sm:$0xf0]  ;;  %v1645_v62 = vadd.f32 %v1644_v51, %v5654_v21  ;;  %v7260_v51 = vld [vmem:[#allocation122_spill] sm:$0xff] }
 0x19a   :  { %2179 = vmatpush.bf16.msra.mxu1 %v7255_v10 }
 0x19b   :  { %2217 = vmatpush.bf16.msra.mxu3 %v7140_v11  ;;  %v1660_v17 = vpop.f32.mrf.mxu0  ;;  %v1679_v47 = vpop.f32.mrf.mxu1  ;;  %v1716_v36 = vadd.f32 %v1715_v6, %v1697_v23  ;;  %v7281_v11 = vld [vmem:[#allocation135_spill] sm:$0xff] }
 0x19c   :  { %v1661_v3 = vadd.f32 %v1660_v17, %v1642_v28  ;;  %2199 = vmatpush.bf16.msra.mxu2 %v7141_v30  ;;  %2161 = vmatpush.bf16.msra.mxu0 %v7256_v24  ;;  %v7259_v28 = vld [vmem:[#allocation117_spill] sm:$0xff]  ;;  %v6116_v17 = vor.u32 %v3892_v34, %v3601_v54  ;;  %v1647_v54 = vadd.f32 %v6080_v63, %v5654_v21 }
 0x19e   :  { %2180 = vmatpush.bf16.msra.mxu1 %v7257_v22  ;;  %v1680_v20 = vadd.f32 %v1679_v47, %v1661_v3 }
 0x19f   :  { %2218 = vmatpush.bf16.msra.mxu3 %v7142_v25 }
 0x1a0   :  { %2200 = vmatpush.bf16.msra.mxu2 %v7143_v4  ;;  %2162 = vmatpush.bf16.msra.mxu0 %v7258_v8  ;;  %v1698_v6 = vpop.f32.mrf.mxu2 }
 0x1a1   :  { %v1717_v23 = vpop.f32.mrf.mxu3  ;;  %v1699_v47 = vadd.f32 %v1698_v6, %v1680_v20  ;;  %v7261_v20 = vld [vmem:[#allocation123_spill] sm:$0xff] }
 0x1a2   :  { %2181 = vmatpush.bf16.msra.mxu1 %v7259_v28 }
 0x1a3   :  { %2219 = vmatpush.bf16.msra.mxu3 %v7144_v18  ;;  %v1663_v3 = vpop.f32.mrf.mxu0  ;;  %v1682_v25 = vpop.f32.mrf.mxu1  ;;  %v1718_v4 = vadd.f32 %v1717_v23, %v1699_v47  ;;  %2133 = vmatmul.bf16.gmra.mxu2 %v5917_v0  ;;  %v7263_v23 = vld [vmem:[#allocation128_spill] sm:$0xff] }
 0x1a4   :  { %v1664_v30 = vadd.f32 %v1663_v3, %v1645_v62  ;;  %2201 = vmatpush.bf16.msra.mxu2 %v7145_v27  ;;  %2163 = vmatpush.bf16.msra.mxu0 %v5155_v2  ;;  %v7264_v3 = vld [vmem:[#allocation127_spill] sm:$0xff] }
 0x1a5   :  { %2095 = vmatmul.bf16.gmra.mxu0 %v6116_v17  ;;  %2114 = vmatmul.bf16.gmra.mxu1 %v5915_v44 }
 0x1a6   :  { %2182 = vmatpush.bf16.msra.mxu1 %v5179_v15  ;;  %v1683_v18 = vadd.f32 %v1682_v25, %v1664_v30  ;;  %2152 = vmatmul.bf16.gmra.mxu3 %v5919_v60  ;;  %v7262_v60 = vld [vmem:[#allocation126_spill] sm:$0xff] }
 0x1a7   :  { %2220 = vmatpush.bf16.msra.mxu3 %v7146_v42  ;;  %v7279_v42 = vld [vmem:[#allocation86_spill] sm:$0xff] }
 0x1a8   :  { %2202 = vmatpush.bf16.msra.mxu2 %v7147_v40  ;;  %2164 = vmatpush.bf16.msra.mxu0 %v7260_v51  ;;  %v1701_v30 = vpop.f32.mrf.mxu2  ;;  %v7274_v40 = vld [vmem:[#allocation11_spill] sm:$0xff]  ;;  %v1339_v27 = vmax.f32 %v7279_v42, 0.0  ;;  %v7286_v42 = vld [vmem:[#allocation137_spill] sm:$0xff] }
 0x1a9   :  { %v1720_v25 = vpop.f32.mrf.mxu3  ;;  %v1702_v34 = vadd.f32 %v1701_v30, %v1683_v18 }
 0x1aa   :  { %2183 = vmatpush.bf16.msra.mxu1 %v7261_v20 }
 0x1ab   :  { %2221 = vmatpush.bf16.msra.mxu3 %v7148_v48  ;;  %v1665_v62 = vpop.f32.mrf.mxu0  ;;  %v1684_v44 = vpop.f32.mrf.mxu1  ;;  %v1721_v0 = vadd.f32 %v1720_v25, %v1702_v34  ;;  %v7265_v34 = vld [vmem:[#allocation130_spill] sm:$0xff]  ;;  %v7270_v48 = vld [vmem:[#allocation87_spill] sm:$0xff] }
 0x1ac   :  { %v1666_v6 = vadd.f32 %v1665_v62, %v1647_v54  ;;  %2203 = vmatpush.bf16.msra.mxu2 %v5234_v41  ;;  %2165 = vmatpush.bf16.msra.mxu0 %v7262_v60  ;;  %v7266_v62 = vld [vmem:[#allocation7_spill] sm:$0xff] }
 0x1ad   :  { %v7268_v41 = vld [vmem:[#allocation3_spill] sm:$0xff] }
 0x1ae   :  { %2184 = vmatpush.bf16.msra.mxu1 %v7263_v23  ;;  %v1685_v47 = vadd.f32 %v1684_v44, %v1666_v6 }
 0x1af   :  { %2222 = vmatpush.bf16.msra.mxu3 %v5265_v39  ;;  %v7267_v39 = vld [vmem:[#allocation106_spill] sm:$0xff] }
 0x1b0   :  { %2401 = vmatpush.bf16.msrb.mxu2 %v7150_v52  ;;  %2234 = vmatpush.bf16.msrb.mxu0 %v7264_v3  ;;  %v1703_v18 = vpop.f32.mrf.mxu2 }
 0x1b1   :  { %v1722_v63 = vpop.f32.mrf.mxu3  ;;  %v1704_v54 = vadd.f32 %v1703_v18, %v1685_v47  ;;  %v7272_v47 = vld [vmem:[#allocation131_spill] sm:$0xff]  ;;  %v7273_v18 = vld [vmem:[#allocation132_spill] sm:$0xff] }
 0x1b2   :  { %2253 = vmatpush.bf16.msrb.mxu1 %v5269_v37 }
 0x1b3   :  { %2420 = vmatpush.bf16.msrb.mxu3 %v7151_v53  ;;  %v1734_v30 = vpop.f32.mrf.mxu0  ;;  %v1753_v25 = vpop.f32.mrf.mxu1  ;;  %v1723_v44 = vadd.f32 %v1722_v63, %v1704_v54  ;;  %v7269_v53 = vld [vmem:[#allocation6_spill] sm:$0xff] }
 0x1b4   :  { %2402 = vmatpush.bf16.msrb.mxu2 %v7154_v31  ;;  %2235 = vmatpush.bf16.msrb.mxu0 %v5273_v50  ;;  %v1735_v52 = vadd.f32 %v1734_v30, %v1716_v36  ;;  %v7271_v31 = vld [vmem:[#allocation10_spill] sm:$0xff] }
 0x1b5   :  { %2166 = vmatmul.bf16.vlgmr.msra.gmra.mxu0 %v7267_v39  ;;  %2185 = vmatmul.bf16.vlgmr.msra.gmra.mxu1 %v7268_v41  ;;  %v7276_v41 = vld [vmem:[#allocation133_spill] sm:$0xff] }
 0x1b6   :  { %2254 = vmatpush.bf16.msrb.mxu1 %v7265_v34  ;;  %v1754_v6 = vadd.f32 %v1753_v25, %v1735_v52  ;;  %2204 = vmatmul.bf16.vlgmr.msra.gmra.mxu2 %v7269_v53  ;;  %v7275_v25 = vld [vmem:[#allocation14_spill] sm:$0xff]  ;;  %v7278_v53 = vld [vmem:[#allocation15_spill] sm:$0xff] }
 0x1b7   :  { %2421 = vmatpush.bf16.msrb.mxu3 %v7266_v62 }
 0x1b8   :  { %2223 = vmatmul.bf16.vlgmr.msra.gmra.mxu3 %v7270_v48  ;;  %2403 = vmatpush.bf16.msrb.mxu2 %v7271_v31  ;;  %v1772_v62 = vpop.f32.mrf.mxu2  ;;  %v7277_v48 = vld [vmem:[#allocation134_spill] sm:$0xff] }
 0x1b9   :  { %2236 = vmatpush.bf16.msrb.mxu0 %v7272_v47  ;;  %v1791_v36 = vpop.f32.mrf.mxu3  ;;  %v1773_v63 = vadd.f32 %v1772_v62, %v1754_v6  ;;  %v7284_v62 = vld [vmem:[#allocation19_spill] sm:$0xff] }
 0x1ba   :  { %2255 = vmatpush.bf16.msrb.mxu1 %v7273_v18 }
 0x1bb   :  { %2422 = vmatpush.bf16.msrb.mxu3 %v7274_v40  ;;  %v1736_v54 = vpop.f32.mrf.mxu0  ;;  %v1755_v30 = vpop.f32.mrf.mxu1  ;;  %v1792_v52 = vadd.f32 %v1791_v36, %v1773_v63  ;;  %v7280_v40 = vld [vmem:[#allocation18_spill] sm:$0xff] }
 0x1bc   :  { %v1737_v39 = vadd.f32 %v1736_v54, %v1718_v4  ;;  %2404 = vmatpush.bf16.msrb.mxu2 %v7275_v25  ;;  %v7283_v4 = vld [vmem:[#allocation136_spill] sm:$0xff] }
 0x1bd   :  { %2237 = vmatpush.bf16.msrb.mxu0 %v7276_v41  ;;  %v1802_v18 = vmax.f32 %v1792_v52, 0.0  ;;  %v7287_v52 = vld [vmem:[#allocation138_spill] sm:$0xff]  ;;  %v7348_v41 = vld [vmem:[#allocation41_spill] sm:$0xff] }
 0x1be   :  { %2256 = vmatpush.bf16.msrb.mxu1 %v7277_v48  ;;  %v1756_v31 = vadd.f32 %v1755_v30, %v1737_v39  ;;  %v7285_v30 = vld [vmem:[#allocation22_spill] sm:$0xff] }
 0x1bf   :  { %2423 = vmatpush.bf16.msrb.mxu3 %v7278_v53  ;;  %v6159_v6 = vmax.f32 %v1339_v27, %v1802_v18  ;;  %v7289_v18 = vld [vmem:[#allocation2_spill] sm:$0xff] }
 0x1c0   :  { %2405 = vmatpush.bf16.msrb.mxu2 %v7280_v40  ;;  %v1774_v54 = vpop.f32.mrf.mxu2  ;;  %v7288_v40 = vld [vmem:[#allocation23_spill] sm:$0xff] }
 0x1c1   :  { %2238 = vmatpush.bf16.msrb.mxu0 %v7281_v11  ;;  %7282 = vst [vmem:[#allocation88_spill] sm:$0xff] %v6159_v6  ;;  %v1793_v36 = vpop.f32.mrf.mxu3  ;;  %v1775_v63 = vadd.f32 %v1774_v54, %v1756_v31  ;;  %v7292_v54 = vld [vmem:[#allocation139_spill] sm:$0xff] }
 0x1c2   :  { %2257 = vmatpush.bf16.msrb.mxu1 %v7283_v4 }
 0x1c3   :  { %2424 = vmatpush.bf16.msrb.mxu3 %v7284_v62  ;;  %v1739_v25 = vpop.f32.mrf.mxu0  ;;  %v1758_v48 = vpop.f32.mrf.mxu1  ;;  %v1794_v39 = vadd.f32 %v1793_v36, %v1775_v63  ;;  %v7290_v62 = vld [vmem:[#allocation90_spill] sm:$0xff]  ;;  %v7294_v63 = vld [vmem:[#allocation140_spill] sm:$0xff] }
 0x1c4   :  { %v1740_v53 = vadd.f32 %v1739_v25, %v1721_v0  ;;  %2406 = vmatpush.bf16.msrb.mxu2 %v7285_v30  ;;  %v1341_v6 = vmax.f32 %v7290_v62, 0.0  ;;  %v7291_v0 = vld [vmem:[#allocation26_spill] sm:$0xff] }
 0x1c5   :  { %2239 = vmatpush.bf16.msrb.mxu0 %v7286_v42  ;;  %2190 = vmatmul.bf16.gmra.mxu1 %v6036_v32  ;;  %v1804_v31 = vmax.f32 %v1794_v39, 0.0  ;;  %v7298_v62 = vld [vmem:[#allocation142_spill] sm:$0xff] }
 0x1c6   :  { %2258 = vmatpush.bf16.msrb.mxu1 %v7287_v52  ;;  %v1759_v27 = vadd.f32 %v1758_v48, %v1740_v53  ;;  %2171 = vmatmul.bf16.gmra.mxu0 %v7289_v18  ;;  %v7295_v48 = vld [vmem:[#allocation27_spill] sm:$0xff]  ;;  %v7296_v18 = vld [vmem:[#allocation30_spill] sm:$0xff] }
 0x1c7   :  { %2425 = vmatpush.bf16.msrb.mxu3 %v7288_v40  ;;  %2209 = vmatmul.bf16.gmra.mxu2 %v6038_v29  ;;  %v6174_v36 = vmax.f32 %v1341_v6, %v1804_v31  ;;  %v7297_v29 = vld [vmem:[#allocation141_spill] sm:$0xff]  ;;  %v7300_v31 = vld [vmem:[#allocation36_spill] sm:$0xff]  ;;  %v7310_v52 = vld [vmem:[#allocation143_spill] sm:$0xff] }
 0x1c8   :  { %2228 = vmatmul.bf16.gmra.mxu3 %v6040_v7  ;;  %2407 = vmatpush.bf16.msrb.mxu2 %v7291_v0  ;;  %v1777_v25 = vpop.f32.mrf.mxu2  ;;  %v7299_v0 = vld [vmem:[#allocation31_spill] sm:$0xff]  ;;  %v7311_v42 = vld [vmem:[#allocation146_spill] sm:$0xff] }
 0x1c9   :  { %2240 = vmatpush.bf16.msrb.mxu0 %v7292_v54  ;;  %7293 = vst [vmem:[#allocation145_spill] sm:$0xff] %v6174_v36  ;;  %v1796_v53 = vpop.f32.mrf.mxu3  ;;  %v1778_v32 = vadd.f32 %v1777_v25, %v1759_v27  ;;  %v7301_v36 = vld [vmem:[#allocation4_spill] sm:$0xff]  ;;  %v7303_v25 = vld [vmem:[#allocation5_spill] sm:$0xff]  ;;  %v7309_v54 = vld [vmem:[#allocation39_spill] sm:$0xff] }
 0x1ca   :  { %2259 = vmatpush.bf16.msrb.mxu1 %v7294_v63 }
 0x1cb   :  { %2426 = vmatpush.bf16.msrb.mxu3 %v7295_v48  ;;  %v1741_v30 = vpop.f32.mrf.mxu0  ;;  %v1760_v40 = vpop.f32.mrf.mxu1  ;;  %v1797_v7 = vadd.f32 %v1796_v53, %v1778_v32  ;;  %v7302_v48 = vld [vmem:[#allocation91_spill] sm:$0xff]  ;;  %v3897_v53 = vld [vmem:[%s6600_s0 + $0x1d0] sm:$0xf0] }
 0x1cc   :  { %v1742_v39 = vadd.f32 %v1741_v30, %v1723_v44  ;;  %2408 = vmatpush.bf16.msrb.mxu2 %v7296_v18  ;;  %v1343_v63 = vmax.f32 %v7302_v48, 0.0  ;;  %v3625_v44 = vld [vmem:[%s6600_s0 + $0x1b0] sm:$0xf]  ;;  %v7304_v30 = vld [vmem:[#allocation35_spill] sm:$0xff]  ;;  %v3893_v32 = vld [vmem:[%s6600_s0 + $0x1b4] sm:$0xf] }
 0x1cd   :  { %2241 = vmatpush.bf16.msrb.mxu0 %v7297_v29  ;;  %v1806_v27 = vmax.f32 %v1797_v7, 0.0  ;;  %v7306_v7 = vld [vmem:[#allocation40_spill] sm:$0xff]  ;;  %v7308_v29 = vld [vmem:[#allocation9_spill] sm:$0xff] }
 0x1ce   :  { %2260 = vmatpush.bf16.msrb.mxu1 %v7298_v62  ;;  %v1761_v6 = vadd.f32 %v1760_v40, %v1742_v39 }
 0x1cf   :  { %2427 = vmatpush.bf16.msrb.mxu3 %v7299_v0  ;;  %v6199_v40 = vmax.f32 %v1343_v63, %v1806_v27  ;;  %v7307_v0 = vld [vmem:[#allocation8_spill] sm:$0xff] }
 0x1d0   :  { %2477 = vmatpush.bf16.msra.mxu2 %v7300_v31  ;;  %v1779_v39 = vpop.f32.mrf.mxu2 }
 0x1d1   :  { %2439 = vmatpush.bf16.msra.mxu0 %v7301_v36  ;;  %v3627_v36 = vld [vmem:[%s6600_s0 + $0x1d4] sm:$0xf0]  ;;  %7305 = vst [vmem:[#allocation89_spill] sm:$0xff] %v6199_v40  ;;  %v1798_v18 = vpop.f32.mrf.mxu3  ;;  %v1780_v31 = vadd.f32 %v1779_v39, %v1761_v6 }
 0x1d2   :  { %2458 = vmatpush.bf16.msra.mxu1 %v7303_v25  ;;  %v6205_v62 = vor.u32 %v3893_v32, %v3627_v36  ;;  %v7317_v32 = vld [vmem:[#allocation43_spill] sm:$0xff] }
 0x1d3   :  { %2496 = vmatpush.bf16.msra.mxu3 %v7304_v30  ;;  %v1939_v48 = vpop.f32.mrf.mxu0  ;;  %v1958_v25 = vpop.f32.mrf.mxu1  ;;  %v6203_v30 = vor.u32 %v3897_v53, %v3625_v44  ;;  %v1799_v27 = vadd.f32 %v1798_v18, %v1780_v31  ;;  %v7313_v44 = vld [vmem:[#allocation44_spill] sm:$0xff]  ;;  %v7316_v53 = vld [vmem:[#allocation13_spill] sm:$0xff] }
 0x1d4   :  { %2478 = vmatpush.bf16.msra.mxu2 %v7306_v7  ;;  %v1940_v63 = vadd.f32 %v1939_v48, %v7310_v52  ;;  %v7312_v7 = vld [vmem:[#allocation103_spill] sm:$0xff]  ;;  %v7318_v48 = vld [vmem:[#allocation48_spill] sm:$0xff] }
 0x1d5   :  { %2440 = vmatpush.bf16.msra.mxu0 %v7307_v0  ;;  %2261 = vmatmul.bf16.vlgmr.msrb.gmra.mxu1 %v6082_v19  ;;  %v1345_v6 = vmax.f32 %v7312_v7, 0.0  ;;  %v1808_v39 = vmax.f32 %v1799_v27, 0.0  ;;  %v7320_v27 = vld [vmem:[#allocation17_spill] sm:$0xff]  ;;  %v7321_v7 = vld [vmem:[#allocation47_spill] sm:$0xff] }
 0x1d6   :  { %2459 = vmatpush.bf16.msra.mxu1 %v7308_v29  ;;  %v1959_v40 = vadd.f32 %v1958_v25, %v1940_v63  ;;  %2242 = vmatmul.bf16.vlgmr.msrb.gmra.mxu0 %v7311_v42  ;;  %v7314_v29 = vld [vmem:[#allocation12_spill] sm:$0xff] }
 0x1d7   :  { %2497 = vmatpush.bf16.msra.mxu3 %v7309_v54  ;;  %2409 = vmatmul.bf16.vlgmr.msrb.gmra.mxu2 %v6203_v30  ;;  %v6217_v54 = vmax.f32 %v1345_v6, %v1808_v39  ;;  %v7319_v25 = vld [vmem:[#allocation16_spill] sm:$0xff]  ;;  %v3661_v39 = vld [vmem:[%s6600_s0 + $0x1f8] sm:$0xf] }
 0x1d8   :  { %2428 = vmatmul.bf16.vlgmr.msrb.gmra.mxu3 %v6205_v62  ;;  %2479 = vmatpush.bf16.msra.mxu2 %v7313_v44  ;;  %v1977_v42 = vpop.f32.mrf.mxu2  ;;  %v3902_v44 = vld [vmem:[%s6600_s0 + $0x1fc] sm:$0xf] }
 0x1d9   :  { %2441 = vmatpush.bf16.msra.mxu0 %v7314_v29  ;;  %7315 = vst [vmem:[#allocation92_spill] sm:$0xff] %v6217_v54  ;;  %v1996_v36 = vpop.f32.mrf.mxu3  ;;  %v1978_v19 = vadd.f32 %v1977_v42, %v1959_v40  ;;  %v3906_v40 = vld [vmem:[%s6600_s0 + $0x218] sm:$0xf0]  ;;  %v3663_v29 = vld [vmem:[%s6600_s0 + $0x21c] sm:$0xf0]  ;;  %v7327_v54 = vld [vmem:[#allocation56_spill] sm:$0xff] }
 0x1da   :  { %2460 = vmatpush.bf16.msra.mxu1 %v7316_v53  ;;  %v7322_v53 = vld [vmem:[#allocation52_spill] sm:$0xff]  ;;  %v7324_v42 = vld [vmem:[#allocation21_spill] sm:$0xff] }
 0x1db   :  { %2498 = vmatpush.bf16.msra.mxu3 %v7317_v32  ;;  %v1941_v18 = vpop.f32.mrf.mxu0  ;;  %v1960_v0 = vpop.f32.mrf.mxu1  ;;  %v6224_v63 = vadd.f32 %v1996_v36, %v1978_v19  ;;  %v7323_v32 = vld [vmem:[#allocation20_spill] sm:$0xff]  ;;  %v7325_v36 = vld [vmem:[#allocation51_spill] sm:$0xff] }
 0x1dc   :  { %v1942_v31 = vadd.f32 %v1941_v18, %v7310_v52  ;;  %2480 = vmatpush.bf16.msra.mxu2 %v7318_v48 }
 0x1dd   :  { %2442 = vmatpush.bf16.msra.mxu0 %v7319_v25  ;;  %v6244_v25 = vor.u32 %v3906_v40, %v3661_v39  ;;  %v7333_v39 = vld [vmem:[#allocation29_spill] sm:$0xff]  ;;  %v7334_v40 = vld [vmem:[#allocation59_spill] sm:$0xff] }
 0x1de   :  { %2461 = vmatpush.bf16.msra.mxu1 %v7320_v27  ;;  %v1961_v6 = vadd.f32 %v1960_v0, %v1942_v31  ;;  %v6246_v27 = vor.u32 %v3902_v44, %v3663_v29 }
 0x1df   :  { %2499 = vmatpush.bf16.msra.mxu3 %v7321_v7 }
 0x1e0   :  { %2481 = vmatpush.bf16.msra.mxu2 %v7322_v53  ;;  %v1979_v19 = vpop.f32.mrf.mxu2  ;;  %7326 = vst [vmem:[#allocation93_spill] sm:$0xff] %v6246_v27  ;;  %v7328_v53 = vld [vmem:[#allocation24_spill] sm:$0xff] }
 0x1e1   :  { %2443 = vmatpush.bf16.msra.mxu0 %v7323_v32  ;;  %v1998_v18 = vpop.f32.mrf.mxu3  ;;  %v1980_v0 = vadd.f32 %v1979_v19, %v1961_v6  ;;  %v7331_v6 = vld [vmem:[#allocation60_spill] sm:$0xff] }
 0x1e2   :  { %2462 = vmatpush.bf16.msra.mxu1 %v7324_v42  ;;  %v7329_v42 = vld [vmem:[#allocation25_spill] sm:$0xff] }
 0x1e3   :  { %2500 = vmatpush.bf16.msra.mxu3 %v7325_v36  ;;  %v1944_v31 = vpop.f32.mrf.mxu0  ;;  %v1963_v48 = vpop.f32.mrf.mxu1  ;;  %v6251_v32 = vadd.f32 %v1998_v18, %v1980_v0  ;;  %v7330_v36 = vld [vmem:[#allocation55_spill] sm:$0xff] }
 0x1e4   :  { %v1945_v7 = vadd.f32 %v1944_v31, %v7310_v52  ;;  %2482 = vmatpush.bf16.msra.mxu2 %v7327_v54  ;;  %v7332_v54 = vld [vmem:[#allocation28_spill] sm:$0xff] }
 0x1e5   :  { %2444 = vmatpush.bf16.msra.mxu0 %v7328_v53  ;;  %2266 = vmatmul.bf16.gmra.mxu1 %v6116_v17  ;;  %v7335_v17 = vld [vmem:[#allocation66_spill] sm:$0xff]  ;;  %v7336_v31 = vld [vmem:[#allocation32_spill] sm:$0xff]  ;;  %v7338_v53 = vld [vmem:[#allocation63_spill] sm:$0xff] }
 0x1e6   :  { %2463 = vmatpush.bf16.msra.mxu1 %v7329_v42  ;;  %v1964_v4 = vadd.f32 %v1963_v48, %v1945_v7  ;;  %2247 = vmatmul.bf16.gmra.mxu0 %v6042_v43  ;;  %v7337_v7 = vld [vmem:[#allocation33_spill] sm:$0xff] }
 0x1e7   :  { %2501 = vmatpush.bf16.msra.mxu3 %v7330_v36  ;;  %2414 = vmatmul.bf16.gmra.mxu2 %v6244_v25  ;;  %v3633_v36 = vld [vmem:[%s6600_s0 + $0x1b8] sm:$0xf] }
 0x1e8   :  { %2433 = vmatmul.bf16.gmra.mxu3 %v6246_v27  ;;  %2483 = vmatpush.bf16.msra.mxu2 %v7331_v6  ;;  %v1982_v44 = vpop.f32.mrf.mxu2  ;;  %v7339_v6 = vld [vmem:[#allocation68_spill] sm:$0xff] }
 0x1e9   :  { %2445 = vmatpush.bf16.msra.mxu0 %v7332_v54  ;;  %v2001_v29 = vpop.f32.mrf.mxu3  ;;  %v1983_v19 = vadd.f32 %v1982_v44, %v1964_v4  ;;  %v3898_v4 = vld [vmem:[%s6600_s0 + $0x1d8] sm:$0xf0]  ;;  %v7340_v54 = vld [vmem:[#allocation34_spill] sm:$0xff] }
 0x1ea   :  { %2464 = vmatpush.bf16.msra.mxu1 %v7333_v39  ;;  %v3894_v39 = vld [vmem:[%s6600_s0 + $0x1bc] sm:$0xf]  ;;  %v3641_v44 = vld [vmem:[%s6600_s0 + $0x1c0] sm:$0xf] }
 0x1eb   :  { %2502 = vmatpush.bf16.msra.mxu3 %v7334_v40  ;;  %v1946_v18 = vpop.f32.mrf.mxu0  ;;  %v1965_v0 = vpop.f32.mrf.mxu1  ;;  %v6266_v48 = vadd.f32 %v2001_v29, %v1983_v19  ;;  %v3635_v40 = vld [vmem:[%s6600_s0 + $0x1dc] sm:$0xf0]  ;;  %v7341_v29 = vld [vmem:[#allocation37_spill] sm:$0xff] }
 0x1ec   :  { %v1947_v43 = vadd.f32 %v1946_v18, %v7310_v52  ;;  %2484 = vmatpush.bf16.msra.mxu2 %v7335_v17  ;;  %v7342_v19 = vld [vmem:[#allocation65_spill] sm:$0xff]  ;;  %v3899_v18 = vld [vmem:[%s6600_s0 + $0x1e0] sm:$0xf0] }
 0x1ed   :  { %2446 = vmatpush.bf16.msra.mxu0 %v7336_v31  ;;  %v6304_v27 = vor.u32 %v3899_v18, %v3641_v44 }
 0x1ee   :  { %2465 = vmatpush.bf16.msra.mxu1 %v7337_v7  ;;  %v1966_v42 = vadd.f32 %v1965_v0, %v1947_v43  ;;  %v3895_v0 = vld [vmem:[%s6600_s0 + $0x1c4] sm:$0xf]  ;;  %v3643_v43 = vld [vmem:[%s6600_s0 + $0x1e4] sm:$0xf0]  ;;  %v6298_v7 = vor.u32 %v3898_v4, %v3633_v36 }
 0x1ef   :  { %2503 = vmatpush.bf16.msra.mxu3 %v7338_v53  ;;  %v6300_v53 = vor.u32 %v3894_v39, %v3635_v40  ;;  %7346 = vst [vmem:[#allocation98_spill] sm:$0xff] %v6304_v27  ;;  %v6306_v11 = vor.u32 %v3895_v0, %v3643_v43  ;;  %v7351_v40 = vld [vmem:[#allocation42_spill] sm:$0xff] }
 0x1f0   :  { %2553 = vmatpush.bf16.msrb.mxu2 %v7339_v6  ;;  %v1984_v17 = vpop.f32.mrf.mxu2  ;;  %v7344_v6 = vld [vmem:[#allocation71_spill] sm:$0xff] }
 0x1f1   :  { %2515 = vmatpush.bf16.msrb.mxu0 %v7340_v54  ;;  %v2003_v31 = vpop.f32.mrf.mxu3  ;;  %7343 = vst [vmem:[#allocation97_spill] sm:$0xff] %v6300_v53  ;;  %v7345_v54 = vld [vmem:[#allocation38_spill] sm:$0xff] }
 0x1f2   :  { %2534 = vmatpush.bf16.msrb.mxu1 %v7341_v29  ;;  %v1985_v29 = vadd.f32 %v1984_v17, %v1966_v42  ;;  %7347 = vst [vmem:[#allocation100_spill] sm:$0xff] %v6306_v11  ;;  %v7350_v42 = vld [vmem:[#allocation75_spill] sm:$0xff] }
 0x1f3   :  { %2572 = vmatpush.bf16.msrb.mxu3 %v7342_v19  ;;  %v2015_v19 = vpop.f32.mrf.mxu0  ;;  %v2034_v52 = vpop.f32.mrf.mxu1  ;;  %v7354_v17 = vld [vmem:[#allocation79_spill] sm:$0xff] }
 0x1f4   :  { %2554 = vmatpush.bf16.msrb.mxu2 %v7344_v6  ;;  %v2016_v36 = vadd.f32 %v2015_v19, %v6224_v63  ;;  %v6311_v4 = vadd.f32 %v2003_v31, %v1985_v29  ;;  %v7355_v31 = vld [vmem:[#allocation46_spill] sm:$0xff]  ;;  %v7357_v29 = vld [vmem:[#allocation80_spill] sm:$0xff] }
 0x1f5   :  { %2516 = vmatpush.bf16.msrb.mxu0 %v7345_v54  ;;  %2466 = vmatmul.bf16.vlgmr.msra.gmra.mxu1 %v6300_v53  ;;  %v7356_v54 = vld [vmem:[#allocation49_spill] sm:$0xff] }
 0x1f6   :  { %2535 = vmatpush.bf16.msrb.mxu1 %v7348_v41  ;;  %v2035_v39 = vadd.f32 %v2034_v52, %v2016_v36  ;;  %2447 = vmatmul.bf16.vlgmr.msra.gmra.mxu0 %v6298_v7  ;;  %v7352_v41 = vld [vmem:[#allocation45_spill] sm:$0xff]  ;;  %v3669_v36 = vld [vmem:[%s6600_s0 + $0x200] sm:$0xf] }
 0x1f7   :  { %2573 = vmatpush.bf16.msrb.mxu3 %v7349_v9  ;;  %2485 = vmatmul.bf16.vlgmr.msra.gmra.mxu2 %v6304_v27  ;;  %v7353_v9 = vld [vmem:[#allocation76_spill] sm:$0xff] }
 0x1f8   :  { %2504 = vmatmul.bf16.vlgmr.msra.gmra.mxu3 %v6306_v11  ;;  %2555 = vmatpush.bf16.msrb.mxu2 %v7350_v42  ;;  %v2053_v63 = vpop.f32.mrf.mxu2  ;;  %v3671_v42 = vld [vmem:[%s6600_s0 + $0x224] sm:$0xf0] }
 0x1f9   :  { %2517 = vmatpush.bf16.msrb.mxu0 %v7351_v40  ;;  %v2072_v44 = vpop.f32.mrf.mxu3  ;;  %v2054_v18 = vadd.f32 %v2053_v63, %v2035_v39  ;;  %v3907_v39 = vld [vmem:[%s6600_s0 + $0x220] sm:$0xf0]  ;;  %v3677_v40 = vld [vmem:[%s6600_s0 + $0x208] sm:$0xf]  ;;  %v3679_v63 = vld [vmem:[%s6600_s0 + $0x22c] sm:$0xf0] }
 0x1fa   :  { %2536 = vmatpush.bf16.msrb.mxu1 %v7352_v41  ;;  %v3908_v41 = vld [vmem:[%s6600_s0 + $0x228] sm:$0xf0] }
 0x1fb   :  { %2574 = vmatpush.bf16.msrb.mxu3 %v7353_v9  ;;  %v2017_v52 = vpop.f32.mrf.mxu0  ;;  %v2036_v0 = vpop.f32.mrf.mxu1  ;;  %v6324_v6 = vadd.f32 %v2072_v44, %v2054_v18  ;;  %v3904_v9 = vld [vmem:[%s6600_s0 + $0x20c] sm:$0xf]  ;;  %v7359_v18 = vld [vmem:[#allocation50_spill] sm:$0xff]  ;;  %v6360_v27 = vor.u32 %v3908_v41, %v3677_v40 }
 0x1fc   :  { %v2018_v43 = vadd.f32 %v2017_v52, %v6251_v32  ;;  %2556 = vmatpush.bf16.msrb.mxu2 %v7354_v17  ;;  %v3903_v32 = vld [vmem:[%s6600_s0 + $0x204] sm:$0xf]  ;;  %v7358_v44 = vld [vmem:[#allocation83_spill] sm:$0xff]  ;;  %v7360_v52 = vld [vmem:[#allocation53_spill] sm:$0xff]  ;;  %v6362_v53 = vor.u32 %v3904_v9, %v3679_v63 }
 0x1fd   :  { %2518 = vmatpush.bf16.msrb.mxu0 %v7355_v31  ;;  %v6356_v31 = vor.u32 %v3907_v39, %v3669_v36  ;;  %v7368_v9 = vld [vmem:[#allocation64_spill] sm:$0xff]  ;;  %v7369_v63 = vld [vmem:[#allocation69_spill] sm:$0xff] }
 0x1fe   :  { %2537 = vmatpush.bf16.msrb.mxu1 %v7356_v54  ;;  %v2037_v19 = vadd.f32 %v2036_v0, %v2018_v43  ;;  %v7361_v0 = vld [vmem:[#allocation84_spill] sm:$0xff]  ;;  %v6358_v54 = vor.u32 %v3903_v32, %v3671_v42  ;;  %v7366_v42 = vld [vmem:[#allocation62_spill] sm:$0xff] }
 0x1ff   :  { %2575 = vmatpush.bf16.msrb.mxu3 %v7357_v29 }
 0x200   :  { %2557 = vmatpush.bf16.msrb.mxu2 %v7358_v44  ;;  %v2055_v43 = vpop.f32.mrf.mxu2 }
 0x201   :  { %2519 = vmatpush.bf16.msrb.mxu0 %v7359_v18  ;;  %v2074_v17 = vpop.f32.mrf.mxu3  ;;  %v2056_v29 = vadd.f32 %v2055_v43, %v2037_v19  ;;  %v7362_v18 = vld [vmem:[#allocation54_spill] sm:$0xff]  ;;  %v3901_v43 = vld [vmem:[%s6600_s0 + $0x1f0] sm:$0xf0] }
 0x202   :  { %2538 = vmatpush.bf16.msrb.mxu1 %v7360_v52 }
 0x203   :  { %2576 = vmatpush.bf16.msrb.mxu3 %v7361_v0  ;;  %v2020_v11 = vpop.f32.mrf.mxu0  ;;  %v2039_v47 = vpop.f32.mrf.mxu1  ;;  %v6367_v52 = vadd.f32 %v2074_v17, %v2056_v29  ;;  %v7363_v0 = vld [vmem:[#allocation57_spill] sm:$0xff] }
 0x204   :  { %v2021_v44 = vadd.f32 %v2020_v11, %v6266_v48  ;;  %2558 = vmatpush.bf16.msrb.mxu2 %v7243_v59  ;;  %v7364_v11 = vld [vmem:[#allocation58_spill] sm:$0xff]  ;;  %v7365_v59 = vld [vmem:[#allocation61_spill] sm:$0xff] }
 0x205   :  { %2520 = vmatpush.bf16.msrb.mxu0 %v7362_v18  ;;  %2471 = vmatmul.bf16.gmra.mxu1 %v6358_v54 }
 0x206   :  { %2539 = vmatpush.bf16.msrb.mxu1 %v7363_v0  ;;  %v2040_v36 = vadd.f32 %v2039_v47, %v2021_v44  ;;  %2452 = vmatmul.bf16.gmra.mxu0 %v6356_v31  ;;  %v7370_v0 = vld [vmem:[#allocation70_spill] sm:$0xff] }
 0x207   :  { %2577 = vmatpush.bf16.msrb.mxu3 %v7245_v49  ;;  %2490 = vmatmul.bf16.gmra.mxu2 %v6360_v27 }
 0x208   :  { %2509 = vmatmul.bf16.gmra.mxu3 %v6362_v53  ;;  %2559 = vmatpush.bf16.msrb.mxu2 %v7246_v16  ;;  %v2058_v48 = vpop.f32.mrf.mxu2  ;;  %v7367_v16 = vld [vmem:[#allocation67_spill] sm:$0xff] }
 0x209   :  { %2521 = vmatpush.bf16.msrb.mxu0 %v7364_v11  ;;  %v2077_v19 = vpop.f32.mrf.mxu3  ;;  %v2059_v49 = vadd.f32 %v2058_v48, %v2040_v36  ;;  %v7371_v48 = vld [vmem:[#allocation73_spill] sm:$0xff] }
 0x20a   :  { %2540 = vmatpush.bf16.msrb.mxu1 %v7365_v59 }
 0x20b   :  { %2578 = vmatpush.bf16.msrb.mxu3 %v7247_v14  ;;  %v2022_v47 = vpop.f32.mrf.mxu0  ;;  %v2041_v39 = vpop.f32.mrf.mxu1  ;;  %v6382_v40 = vadd.f32 %v2077_v19, %v2059_v49  ;;  %v3649_v14 = vld [vmem:[%s6600_s0 + $0x1c8] sm:$0xf] }
 0x20c   :  { %v2023_v32 = vadd.f32 %v2022_v47, %v6311_v4  ;;  %2560 = vmatpush.bf16.msrb.mxu2 %v7248_v38  ;;  %v3900_v38 = vld [vmem:[%s6600_s0 + $0x1e8] sm:$0xf0] }
 0x20d   :  { %2522 = vmatpush.bf16.msrb.mxu0 %v7366_v42  ;;  %v3896_v4 = vld [vmem:[%s6600_s0 + $0x1cc] sm:$0xf]  ;;  %v6408_v44 = vor.u32 %v3900_v38, %v3649_v14 }
 0x20e   :  { %2541 = vmatpush.bf16.msrb.mxu1 %v7367_v16  ;;  %v2042_v41 = vadd.f32 %v2041_v39, %v2023_v32  ;;  %v7372_v39 = vld [vmem:[#allocation144_spill] sm:$0xff] }
 0x20f   :  { %2579 = vmatpush.bf16.msrb.mxu3 %v7249_v5  ;;  %v3651_v5 = vld [vmem:[%s6600_s0 + $0x1ec] sm:$0xf0] }
 0x210   :  { %2629 = vmatpush.bf16.msra.mxu2 %v7250_v46  ;;  %v3657_v46 = vld [vmem:[%s6600_s0 + $0x1d0] sm:$0xf]  ;;  %v2060_v17 = vpop.f32.mrf.mxu2  ;;  %v6410_v18 = vor.u32 %v3896_v4, %v3651_v5 }
 0x211   :  { %2591 = vmatpush.bf16.msra.mxu0 %v7368_v9  ;;  %v2079_v29 = vpop.f32.mrf.mxu3  ;;  %v2061_v36 = vadd.f32 %v2060_v17, %v2042_v41  ;;  %v6414_v59 = vor.u32 %v3901_v43, %v3657_v46  ;;  %v3910_v43 = vld [vmem:[%s6600_s0 + $0x238] sm:$0xf0]  ;;  %v7377_v17 = vld [vmem:[#allocation82_spill] sm:$0xff] }
 0x212   :  { %2610 = vmatpush.bf16.msra.mxu1 %v7369_v63  ;;  %v3909_v63 = vld [vmem:[%s6600_s0 + $0x230] sm:$0xf0] }
 0x213   :  { %2648 = vmatpush.bf16.msra.mxu3 %v7251_v61  ;;  %v2091_v61 = vpop.f32.mrf.mxu0  ;;  %v2110_v11 = vpop.f32.mrf.mxu1  ;;  %v6419_v49 = vadd.f32 %v2079_v29, %v2061_v36 }
 0x214   :  { %2630 = vmatpush.bf16.msra.mxu2 %v7252_v26  ;;  %v2092_v19 = vadd.f32 %v2091_v61, %v6324_v6  ;;  %v2111_v26 = vadd.f32 %v2110_v11, %v5654_v21  ;;  %v7374_v6 = vld [vmem:[#allocation77_spill] sm:$0xff] }
 0x215   :  { %2592 = vmatpush.bf16.msra.mxu0 %v7370_v0  ;;  %2542 = vmatmul.bf16.vlgmr.msrb.gmra.mxu1 %v6410_v18  ;;  %v7378_v0 = vld [vmem:[#allocation85_spill] sm:$0xff] }
 0x216   :  { %2611 = vmatpush.bf16.msra.mxu1 %v7371_v48  ;;  %v2272_v47 = vmax.f32 %v2092_v19, 0.0  ;;  %2523 = vmatmul.bf16.vlgmr.msrb.gmra.mxu0 %v6408_v44 }
 0x217   :  { %2649 = vmatpush.bf16.msra.mxu3 %v7253_v58  ;;  %2561 = vmatmul.bf16.vlgmr.msrb.gmra.mxu2 %v6414_v59  ;;  %v7373_v58 = vld [vmem:[#allocation74_spill] sm:$0xff] }
 0x218   :  { %2580 = vmatmul.bf16.vlgmr.msrb.gmra.mxu3 %v6203_v30  ;;  %v6427_v32 = vmax.f32 %v7372_v39, %v2272_v47  ;;  %2631 = vmatpush.bf16.msra.mxu2 %v7254_v55  ;;  %v2129_v42 = vpop.f32.mrf.mxu2  ;;  %v7375_v30 = vld [vmem:[#allocation78_spill] sm:$0xff]  ;;  %v7376_v55 = vld [vmem:[#allocation81_spill] sm:$0xff] }
 0x219   :  { %2593 = vmatpush.bf16.msra.mxu0 %v7373_v58  ;;  %v2148_v16 = vpop.f32.mrf.mxu3  ;;  %v2130_v41 = vadd.f32 %v2129_v42, %v2111_v26 }
 0x21a   :  { %2612 = vmatpush.bf16.msra.mxu1 %v7374_v6 }
 0x21b   :  { %2650 = vmatpush.bf16.msra.mxu3 %v7255_v10  ;;  %v2093_v14 = vpop.f32.mrf.mxu0  ;;  %v2112_v9 = vpop.f32.mrf.mxu1  ;;  %v6436_v4 = vadd.f32 %v2148_v16, %v2130_v41  ;;  %v3685_v10 = vld [vmem:[%s6600_s0 + $0x210] sm:$0xf]  ;;  %v7381_v41 = vld [vmem:[#allocation99_spill] sm:$0xff] }
 0x21c   :  { %v2094_v38 = vadd.f32 %v2093_v14, %v6367_v52  ;;  %2632 = vmatpush.bf16.msra.mxu2 %v7256_v24  ;;  %v3905_v24 = vld [vmem:[%s6600_s0 + $0x214] sm:$0xf]  ;;  %v3687_v52 = vld [vmem:[%s6600_s0 + $0x234] sm:$0xf0]  ;;  %v2113_v29 = vadd.f32 %v2112_v9, %v5654_v21  ;;  %v6466_v61 = vor.u32 %v3909_v63, %v3685_v10  ;;  %v7388_v10 = vld [vmem:[#allocation110_spill] sm:$0xff] }
 0x21d   :  { %2594 = vmatpush.bf16.msra.mxu0 %v7375_v30  ;;  %v6468_v11 = vor.u32 %v3905_v24, %v3687_v52 }
 0x21e   :  { %2613 = vmatpush.bf16.msra.mxu1 %v7376_v55  ;;  %v2274_v5 = vmax.f32 %v2094_v38, 0.0  ;;  %v7384_v55 = vld [vmem:[#allocation97_spill] sm:$0xff] }
 0x21f   :  { %2651 = vmatpush.bf16.msra.mxu3 %v7257_v22  ;;  %v3693_v22 = vld [vmem:[%s6600_s0 + $0x218] sm:$0xf] }
 0x220   :  { %v6453_v46 = vmax.f32 %v6052_v35, %v2274_v5  ;;  %2633 = vmatpush.bf16.msra.mxu2 %v7258_v8  ;;  %v2131_v35 = vpop.f32.mrf.mxu2  ;;  %v6470_v26 = vor.u32 %v3910_v43, %v3693_v22  ;;  %v7387_v5 = vld [vmem:[#allocation107_spill] sm:$0xff]  ;;  %v7390_v22 = vld [vmem:[#allocation133_spill] sm:$0xff] }
 0x221   :  { %2595 = vmatpush.bf16.msra.mxu0 %v7377_v17  ;;  %v2150_v36 = vpop.f32.mrf.mxu3  ;;  %v2132_v48 = vadd.f32 %v2131_v35, %v2113_v29  ;;  %v7392_v17 = vld [vmem:[#allocation114_spill] sm:$0xff]  ;;  %v7394_v35 = vld [vmem:[#allocation135_spill] sm:$0xff] }
 0x222   :  { %2614 = vmatpush.bf16.msra.mxu1 %v7378_v0  ;;  %v7393_v29 = vld [vmem:[#allocation134_spill] sm:$0xff] }
 0x223   :  { %2652 = vmatpush.bf16.msra.mxu3 %v7259_v28  ;;  %v2096_v19 = vpop.f32.mrf.mxu0  ;;  %v2115_v47 = vpop.f32.mrf.mxu1  ;;  %v2151_v39 = vadd.f32 %v2150_v36, %v2132_v48  ;;  %v7395_v36 = vld [vmem:[#allocation115_spill] sm:$0xff]  ;;  %v7396_v48 = vld [vmem:[#allocation118_spill] sm:$0xff] }
 0x224   :  { %v2097_v8 = vadd.f32 %v2096_v19, %v6382_v40  ;;  %2634 = vmatpush.bf16.msra.mxu2 %v5155_v2  ;;  %v2116_v58 = vadd.f32 %v2115_v47, %v5654_v21  ;;  %v7397_v19 = vld [vmem:[#allocation136_spill] sm:$0xff] }
 0x225   :  { %2596 = vmatpush.bf16.msra.mxu0 %v7129_v33  ;;  %2547 = vmatmul.bf16.gmra.mxu1 %v6468_v11 }
 0x226   :  { %2615 = vmatpush.bf16.msra.mxu1 %v7130_v56  ;;  %v2276_v28 = vmax.f32 %v2097_v8, 0.0  ;;  %2528 = vmatmul.bf16.gmra.mxu0 %v6466_v61  ;;  %v7379_v56 = vld [vmem:[#allocation94_spill] sm:$0xff] }
 0x227   :  { %2653 = vmatpush.bf16.msra.mxu3 %v5179_v15  ;;  %2566 = vmatmul.bf16.gmra.mxu2 %v6470_v26 }
 0x228   :  { %2585 = vmatmul.bf16.gmra.mxu3 %v6244_v25  ;;  %v6483_v2 = vmax.f32 %v6068_v13, %v2276_v28  ;;  %2635 = vmatpush.bf16.msra.mxu2 %v7260_v51  ;;  %v2134_v15 = vpop.f32.mrf.mxu2  ;;  %v7380_v25 = vld [vmem:[#allocation95_spill] sm:$0xff]  ;;  %v7382_v51 = vld [vmem:[#allocation96_spill] sm:$0xff] }
 0x229   :  { %2597 = vmatpush.bf16.msra.mxu0 %v7131_v57  ;;  %v2153_v33 = vpop.f32.mrf.mxu3  ;;  %v2135_v40 = vadd.f32 %v2134_v15, %v2116_v58  ;;  %v7398_v15 = vld [vmem:[#allocation137_spill] sm:$0xff] }
 0x22a   :  { %2616 = vmatpush.bf16.msra.mxu1 %v7379_v56 }
 0x22b   :  { %2654 = vmatpush.bf16.msra.mxu3 %v7261_v20  ;;  %v2098_v6 = vpop.f32.mrf.mxu0  ;;  %v2117_v42 = vpop.f32.mrf.mxu1  ;;  %v2154_v13 = vadd.f32 %v2153_v33, %v2135_v40  ;;  %v7383_v20 = vld [vmem:[#allocation102_spill] sm:$0xff]  ;;  %v7399_v33 = vld [vmem:[#allocation119_spill] sm:$0xff] }
 0x22c   :  { %v2099_v16 = vadd.f32 %v2098_v6, %v6419_v49  ;;  %2636 = vmatpush.bf16.msra.mxu2 %v7262_v60  ;;  %v2118_v60 = vadd.f32 %v2117_v42, %v5654_v21  ;;  %v7400_v6 = vld [vmem:[#allocation120_spill] sm:$0xff]  ;;  %v7401_v42 = vld [vmem:[#allocation138_spill] sm:$0xff] }
 0x22d   :  { %2598 = vmatpush.bf16.msra.mxu0 %v7380_v25  ;;  %v7402_v25 = vld [vmem:[#allocation93_spill] sm:$0xff] }
 0x22e   :  { %2617 = vmatpush.bf16.msra.mxu1 %v7381_v41  ;;  %v2278_v57 = vmax.f32 %v2099_v16, 0.0  ;;  %v7403_v41 = vld [vmem:[#allocation139_spill] sm:$0xff] }
 0x22f   :  { %2655 = vmatpush.bf16.msra.mxu3 %v7263_v23 }
 0x230   :  { %2705 = vmatpush.bf16.msrb.mxu2 %v7264_v3  ;;  %v6499_v49 = vmax.f32 %v6091_v45, %v2278_v57  ;;  %v2136_v14 = vpop.f32.mrf.mxu2  ;;  %v7405_v57 = vld [vmem:[#allocation124_spill] sm:$0xff] }
 0x231   :  { %2667 = vmatpush.bf16.msrb.mxu0 %v7382_v51  ;;  %v2155_v9 = vpop.f32.mrf.mxu3  ;;  %v2137_v23 = vadd.f32 %v2136_v14, %v2118_v60  ;;  %v7406_v51 = vld [vmem:[#allocation140_spill] sm:$0xff] }
 0x232   :  { %2686 = vmatpush.bf16.msrb.mxu1 %v7383_v20 }
 0x233   :  { %2724 = vmatpush.bf16.msrb.mxu3 %v5269_v37  ;;  %v2167_v38 = vpop.f32.mrf.mxu0  ;;  %v2186_v3 = vpop.f32.mrf.mxu1  ;;  %v2156_v30 = vadd.f32 %v2155_v9, %v2137_v23 }
 0x234   :  { %2706 = vmatpush.bf16.msrb.mxu2 %v5273_v50  ;;  %v2168_v37 = vadd.f32 %v2167_v38, %v6436_v4  ;;  %v7385_v50 = vld [vmem:[#allocation98_spill] sm:$0xff] }
 0x235   :  { %2668 = vmatpush.bf16.msrb.mxu0 %v7137_v12  ;;  %2618 = vmatmul.bf16.vlgmr.msra.gmra.mxu1 %v6298_v7  ;;  %v7386_v12 = vld [vmem:[#allocation131_spill] sm:$0xff] }
 0x236   :  { %2687 = vmatpush.bf16.msrb.mxu1 %v7138_v1  ;;  %v2187_v45 = vadd.f32 %v2186_v3, %v2168_v37  ;;  %2599 = vmatmul.bf16.vlgmr.msra.gmra.mxu0 %v6205_v62  ;;  %v7389_v1 = vld [vmem:[#allocation132_spill] sm:$0xff]  ;;  %v7391_v7 = vld [vmem:[#allocation111_spill] sm:$0xff]  ;;  %v7407_v3 = vld [vmem:[#allocation141_spill] sm:$0xff] }
 0x237   :  { %2725 = vmatpush.bf16.msrb.mxu3 %v7265_v34  ;;  %2637 = vmatmul.bf16.vlgmr.msra.gmra.mxu2 %v7384_v55  ;;  %v7410_v37 = vld [vmem:[#allocation142_spill] sm:$0xff] }
 0x238   :  { %2656 = vmatmul.bf16.vlgmr.msra.gmra.mxu3 %v7385_v50  ;;  %2707 = vmatpush.bf16.msrb.mxu2 %v7386_v12 }
 0x239   :  { %2669 = vmatpush.bf16.msrb.mxu0 %v7387_v5  ;;  %v2205_v34 = vpop.f32.mrf.mxu2 }
 0x23a   :  { %2688 = vmatpush.bf16.msrb.mxu1 %v7388_v10  ;;  %v2206_v63 = vadd.f32 %v2205_v34, %v2187_v45 }
 0x23b   :  { %2726 = vmatpush.bf16.msrb.mxu3 %v7389_v1  ;;  %v2224_v4 = vpop.f32.mrf.mxu3  ;;  %v2169_v24 = vpop.f32.mrf.mxu0 }
 0x23c   :  { %v2188_v52 = vpop.f32.mrf.mxu1  ;;  %v2170_v62 = vadd.f32 %v2169_v24, %v2151_v39  ;;  %2708 = vmatpush.bf16.msrb.mxu2 %v7390_v22  ;;  %v2225_v43 = vadd.f32 %v2224_v4, %v2206_v63  ;;  %v7411_v63 = vld [vmem:[#allocation100_spill] sm:$0xff] }
 0x23d   :  { %2670 = vmatpush.bf16.msrb.mxu0 %v7391_v7  ;;  %v7412_v24 = vld [vmem:[#allocation88_spill] sm:$0xff]  ;;  %v7413_v7 = vld [vmem:[#allocation143_spill] sm:$0xff] }
 0x23e   :  { %2689 = vmatpush.bf16.msrb.mxu1 %v7392_v17  ;;  %v2189_v0 = vadd.f32 %v2188_v52, %v2170_v62 }
 0x23f   :  { %2727 = vmatpush.bf16.msrb.mxu3 %v7393_v29 }
 0x240   :  { %2709 = vmatpush.bf16.msrb.mxu2 %v7394_v35 }
 0x241   :  { %2671 = vmatpush.bf16.msrb.mxu0 %v7395_v36  ;;  %v2207_v47 = vpop.f32.mrf.mxu2 }
 0x242   :  { %2690 = vmatpush.bf16.msrb.mxu1 %v7396_v48  ;;  %v2208_v39 = vadd.f32 %v2207_v47, %v2189_v0 }
 0x243   :  { %2728 = vmatpush.bf16.msrb.mxu3 %v7397_v19  ;;  %v2226_v8 = vpop.f32.mrf.mxu3  ;;  %v2172_v28 = vpop.f32.mrf.mxu0  ;;  %v7414_v19 = vld [vmem:[#allocation145_spill] sm:$0xff] }
 0x244   :  { %v2191_v58 = vpop.f32.mrf.mxu1  ;;  %v2173_v56 = vadd.f32 %v2172_v28, %v2154_v13  ;;  %2710 = vmatpush.bf16.msrb.mxu2 %v7398_v15  ;;  %v2227_v40 = vadd.f32 %v2226_v8, %v2208_v39  ;;  %v7404_v13 = vld [vmem:[#allocation121_spill] sm:$0xff] }
 0x245   :  { %2672 = vmatpush.bf16.msrb.mxu0 %v7399_v33  ;;  %2623 = vmatmul.bf16.gmra.mxu1 %v6356_v31  ;;  %v7408_v31 = vld [vmem:[#allocation125_spill] sm:$0xff] }
 0x246   :  { %2691 = vmatpush.bf16.msrb.mxu1 %v7400_v6  ;;  %v2192_v16 = vadd.f32 %v2191_v58, %v2173_v56  ;;  %2604 = vmatmul.bf16.gmra.mxu0 %v7402_v25  ;;  %v7415_v33 = vld [vmem:[#allocation89_spill] sm:$0xff] }
 0x247   :  { %2729 = vmatpush.bf16.msrb.mxu3 %v7401_v42  ;;  %2642 = vmatmul.bf16.gmra.mxu2 %v6358_v54 }
 0x248   :  { %2661 = vmatmul.bf16.gmra.mxu3 %v6360_v27  ;;  %2711 = vmatpush.bf16.msrb.mxu2 %v7403_v41  ;;  %v7409_v27 = vld [vmem:[#allocation129_spill] sm:$0xff] }
 0x249   :  { %2673 = vmatpush.bf16.msrb.mxu0 %v7404_v13 }
 0x24a   :  { %2692 = vmatpush.bf16.msrb.mxu1 %v7405_v57  ;;  %v2210_v20 = vpop.f32.mrf.mxu2 }
 0x24b   :  { %2730 = vmatpush.bf16.msrb.mxu3 %v7406_v51  ;;  %v2229_v60 = vpop.f32.mrf.mxu3  ;;  %v2211_v14 = vadd.f32 %v2210_v20, %v2192_v16  ;;  %v2174_v9 = vpop.f32.mrf.mxu0  ;;  %v7416_v20 = vld [vmem:[#allocation92_spill] sm:$0xff] }
 0x24c   :  { %v2193_v23 = vpop.f32.mrf.mxu1  ;;  %v2175_v38 = vadd.f32 %v2174_v9, %v2156_v30  ;;  %2712 = vmatpush.bf16.msrb.mxu2 %v7407_v3 }
 0x24d   :  { %2674 = vmatpush.bf16.msrb.mxu0 %v7408_v31  ;;  %v2230_v54 = vadd.f32 %v2229_v60, %v2211_v14 }
 0x24e   :  { %2693 = vmatpush.bf16.msrb.mxu1 %v7409_v27  ;;  %v2194_v45 = vadd.f32 %v2193_v23, %v2175_v38 }
 0x24f   :  { %2731 = vmatpush.bf16.msrb.mxu3 %v7410_v37 }
 0x252   :  { %v2212_v55 = vpop.f32.mrf.mxu2 }
 0x253   :  { %v2231_v50 = vpop.f32.mrf.mxu3  ;;  %v2213_v12 = vadd.f32 %v2212_v55, %v2194_v45  ;;  %v2243_v5 = vpop.f32.mrf.mxu0 }
 0x254   :  { %v2262_v10 = vpop.f32.mrf.mxu1  ;;  %v2244_v1 = vadd.f32 %v2243_v5, %v2225_v43 }
 0x255   :  { %v2232_v34 = vadd.f32 %v2231_v50, %v2213_v12  ;;  %2694 = vmatmul.bf16.vlgmr.msrb.gmra.mxu1 %v6408_v44 }
 0x256   :  { %v2263_v4 = vadd.f32 %v2262_v10, %v2244_v1  ;;  %2675 = vmatmul.bf16.vlgmr.msrb.gmra.mxu0 %v7411_v63 }
 0x257   :  { %2713 = vmatmul.bf16.vlgmr.msrb.gmra.mxu2 %v6410_v18 }
 0x258   :  { %2732 = vmatmul.bf16.vlgmr.msrb.gmra.mxu3 %v6414_v59  ;;  %v2273_v30 = vmax.f32 %v2263_v4, 0.0 }
 0x25a   :  { %v6544_v52 = vmax.f32 %v7412_v24, %v2273_v30  ;;  %v2410_v62 = vpop.f32.mrf.mxu2 }
 0x25b   :  { %v2429_v22 = vpop.f32.mrf.mxu3  ;;  %v2411_v17 = vadd.f32 %v2410_v62, %v7413_v7  ;;  %v2245_v29 = vpop.f32.mrf.mxu0 }
 0x25c   :  { %v2264_v43 = vpop.f32.mrf.mxu1  ;;  %v2246_v0 = vadd.f32 %v2245_v29, %v2227_v40 }
 0x25d   :  { %v2430_v35 = vadd.f32 %v2429_v22, %v2411_v17 }
 0x25e   :  { %v2265_v36 = vadd.f32 %v2264_v43, %v2246_v0 }
 0x260   :  { %v2275_v48 = vmax.f32 %v2265_v36, 0.0 }
 0x262   :  { %v6548_v44 = vmax.f32 %v7414_v19, %v2275_v48  ;;  %v2412_v18 = vpop.f32.mrf.mxu2 }
 0x263   :  { %v2431_v47 = vpop.f32.mrf.mxu3  ;;  %v2413_v59 = vadd.f32 %v2412_v18, %v7413_v7  ;;  %v2248_v8 = vpop.f32.mrf.mxu0 }
 0x264   :  { %v2267_v39 = vpop.f32.mrf.mxu1  ;;  %v2249_v28 = vadd.f32 %v2248_v8, %v2230_v54 }
 0x265   :  { %v2432_v58 = vadd.f32 %v2431_v47, %v2413_v59  ;;  %2699 = vmatmul.bf16.gmra.mxu1 %v6466_v61 }
 0x266   :  { %v2268_v56 = vadd.f32 %v2267_v39, %v2249_v28  ;;  %2680 = vmatmul.bf16.gmra.mxu0 %v6362_v53 }
 0x267   :  { %2718 = vmatmul.bf16.gmra.mxu2 %v6468_v11 }
 0x268   :  { %2737 = vmatmul.bf16.gmra.mxu3 %v6470_v26  ;;  %v2277_v15 = vmax.f32 %v2268_v56, 0.0 }
 0x26a   :  { %v6556_v40 = vmax.f32 %v7415_v33, %v2277_v15  ;;  %v2415_v6 = vpop.f32.mrf.mxu2 }
 0x26b   :  { %v2434_v42 = vpop.f32.mrf.mxu3  ;;  %v2416_v16 = vadd.f32 %v2415_v6, %v7413_v7  ;;  %v2250_v25 = vpop.f32.mrf.mxu0 }
 0x26c   :  { %v2269_v41 = vpop.f32.mrf.mxu1  ;;  %v2251_v13 = vadd.f32 %v2250_v25, %v2232_v34 }
 0x26d   :  { %v2435_v57 = vadd.f32 %v2434_v42, %v2416_v16 }
 0x26e   :  { %v2270_v51 = vadd.f32 %v2269_v41, %v2251_v13 }
 0x270   :  { %v2279_v53 = vmax.f32 %v2270_v51, 0.0 }
 0x272   :  { %v6560_v61 = vmax.f32 %v7416_v20, %v2279_v53  ;;  %v2417_v11 = vpop.f32.mrf.mxu2 }
 0x273   :  { %v2436_v60 = vpop.f32.mrf.mxu3  ;;  %v2418_v26 = vadd.f32 %v2417_v11, %v7413_v7  ;;  %v2448_v14 = vpop.f32.mrf.mxu0 }
 0x274   :  { %v2467_v9 = vpop.f32.mrf.mxu1  ;;  %v2449_v23 = vadd.f32 %v2448_v14, %v2430_v35 }
 0x275   :  { %v2437_v38 = vadd.f32 %v2436_v60, %v2418_v26 }
 0x276   :  { %v2468_v3 = vadd.f32 %v2467_v9, %v2449_v23 }
 0x27a   :  { %v2486_v31 = vpop.f32.mrf.mxu2 }
 0x27b   :  { %v2505_v54 = vpop.f32.mrf.mxu3  ;;  %v2487_v27 = vadd.f32 %v2486_v31, %v2468_v3  ;;  %v2450_v37 = vpop.f32.mrf.mxu0 }
 0x27c   :  { %v2469_v45 = vpop.f32.mrf.mxu1  ;;  %v2451_v55 = vadd.f32 %v2450_v37, %v2432_v58 }
 0x27d   :  { %v2506_v50 = vadd.f32 %v2505_v54, %v2487_v27 }
 0x27e   :  { %v2470_v12 = vadd.f32 %v2469_v45, %v2451_v55 }
 0x282   :  { %v2488_v5 = vpop.f32.mrf.mxu2 }
 0x283   :  { %v2507_v10 = vpop.f32.mrf.mxu3  ;;  %v2489_v1 = vadd.f32 %v2488_v5, %v2470_v12  ;;  %v2453_v34 = vpop.f32.mrf.mxu0 }
 0x284   :  { %v2472_v4 = vpop.f32.mrf.mxu1  ;;  %v2454_v63 = vadd.f32 %v2453_v34, %v2435_v57 }
 0x285   :  { %v2508_v30 = vadd.f32 %v2507_v10, %v2489_v1 }
 0x286   :  { %v2473_v24 = vadd.f32 %v2472_v4, %v2454_v63 }
 0x28a   :  { %v2491_v62 = vpop.f32.mrf.mxu2 }
 0x28b   :  { %v2510_v22 = vpop.f32.mrf.mxu3  ;;  %v2492_v7 = vadd.f32 %v2491_v62, %v2473_v24  ;;  %v2455_v17 = vpop.f32.mrf.mxu0 }
 0x28c   :  { %v2474_v29 = vpop.f32.mrf.mxu1  ;;  %v2456_v43 = vadd.f32 %v2455_v17, %v2437_v38 }
 0x28d   :  { %v2511_v0 = vadd.f32 %v2510_v22, %v2492_v7 }
 0x28e   :  { %v2475_v35 = vadd.f32 %v2474_v29, %v2456_v43 }
 0x292   :  { %v2493_v36 = vpop.f32.mrf.mxu2 }
 0x293   :  { %v2512_v48 = vpop.f32.mrf.mxu3  ;;  %v2494_v19 = vadd.f32 %v2493_v36, %v2475_v35  ;;  %v2524_v18 = vpop.f32.mrf.mxu0 }
 0x294   :  { %v2543_v47 = vpop.f32.mrf.mxu1  ;;  %v2525_v59 = vadd.f32 %v2524_v18, %v2506_v50 }
 0x295   :  { %v2513_v8 = vadd.f32 %v2512_v48, %v2494_v19 }
 0x296   :  { %v2544_v39 = vadd.f32 %v2543_v47, %v2525_v59 }
 0x29a   :  { %v2562_v28 = vpop.f32.mrf.mxu2 }
 0x29b   :  { %v2581_v58 = vpop.f32.mrf.mxu3  ;;  %v2563_v56 = vadd.f32 %v2562_v28, %v2544_v39  ;;  %v2526_v15 = vpop.f32.mrf.mxu0 }
 0x29c   :  { %v2545_v33 = vpop.f32.mrf.mxu1  ;;  %v2527_v6 = vadd.f32 %v2526_v15, %v2508_v30 }
 0x29d   :  { %v2743_v42 = vmax.f32 %v2563_v56, 0.0 }
 0x29e   :  { %v2546_v16 = vadd.f32 %v2545_v33, %v2527_v6 }
 0x29f   :  { %v6564_v25 = vmax.f32 %v6427_v32, %v2743_v42 }
 0x2a2   :  { %v2564_v41 = vpop.f32.mrf.mxu2 }
 0x2a3   :  { %v2583_v13 = vpop.f32.mrf.mxu3  ;;  %v2565_v57 = vadd.f32 %v2564_v41, %v2546_v16  ;;  %v2529_v51 = vpop.f32.mrf.mxu0 }
 0x2a4   :  { %v2548_v53 = vpop.f32.mrf.mxu1  ;;  %v2530_v20 = vadd.f32 %v2529_v51, %v2511_v0  ;;  %v2584_v35 = vadd.f32 %v2583_v13, %v5654_v21 }
 0x2a5   :  { %v2745_v11 = vmax.f32 %v2565_v57, 0.0 }
 0x2a6   :  { %v2549_v60 = vadd.f32 %v2548_v53, %v2530_v20 }
 0x2a7   :  { %v6567_v26 = vmax.f32 %v6453_v46, %v2745_v11 }
 0x2aa   :  { %v2567_v14 = vpop.f32.mrf.mxu2 }
 0x2ab   :  { %v2586_v9 = vpop.f32.mrf.mxu3  ;;  %v2568_v23 = vadd.f32 %v2567_v14, %v2549_v60  ;;  %v2531_v38 = vpop.f32.mrf.mxu0 }
 0x2ac   :  { %v2550_v3 = vpop.f32.mrf.mxu1  ;;  %v2532_v31 = vadd.f32 %v2531_v38, %v2513_v8  ;;  %v2587_v28 = vadd.f32 %v2586_v9, %v5654_v21 }
 0x2ad   :  { %v2747_v54 = vmax.f32 %v2568_v23, 0.0 }
 0x2ae   :  { %v2551_v32 = vadd.f32 %v2550_v3, %v2532_v31 }
 0x2af   :  { %v6570_v27 = vmax.f32 %v6483_v2, %v2747_v54  ;;  %v2582_v2 = vadd.f32 %v2581_v58, %v5654_v21 }
 0x2b2   :  { %v2569_v37 = vpop.f32.mrf.mxu2 }
 0x2b3   :  { %v2588_v45 = vpop.f32.mrf.mxu3  ;;  %v2570_v55 = vadd.f32 %v2569_v37, %v2551_v32  ;;  %v2600_v50 = vpop.f32.mrf.mxu0 }
 0x2b4   :  { %v2619_v12 = vpop.f32.mrf.mxu1  ;;  %v2601_v22 = vadd.f32 %v2600_v50, %v2582_v2  ;;  %v2589_v20 = vadd.f32 %v2588_v45, %v5654_v21 }
 0x2b5   :  { %v2749_v5 = vmax.f32 %v2570_v55, 0.0 }
 0x2b6   :  { %v2620_v0 = vadd.f32 %v2619_v12, %v2601_v22 }
 0x2b7   :  { %v6573_v46 = vmax.f32 %v6499_v49, %v2749_v5 }
 0x2ba   :  { %v2638_v10 = vpop.f32.mrf.mxu2 }
 0x2bb   :  { %v2657_v1 = vpop.f32.mrf.mxu3  ;;  %v2602_v34 = vpop.f32.mrf.mxu0  ;;  %v2639_v49 = vadd.f32 %v2638_v10, %v2620_v0 }
 0x2bc   :  { %v2621_v4 = vpop.f32.mrf.mxu1  ;;  %v2603_v36 = vadd.f32 %v2602_v34, %v2584_v35 }
 0x2bd   :  { %v2658_v18 = vadd.f32 %v2657_v1, %v2639_v49 }
 0x2be   :  { %v2622_v8 = vadd.f32 %v2621_v4, %v2603_v36 }
 0x2c2   :  { %v2640_v63 = vpop.f32.mrf.mxu2 }
 0x2c3   :  { %v2659_v30 = vpop.f32.mrf.mxu3  ;;  %v2605_v24 = vpop.f32.mrf.mxu0  ;;  %v2641_v58 = vadd.f32 %v2640_v63, %v2622_v8 }
 0x2c4   :  { %v2624_v62 = vpop.f32.mrf.mxu1  ;;  %v2606_v56 = vadd.f32 %v2605_v24, %v2587_v28 }
 0x2c5   :  { %v2660_v42 = vadd.f32 %v2659_v30, %v2641_v58 }
 0x2c6   :  { %v2625_v57 = vadd.f32 %v2624_v62, %v2606_v56 }
 0x2ca   :  { %v2643_v7 = vpop.f32.mrf.mxu2 }
 0x2cb   :  { %v2662_v17 = vpop.f32.mrf.mxu3  ;;  %v2607_v29 = vpop.f32.mrf.mxu0  ;;  %v2644_v11 = vadd.f32 %v2643_v7, %v2625_v57 }
 0x2cc   :  { %v2626_v43 = vpop.f32.mrf.mxu1  ;;  %v2608_v14 = vadd.f32 %v2607_v29, %v2589_v20 }
 0x2cd   :  { %v2663_v31 = vadd.f32 %v2662_v17, %v2644_v11 }
 0x2ce   :  { %v2627_v55 = vadd.f32 %v2626_v43, %v2608_v14 }
 0x2d2   :  { %v2645_v48 = vpop.f32.mrf.mxu2 }
 0x2d3   :  { %v2664_v19 = vpop.f32.mrf.mxu3  ;;  %v2676_v47 = vpop.f32.mrf.mxu0  ;;  %v2646_v12 = vadd.f32 %v2645_v48, %v2627_v55 }
 0x2d4   :  { %v2695_v59 = vpop.f32.mrf.mxu1  ;;  %v2677_v39 = vadd.f32 %v2676_v47, %v2658_v18 }
 0x2d5   :  { %v2665_v4 = vadd.f32 %v2664_v19, %v2646_v12 }
 0x2d6   :  { %v2696_v15 = vadd.f32 %v2695_v59, %v2677_v39 }
 0x2da   :  { %v2714_v33 = vpop.f32.mrf.mxu2 }
 0x2db   :  { %v2733_v6 = vpop.f32.mrf.mxu3  ;;  %v2715_v16 = vadd.f32 %v2714_v33, %v2696_v15  ;;  %v2678_v41 = vpop.f32.mrf.mxu0 }
 0x2dc   :  { %v2697_v13 = vpop.f32.mrf.mxu1  ;;  %v2679_v53 = vadd.f32 %v2678_v41, %v2660_v42 }
 0x2dd   :  { %v2734_v51 = vadd.f32 %v2733_v6, %v2715_v16 }
 0x2de   :  { %v2698_v9 = vadd.f32 %v2697_v13, %v2679_v53 }
 0x2df   :  { %v2744_v60 = vmax.f32 %v2734_v51, 0.0 }
 0x2e1   :  { %v2752_v23 = vmax.f32 %v6544_v52, %v2744_v60 }
 0x2e2   :  { %v2716_v38 = vpop.f32.mrf.mxu2 }
 0x2e3   :  { %v2735_v3 = vpop.f32.mrf.mxu3  ;;  %v2759_v54 = vpack.c.bf16 %v2752_v23, %v6564_v25  ;;  %v2717_v32 = vadd.f32 %v2716_v38, %v2698_v9  ;;  %v2681_v37 = vpop.f32.mrf.mxu0 }
 0x2e4   :  { %v2682_v21 = vadd.f32 %v2681_v37, %v2663_v31  ;;  %v2700_v45 = vpop.f32.mrf.mxu1 }
 0x2e5   :  { %2763 = vst [vmem:[%s6602_s3] sm:$0xff] %v2759_v54  ;;  %v2736_v50 = vadd.f32 %v2735_v3, %v2717_v32 }
 0x2e6   :  { %v2701_v10 = vadd.f32 %v2700_v45, %v2682_v21 }
 0x2e7   :  { %v2746_v5 = vmax.f32 %v2736_v50, 0.0 }
 0x2e9   :  { %v2754_v52 = vmax.f32 %v6548_v44, %v2746_v5 }
 0x2ea   :  { %v2719_v1 = vpop.f32.mrf.mxu2 }
 0x2eb   :  { %v2738_v34 = vpop.f32.mrf.mxu3  ;;  %v2760_v25 = vpack.c.bf16 %v2754_v52, %v6567_v26  ;;  %v2720_v63 = vadd.f32 %v2719_v1, %v2701_v10  ;;  %v2683_v30 = vpop.f32.mrf.mxu0 }
 0x2ec   :  { %v2684_v62 = vadd.f32 %v2683_v30, %v2665_v4  ;;  %v2702_v22 = vpop.f32.mrf.mxu1 }
 0x2ed   :  { %2764 = vst [vmem:[%s6602_s3 + $0x8] sm:$0xff] %v2760_v25  ;;  %v2739_v24 = vadd.f32 %v2738_v34, %v2720_v63 }
 0x2ee   :  { %v2703_v17 = vadd.f32 %v2702_v22, %v2684_v62 }
 0x2ef   :  { %v2748_v2 = vmax.f32 %v2739_v24, 0.0 }
 0x2f1   :  { %v2756_v7 = vmax.f32 %v6556_v40, %v2748_v2 }
 0x2f2   :  { %v2721_v44 = vpop.f32.mrf.mxu2 }
 0x2f3   :  { %v2761_v29 = vpack.c.bf16 %v2756_v7, %v6570_v27  ;;  %v2722_v43 = vadd.f32 %v2721_v44, %v2703_v17  ;;  %v2740_v0 = vpop.f32.mrf.mxu3 }
 0x2f5   :  { %2765 = vst [vmem:[%s6602_s3 + $0x10] sm:$0xff] %v2761_v29  ;;  %v2741_v26 = vadd.f32 %v2740_v0, %v2722_v43 }
 0x2f7   :  { %v2750_v35 = vmax.f32 %v2741_v26, 0.0 }
 0x2f9   :  { %v2758_v49 = vmax.f32 %v6560_v61, %v2750_v35 }
 0x2fb   :  { %v2762_v36 = vpack.c.bf16 %v2758_v49, %v6573_v46 }
 0x2fd   :  { %2766 = vst [vmem:[%s6602_s3 + $0x18] sm:$0xff] %v2762_v36 }

// kernel: fully_cnet_forward.10
= control target key start
LH: loop header
LB: loop body
LE: loop exit
PB: predicated region body
PF: predicated region fallthrough
CT: control target
= control target key end

     0   :  { %s709_s1 = inlined_call_operand.vmem [shape: bf16[128,256], index: 1, kind: input, shape index: {}]   ;;  %s710_s0 = inlined_call_operand.vmem [shape: bf16[128,128], index: 0, kind: input, shape index: {}]   ;;  %s711_s2 = inlined_call_operand.vmem [shape: f32[1,256], index: 2, kind: input, shape index: {}]   ;;  %s712_s3 = inlined_call_operand.vmem [shape: bf16[128,256], index: 3, kind: output, shape index: {}]  }
   0x1   :  { %v436_v0 = vld [vmem:[%s709_s1 + $0x70] sm:$0xf]  ;;  %v465_v1 = vld [vmem:[%s709_s1 + $0x74] sm:$0xf0]  ;;  %v464_v2 = vld [vmem:[%s709_s1 + $0x74] sm:$0xf] }
   0x2   :  { %v437_v3 = vor.u32 %v465_v1, %v436_v0  ;;  %v438_v4 = vld [vmem:[%s709_s1 + $0x78] sm:$0xf0]  ;;  %v428_v5 = vld [vmem:[%s709_s1 + $0x60] sm:$0xf]  ;;  %v463_v6 = vld [vmem:[%s709_s1 + $0x64] sm:$0xf0] }
   0x3   :  { %v441_v7 = vor.u32 %v464_v2, %v438_v4  ;;  %v462_v8 = vld [vmem:[%s709_s1 + $0x64] sm:$0xf]  ;;  %v430_v9 = vld [vmem:[%s709_s1 + $0x68] sm:$0xf0]  ;;  %v429_v10 = vor.u32 %v463_v6, %v428_v5  ;;  %v420_v12 = vld [vmem:[%s709_s1 + $0x50] sm:$0xf] }
   0x4   :  { %180 = vmatpush.bf16.msra.mxu0 %v437_v3  ;;  %466 = vmatpush.bf16.msra.mxu2 %v437_v3  ;;  %v433_v11 = vor.u32 %v462_v8, %v430_v9  ;;  %v461_v13 = vld [vmem:[%s709_s1 + $0x54] sm:$0xf0]  ;;  %v460_v14 = vld [vmem:[%s709_s1 + $0x54] sm:$0xf]  ;;  %v422_v15 = vld [vmem:[%s709_s1 + $0x58] sm:$0xf0] }
   0x5   :  { %229 = vmatpush.bf16.msra.mxu1 %v441_v7  ;;  %474 = vmatpush.bf16.msra.mxu3 %v441_v7  ;;  %v421_v16 = vor.u32 %v461_v13, %v420_v12  ;;  %v425_v17 = vor.u32 %v460_v14, %v422_v15  ;;  %v412_v18 = vld [vmem:[%s709_s1 + $0x40] sm:$0xf]  ;;  %v459_v19 = vld [vmem:[%s709_s1 + $0x44] sm:$0xf0]  ;;  %v458_v20 = vld [vmem:[%s709_s1 + $0x44] sm:$0xf] }
   0x6   :  { %v414_v21 = vld [vmem:[%s709_s1 + $0x48] sm:$0xf0]  ;;  %v413_v22 = vor.u32 %v459_v19, %v412_v18  ;;  %v404_v24 = vld [vmem:[%s709_s1 + $0x30] sm:$0xf]  ;;  %v457_v25 = vld [vmem:[%s709_s1 + $0x34] sm:$0xf0] }
   0x7   :  { %v417_v23 = vor.u32 %v458_v20, %v414_v21  ;;  %v456_v26 = vld [vmem:[%s709_s1 + $0x34] sm:$0xf]  ;;  %v406_v27 = vld [vmem:[%s709_s1 + $0x38] sm:$0xf0]  ;;  %v405_v28 = vor.u32 %v457_v25, %v404_v24  ;;  %v396_v30 = vld [vmem:[%s709_s1 + $0x20] sm:$0xf] }
   0x8   :  { %181 = vmatpush.bf16.msra.mxu0 %v429_v10  ;;  %467 = vmatpush.bf16.msra.mxu2 %v429_v10  ;;  %v409_v29 = vor.u32 %v456_v26, %v406_v27  ;;  %v455_v31 = vld [vmem:[%s709_s1 + $0x24] sm:$0xf0]  ;;  %v454_v32 = vld [vmem:[%s709_s1 + $0x24] sm:$0xf]  ;;  %v398_v33 = vld [vmem:[%s709_s1 + $0x28] sm:$0xf0] }
   0x9   :  { %230 = vmatpush.bf16.msra.mxu1 %v433_v11  ;;  %475 = vmatpush.bf16.msra.mxu3 %v433_v11  ;;  %v397_v34 = vor.u32 %v455_v31, %v396_v30  ;;  %v401_v35 = vor.u32 %v454_v32, %v398_v33  ;;  %v388_v36 = vld [vmem:[%s709_s1 + $0x10] sm:$0xf]  ;;  %v453_v37 = vld [vmem:[%s709_s1 + $0x14] sm:$0xf0]  ;;  %v452_v38 = vld [vmem:[%s709_s1 + $0x14] sm:$0xf] }
   0xa   :  { %v390_v39 = vld [vmem:[%s709_s1 + $0x18] sm:$0xf0]  ;;  %v389_v40 = vor.u32 %v453_v37, %v388_v36  ;;  %v380_v42 = vld [vmem:[%s709_s1] sm:$0xf]  ;;  %v451_v43 = vld [vmem:[%s709_s1 + $0x4] sm:$0xf0] }
   0xb   :  { %v393_v41 = vor.u32 %v452_v38, %v390_v39  ;;  %v450_v44 = vld [vmem:[%s709_s1 + $0x4] sm:$0xf]  ;;  %v382_v45 = vld [vmem:[%s709_s1 + $0x8] sm:$0xf0]  ;;  %v381_v46 = vor.u32 %v451_v43, %v380_v42  ;;  %v444_v52 = vld [vmem:[%s710_s0 + $0x10] sm:$0xff] }
   0xc   :  { %182 = vmatpush.bf16.msra.mxu0 %v421_v16  ;;  %468 = vmatpush.bf16.msra.mxu2 %v421_v16  ;;  %v385_v47 = vor.u32 %v450_v44, %v382_v45  ;;  %v442_v48 = vld [vmem:[%s710_s0] sm:$0xff]  ;;  %v443_v50 = vld [vmem:[%s710_s0 + $0x8] sm:$0xff]  ;;  %v448_v53 = vld [vmem:[%s710_s0 + $0x30] sm:$0xff] }
   0xd   :  { %231 = vmatpush.bf16.msra.mxu1 %v425_v17  ;;  %476 = vmatpush.bf16.msra.mxu3 %v425_v17  ;;  %v446_v49 = vld [vmem:[%s710_s0 + $0x20] sm:$0xff]  ;;  %v447_v51 = vld [vmem:[%s710_s0 + $0x28] sm:$0xff]  ;;  %v445_v54 = vld [vmem:[%s710_s0 + $0x18] sm:$0xff] }
   0xe   :  { %v449_v55 = vld [vmem:[%s710_s0 + $0x38] sm:$0xff]  ;;  %v46_v56 = vld [vmem:[%s711_s2] sm:$0x3] }
   0xf   :  { %v625_v57 = vperm.slane %v46_v56, 0  ;;  %v627_v58 = vperm.slane %v46_v56, 1 }
  0x10   :  { %183 = vmatpush.bf16.msra.mxu0 %v413_v22  ;;  %469 = vmatpush.bf16.msra.mxu2 %v413_v22 }
  0x11   :  { %232 = vmatpush.bf16.msra.mxu1 %v417_v23  ;;  %477 = vmatpush.bf16.msra.mxu3 %v417_v23 }
  0x14   :  { %184 = vmatpush.bf16.msra.mxu0 %v405_v28  ;;  %470 = vmatpush.bf16.msra.mxu2 %v405_v28 }
  0x15   :  { %233 = vmatpush.bf16.msra.mxu1 %v409_v29  ;;  %478 = vmatpush.bf16.msra.mxu3 %v409_v29 }
  0x18   :  { %185 = vmatpush.bf16.msra.mxu0 %v397_v34  ;;  %471 = vmatpush.bf16.msra.mxu2 %v397_v34 }
  0x19   :  { %234 = vmatpush.bf16.msra.mxu1 %v401_v35  ;;  %479 = vmatpush.bf16.msra.mxu3 %v401_v35 }
  0x1c   :  { %186 = vmatpush.bf16.msra.mxu0 %v389_v40  ;;  %472 = vmatpush.bf16.msra.mxu2 %v389_v40 }
  0x1d   :  { %235 = vmatpush.bf16.msra.mxu1 %v393_v41  ;;  %480 = vmatpush.bf16.msra.mxu3 %v393_v41 }
  0x20   :  { %187 = vmatpush.bf16.msra.mxu0 %v381_v46  ;;  %473 = vmatpush.bf16.msra.mxu2 %v381_v46 }
  0x21   :  { %236 = vmatpush.bf16.msra.mxu1 %v385_v47  ;;  %481 = vmatpush.bf16.msra.mxu3 %v385_v47 }
  0x23   :  { %188 = vmatmul.bf16.vlgmr.msra.gmra.mxu0 %v442_v48  ;;  %208 = vmatmul.bf16.vlgmr.msra.gmra.mxu2 %v446_v49 }
  0x24   :  { %237 = vmatmul.bf16.vlgmr.msra.gmra.mxu1 %v442_v48  ;;  %257 = vmatmul.bf16.vlgmr.msra.gmra.mxu3 %v446_v49 }
  0x33   :  { %193 = vmatmul.bf16.gmra.mxu0 %v443_v50  ;;  %213 = vmatmul.bf16.gmra.mxu2 %v447_v51 }
  0x34   :  { %242 = vmatmul.bf16.gmra.mxu1 %v443_v50  ;;  %262 = vmatmul.bf16.gmra.mxu3 %v447_v51 }
  0x43   :  { %198 = vmatmul.bf16.gmra.mxu0 %v444_v52  ;;  %218 = vmatmul.bf16.gmra.mxu2 %v448_v53 }
  0x44   :  { %247 = vmatmul.bf16.gmra.mxu1 %v444_v52  ;;  %267 = vmatmul.bf16.gmra.mxu3 %v448_v53 }
  0x53   :  { %203 = vmatmul.bf16.gmra.mxu0 %v445_v54  ;;  %223 = vmatmul.bf16.gmra.mxu2 %v449_v55 }
  0x54   :  { %252 = vmatmul.bf16.gmra.mxu1 %v445_v54  ;;  %272 = vmatmul.bf16.gmra.mxu3 %v449_v55 }
  0xa0   :  { %v189_v59 = vpop.f32.mrf.mxu0 }
  0xa1   :  { %v190_v60 = vadd.f32 %v189_v59, %v625_v57  ;;  %v238_v61 = vpop.f32.mrf.mxu1 }
  0xa2   :  { %v239_v62 = vadd.f32 %v238_v61, %v627_v58 }
  0xa3   :  { %v278_v63 = vmax.f32 %v190_v60, 0.0 }
  0xa4   :  { %v279_v0 = vmax.f32 %v239_v62, 0.0 }
  0xa6   :  { %v310_v1 = vpack.c.bf16 %v279_v0, %v278_v63  ;;  %v209_v2 = vpop.f32.mrf.mxu2 }
  0xa7   :  { %v210_v3 = vadd.f32 %v209_v2, %v625_v57  ;;  %v258_v4 = vpop.f32.mrf.mxu3 }
  0xa8   :  { %326 = vst [vmem:[%s712_s3] sm:$0xff] %v310_v1  ;;  %v259_v5 = vadd.f32 %v258_v4, %v627_v58  ;;  %v191_v6 = vpop.f32.mrf.mxu0 }
  0xa9   :  { %v294_v7 = vmax.f32 %v210_v3, 0.0  ;;  %v192_v8 = vadd.f32 %v191_v6, %v625_v57  ;;  %v240_v9 = vpop.f32.mrf.mxu1 }
  0xaa   :  { %v295_v10 = vmax.f32 %v259_v5, 0.0  ;;  %v241_v11 = vadd.f32 %v240_v9, %v627_v58 }
  0xab   :  { %v280_v12 = vmax.f32 %v192_v8, 0.0 }
  0xac   :  { %v318_v13 = vpack.c.bf16 %v295_v10, %v294_v7  ;;  %v281_v14 = vmax.f32 %v241_v11, 0.0 }
  0xae   :  { %334 = vst [vmem:[%s712_s3 + $0x40] sm:$0xff] %v318_v13  ;;  %v311_v15 = vpack.c.bf16 %v281_v14, %v280_v12  ;;  %v211_v16 = vpop.f32.mrf.mxu2 }
  0xaf   :  { %v212_v17 = vadd.f32 %v211_v16, %v625_v57  ;;  %v260_v18 = vpop.f32.mrf.mxu3 }
  0xb0   :  { %327 = vst [vmem:[%s712_s3 + $0x8] sm:$0xff] %v311_v15  ;;  %v261_v19 = vadd.f32 %v260_v18, %v627_v58  ;;  %v194_v20 = vpop.f32.mrf.mxu0 }
  0xb1   :  { %v296_v21 = vmax.f32 %v212_v17, 0.0  ;;  %v195_v22 = vadd.f32 %v194_v20, %v625_v57  ;;  %v243_v23 = vpop.f32.mrf.mxu1 }
  0xb2   :  { %v297_v24 = vmax.f32 %v261_v19, 0.0  ;;  %v244_v25 = vadd.f32 %v243_v23, %v627_v58 }
  0xb3   :  { %v282_v26 = vmax.f32 %v195_v22, 0.0 }
  0xb4   :  { %v319_v27 = vpack.c.bf16 %v297_v24, %v296_v21  ;;  %v283_v28 = vmax.f32 %v244_v25, 0.0 }
  0xb6   :  { %335 = vst [vmem:[%s712_s3 + $0x48] sm:$0xff] %v319_v27  ;;  %v312_v29 = vpack.c.bf16 %v283_v28, %v282_v26  ;;  %v214_v30 = vpop.f32.mrf.mxu2 }
  0xb7   :  { %v215_v31 = vadd.f32 %v214_v30, %v625_v57  ;;  %v263_v32 = vpop.f32.mrf.mxu3 }
  0xb8   :  { %328 = vst [vmem:[%s712_s3 + $0x10] sm:$0xff] %v312_v29  ;;  %v264_v33 = vadd.f32 %v263_v32, %v627_v58  ;;  %v196_v34 = vpop.f32.mrf.mxu0 }
  0xb9   :  { %v298_v35 = vmax.f32 %v215_v31, 0.0  ;;  %v197_v36 = vadd.f32 %v196_v34, %v625_v57  ;;  %v245_v37 = vpop.f32.mrf.mxu1 }
  0xba   :  { %v299_v38 = vmax.f32 %v264_v33, 0.0  ;;  %v246_v39 = vadd.f32 %v245_v37, %v627_v58 }
  0xbb   :  { %v284_v40 = vmax.f32 %v197_v36, 0.0 }
  0xbc   :  { %v320_v41 = vpack.c.bf16 %v299_v38, %v298_v35  ;;  %v285_v42 = vmax.f32 %v246_v39, 0.0 }
  0xbe   :  { %336 = vst [vmem:[%s712_s3 + $0x50] sm:$0xff] %v320_v41  ;;  %v313_v43 = vpack.c.bf16 %v285_v42, %v284_v40  ;;  %v216_v44 = vpop.f32.mrf.mxu2 }
  0xbf   :  { %v217_v45 = vadd.f32 %v216_v44, %v625_v57  ;;  %v265_v46 = vpop.f32.mrf.mxu3 }
  0xc0   :  { %329 = vst [vmem:[%s712_s3 + $0x18] sm:$0xff] %v313_v43  ;;  %v266_v47 = vadd.f32 %v265_v46, %v627_v58  ;;  %v199_v48 = vpop.f32.mrf.mxu0 }
  0xc1   :  { %v300_v49 = vmax.f32 %v217_v45, 0.0  ;;  %v200_v50 = vadd.f32 %v199_v48, %v625_v57  ;;  %v248_v51 = vpop.f32.mrf.mxu1 }
  0xc2   :  { %v301_v52 = vmax.f32 %v266_v47, 0.0  ;;  %v249_v53 = vadd.f32 %v248_v51, %v627_v58 }
  0xc3   :  { %v286_v54 = vmax.f32 %v200_v50, 0.0 }
  0xc4   :  { %v321_v55 = vpack.c.bf16 %v301_v52, %v300_v49  ;;  %v287_v56 = vmax.f32 %v249_v53, 0.0 }
  0xc6   :  { %337 = vst [vmem:[%s712_s3 + $0x58] sm:$0xff] %v321_v55  ;;  %v314_v59 = vpack.c.bf16 %v287_v56, %v286_v54  ;;  %v219_v60 = vpop.f32.mrf.mxu2 }
  0xc7   :  { %v220_v61 = vadd.f32 %v219_v60, %v625_v57  ;;  %v268_v62 = vpop.f32.mrf.mxu3 }
  0xc8   :  { %330 = vst [vmem:[%s712_s3 + $0x20] sm:$0xff] %v314_v59  ;;  %v269_v63 = vadd.f32 %v268_v62, %v627_v58  ;;  %v201_v0 = vpop.f32.mrf.mxu0 }
  0xc9   :  { %v302_v1 = vmax.f32 %v220_v61, 0.0  ;;  %v202_v2 = vadd.f32 %v201_v0, %v625_v57  ;;  %v250_v3 = vpop.f32.mrf.mxu1 }
  0xca   :  { %v303_v4 = vmax.f32 %v269_v63, 0.0  ;;  %v251_v5 = vadd.f32 %v250_v3, %v627_v58 }
  0xcb   :  { %v288_v6 = vmax.f32 %v202_v2, 0.0 }
  0xcc   :  { %v322_v7 = vpack.c.bf16 %v303_v4, %v302_v1  ;;  %v289_v8 = vmax.f32 %v251_v5, 0.0 }
  0xce   :  { %338 = vst [vmem:[%s712_s3 + $0x60] sm:$0xff] %v322_v7  ;;  %v315_v9 = vpack.c.bf16 %v289_v8, %v288_v6  ;;  %v221_v10 = vpop.f32.mrf.mxu2 }
  0xcf   :  { %v222_v11 = vadd.f32 %v221_v10, %v625_v57  ;;  %v270_v12 = vpop.f32.mrf.mxu3 }
  0xd0   :  { %331 = vst [vmem:[%s712_s3 + $0x28] sm:$0xff] %v315_v9  ;;  %v271_v13 = vadd.f32 %v270_v12, %v627_v58  ;;  %v204_v14 = vpop.f32.mrf.mxu0 }
  0xd1   :  { %v304_v15 = vmax.f32 %v222_v11, 0.0  ;;  %v205_v16 = vadd.f32 %v204_v14, %v625_v57  ;;  %v253_v17 = vpop.f32.mrf.mxu1 }
  0xd2   :  { %v305_v18 = vmax.f32 %v271_v13, 0.0  ;;  %v254_v19 = vadd.f32 %v253_v17, %v627_v58 }
  0xd3   :  { %v290_v20 = vmax.f32 %v205_v16, 0.0 }
  0xd4   :  { %v323_v21 = vpack.c.bf16 %v305_v18, %v304_v15  ;;  %v291_v22 = vmax.f32 %v254_v19, 0.0 }
  0xd6   :  { %339 = vst [vmem:[%s712_s3 + $0x68] sm:$0xff] %v323_v21  ;;  %v316_v23 = vpack.c.bf16 %v291_v22, %v290_v20  ;;  %v224_v24 = vpop.f32.mrf.mxu2 }
  0xd7   :  { %v225_v25 = vadd.f32 %v224_v24, %v625_v57  ;;  %v273_v26 = vpop.f32.mrf.mxu3 }
  0xd8   :  { %332 = vst [vmem:[%s712_s3 + $0x30] sm:$0xff] %v316_v23  ;;  %v274_v27 = vadd.f32 %v273_v26, %v627_v58  ;;  %v206_v28 = vpop.f32.mrf.mxu0 }
  0xd9   :  { %v306_v29 = vmax.f32 %v225_v25, 0.0  ;;  %v207_v30 = vadd.f32 %v206_v28, %v625_v57  ;;  %v255_v31 = vpop.f32.mrf.mxu1 }
  0xda   :  { %v307_v32 = vmax.f32 %v274_v27, 0.0  ;;  %v256_v33 = vadd.f32 %v255_v31, %v627_v58 }
  0xdb   :  { %v292_v34 = vmax.f32 %v207_v30, 0.0 }
  0xdc   :  { %v324_v35 = vpack.c.bf16 %v307_v32, %v306_v29  ;;  %v293_v36 = vmax.f32 %v256_v33, 0.0 }
  0xde   :  { %340 = vst [vmem:[%s712_s3 + $0x70] sm:$0xff] %v324_v35  ;;  %v317_v37 = vpack.c.bf16 %v293_v36, %v292_v34  ;;  %v226_v38 = vpop.f32.mrf.mxu2 }
  0xdf   :  { %v227_v39 = vadd.f32 %v226_v38, %v625_v57  ;;  %v275_v40 = vpop.f32.mrf.mxu3 }
  0xe0   :  { %333 = vst [vmem:[%s712_s3 + $0x38] sm:$0xff] %v317_v37  ;;  %v276_v41 = vadd.f32 %v275_v40, %v627_v58 }
  0xe1   :  { %v308_v42 = vmax.f32 %v227_v39, 0.0 }
  0xe2   :  { %v309_v43 = vmax.f32 %v276_v41, 0.0 }
  0xe4   :  { %v325_v44 = vpack.c.bf16 %v309_v43, %v308_v42 }
  0xe6   :  { %341 = vst [vmem:[%s712_s3 + $0x78] sm:$0xff] %v325_v44 }

// kernel: fully_cnet_forward.11
= control target key start
LH: loop header
LB: loop body
LE: loop exit
PB: predicated region body
PF: predicated region fallthrough
CT: control target
= control target key end

     0   :  { %s725_s12 = smov 0   ;;  %s863_s0 = inlined_call_operand.vmem [shape: bf16[512,64], index: 0, kind: input, shape index: {}]   ;;  %s864_s1 = inlined_call_operand.vmem [shape: bf16[64,128], index: 1, kind: input, shape index: {}]   ;;  %s865_s2 = inlined_call_operand.vmem [shape: f32[1,128], index: 2, kind: input, shape index: {}]   ;;  %s866_s3 = inlined_call_operand.vmem [shape: f32[512,128], index: 3, kind: output, shape index: {}]  }
   0x1 LB: > { %s549_s13 = sadd.s32 4294967295, %s703_s12   ;;  %p553_p0 = scmp.ge.s32.totalorder %s703_s12, 1  ;;  %s703_s12 = sphi %s725_s12, %s13_s12  }
   0x2   : > { %p138_p1 = scmp.lt.s32.totalorder %s703_s12, 3 }
   0x4   : > { %p139_p2 = pnand %p553_p0, %p138_p1 }
   0x5   : > { %s554_s16 = sshll.u32 (!%p139_p2), %s549_s13, 5 }
   0x6   : > { %142 = sbr.rel (%p139_p2) target bundleno = 220 (0xdc), region = 32  ;;  %p163_p3 = scmp.lt.s32.totalorder (!%p139_p2), %s554_s16, 63 }
   0xb   : > { %v675_v0 = vld [vmem:[%s864_s1 + $0x18] sm:$0xff]  ;;  %v674_v1 = vld [vmem:[%s864_s1 + $0x10] sm:$0xff]  ;;  %s868_s16 = smov (!%p163_p3, %s554_s16), 63  ;;  %v673_v2 = vld [vmem:[%s864_s1 + $0x8] sm:$0xff]  ;;  %vm323_vm0 = vcmask 523264  }
   0xc   : > { %376 = vmatpush.bf16.msra.mxu0 %v675_v0  ;;  %676 = vmatpush.bf16.msra.mxu1 %v675_v0  ;;  %s555_s21 = sshll.u32 %s868_s16, 2  ;;  %v672_v3 = vld [vmem:[%s864_s1] sm:$0xff]  ;;  %s557_s27 = sshll.u32 %s868_s16, 3 }
   0xd   : > { %677 = vmatpush.bf16.msra.mxu2 %v675_v0  ;;  %678 = vmatpush.bf16.msra.mxu3 %v675_v0  ;;  %s751_s26 = scalar_lea.vmem %s863_s0, %s555_s21  ;;  %v789_v20 = vld [vmem:[%s865_s2] ss:$0 sm:$0xff]  ;;  %s794_s5 = scalar_lea.vmem %s866_s3, %s557_s27 }
   0xe   : > { %v656_v4 = vld [vmem:[%s751_s26] sm:$0xff]  ;;  %v657_v8 = vld [vmem:[%s751_s26 + $0x8] sm:$0xff]  ;;  %v658_v12 = vld [vmem:[%s751_s26 + $0x10] sm:$0xff] }
   0xf   : > { %v660_v5 = vld [vmem:[%s751_s26 + $0x20] sm:$0xff]  ;;  %v661_v9 = vld [vmem:[%s751_s26 + $0x28] sm:$0xff]  ;;  %v662_v13 = vld [vmem:[%s751_s26 + $0x30] sm:$0xff] }
  0x10   : > { %377 = vmatpush.bf16.msra.mxu0 %v674_v1  ;;  %679 = vmatpush.bf16.msra.mxu1 %v674_v1  ;;  %v664_v6 = vld [vmem:[%s751_s26 + $0x40] sm:$0xff]  ;;  %v665_v10 = vld [vmem:[%s751_s26 + $0x48] sm:$0xff]  ;;  %v666_v14 = vld [vmem:[%s751_s26 + $0x50] sm:$0xff] }
  0x11   : > { %680 = vmatpush.bf16.msra.mxu2 %v674_v1  ;;  %681 = vmatpush.bf16.msra.mxu3 %v674_v1  ;;  %v668_v7 = vld [vmem:[%s751_s26 + $0x60] sm:$0xff]  ;;  %v669_v11 = vld [vmem:[%s751_s26 + $0x68] sm:$0xff]  ;;  %v670_v15 = vld [vmem:[%s751_s26 + $0x70] sm:$0xff] }
  0x12   : > { %v659_v16 = vld [vmem:[%s751_s26 + $0x18] sm:$0xff] }
  0x13   : > { %v663_v17 = vld [vmem:[%s751_s26 + $0x38] sm:$0xff] }
  0x14   : > { %378 = vmatpush.bf16.msra.mxu0 %v673_v2  ;;  %682 = vmatpush.bf16.msra.mxu1 %v673_v2  ;;  %v667_v18 = vld [vmem:[%s751_s26 + $0x58] sm:$0xff] }
  0x15   : > { %683 = vmatpush.bf16.msra.mxu2 %v673_v2  ;;  %684 = vmatpush.bf16.msra.mxu3 %v673_v2  ;;  %v671_v19 = vld [vmem:[%s751_s26 + $0x78] sm:$0xff] }
  0x18   : > { %379 = vmatpush.bf16.msra.mxu0 %v672_v3  ;;  %685 = vmatpush.bf16.msra.mxu1 %v672_v3 }
  0x19   : > { %686 = vmatpush.bf16.msra.mxu2 %v672_v3  ;;  %687 = vmatpush.bf16.msra.mxu3 %v672_v3 }
  0x1b   : > { %638 = vmatmul.msk.bf16.vlgmr.msra.gmra.mxu0 %vm323_vm0, %v656_v4  ;;  %642 = vmatmul.msk.bf16.vlgmr.msra.gmra.mxu1 %vm323_vm0, %v660_v5 }
  0x1c   : > { %646 = vmatmul.msk.bf16.vlgmr.msra.gmra.mxu2 %vm323_vm0, %v664_v6  ;;  %650 = vmatmul.msk.bf16.vlgmr.msra.gmra.mxu3 %vm323_vm0, %v668_v7 }
  0x2b   : > { %639 = vmatmul.msk.bf16.gmra.mxu0 %vm323_vm0, %v657_v8  ;;  %643 = vmatmul.msk.bf16.gmra.mxu1 %vm323_vm0, %v661_v9 }
  0x2c   : > { %647 = vmatmul.msk.bf16.gmra.mxu2 %vm323_vm0, %v665_v10  ;;  %651 = vmatmul.msk.bf16.gmra.mxu3 %vm323_vm0, %v669_v11 }
  0x3b   : > { %640 = vmatmul.msk.bf16.gmra.mxu0 %vm323_vm0, %v658_v12  ;;  %644 = vmatmul.msk.bf16.gmra.mxu1 %vm323_vm0, %v662_v13 }
  0x3c   : > { %648 = vmatmul.msk.bf16.gmra.mxu2 %vm323_vm0, %v666_v14  ;;  %652 = vmatmul.msk.bf16.gmra.mxu3 %vm323_vm0, %v670_v15 }
  0x4b   : > { %641 = vmatmul.msk.bf16.gmra.mxu0 %vm323_vm0, %v659_v16  ;;  %645 = vmatmul.msk.bf16.gmra.mxu1 %vm323_vm0, %v663_v17 }
  0x4c   : > { %649 = vmatmul.msk.bf16.gmra.mxu2 %vm323_vm0, %v667_v18  ;;  %653 = vmatmul.msk.bf16.gmra.mxu3 %vm323_vm0, %v671_v19 }
  0x98   : > { %v381_v21 = vpop.f32.mrf.mxu0  ;;  %v401_v22 = vpop.f32.mrf.mxu1 }
  0x99   : > { %v382_v23 = vadd.f32 %v789_v20, %v381_v21  ;;  %v402_v24 = vadd.f32 %v789_v20, %v401_v22 }
  0x9b   : > { %461 = vst [vmem:[%s794_s5] sm:$0xff] %v382_v23 }
  0x9c   : > { %469 = vst [vmem:[%s794_s5 + $0x40] sm:$0xff] %v402_v24 }
  0x9f   : > { %v421_v25 = vpop.f32.mrf.mxu2  ;;  %v441_v26 = vpop.f32.mrf.mxu3 }
  0xa0   : > { %v422_v27 = vadd.f32 %v789_v20, %v421_v25  ;;  %v442_v28 = vadd.f32 %v789_v20, %v441_v26  ;;  %v383_v29 = vpop.f32.mrf.mxu0  ;;  %v403_v30 = vpop.f32.mrf.mxu1 }
  0xa1   : > { %v384_v31 = vadd.f32 %v789_v20, %v383_v29  ;;  %v404_v32 = vadd.f32 %v789_v20, %v403_v30 }
  0xa2   : > { %477 = vst [vmem:[%s794_s5 + $0x80] sm:$0xff] %v422_v27 }
  0xa3   : > { %485 = vst [vmem:[%s794_s5 + $0xc0] sm:$0xff] %v442_v28 }
  0xa4   : > { %462 = vst [vmem:[%s794_s5 + $0x8] sm:$0xff] %v384_v31 }
  0xa5   : > { %470 = vst [vmem:[%s794_s5 + $0x48] sm:$0xff] %v404_v32 }
  0xa7   : > { %v423_v33 = vpop.f32.mrf.mxu2  ;;  %v443_v34 = vpop.f32.mrf.mxu3 }
  0xa8   : > { %v424_v35 = vadd.f32 %v789_v20, %v423_v33  ;;  %v444_v36 = vadd.f32 %v789_v20, %v443_v34  ;;  %v386_v37 = vpop.f32.mrf.mxu0  ;;  %v406_v38 = vpop.f32.mrf.mxu1 }
  0xa9   : > { %v387_v39 = vadd.f32 %v789_v20, %v386_v37  ;;  %v407_v40 = vadd.f32 %v789_v20, %v406_v38 }
  0xaa   : > { %478 = vst [vmem:[%s794_s5 + $0x88] sm:$0xff] %v424_v35 }
  0xab   : > { %486 = vst [vmem:[%s794_s5 + $0xc8] sm:$0xff] %v444_v36 }
  0xac   : > { %463 = vst [vmem:[%s794_s5 + $0x10] sm:$0xff] %v387_v39 }
  0xad   : > { %471 = vst [vmem:[%s794_s5 + $0x50] sm:$0xff] %v407_v40 }
  0xaf   : > { %v426_v41 = vpop.f32.mrf.mxu2  ;;  %v446_v42 = vpop.f32.mrf.mxu3 }
  0xb0   : > { %v427_v43 = vadd.f32 %v789_v20, %v426_v41  ;;  %v447_v44 = vadd.f32 %v789_v20, %v446_v42  ;;  %v388_v45 = vpop.f32.mrf.mxu0  ;;  %v408_v46 = vpop.f32.mrf.mxu1 }
  0xb1   : > { %v389_v47 = vadd.f32 %v789_v20, %v388_v45  ;;  %v409_v48 = vadd.f32 %v789_v20, %v408_v46 }
  0xb2   : > { %479 = vst [vmem:[%s794_s5 + $0x90] sm:$0xff] %v427_v43 }
  0xb3   : > { %487 = vst [vmem:[%s794_s5 + $0xd0] sm:$0xff] %v447_v44 }
  0xb4   : > { %464 = vst [vmem:[%s794_s5 + $0x18] sm:$0xff] %v389_v47 }
  0xb5   : > { %472 = vst [vmem:[%s794_s5 + $0x58] sm:$0xff] %v409_v48 }
  0xb7   : > { %v428_v49 = vpop.f32.mrf.mxu2  ;;  %v448_v50 = vpop.f32.mrf.mxu3 }
  0xb8   : > { %v429_v51 = vadd.f32 %v789_v20, %v428_v49  ;;  %v449_v52 = vadd.f32 %v789_v20, %v448_v50  ;;  %v391_v53 = vpop.f32.mrf.mxu0  ;;  %v411_v54 = vpop.f32.mrf.mxu1 }
  0xb9   : > { %v392_v55 = vadd.f32 %v789_v20, %v391_v53  ;;  %v412_v56 = vadd.f32 %v789_v20, %v411_v54 }
  0xba   : > { %480 = vst [vmem:[%s794_s5 + $0x98] sm:$0xff] %v429_v51 }
  0xbb   : > { %488 = vst [vmem:[%s794_s5 + $0xd8] sm:$0xff] %v449_v52 }
  0xbc   : > { %465 = vst [vmem:[%s794_s5 + $0x20] sm:$0xff] %v392_v55 }
  0xbd   : > { %473 = vst [vmem:[%s794_s5 + $0x60] sm:$0xff] %v412_v56 }
  0xbf   : > { %v431_v57 = vpop.f32.mrf.mxu2  ;;  %v451_v58 = vpop.f32.mrf.mxu3 }
  0xc0   : > { %v432_v59 = vadd.f32 %v789_v20, %v431_v57  ;;  %v452_v60 = vadd.f32 %v789_v20, %v451_v58  ;;  %v393_v61 = vpop.f32.mrf.mxu0  ;;  %v413_v62 = vpop.f32.mrf.mxu1 }
  0xc1   : > { %v394_v63 = vadd.f32 %v789_v20, %v393_v61  ;;  %v414_v0 = vadd.f32 %v789_v20, %v413_v62 }
  0xc2   : > { %481 = vst [vmem:[%s794_s5 + $0xa0] sm:$0xff] %v432_v59 }
  0xc3   : > { %489 = vst [vmem:[%s794_s5 + $0xe0] sm:$0xff] %v452_v60 }
  0xc4   : > { %466 = vst [vmem:[%s794_s5 + $0x28] sm:$0xff] %v394_v63 }
  0xc5   : > { %474 = vst [vmem:[%s794_s5 + $0x68] sm:$0xff] %v414_v0 }
  0xc7   : > { %v433_v1 = vpop.f32.mrf.mxu2  ;;  %v453_v2 = vpop.f32.mrf.mxu3 }
  0xc8   : > { %v434_v3 = vadd.f32 %v789_v20, %v433_v1  ;;  %v454_v4 = vadd.f32 %v789_v20, %v453_v2  ;;  %v396_v5 = vpop.f32.mrf.mxu0  ;;  %v416_v6 = vpop.f32.mrf.mxu1 }
  0xc9   : > { %v397_v7 = vadd.f32 %v789_v20, %v396_v5  ;;  %v417_v8 = vadd.f32 %v789_v20, %v416_v6 }
  0xca   : > { %482 = vst [vmem:[%s794_s5 + $0xa8] sm:$0xff] %v434_v3 }
  0xcb   : > { %490 = vst [vmem:[%s794_s5 + $0xe8] sm:$0xff] %v454_v4 }
  0xcc   : > { %467 = vst [vmem:[%s794_s5 + $0x30] sm:$0xff] %v397_v7 }
  0xcd   : > { %475 = vst [vmem:[%s794_s5 + $0x70] sm:$0xff] %v417_v8 }
  0xcf   : > { %v436_v9 = vpop.f32.mrf.mxu2  ;;  %v456_v10 = vpop.f32.mrf.mxu3 }
  0xd0   : > { %v437_v11 = vadd.f32 %v789_v20, %v436_v9  ;;  %v457_v12 = vadd.f32 %v789_v20, %v456_v10  ;;  %v398_v13 = vpop.f32.mrf.mxu0  ;;  %v418_v14 = vpop.f32.mrf.mxu1 }
  0xd1   : > { %v399_v15 = vadd.f32 %v789_v20, %v398_v13  ;;  %v419_v16 = vadd.f32 %v789_v20, %v418_v14 }
  0xd2   : > { %483 = vst [vmem:[%s794_s5 + $0xb0] sm:$0xff] %v437_v11 }
  0xd3   : > { %491 = vst [vmem:[%s794_s5 + $0xf0] sm:$0xff] %v457_v12 }
  0xd4   : > { %468 = vst [vmem:[%s794_s5 + $0x38] sm:$0xff] %v399_v15 }
  0xd5   : > { %476 = vst [vmem:[%s794_s5 + $0x78] sm:$0xff] %v419_v16 }
  0xd7   : > { %v438_v17 = vpop.f32.mrf.mxu2  ;;  %v458_v18 = vpop.f32.mrf.mxu3 }
  0xd8   : > { %v439_v19 = vadd.f32 %v789_v20, %v438_v17  ;;  %v459_v21 = vadd.f32 %v789_v20, %v458_v18 }
  0xda   : > { %484 = vst [vmem:[%s794_s5 + $0xb8] sm:$0xff] %v439_v19 }
  0xdb   : > { %492 = vst [vmem:[%s794_s5 + $0xf8] sm:$0xff] %v459_v21 }
  0xdc PF: > { %s13_s12 = sadd.s32 1, %s703_s12  }
  0xdd   : > { %p10_p4 = scmp.ge.s32.totalorder %s13_s12, 4  }
  0xdf   :  { %12 = sbr.rel (!%p10_p4) target bundleno = 1 (0x1), region = 62 }

</bundles_post_ra>
